<compile_context>
chip_gen: v5e
topology: v5e:2x2
jax: 0.10.0
libtpu: 0.0.40
codegen_flags: <defaults>
</compile_context>

<pallas_src>
import jax
import jax.numpy as jnp
from jax import lax
from jax.experimental import pallas as pl
from jax.experimental.pallas import tpu as pltpu

LANE = 128


def _round_up(n, m):
    return ((n + m - 1) // m) * m


def _pick_block_h(H, Wp, max_rows=2048):
    """Largest divisor of H with block_h * Wp <= max_rows (MXU-friendly M,
    VMEM-bounded)."""
    best = 1
    for bh in range(1, H + 1):
        if H % bh == 0 and bh * Wp <= max_rows:
            best = bh
    return best


def _vmem_limit_bytes():
    """Explicit scoped-VMEM budget: ~3/4 of physical capacity, capped at 100 MiB
    (-> ~96 MiB on 128-MiB v5e/v6e, 48 MiB on 64-MiB v7x); safe fallback."""
    try:
        info = pltpu.get_tpu_info()
        cap = getattr(info, "vmem_capacity_bytes", None)
        if cap is None:
            cap = getattr(info, "vmem_size_bytes", None)
        if not cap:
            raise ValueError("no vmem capacity field")
        return int(min(int(cap) * 3 // 4, 100 * 1024 * 1024))
    except Exception:
        return 48 * 1024 * 1024


def make_bottleneck_kernel(w_real):
    """Kernel-body factory; w_real = real (unpadded) spatial width for kx masks."""

    def bottleneck_kernel(x_ref, xh_ref, w1_ref, w2_ref, w3_ref,
                          b1_ref, b2_ref, b3_ref, o_ref, g_ref):
        Hb, Wp, Ci = x_ref.shape        # row-block height, padded width, padded Cin
        Cw = w1_ref.shape[1]            # padded bottleneck width
        Co = w3_ref.shape[1]            # padded output channels
        rows = (Hb + 2) * Wp            # block rows + 1-row halo above/below
        out_rows = Hb * Wp

        i = pl.program_id(1)
        nb = pl.num_programs(1)

        w1 = w1_ref[...]
        b1 = b1_ref[...]

        # ---- conv1 (1x1, BN scale pre-folded into weights) on the block rows ----
        xm = x_ref[...].reshape(out_rows, Ci)
        h_mid = jnp.maximum(
            jnp.dot(xm, w1, preferred_element_type=jnp.float32) + b1, 0.0)

        # conv1 recomputed on the two halo rows (no (Hb+2)*Wp x Cin concatenate).
        hh = jnp.maximum(
            jnp.dot(xh_ref[...].reshape(2 * Wp, Ci), w1,
                    preferred_element_type=jnp.float32) + b1, 0.0)
        # 'SAME' zero padding of the conv2 *activation*: halo rows at the image
        # boundary must be zero.  Scalar-predicated selects on W-row slabs only.
        h_top = jnp.where(i > 0, hh[0:Wp, :], 0.0)
        h_bot = jnp.where(i < nb - 1, hh[Wp:2 * Wp, :], 0.0)

        # Single f32->bf16 cast; all im2col shuffles and scratch stores are bf16.
        hb_top = h_top.astype(jnp.bfloat16)
        hb_mid = h_mid.astype(jnp.bfloat16)
        hb_bot = h_bot.astype(jnp.bfloat16)

        # ---- kx-im2col written into scratch.  The +/-1 column shift is applied
        # at *write* time so every conv2 read below is 8-sublane aligned. ----
        g_ref[0:Wp, Cw:2 * Cw] = hb_top
        g_ref[Wp:Wp + out_rows, Cw:2 * Cw] = hb_mid
        g_ref[Wp + out_rows:rows, Cw:2 * Cw] = hb_bot

        zrow = jnp.zeros((1, Cw), jnp.bfloat16)
        h_dn = jnp.concatenate([zrow, hb_top, hb_mid, hb_bot[:-1, :]], axis=0)  # h[p-1]
        h_up = jnp.concatenate([hb_top[1:, :], hb_mid, hb_bot, zrow], axis=0)   # h[p+1]
        colx = lax.broadcasted_iota(jnp.int32, (rows, 1), 0) % Wp
        g_ref[:, 0:Cw] = jnp.where(colx > 0, h_dn, zrow).astype(jnp.bfloat16)
        g_ref[:, 2 * Cw:3 * Cw] = jnp.where(colx < w_real - 1, h_up,
                                            zrow).astype(jnp.bfloat16)

        # ---- conv2 (3x3) as three aligned row-offset K=3*Cw MXU matmuls ----
        acc = jnp.dot(g_ref[0:out_rows, :], w2_ref[0],
                      preferred_element_type=jnp.float32)
        acc = acc + jnp.dot(g_ref[Wp:Wp + out_rows, :], w2_ref[1],
                            preferred_element_type=jnp.float32)
        acc = acc + jnp.dot(g_ref[2 * Wp:2 * Wp + out_rows, :], w2_ref[2],
                            preferred_element_type=jnp.float32)
        h2 = jnp.maximum(acc + b2_ref[...], 0.0).astype(jnp.bfloat16)

        # ---- conv3 (1x1) + bias + identity residual + relu; bf16 output ----
        h3 = jnp.dot(h2, w3_ref[...], preferred_element_type=jnp.float32) + b3_ref[...]
        res = xm.astype(jnp.float32)            # identity path (Cp_in == Cp_out)
        out = jnp.maximum(h3 + res, 0.0)
        o_ref[...] = out.reshape(Hb, Wp, Co).astype(o_ref.dtype)

    return bottleneck_kernel


def prepare_bottleneck_params(w1, w2, w3, s1, b1, s2, b2, s3, b3):
    """One-time init: fold BN scale into the conv weights, zero-pad channels to
    full 128-lane multiples, cast matmul operands to bf16, stack w2 per ky."""
    Cin, width = w1.shape
    Cout = w3.shape[1]
    Cp_in = _round_up(Cin, LANE)
    Cp_w = _round_up(width, LANE)
    Cp_out = _round_up(Cout, LANE)

    w1f = w1 * s1[None, :]
    w2f = w2 * s2[None, None, None, :]
    w3f = w3 * s3[None, :]

    w1p = jnp.pad(w1f, ((0, Cp_in - Cin), (0, Cp_w - width))).astype(jnp.bfloat16)
    w2p = jnp.pad(w2f, ((0, 0), (0, 0), (0, Cp_w - width),
                        (0, Cp_w - width))).astype(jnp.bfloat16)
    w2s = w2p.reshape(3, 3 * Cp_w, Cp_w)          # per-ky (kx,cin)-stacked weight
    w3p = jnp.pad(w3f, ((0, Cp_w - width), (0, Cp_out - Cout))).astype(jnp.bfloat16)
    b1p = jnp.pad(b1, (0, Cp_w - width)).reshape(1, Cp_w).astype(jnp.float32)
    b2p = jnp.pad(b2, (0, Cp_w - width)).reshape(1, Cp_w).astype(jnp.float32)
    b3p = jnp.pad(b3, (0, Cp_out - Cout)).reshape(1, Cp_out).astype(jnp.float32)

    return dict(w1=w1p, w2=w2s, w3=w3p, b1=b1p, b2=b2p, b3=b3p,
                Cin=Cin, width=width, Cout=Cout,
                Cp_in=Cp_in, Cp_w=Cp_w, Cp_out=Cp_out)


def bottleneck_apply(x_nchw, params, *, block_h=None):
    """x_nchw: (N, Cin, H, W) f32; params from prepare_bottleneck_params."""
    N, Cin, H, W = x_nchw.shape
    p = params
    assert Cin == p["Cin"]
    assert p["Cout"] == Cin, "downsample=None requires inplanes == planes * expansion"
    Cp_in, Cp_w, Cp_out = p["Cp_in"], p["Cp_w"], p["Cp_out"]

    Wp = _round_up(W, 8)                 # sublane-pad spatial width (14x14 / 7x7 ok)
    if block_h is None:
        block_h = _pick_block_h(H, Wp)
    assert H % block_h == 0, "H must be divisible by block_h"
    nb = H // block_h

    # NCHW -> NHWC (channels on the lane axis), pad W and channels, cast bf16.
    x = jnp.transpose(x_nchw, (0, 2, 3, 1))
    xp = jnp.pad(x, ((0, 0), (0, 0), (0, Wp - W),
                     (0, Cp_in - Cin))).astype(jnp.bfloat16)

    # Per-row-block halo rows (row above / below each block; zeros at image edge).
    zrow = jnp.zeros((N, 1, Wp, Cp_in), xp.dtype)
    above = jnp.concatenate([zrow, xp[:, block_h - 1:H - 1:block_h]], axis=1)
    below = jnp.concatenate([xp[:, block_h:H:block_h], zrow], axis=1)
    xh = jnp.stack([above, below], axis=2)        # (N, nb, 2, Wp, Cp_in)

    flops = 2 * N * H * Wp * (Cp_in * Cp_w + 9 * Cp_w * Cp_w + Cp_w * Cp_out)
    bytes_accessed = (xp.size * 2 + xh.size * 2 + N * H * Wp * Cp_out * 2
                      + (p["w1"].size + p["w2"].size + p["w3"].size) * 2
                      + (p["b1"].size + p["b2"].size + p["b3"].size) * 4)

    kernel = make_bottleneck_kernel(W)
    vmem_limit = _vmem_limit_bytes()

    def build(single_buffer_consts):
        def cspec(shape, imap):
            # Grid-invariant operands: single-buffer them when supported.
            if single_buffer_consts:
                return pl.BlockSpec(shape, imap, pipeline_mode=pl.Buffered(1))
            return pl.BlockSpec(shape, imap)

        return pl.pallas_call(
            kernel,
            out_shape=jax.ShapeDtypeStruct((N, H, Wp, Cp_out), jnp.bfloat16),
            grid_spec=pltpu.PrefetchScalarGridSpec(
                num_scalar_prefetch=0,
                grid=(N, nb),
                in_specs=[
                    pl.BlockSpec((None, block_h, Wp, Cp_in),
                                 lambda n, i: (n, i, 0, 0)),
                    pl.BlockSpec((None, None, 2, Wp, Cp_in),
                                 lambda n, i: (n, i, 0, 0, 0)),
                    cspec((Cp_in, Cp_w), lambda n, i: (0, 0)),
                    cspec((3, 3 * Cp_w, Cp_w), lambda n, i: (0, 0, 0)),
                    cspec((Cp_w, Cp_out), lambda n, i: (0, 0)),
                    cspec((1, Cp_w), lambda n, i: (0, 0)),
                    cspec((1, Cp_w), lambda n, i: (0, 0)),
                    cspec((1, Cp_out), lambda n, i: (0, 0)),
                ],
                out_specs=pl.BlockSpec((None, block_h, Wp, Cp_out),
                                       lambda n, i: (n, i, 0, 0)),
                scratch_shapes=[
                    pltpu.VMEM(((block_h + 2) * Wp, 3 * Cp_w), jnp.bfloat16)],
            ),
            compiler_params=pltpu.CompilerParams(
                dimension_semantics=("parallel", "parallel"),
                vmem_limit_bytes=vmem_limit),
            cost_estimate=pl.CostEstimate(flops=flops, transcendentals=0,
                                          bytes_accessed=bytes_accessed),
        )

    args = (xp, xh, p["w1"], p["w2"], p["w3"], p["b1"], p["b2"], p["b3"])
    out, err = None, None
    attempts = (True, False) if hasattr(pl, "Buffered") else (False,)
    for single in attempts:
        try:
            res = build(single)(*args)
            if single:                    # force any failure to surface here
                jax.block_until_ready(res)
            out = res
            break
        except Exception as e:            # fall back to default 2-deep buffering
            err = e
            out = None
    if out is None:
        raise err

    out = out[:, :, :W, :p["Cout"]]
    return jnp.transpose(out, (0, 3, 1, 2)).astype(jnp.float32)   # NHWC -> NCHW


def _fold_bn(gamma, beta, mean, var, eps=1e-5):
    scale = gamma / jnp.sqrt(var + eps)
    bias = beta - mean * scale
    return scale, bias


def _reference(x_nchw, w1, w2, w3, s1, b1, s2, b2, s3, b3):
    """Plain-JAX reference with the same bf16 rounding of matmul operands."""
    bf = lambda a: a.astype(jnp.bfloat16).astype(jnp.float32)
    x = bf(jnp.transpose(x_nchw, (0, 2, 3, 1)))
    w1f = bf(w1 * s1[None, :])
    w2f = bf(w2 * s2[None, None, None, :])
    w3f = bf(w3 * s3[None, :])
    dn = ('NHWC', 'HWIO', 'NHWC')
    h = lax.conv_general_dilated(x, w1f.reshape(1, 1, *w1f.shape), (1, 1),
                                 'SAME', dimension_numbers=dn)
    h = bf(jnp.maximum(h + b1[None, None, None, :], 0.0))
    h = lax.conv_general_dilated(h, w2f, (1, 1), 'SAME', dimension_numbers=dn)
    h = bf(jnp.maximum(h + b2[None, None, None, :], 0.0))
    h = lax.conv_general_dilated(h, w3f.reshape(1, 1, *w3f.shape), (1, 1),
                                 'SAME', dimension_numbers=dn)
    h = jnp.maximum(h + b3[None, None, None, :] + x, 0.0)
    return jnp.transpose(h, (0, 3, 1, 2))


if __name__ == "__main__":
    key = jax.random.PRNGKey(0)

    def make_case(k, N, planes, H, W):
        inplanes = planes * 4          # downsample=None -> inplanes == planes*4
        width = planes                 # base_width=64, groups=1
        cout = planes * 4
        ks = jax.random.split(k, 7)
        x = jax.random.normal(ks[0], (N, inplanes, H, W), jnp.float32)
        w1 = jax.random.normal(ks[1], (inplanes, width), jnp.float32) * 0.2
        w2 = jax.random.normal(ks[2], (3, 3, width, width), jnp.float32) * 0.2
        w3 = jax.random.normal(ks[3], (width, cout), jnp.float32) * 0.2

        def bn_params(kk, c):
            kks = jax.random.split(kk, 4)
            gamma = 1.0 + 0.1 * jax.random.normal(kks[0], (c,), jnp.float32)
            beta = 0.1 * jax.random.normal(kks[1], (c,), jnp.float32)
            mean = 0.1 * jax.random.normal(kks[2], (c,), jnp.float32)
            var = 1.0 + 0.1 * jnp.abs(jax.random.normal(kks[3], (c,), jnp.float32))
            return _fold_bn(gamma, beta, mean, var)

        s1, b1 = bn_params(ks[4], width)
        s2, b2 = bn_params(ks[5], width)
        s3, b3 = bn_params(ks[6], cout)
        return x, (w1, w2, w3, s1, b1, s2, b2, s3, b3)

    def check(x, raw, block_h=None, tag=""):
        params = prepare_bottleneck_params(*raw)     # one-time hoisted weight prep
        out = bottleneck_apply(x, params, block_h=block_h)
        out = jax.block_until_ready(out)
        ref = _reference(x, *raw)
        refb = ref.astype(jnp.bfloat16).astype(jnp.float32)   # kernel emits bf16
        assert out.shape == x.shape, (tag, out.shape, x.shape)
        max_err = float(jnp.max(jnp.abs(out - refb)))
        assert jnp.allclose(out, refb, atol=2e-2, rtol=2e-2), \
            f"{tag}: mismatch vs reference (max err {max_err})"

    k1, k2 = jax.random.split(key)
    # Case 1: small shapes consistent with the module; auto block_h (whole image).
    x1, raw1 = make_case(k1, N=2, planes=4, H=16, W=16)
    check(x1, raw1, tag="case1")
    # Case 2: W=14 (not a multiple of 8) + multi-row-block halos (block_h=4, nb=3).
    x2, raw2 = make_case(k2, N=1, planes=8, H=12, W=14)
    check(x2, raw2, block_h=4, tag="case2")

    print("KERNEL_OK")
</pallas_src>

<mosaic_0001>
module attributes {stable_mosaic.version = 11 : i64} {
  func.func @bottleneck_kernel(%arg0: i32, %arg1: i32, %arg2: memref<1x16x16x128xbf16, #tpu.memory_space<vmem>>, %arg3: memref<1x1x2x16x128xbf16, #tpu.memory_space<vmem>>, %arg4: memref<128x128xbf16, #tpu.memory_space<vmem>>, %arg5: memref<3x384x128xbf16, #tpu.memory_space<vmem>>, %arg6: memref<128x128xbf16, #tpu.memory_space<vmem>>, %arg7: memref<1x128xf32, #tpu.memory_space<vmem>>, %arg8: memref<1x128xf32, #tpu.memory_space<vmem>>, %arg9: memref<1x128xf32, #tpu.memory_space<vmem>>, %arg10: memref<1x16x16x128xbf16, #tpu.memory_space<vmem>>, %arg11: memref<288x384xbf16, #tpu.memory_space<vmem>>) attributes {dimension_semantics = [#tpu.dimension_semantics<parallel>, #tpu.dimension_semantics<parallel>], iteration_bounds = array<i64: 2, 1>, scalar_prefetch = 0 : i64, scratch_operands = 1 : i64, tpu.core_type = #tpu.core_type<tc>, window_params = [{transform_indices = @transform_0, window_bounds = array<i64: 1, 16, 16, 128>}, {transform_indices = @transform_1, window_bounds = array<i64: 1, 1, 2, 16, 128>}, {pipeline_mode = #tpu.pipeline_mode<synchronous>, transform_indices = @transform_2, window_bounds = array<i64: 128, 128>}, {pipeline_mode = #tpu.pipeline_mode<synchronous>, transform_indices = @transform_3, window_bounds = array<i64: 3, 384, 128>}, {pipeline_mode = #tpu.pipeline_mode<synchronous>, transform_indices = @transform_4, window_bounds = array<i64: 128, 128>}, {pipeline_mode = #tpu.pipeline_mode<synchronous>, transform_indices = @transform_5, window_bounds = array<i64: 1, 128>}, {pipeline_mode = #tpu.pipeline_mode<synchronous>, transform_indices = @transform_6, window_bounds = array<i64: 1, 128>}, {pipeline_mode = #tpu.pipeline_mode<synchronous>, transform_indices = @transform_7, window_bounds = array<i64: 1, 128>}, {transform_indices = @transform_8, window_bounds = array<i64: 1, 16, 16, 128>}]} {
    %c0 = arith.constant 0 : index
    %c0_0 = arith.constant 0 : index
    %0 = vector.load %arg4[%c0, %c0_0] : memref<128x128xbf16, #tpu.memory_space<vmem>>, vector<128x128xbf16>
    %c0_1 = arith.constant 0 : index
    %c0_2 = arith.constant 0 : index
    %1 = vector.load %arg7[%c0_1, %c0_2] : memref<1x128xf32, #tpu.memory_space<vmem>>, vector<1x128xf32>
    %c0_3 = arith.constant 0 : index
    %c0_4 = arith.constant 0 : index
    %c0_5 = arith.constant 0 : index
    %c0_6 = arith.constant 0 : index
    %2 = vector.load %arg2[%c0_3, %c0_4, %c0_5, %c0_6] : memref<1x16x16x128xbf16, #tpu.memory_space<vmem>>, vector<1x16x16x128xbf16>
    %3 = vector.shape_cast %2 : vector<1x16x16x128xbf16> to vector<16x16x128xbf16>
    %4 = vector.shape_cast %3 : vector<16x16x128xbf16> to vector<256x128xbf16>
    %cst = arith.constant dense<0.000000e+00> : vector<256x128xf32>
    %5 = tpu.matmul %4, %0, %cst {dimension_numbers = #tpu.dot_dimension_numbers<[1], [0], [0], [1], [0, 0, 1, 1], [], []>} : vector<256x128xbf16>, vector<128x128xbf16>, vector<256x128xf32> -> vector<256x128xf32>
    %6 = vector.broadcast %1 : vector<1x128xf32> to vector<256x128xf32>
    %7 = arith.addf %5, %6 : vector<256x128xf32>
    %cst_7 = arith.constant 0.000000e+00 : f32
    %8 = vector.broadcast %cst_7 : f32 to vector<256x128xf32>
    %9 = arith.maximumf %7, %8 : vector<256x128xf32>
    %c0_8 = arith.constant 0 : index
    %c0_9 = arith.constant 0 : index
    %c0_10 = arith.constant 0 : index
    %c0_11 = arith.constant 0 : index
    %c0_12 = arith.constant 0 : index
    %10 = vector.load %arg3[%c0_8, %c0_9, %c0_10, %c0_11, %c0_12] : memref<1x1x2x16x128xbf16, #tpu.memory_space<vmem>>, vector<1x1x2x16x128xbf16>
    %11 = vector.shape_cast %10 : vector<1x1x2x16x128xbf16> to vector<2x16x128xbf16>
    %12 = vector.shape_cast %11 : vector<2x16x128xbf16> to vector<32x128xbf16>
    %cst_13 = arith.constant dense<0.000000e+00> : vector<32x128xf32>
    %13 = tpu.matmul %12, %0, %cst_13 {dimension_numbers = #tpu.dot_dimension_numbers<[1], [0], [0], [1], [0, 0, 1, 1], [], []>} : vector<32x128xbf16>, vector<128x128xbf16>, vector<32x128xf32> -> vector<32x128xf32>
    %14 = vector.broadcast %1 : vector<1x128xf32> to vector<32x128xf32>
    %15 = arith.addf %13, %14 : vector<32x128xf32>
    %cst_14 = arith.constant 0.000000e+00 : f32
    %16 = vector.broadcast %cst_14 : f32 to vector<32x128xf32>
    %17 = arith.maximumf %15, %16 : vector<32x128xf32>
    %c0_i32 = arith.constant 0 : i32
    %18 = arith.cmpi sgt, %arg1, %c0_i32 : i32
    %19 = vector.extract_strided_slice %17 {offsets = [0, 0], sizes = [16, 128], strides = [1, 1]} : vector<32x128xf32> to vector<16x128xf32>
    %cst_15 = arith.constant 0.000000e+00 : f32
    %20 = vector.broadcast %cst_15 : f32 to vector<16x128xf32>
    %21 = arith.select %18, %19, %20 : vector<16x128xf32>
    %c0_i32_16 = arith.constant 0 : i32
    %22 = arith.cmpi slt, %arg1, %c0_i32_16 : i32
    %23 = vector.extract_strided_slice %17 {offsets = [16, 0], sizes = [16, 128], strides = [1, 1]} : vector<32x128xf32> to vector<16x128xf32>
    %cst_17 = arith.constant 0.000000e+00 : f32
    %24 = vector.broadcast %cst_17 : f32 to vector<16x128xf32>
    %25 = arith.select %22, %23, %24 : vector<16x128xf32>
    %26 = arith.truncf %21 : vector<16x128xf32> to vector<16x128xbf16>
    %27 = arith.truncf %9 : vector<256x128xf32> to vector<256x128xbf16>
    %28 = arith.truncf %25 : vector<16x128xf32> to vector<16x128xbf16>
    %c0_18 = arith.constant 0 : index
    %c128 = arith.constant 128 : index
    %29 = vector.load %arg11[%c0_18, %c128] : memref<288x384xbf16, #tpu.memory_space<vmem>>, vector<16x128xbf16>
    tpu.vector_store %arg11[%c0_18, %c128], %26 {strides = array<i32>} : memref<288x384xbf16, #tpu.memory_space<vmem>>, vector<16x128xbf16>,
    %c16 = arith.constant 16 : index
    %c128_19 = arith.constant 128 : index
    %30 = vector.load %arg11[%c16, %c128_19] : memref<288x384xbf16, #tpu.memory_space<vmem>>, vector<256x128xbf16>
    tpu.vector_store %arg11[%c16, %c128_19], %27 {strides = array<i32>} : memref<288x384xbf16, #tpu.memory_space<vmem>>, vector<256x128xbf16>,
    %c272 = arith.constant 272 : index
    %c128_20 = arith.constant 128 : index
    %31 = vector.load %arg11[%c272, %c128_20] : memref<288x384xbf16, #tpu.memory_space<vmem>>, vector<16x128xbf16>
    tpu.vector_store %arg11[%c272, %c128_20], %28 {strides = array<i32>} : memref<288x384xbf16, #tpu.memory_space<vmem>>, vector<16x128xbf16>,
    %cst_21 = arith.constant 0.000000e+00 : bf16
    %32 = vector.broadcast %cst_21 : bf16 to vector<1x128xbf16>
    %33 = vector.extract_strided_slice %28 {offsets = [0, 0], sizes = [15, 128], strides = [1, 1]} : vector<16x128xbf16> to vector<15x128xbf16>
    %34 = tpu.concatenate %32, %26, %27, %33 in 0 : vector<1x128xbf16>, vector<16x128xbf16>, vector<256x128xbf16>, vector<15x128xbf16> -> vector<288x128xbf16>
    %35 = vector.extract_strided_slice %26 {offsets = [1, 0], sizes = [15, 128], strides = [1, 1]} : vector<16x128xbf16> to vector<15x128xbf16>
    %36 = tpu.concatenate %35, %27, %28, %32 in 0 : vector<15x128xbf16>, vector<256x128xbf16>, vector<16x128xbf16>, vector<1x128xbf16> -> vector<288x128xbf16>
    %37 = tpu.iota {dimensions = array<i32: 0>} : vector<288x1xi32>
    %c16_i32 = arith.constant 16 : i32
    %c0_i32_22 = arith.constant 0 : i32
    %38 = arith.cmpi eq, %c16_i32, %c0_i32_22 : i32
    %c1_i32 = arith.constant 1 : i32
    %39 = arith.select %38, %c1_i32, %c16_i32 : i32
    %40 = vector.broadcast %39 : i32 to vector<288x1xi32>
    %41 = arith.remsi %37, %40 : vector<288x1xi32>
    %c0_i32_23 = arith.constant 0 : i32
    %42 = vector.broadcast %c0_i32_23 : i32 to vector<288x1xi32>
    %43 = arith.cmpi ne, %41, %42 : vector<288x1xi32>
    %c0_i32_24 = arith.constant 0 : i32
    %44 = vector.broadcast %c0_i32_24 : i32 to vector<288x1xi32>
    %45 = arith.cmpi slt, %41, %44 : vector<288x1xi32>
    %c0_i32_25 = arith.constant 0 : i32
    %46 = arith.cmpi slt, %39, %c0_i32_25 : i32
    %47 = vector.broadcast %46 : i1 to vector<288x1xi1>
    %48 = vector.broadcast %47 : vector<288x1xi1> to vector<288x1xi1>
    %49 = arith.xori %45, %48 : vector<288x1xi1>
    %50 = arith.andi %49, %43 : vector<288x1xi1>
    %51 = vector.broadcast %39 : i32 to vector<288x1xi32>
    %52 = arith.addi %41, %51 : vector<288x1xi32>
    %53 = arith.select %50, %52, %41 : vector<288x1xi1>, vector<288x1xi32>
    %c0_i32_26 = arith.constant 0 : i32
    %54 = vector.broadcast %c0_i32_26 : i32 to vector<288x1xi32>
    %55 = arith.cmpi sgt, %53, %54 : vector<288x1xi32>
    %56 = vector.shape_cast %55 : vector<288x1xi1> to vector<288x1xi1>
    %57 = vector.broadcast %56 : vector<288x1xi1> to vector<288x128xi1>
    %58 = vector.shape_cast %32 : vector<1x128xbf16> to vector<1x128xbf16>
    %59 = vector.broadcast %58 : vector<1x128xbf16> to vector<288x128xbf16>
    %60 = arith.select %57, %34, %59 : vector<288x128xi1>, vector<288x128xbf16>
    %c0_27 = arith.constant 0 : index
    %c0_28 = arith.constant 0 : index
    %61 = vector.load %arg11[%c0_27, %c0_28] : memref<288x384xbf16, #tpu.memory_space<vmem>>, vector<288x128xbf16>
    tpu.vector_store %arg11[%c0_27, %c0_28], %60 {strides = array<i32>} : memref<288x384xbf16, #tpu.memory_space<vmem>>, vector<288x128xbf16>,
    %c15_i32 = arith.constant 15 : i32
    %62 = vector.broadcast %c15_i32 : i32 to vector<288x1xi32>
    %63 = arith.cmpi slt, %53, %62 : vector<288x1xi32>
    %64 = vector.shape_cast %63 : vector<288x1xi1> to vector<288x1xi1>
    %65 = vector.broadcast %64 : vector<288x1xi1> to vector<288x128xi1>
    %66 = vector.shape_cast %32 : vector<1x128xbf16> to vector<1x128xbf16>
    %67 = vector.broadcast %66 : vector<1x128xbf16> to vector<288x128xbf16>
    %68 = arith.select %65, %36, %67 : vector<288x128xi1>, vector<288x128xbf16>
    %c0_29 = arith.constant 0 : index
    %c256 = arith.constant 256 : index
    %69 = vector.load %arg11[%c0_29, %c256] : memref<288x384xbf16, #tpu.memory_space<vmem>>, vector<288x128xbf16>
    tpu.vector_store %arg11[%c0_29, %c256], %68 {strides = array<i32>} : memref<288x384xbf16, #tpu.memory_space<vmem>>, vector<288x128xbf16>,
    %c0_30 = arith.constant 0 : index
    %c0_31 = arith.constant 0 : index
    %70 = vector.load %arg11[%c0_30, %c0_31] : memref<288x384xbf16, #tpu.memory_space<vmem>>, vector<256x384xbf16>
    %c0_32 = arith.constant 0 : index
    %c0_33 = arith.constant 0 : index
    %c0_34 = arith.constant 0 : index
    %71 = vector.load %arg5[%c0_32, %c0_33, %c0_34] : memref<3x384x128xbf16, #tpu.memory_space<vmem>>, vector<1x384x128xbf16>
    %72 = vector.shape_cast %71 : vector<1x384x128xbf16> to vector<384x128xbf16>
    %cst_35 = arith.constant dense<0.000000e+00> : vector<256x128xf32>
    %73 = tpu.matmul %70, %72, %cst_35 {dimension_numbers = #tpu.dot_dimension_numbers<[1], [0], [0], [1], [0, 0, 1, 1], [], []>} : vector<256x384xbf16>, vector<384x128xbf16>, vector<256x128xf32> -> vector<256x128xf32>
    %c16_36 = arith.constant 16 : index
    %c0_37 = arith.constant 0 : index
    %74 = vector.load %arg11[%c16_36, %c0_37] : memref<288x384xbf16, #tpu.memory_space<vmem>>, vector<256x384xbf16>
    %c1 = arith.constant 1 : index
    %c0_38 = arith.constant 0 : index
    %c0_39 = arith.constant 0 : index
    %75 = vector.load %arg5[%c1, %c0_38, %c0_39] : memref<3x384x128xbf16, #tpu.memory_space<vmem>>, vector<1x384x128xbf16>
    %76 = vector.shape_cast %75 : vector<1x384x128xbf16> to vector<384x128xbf16>
    %cst_40 = arith.constant dense<0.000000e+00> : vector<256x128xf32>
    %77 = tpu.matmul %74, %76, %cst_40 {dimension_numbers = #tpu.dot_dimension_numbers<[1], [0], [0], [1], [0, 0, 1, 1], [], []>} : vector<256x384xbf16>, vector<384x128xbf16>, vector<256x128xf32> -> vector<256x128xf32>
    %78 = arith.addf %73, %77 : vector<256x128xf32>
    %c32 = arith.constant 32 : index
    %c0_41 = arith.constant 0 : index
    %79 = vector.load %arg11[%c32, %c0_41] : memref<288x384xbf16, #tpu.memory_space<vmem>>, vector<256x384xbf16>
    %c2 = arith.constant 2 : index
    %c0_42 = arith.constant 0 : index
    %c0_43 = arith.constant 0 : index
    %80 = vector.load %arg5[%c2, %c0_42, %c0_43] : memref<3x384x128xbf16, #tpu.memory_space<vmem>>, vector<1x384x128xbf16>
    %81 = vector.shape_cast %80 : vector<1x384x128xbf16> to vector<384x128xbf16>
    %cst_44 = arith.constant dense<0.000000e+00> : vector<256x128xf32>
    %82 = tpu.matmul %79, %81, %cst_44 {dimension_numbers = #tpu.dot_dimension_numbers<[1], [0], [0], [1], [0, 0, 1, 1], [], []>} : vector<256x384xbf16>, vector<384x128xbf16>, vector<256x128xf32> -> vector<256x128xf32>
    %83 = arith.addf %78, %82 : vector<256x128xf32>
    %c0_45 = arith.constant 0 : index
    %c0_46 = arith.constant 0 : index
    %84 = vector.load %arg8[%c0_45, %c0_46] : memref<1x128xf32, #tpu.memory_space<vmem>>, vector<1x128xf32>
    %85 = vector.broadcast %84 : vector<1x128xf32> to vector<256x128xf32>
    %86 = arith.addf %83, %85 : vector<256x128xf32>
    %cst_47 = arith.constant 0.000000e+00 : f32
    %87 = vector.broadcast %cst_47 : f32 to vector<256x128xf32>
    %88 = arith.maximumf %86, %87 : vector<256x128xf32>
    %89 = arith.truncf %88 : vector<256x128xf32> to vector<256x128xbf16>
    %c0_48 = arith.constant 0 : index
    %c0_49 = arith.constant 0 : index
    %90 = vector.load %arg6[%c0_48, %c0_49] : memref<128x128xbf16, #tpu.memory_space<vmem>>, vector<128x128xbf16>
    %cst_50 = arith.constant dense<0.000000e+00> : vector<256x128xf32>
    %91 = tpu.matmul %89, %90, %cst_50 {dimension_numbers = #tpu.dot_dimension_numbers<[1], [0], [0], [1], [0, 0, 1, 1], [], []>} : vector<256x128xbf16>, vector<128x128xbf16>, vector<256x128xf32> -> vector<256x128xf32>
    %c0_51 = arith.constant 0 : index
    %c0_52 = arith.constant 0 : index
    %92 = vector.load %arg9[%c0_51, %c0_52] : memref<1x128xf32, #tpu.memory_space<vmem>>, vector<1x128xf32>
    %93 = vector.broadcast %92 : vector<1x128xf32> to vector<256x128xf32>
    %94 = arith.addf %91, %93 : vector<256x128xf32>
    %95 = arith.extf %4 : vector<256x128xbf16> to vector<256x128xf32>
    %96 = arith.addf %94, %95 : vector<256x128xf32>
    %cst_53 = arith.constant 0.000000e+00 : f32
    %97 = vector.broadcast %cst_53 : f32 to vector<256x128xf32>
    %98 = arith.maximumf %96, %97 : vector<256x128xf32>
    %99 = vector.shape_cast %98 : vector<256x128xf32> to vector<16x16x128xf32>
    %100 = arith.truncf %99 : vector<16x16x128xf32> to vector<16x16x128xbf16>
    %c0_54 = arith.constant 0 : index
    %c0_55 = arith.constant 0 : index
    %c0_56 = arith.constant 0 : index
    %c0_57 = arith.constant 0 : index
    %101 = vector.load %arg10[%c0_54, %c0_55, %c0_56, %c0_57] : memref<1x16x16x128xbf16, #tpu.memory_space<vmem>>, vector<1x16x16x128xbf16>
    %102 = vector.shape_cast %101 : vector<1x16x16x128xbf16> to vector<16x16x128xbf16>
    %103 = vector.shape_cast %100 : vector<16x16x128xbf16> to vector<1x16x16x128xbf16>
    tpu.vector_store %arg10[%c0_54, %c0_55, %c0_56, %c0_57], %103 {strides = array<i32>} : memref<1x16x16x128xbf16, #tpu.memory_space<vmem>>, vector<1x16x16x128xbf16>,
    return
  }
  func.func @transform_0(%arg0: i32, %arg1: i32) -> (i32, i32, i32, i32) {
    %c0_i32 = arith.constant 0 : i32
    %c0_i32_0 = arith.constant 0 : i32
    %c0_i32_1 = arith.constant 0 : i32
    return %arg0, %arg1, %c0_i32, %c0_i32_0 : i32, i32, i32, i32
  }
  func.func @transform_1(%arg0: i32, %arg1: i32) -> (i32, i32, i32, i32, i32) {
    %c0_i32 = arith.constant 0 : i32
    %c0_i32_0 = arith.constant 0 : i32
    %c0_i32_1 = arith.constant 0 : i32
    %c0_i32_2 = arith.constant 0 : i32
    return %arg0, %arg1, %c0_i32, %c0_i32_0, %c0_i32_1 : i32, i32, i32, i32, i32
  }
  func.func @transform_2(%arg0: i32, %arg1: i32) -> (i32, i32) {
    %c0_i32 = arith.constant 0 : i32
    %c0_i32_0 = arith.constant 0 : i32
    %c0_i32_1 = arith.constant 0 : i32
    return %c0_i32, %c0_i32_0 : i32, i32
  }
  func.func @transform_3(%arg0: i32, %arg1: i32) -> (i32, i32, i32) {
    %c0_i32 = arith.constant 0 : i32
    %c0_i32_0 = arith.constant 0 : i32
    %c0_i32_1 = arith.constant 0 : i32
    %c0_i32_2 = arith.constant 0 : i32
    return %c0_i32, %c0_i32_0, %c0_i32_1 : i32, i32, i32
  }
  func.func @transform_4(%arg0: i32, %arg1: i32) -> (i32, i32) {
    %c0_i32 = arith.constant 0 : i32
    %c0_i32_0 = arith.constant 0 : i32
    %c0_i32_1 = arith.constant 0 : i32
    return %c0_i32, %c0_i32_0 : i32, i32
  }
  func.func @transform_5(%arg0: i32, %arg1: i32) -> (i32, i32) {
    %c0_i32 = arith.constant 0 : i32
    %c0_i32_0 = arith.constant 0 : i32
    %c0_i32_1 = arith.constant 0 : i32
    return %c0_i32, %c0_i32_0 : i32, i32
  }
  func.func @transform_6(%arg0: i32, %arg1: i32) -> (i32, i32) {
    %c0_i32 = arith.constant 0 : i32
    %c0_i32_0 = arith.constant 0 : i32
    %c0_i32_1 = arith.constant 0 : i32
    return %c0_i32, %c0_i32_0 : i32, i32
  }
  func.func @transform_7(%arg0: i32, %arg1: i32) -> (i32, i32) {
    %c0_i32 = arith.constant 0 : i32
    %c0_i32_0 = arith.constant 0 : i32
    %c0_i32_1 = arith.constant 0 : i32
    return %c0_i32, %c0_i32_0 : i32, i32
  }
  func.func @transform_8(%arg0: i32, %arg1: i32) -> (i32, i32, i32, i32) {
    %c0_i32 = arith.constant 0 : i32
    %c0_i32_0 = arith.constant 0 : i32
    %c0_i32_1 = arith.constant 0 : i32
    return %arg0, %arg1, %c0_i32, %c0_i32_0 : i32, i32, i32, i32
  }
}

module attributes {stable_mosaic.version = 11 : i64} {
  func.func @bottleneck_kernel(%arg0: i32, %arg1: i32, %arg2: memref<1x16x16x128xbf16, #tpu.memory_space<vmem>>, %arg3: memref<1x1x2x16x128xbf16, #tpu.memory_space<vmem>>, %arg4: memref<128x128xbf16, #tpu.memory_space<vmem>>, %arg5: memref<3x384x128xbf16, #tpu.memory_space<vmem>>, %arg6: memref<128x128xbf16, #tpu.memory_space<vmem>>, %arg7: memref<1x128xf32, #tpu.memory_space<vmem>>, %arg8: memref<1x128xf32, #tpu.memory_space<vmem>>, %arg9: memref<1x128xf32, #tpu.memory_space<vmem>>, %arg10: memref<1x16x16x128xbf16, #tpu.memory_space<vmem>>, %arg11: memref<288x384xbf16, #tpu.memory_space<vmem>>) attributes {dimension_semantics = [#tpu.dimension_semantics<parallel>, #tpu.dimension_semantics<parallel>], iteration_bounds = array<i64: 2, 1>, scalar_prefetch = 0 : i64, scratch_operands = 1 : i64, tpu.core_type = #tpu.core_type<tc>, window_params = [{transform_indices = @transform_0, window_bounds = array<i64: 1, 16, 16, 128>}, {transform_indices = @transform_1, window_bounds = array<i64: 1, 1, 2, 16, 128>}, {pipeline_mode = #tpu.pipeline_mode<synchronous>, transform_indices = @transform_2, window_bounds = array<i64: 128, 128>}, {pipeline_mode = #tpu.pipeline_mode<synchronous>, transform_indices = @transform_3, window_bounds = array<i64: 3, 384, 128>}, {pipeline_mode = #tpu.pipeline_mode<synchronous>, transform_indices = @transform_4, window_bounds = array<i64: 128, 128>}, {pipeline_mode = #tpu.pipeline_mode<synchronous>, transform_indices = @transform_5, window_bounds = array<i64: 1, 128>}, {pipeline_mode = #tpu.pipeline_mode<synchronous>, transform_indices = @transform_6, window_bounds = array<i64: 1, 128>}, {pipeline_mode = #tpu.pipeline_mode<synchronous>, transform_indices = @transform_7, window_bounds = array<i64: 1, 128>}, {transform_indices = @transform_8, window_bounds = array<i64: 1, 16, 16, 128>}]} {
    %c0 = arith.constant 0 : index
    %c0_0 = arith.constant 0 : index
    %0 = vector.load %arg4[%c0, %c0_0] : memref<128x128xbf16, #tpu.memory_space<vmem>>, vector<128x128xbf16>
    %c0_1 = arith.constant 0 : index
    %c0_2 = arith.constant 0 : index
    %1 = vector.load %arg7[%c0_1, %c0_2] : memref<1x128xf32, #tpu.memory_space<vmem>>, vector<1x128xf32>
    %c0_3 = arith.constant 0 : index
    %c0_4 = arith.constant 0 : index
    %c0_5 = arith.constant 0 : index
    %c0_6 = arith.constant 0 : index
    %2 = vector.load %arg2[%c0_3, %c0_4, %c0_5, %c0_6] : memref<1x16x16x128xbf16, #tpu.memory_space<vmem>>, vector<1x16x16x128xbf16>
    %3 = vector.shape_cast %2 : vector<1x16x16x128xbf16> to vector<16x16x128xbf16>
    %4 = vector.shape_cast %3 : vector<16x16x128xbf16> to vector<256x128xbf16>
    %cst = arith.constant dense<0.000000e+00> : vector<256x128xf32>
    %5 = tpu.matmul %4, %0, %cst {dimension_numbers = #tpu.dot_dimension_numbers<[1], [0], [0], [1], [0, 0, 1, 1], [], []>} : vector<256x128xbf16>, vector<128x128xbf16>, vector<256x128xf32> -> vector<256x128xf32>
    %6 = vector.broadcast %1 : vector<1x128xf32> to vector<256x128xf32>
    %7 = arith.addf %5, %6 : vector<256x128xf32>
    %cst_7 = arith.constant 0.000000e+00 : f32
    %8 = vector.broadcast %cst_7 : f32 to vector<256x128xf32>
    %9 = arith.maximumf %7, %8 : vector<256x128xf32>
    %c0_8 = arith.constant 0 : index
    %c0_9 = arith.constant 0 : index
    %c0_10 = arith.constant 0 : index
    %c0_11 = arith.constant 0 : index
    %c0_12 = arith.constant 0 : index
    %10 = vector.load %arg3[%c0_8, %c0_9, %c0_10, %c0_11, %c0_12] : memref<1x1x2x16x128xbf16, #tpu.memory_space<vmem>>, vector<1x1x2x16x128xbf16>
    %11 = vector.shape_cast %10 : vector<1x1x2x16x128xbf16> to vector<2x16x128xbf16>
    %12 = vector.shape_cast %11 : vector<2x16x128xbf16> to vector<32x128xbf16>
    %cst_13 = arith.constant dense<0.000000e+00> : vector<32x128xf32>
    %13 = tpu.matmul %12, %0, %cst_13 {dimension_numbers = #tpu.dot_dimension_numbers<[1], [0], [0], [1], [0, 0, 1, 1], [], []>} : vector<32x128xbf16>, vector<128x128xbf16>, vector<32x128xf32> -> vector<32x128xf32>
    %14 = vector.broadcast %1 : vector<1x128xf32> to vector<32x128xf32>
    %15 = arith.addf %13, %14 : vector<32x128xf32>
    %cst_14 = arith.constant 0.000000e+00 : f32
    %16 = vector.broadcast %cst_14 : f32 to vector<32x128xf32>
    %17 = arith.maximumf %15, %16 : vector<32x128xf32>
    %c0_i32 = arith.constant 0 : i32
    %18 = arith.cmpi sgt, %arg1, %c0_i32 : i32
    %19 = vector.extract_strided_slice %17 {offsets = [0, 0], sizes = [16, 128], strides = [1, 1]} : vector<32x128xf32> to vector<16x128xf32>
    %cst_15 = arith.constant 0.000000e+00 : f32
    %20 = vector.broadcast %cst_15 : f32 to vector<16x128xf32>
    %21 = arith.select %18, %19, %20 : vector<16x128xf32>
    %c0_i32_16 = arith.constant 0 : i32
    %22 = arith.cmpi slt, %arg1, %c0_i32_16 : i32
    %23 = vector.extract_strided_slice %17 {offsets = [16, 0], sizes = [16, 128], strides = [1, 1]} : vector<32x128xf32> to vector<16x128xf32>
    %cst_17 = arith.constant 0.000000e+00 : f32
    %24 = vector.broadcast %cst_17 : f32 to vector<16x128xf32>
    %25 = arith.select %22, %23, %24 : vector<16x128xf32>
    %26 = arith.truncf %21 : vector<16x128xf32> to vector<16x128xbf16>
    %27 = arith.truncf %9 : vector<256x128xf32> to vector<256x128xbf16>
    %28 = arith.truncf %25 : vector<16x128xf32> to vector<16x128xbf16>
    %c0_18 = arith.constant 0 : index
    %c128 = arith.constant 128 : index
    %29 = vector.load %arg11[%c0_18, %c128] : memref<288x384xbf16, #tpu.memory_space<vmem>>, vector<16x128xbf16>
    tpu.vector_store %arg11[%c0_18, %c128], %26 {strides = array<i32>} : memref<288x384xbf16, #tpu.memory_space<vmem>>, vector<16x128xbf16>,
    %c16 = arith.constant 16 : index
    %c128_19 = arith.constant 128 : index
    %30 = vector.load %arg11[%c16, %c128_19] : memref<288x384xbf16, #tpu.memory_space<vmem>>, vector<256x128xbf16>
    tpu.vector_store %arg11[%c16, %c128_19], %27 {strides = array<i32>} : memref<288x384xbf16, #tpu.memory_space<vmem>>, vector<256x128xbf16>,
    %c272 = arith.constant 272 : index
    %c128_20 = arith.constant 128 : index
    %31 = vector.load %arg11[%c272, %c128_20] : memref<288x384xbf16, #tpu.memory_space<vmem>>, vector<16x128xbf16>
    tpu.vector_store %arg11[%c272, %c128_20], %28 {strides = array<i32>} : memref<288x384xbf16, #tpu.memory_space<vmem>>, vector<16x128xbf16>,
    %cst_21 = arith.constant 0.000000e+00 : bf16
    %32 = vector.broadcast %cst_21 : bf16 to vector<1x128xbf16>
    %33 = vector.extract_strided_slice %28 {offsets = [0, 0], sizes = [15, 128], strides = [1, 1]} : vector<16x128xbf16> to vector<15x128xbf16>
    %34 = tpu.concatenate %32, %26, %27, %33 in 0 : vector<1x128xbf16>, vector<16x128xbf16>, vector<256x128xbf16>, vector<15x128xbf16> -> vector<288x128xbf16>
    %35 = vector.extract_strided_slice %26 {offsets = [1, 0], sizes = [15, 128], strides = [1, 1]} : vector<16x128xbf16> to vector<15x128xbf16>
    %36 = tpu.concatenate %35, %27, %28, %32 in 0 : vector<15x128xbf16>, vector<256x128xbf16>, vector<16x128xbf16>, vector<1x128xbf16> -> vector<288x128xbf16>
    %37 = tpu.iota {dimensions = array<i32: 0>} : vector<288x1xi32>
    %c16_i32 = arith.constant 16 : i32
    %c0_i32_22 = arith.constant 0 : i32
    %38 = arith.cmpi eq, %c16_i32, %c0_i32_22 : i32
    %c1_i32 = arith.constant 1 : i32
    %39 = arith.select %38, %c1_i32, %c16_i32 : i32
    %40 = vector.broadcast %39 : i32 to vector<288x1xi32>
    %41 = arith.remsi %37, %40 : vector<288x1xi32>
    %c0_i32_23 = arith.constant 0 : i32
    %42 = vector.broadcast %c0_i32_23 : i32 to vector<288x1xi32>
    %43 = arith.cmpi ne, %41, %42 : vector<288x1xi32>
    %c0_i32_24 = arith.constant 0 : i32
    %44 = vector.broadcast %c0_i32_24 : i32 to vector<288x1xi32>
    %45 = arith.cmpi slt, %41, %44 : vector<288x1xi32>
    %c0_i32_25 = arith.constant 0 : i32
    %46 = arith.cmpi slt, %39, %c0_i32_25 : i32
    %47 = vector.broadcast %46 : i1 to vector<288x1xi1>
    %48 = vector.broadcast %47 : vector<288x1xi1> to vector<288x1xi1>
    %49 = arith.xori %45, %48 : vector<288x1xi1>
    %50 = arith.andi %49, %43 : vector<288x1xi1>
    %51 = vector.broadcast %39 : i32 to vector<288x1xi32>
    %52 = arith.addi %41, %51 : vector<288x1xi32>
    %53 = arith.select %50, %52, %41 : vector<288x1xi1>, vector<288x1xi32>
    %c0_i32_26 = arith.constant 0 : i32
    %54 = vector.broadcast %c0_i32_26 : i32 to vector<288x1xi32>
    %55 = arith.cmpi sgt, %53, %54 : vector<288x1xi32>
    %56 = vector.shape_cast %55 : vector<288x1xi1> to vector<288x1xi1>
    %57 = vector.broadcast %56 : vector<288x1xi1> to vector<288x128xi1>
    %58 = vector.shape_cast %32 : vector<1x128xbf16> to vector<1x128xbf16>
    %59 = vector.broadcast %58 : vector<1x128xbf16> to vector<288x128xbf16>
    %60 = arith.select %57, %34, %59 : vector<288x128xi1>, vector<288x128xbf16>
    %c0_27 = arith.constant 0 : index
    %c0_28 = arith.constant 0 : index
    %61 = vector.load %arg11[%c0_27, %c0_28] : memref<288x384xbf16, #tpu.memory_space<vmem>>, vector<288x128xbf16>
    tpu.vector_store %arg11[%c0_27, %c0_28], %60 {strides = array<i32>} : memref<288x384xbf16, #tpu.memory_space<vmem>>, vector<288x128xbf16>,
    %c15_i32 = arith.constant 15 : i32
    %62 = vector.broadcast %c15_i32 : i32 to vector<288x1xi32>
    %63 = arith.cmpi slt, %53, %62 : vector<288x1xi32>
    %64 = vector.shape_cast %63 : vector<288x1xi1> to vector<288x1xi1>
    %65 = vector.broadcast %64 : vector<288x1xi1> to vector<288x128xi1>
    %66 = vector.shape_cast %32 : vector<1x128xbf16> to vector<1x128xbf16>
    %67 = vector.broadcast %66 : vector<1x128xbf16> to vector<288x128xbf16>
    %68 = arith.select %65, %36, %67 : vector<288x128xi1>, vector<288x128xbf16>
    %c0_29 = arith.constant 0 : index
    %c256 = arith.constant 256 : index
    %69 = vector.load %arg11[%c0_29, %c256] : memref<288x384xbf16, #tpu.memory_space<vmem>>, vector<288x128xbf16>
    tpu.vector_store %arg11[%c0_29, %c256], %68 {strides = array<i32>} : memref<288x384xbf16, #tpu.memory_space<vmem>>, vector<288x128xbf16>,
    %c0_30 = arith.constant 0 : index
    %c0_31 = arith.constant 0 : index
    %70 = vector.load %arg11[%c0_30, %c0_31] : memref<288x384xbf16, #tpu.memory_space<vmem>>, vector<256x384xbf16>
    %c0_32 = arith.constant 0 : index
    %c0_33 = arith.constant 0 : index
    %c0_34 = arith.constant 0 : index
    %71 = vector.load %arg5[%c0_32, %c0_33, %c0_34] : memref<3x384x128xbf16, #tpu.memory_space<vmem>>, vector<1x384x128xbf16>
    %72 = vector.shape_cast %71 : vector<1x384x128xbf16> to vector<384x128xbf16>
    %cst_35 = arith.constant dense<0.000000e+00> : vector<256x128xf32>
    %73 = tpu.matmul %70, %72, %cst_35 {dimension_numbers = #tpu.dot_dimension_numbers<[1], [0], [0], [1], [0, 0, 1, 1], [], []>} : vector<256x384xbf16>, vector<384x128xbf16>, vector<256x128xf32> -> vector<256x128xf32>
    %c16_36 = arith.constant 16 : index
    %c0_37 = arith.constant 0 : index
    %74 = vector.load %arg11[%c16_36, %c0_37] : memref<288x384xbf16, #tpu.memory_space<vmem>>, vector<256x384xbf16>
    %c1 = arith.constant 1 : index
    %c0_38 = arith.constant 0 : index
    %c0_39 = arith.constant 0 : index
    %75 = vector.load %arg5[%c1, %c0_38, %c0_39] : memref<3x384x128xbf16, #tpu.memory_space<vmem>>, vector<1x384x128xbf16>
    %76 = vector.shape_cast %75 : vector<1x384x128xbf16> to vector<384x128xbf16>
    %cst_40 = arith.constant dense<0.000000e+00> : vector<256x128xf32>
    %77 = tpu.matmul %74, %76, %cst_40 {dimension_numbers = #tpu.dot_dimension_numbers<[1], [0], [0], [1], [0, 0, 1, 1], [], []>} : vector<256x384xbf16>, vector<384x128xbf16>, vector<256x128xf32> -> vector<256x128xf32>
    %78 = arith.addf %73, %77 : vector<256x128xf32>
    %c32 = arith.constant 32 : index
    %c0_41 = arith.constant 0 : index
    %79 = vector.load %arg11[%c32, %c0_41] : memref<288x384xbf16, #tpu.memory_space<vmem>>, vector<256x384xbf16>
    %c2 = arith.constant 2 : index
    %c0_42 = arith.constant 0 : index
    %c0_43 = arith.constant 0 : index
    %80 = vector.load %arg5[%c2, %c0_42, %c0_43] : memref<3x384x128xbf16, #tpu.memory_space<vmem>>, vector<1x384x128xbf16>
    %81 = vector.shape_cast %80 : vector<1x384x128xbf16> to vector<384x128xbf16>
    %cst_44 = arith.constant dense<0.000000e+00> : vector<256x128xf32>
    %82 = tpu.matmul %79, %81, %cst_44 {dimension_numbers = #tpu.dot_dimension_numbers<[1], [0], [0], [1], [0, 0, 1, 1], [], []>} : vector<256x384xbf16>, vector<384x128xbf16>, vector<256x128xf32> -> vector<256x128xf32>
    %83 = arith.addf %78, %82 : vector<256x128xf32>
    %c0_45 = arith.constant 0 : index
    %c0_46 = arith.constant 0 : index
    %84 = vector.load %arg8[%c0_45, %c0_46] : memref<1x128xf32, #tpu.memory_space<vmem>>, vector<1x128xf32>
    %85 = vector.broadcast %84 : vector<1x128xf32> to vector<256x128xf32>
    %86 = arith.addf %83, %85 : vector<256x128xf32>
    %cst_47 = arith.constant 0.000000e+00 : f32
    %87 = vector.broadcast %cst_47 : f32 to vector<256x128xf32>
    %88 = arith.maximumf %86, %87 : vector<256x128xf32>
    %89 = arith.truncf %88 : vector<256x128xf32> to vector<256x128xbf16>
    %c0_48 = arith.constant 0 : index
    %c0_49 = arith.constant 0 : index
    %90 = vector.load %arg6[%c0_48, %c0_49] : memref<128x128xbf16, #tpu.memory_space<vmem>>, vector<128x128xbf16>
    %cst_50 = arith.constant dense<0.000000e+00> : vector<256x128xf32>
    %91 = tpu.matmul %89, %90, %cst_50 {dimension_numbers = #tpu.dot_dimension_numbers<[1], [0], [0], [1], [0, 0, 1, 1], [], []>} : vector<256x128xbf16>, vector<128x128xbf16>, vector<256x128xf32> -> vector<256x128xf32>
    %c0_51 = arith.constant 0 : index
    %c0_52 = arith.constant 0 : index
    %92 = vector.load %arg9[%c0_51, %c0_52] : memref<1x128xf32, #tpu.memory_space<vmem>>, vector<1x128xf32>
    %93 = vector.broadcast %92 : vector<1x128xf32> to vector<256x128xf32>
    %94 = arith.addf %91, %93 : vector<256x128xf32>
    %95 = arith.extf %4 : vector<256x128xbf16> to vector<256x128xf32>
    %96 = arith.addf %94, %95 : vector<256x128xf32>
    %cst_53 = arith.constant 0.000000e+00 : f32
    %97 = vector.broadcast %cst_53 : f32 to vector<256x128xf32>
    %98 = arith.maximumf %96, %97 : vector<256x128xf32>
    %99 = vector.shape_cast %98 : vector<256x128xf32> to vector<16x16x128xf32>
    %100 = arith.truncf %99 : vector<16x16x128xf32> to vector<16x16x128xbf16>
    %c0_54 = arith.constant 0 : index
    %c0_55 = arith.constant 0 : index
    %c0_56 = arith.constant 0 : index
    %c0_57 = arith.constant 0 : index
    %101 = vector.load %arg10[%c0_54, %c0_55, %c0_56, %c0_57] : memref<1x16x16x128xbf16, #tpu.memory_space<vmem>>, vector<1x16x16x128xbf16>
    %102 = vector.shape_cast %101 : vector<1x16x16x128xbf16> to vector<16x16x128xbf16>
    %103 = vector.shape_cast %100 : vector<16x16x128xbf16> to vector<1x16x16x128xbf16>
    tpu.vector_store %arg10[%c0_54, %c0_55, %c0_56, %c0_57], %103 {strides = array<i32>} : memref<1x16x16x128xbf16, #tpu.memory_space<vmem>>, vector<1x16x16x128xbf16>,
    return
  }
  func.func @transform_0(%arg0: i32, %arg1: i32) -> (i32, i32, i32, i32) {
    %c0_i32 = arith.constant 0 : i32
    %c0_i32_0 = arith.constant 0 : i32
    %c0_i32_1 = arith.constant 0 : i32
    return %arg0, %arg1, %c0_i32, %c0_i32_0 : i32, i32, i32, i32
  }
  func.func @transform_1(%arg0: i32, %arg1: i32) -> (i32, i32, i32, i32, i32) {
    %c0_i32 = arith.constant 0 : i32
    %c0_i32_0 = arith.constant 0 : i32
    %c0_i32_1 = arith.constant 0 : i32
    %c0_i32_2 = arith.constant 0 : i32
    return %arg0, %arg1, %c0_i32, %c0_i32_0, %c0_i32_1 : i32, i32, i32, i32, i32
  }
  func.func @transform_2(%arg0: i32, %arg1: i32) -> (i32, i32) {
    %c0_i32 = arith.constant 0 : i32
    %c0_i32_0 = arith.constant 0 : i32
    %c0_i32_1 = arith.constant 0 : i32
    return %c0_i32, %c0_i32_0 : i32, i32
  }
  func.func @transform_3(%arg0: i32, %arg1: i32) -> (i32, i32, i32) {
    %c0_i32 = arith.constant 0 : i32
    %c0_i32_0 = arith.constant 0 : i32
    %c0_i32_1 = arith.constant 0 : i32
    %c0_i32_2 = arith.constant 0 : i32
    return %c0_i32, %c0_i32_0, %c0_i32_1 : i32, i32, i32
  }
  func.func @transform_4(%arg0: i32, %arg1: i32) -> (i32, i32) {
    %c0_i32 = arith.constant 0 : i32
    %c0_i32_0 = arith.constant 0 : i32
    %c0_i32_1 = arith.constant 0 : i32
    return %c0_i32, %c0_i32_0 : i32, i32
  }
  func.func @transform_5(%arg0: i32, %arg1: i32) -> (i32, i32) {
    %c0_i32 = arith.constant 0 : i32
    %c0_i32_0 = arith.constant 0 : i32
    %c0_i32_1 = arith.constant 0 : i32
    return %c0_i32, %c0_i32_0 : i32, i32
  }
  func.func @transform_6(%arg0: i32, %arg1: i32) -> (i32, i32) {
    %c0_i32 = arith.constant 0 : i32
    %c0_i32_0 = arith.constant 0 : i32
    %c0_i32_1 = arith.constant 0 : i32
    return %c0_i32, %c0_i32_0 : i32, i32
  }
  func.func @transform_7(%arg0: i32, %arg1: i32) -> (i32, i32) {
    %c0_i32 = arith.constant 0 : i32
    %c0_i32_0 = arith.constant 0 : i32
    %c0_i32_1 = arith.constant 0 : i32
    return %c0_i32, %c0_i32_0 : i32, i32
  }
  func.func @transform_8(%arg0: i32, %arg1: i32) -> (i32, i32, i32, i32) {
    %c0_i32 = arith.constant 0 : i32
    %c0_i32_0 = arith.constant 0 : i32
    %c0_i32_1 = arith.constant 0 : i32
    return %arg0, %arg1, %c0_i32, %c0_i32_0 : i32, i32, i32, i32
  }
}

</mosaic_0001>

<bundles_post_ra>
// kernel: tpu_custom_call.1
= control target key start
LH: loop header
LB: loop body
LE: loop exit
PB: predicated region body
PF: predicated region fallthrough
CT: control target
= control target key end

     0   :  { %s8978_s0 = inlined_call_operand.hbm [shape: bf16[2,16,16,128], index: 0, kind: input, shape index: {}]   ;;  %s8979_s1 = inlined_call_operand.hbm [shape: bf16[2,1,2,16,128], index: 1, kind: input, shape index: {}]   ;;  %s8980_s2 = inlined_call_operand.hbm [shape: bf16[128,128], index: 2, kind: input, shape index: {}]   ;;  %s8981_s3 = inlined_call_operand.hbm [shape: bf16[3,384,128], index: 3, kind: input, shape index: {}]   ;;  %s8982_s4 = inlined_call_operand.hbm [shape: bf16[128,128], index: 4, kind: input, shape index: {}]   ;;  %s8983_s5 = inlined_call_operand.vmem [shape: f32[1,128], index: 5, kind: input, shape index: {}]   ;;  %s8984_s6 = inlined_call_operand.vmem [shape: f32[1,128], index: 6, kind: input, shape index: {}]   ;;  %s8985_s7 = inlined_call_operand.vmem [shape: f32[1,128], index: 7, kind: input, shape index: {}]   ;;  %s8986_s8 = inlined_call_operand.hbm [shape: bf16[2,16,16,128], index: 8, kind: output, shape index: {}]  }
   0x1   :  { %9001 = sst [smem:[#allocation49_spill]] %s8980_s2 }
   0x2   :  { %9002 = sst [smem:[#allocation50_spill]] %s8981_s3 }
   0x3   :  { %9003 = sst [smem:[#allocation51_spill]] %s8982_s4 }
   0x4   :  { %13 = vsyncpa [#allocation4], 0 }
   0x5   :  { %15 = vsyncpa [#allocation4 + $0x1], 0 }
   0x6   :  { %16 = vsyncpa [#allocation7], 0 }
   0x7   :  { %18 = vsyncpa [#allocation7 + $0x1], 0 }
   0x8   :  { %19 = vsyncpa [#allocation10], 0 }
   0x9   :  { %20 = vsyncpa [#allocation5], 0 }
   0xa   :  { %22 = vsyncpa [#allocation5 + $0x1], 0  ;;  %s7055_s27 = smov 0   ;;  %s7057_s28 = smov 0  }
   0xb   :  { %s7059_s29 = smov 0   ;;  %s7061_s30 = smov 0  }
   0xc   :  { %s7063_s9 = smov 0   ;;  %s7065_s10 = smov 0  }
   0xd LB: > { %9004 = sst [smem:[#allocation18_spill]] %s6978_s27  ;;  %s7086_s11 = sadd.s32 4294967295, %s6998_s10   ;;  %s6998_s10 = sphi %s7065_s10, %s28_s10   ;;  %s6994_s9 = sphi %s7063_s9, %s9188_s9   ;;  %s6990_s30 = sphi %s7061_s30, %s9187_s30   ;;  %s6986_s29 = sphi %s7059_s29, %s9183_s29   ;;  %s6982_s28 = sphi %s7057_s28, %s9186_s28   ;;  %s6978_s27 = sphi %s7055_s27, %s9185_s27  }
   0xe   : > { %9005 = sst [smem:[#allocation19_spill]] %s6986_s29  ;;  %s5401_s12 = sadd.s32 4294967294, %s6998_s10  }
   0xf   : > { %p62_p0 = scmp.ne.s32.totalorder %s6982_s28, %s6978_s27  ;;  %p63_p1 = scmp.eq.s32.totalorder %s7086_s11, 0 }
  0x10   : > { %p242_p2 = scmp.eq.s32.totalorder %s7086_s11, 1  ;;  %p248_p3 = scmp.eq.s32.totalorder %s5401_s12, 1 }
  0x11   : > { %p7095_p4 = por %p63_p1, %p62_p0  ;;  %p5402_p5 = scmp.ge.s32.totalorder %s6998_s10, 1 }
  0x12   : > { %p7100_p6 = por %p248_p3, %p62_p0  ;;  %p255_p7 = scmp.lt.s32.totalorder %s6998_s10, 3 }
  0x13   : > { %s9009_s2 = sld [smem:[#allocation49_spill]]  ;;  %s7000_s19 = smov [#allocation8]  }
  0x14   : > { %s9007_s14 = scalar_select %p7100_p6, 1, 0 }
  0x15   : > { %p7108_p8 = pnand %p5402_p5, %p255_p7  ;;  %s268_s20 = sshll.u32 %s7000_s19, 4  ;;  %s269_s20 = int_to_ptr.vmem [resolvable:$true] %s268_s20 }
  0x16   : > { %9008 = sst [smem:[#allocation20_spill]] %s9007_s14  ;;  %p5406_p11 = scmp.ge.s32.totalorder %s6998_s10, 2 }
  0x17   : > { %p6662_p9 = pneg %p7108_p8  ;;  %s9012_s3 = sld [smem:[#allocation50_spill]] }
  0x18   : > { %s8987_s25 = smov 64   ;;  %s8989_s26 = smov 4  }
  0x19   : > { %s266_s17 = sshll.u32 %s9009_s2, 4  ;;  %p7116_p10 = pnand %p6662_p9, %p63_p1  ;;  %s267_s17 = int_to_ptr.hbm [resolvable:$true] %s266_s17 }
  0x1a   : > { %s7003_s12 = smov [#allocation9]   ;;  %s9013_s4 = sld [smem:[#allocation51_spill]] }
  0x1b   : > { %6665 = dma.hbm_to_vmem [thread:$0]  (!%p7116_p10), %s267_s17, 1024, %s269_s20, [#allocation7], %s8987_s25, %s8987_s25, %s8989_s26  }
  0x1c   : > { %s282_s15 = sshll.u32 %s7003_s12, 4  ;;  %s7004_s23 = smov [#allocation11]   ;;  %s283_s15 = int_to_ptr.vmem [resolvable:$true] %s282_s15 }
  0x1d   : > { %s280_s24 = sshll.u32 %s9012_s3, 4  ;;  %s296_s2 = sshll.u32 %s7004_s23, 4  ;;  %s281_s24 = int_to_ptr.hbm [resolvable:$true] %s280_s24  ;;  %s297_s2 = int_to_ptr.vmem [resolvable:$true] %s296_s2 }
  0x1e   : > { %6668 = dma.hbm_to_vmem [thread:$0]  (!%p7116_p10), %s281_s24, 9216, %s283_s15, [#allocation10], %s8987_s25, %s8987_s25, %s8989_s26  }
  0x1f   : > { %s40_s17 = sadd.s32 1, %s6994_s9  ;;  %s49_s20 = sadd.s32 1, %s6986_s29 }
  0x20   : > { %s294_s22 = sshll.u32 %s9013_s4, 4  ;;  %p42_p12 = scmp.ge.s32.totalorder %s40_s17, 2  ;;  %s295_s22 = int_to_ptr.hbm [resolvable:$true] %s294_s22 }
  0x21   : > { %6671 = dma.hbm_to_vmem [thread:$0]  (!%p7116_p10), %s295_s22, 1024, %s297_s2, [#allocation10], %s8987_s25, %s8987_s25, %s8989_s26  }
  0x22   : > { %p56_p13 = scmp.ne.s32.totalorder %s6986_s29, %s6982_s28  ;;  %p57_p0 = scmp.eq.s32.totalorder %s6998_s10, 0 }
  0x23   : > { %s9190_s17 = smov (%p42_p12, %s40_s17), 0  ;;  %p6686_p7 = scmp.lt.s32.totalorder %s6998_s10, 2 }
  0x24   : > { %9014 = sst [smem:[#allocation21_spill]] %s9190_s17  ;;  %p7149_p3 = por %p57_p0, %p56_p13 }
  0x25   : > { %p7155_p5 = por %p242_p2, %p56_p13  ;;  %s44_s2 = ssub.s32 %s6994_s9, %s9190_s17 }
  0x26   : > { %p47_p9 = scmp.eq.s32.totalorder %s44_s2, 0  ;;  %s319_s12 = sand.u32 1, %s6986_s29  }
  0x27   : > { %s9016_s21 = scalar_select %p7155_p5, 1, 0 }
  0x28   : > { %s5407_s15 = sshll.u32 %s319_s12, 7  ;;  %s6317_s19 = sshll.u32 %s6994_s9, 7 }
  0x29   : > { %9017 = sst [smem:[#allocation22_spill]] %s9016_s21  ;;  %s331_s25 = scalar_lea.hbm %s8978_s0, %s6317_s19 }
  0x2a   : > { %s7164_s16 = scalar_select %p47_p9, %s6986_s29, %s49_s20  }
  0x2b   : > { %s323_s26 = scalar_lea.vmem [#allocation3], %s5407_s15  ;;  %s332_s4 = sshll.u32 %s331_s25, 4  ;;  %s333_s4 = int_to_ptr.hbm [resolvable:$true] %s332_s4 }
  0x2c   : > { %9018 = sst [smem:[#allocation23_spill]] %s7164_s16  ;;  %s334_s3 = sshll.u32 %s323_s26, 4  ;;  %s335_s3 = int_to_ptr.vmem [resolvable:$true] %s334_s3 }
  0x2d   : > { %p6673_p2 = pnand %p6686_p7, %p7149_p3  ;;  %s344_s17 = sand.u32 1, %s6998_s10  }
  0x2e   : > { %s5410_s14 = sshll.u32 %s319_s12, 4  ;;  %s320_s2 = scalar_lea.sflag [#allocation4], %s319_s12 }
  0x2f   : > { %s9019_s27 = smov 4   ;;  %s9020_s21 = smov 64  }
  0x30   : > { %6675 = dma.hbm_to_vmem [thread:$0]  (!%p6673_p2), %s333_s4, 2048, %s335_s3, %s320_s2, %s9020_s21, %s9020_s21, %s9019_s27  }
  0x31   : > { %s6318_s20 = sshll.u32 %s6994_s9, 4  ;;  %s348_s19 = scalar_lea.vmem [#allocation6], %s5410_s14 }
  0x32   : > { %s355_s22 = scalar_lea.hbm %s8979_s1, %s6318_s20  ;;  %s358_s15 = sshll.u32 %s348_s19, 4  ;;  %s359_s15 = int_to_ptr.vmem [resolvable:$true] %s358_s15 }
  0x33   : > { %s356_s26 = sshll.u32 %s355_s22, 4  ;;  %s345_s25 = scalar_lea.sflag [#allocation7], %s344_s17  ;;  %s357_s26 = int_to_ptr.hbm [resolvable:$true] %s356_s26 }
  0x34   : > { %6678 = dma.hbm_to_vmem [thread:$0]  (!%p6673_p2), %s357_s26, 256, %s359_s15, %s345_s25, %s9020_s21, %s9020_s21, %s9019_s27  }
  0x35   : > { %370 = sbr.rel (%p7108_p8) target bundleno = 1332 (0x534), region = 52 }
  0x3a   : > { %s7186_s3 = sand.u32 1, %s6982_s28  }
  0x3b   : > { %s5414_s4 = sshll.u32 %s7186_s3, 7  ;;  %s373_s29 = scalar_lea.sflag [#allocation4], %s7186_s3 }
  0x3c   : > { %s7192_s14 = scalar_lea.vmem [#allocation3], %s5414_s4 }
  0x3d   : > { %6957 = dma.done.wait (%p7095_p4), %s373_s29, 2048  }
  0x3e   : > { %6959 = vsyncadd (%p7095_p4), %s373_s29, 4294965248  ;;  %s382_s27 = sand.u32 1, %s7086_s11   ;;  %s5415_s18 = sshll.u32 %s7186_s3, 4 }
  0x3f   : > { %s383_s17 = scalar_lea.sflag [#allocation7], %s382_s27  ;;  %s7200_s24 = scalar_lea.vmem [#allocation6], %s5415_s18 }
  0x40   : > { %6961 = dma.done.wait (%p7095_p4), %s383_s17, 256  }
  0x41   : > { %6963 = vsyncadd (%p7095_p4), %s383_s17, 4294967040 }
  0x42   : > { %6965 = dma.done.wait (%p63_p1), [#allocation7], 1024  }
  0x43   : > { %6967 = vsyncadd (%p63_p1), [#allocation7], 4294966272 }
  0x44   : > { %6969 = dma.done.wait (%p63_p1), [#allocation10], 10240  }
  0x45   : > { %6971 = vsyncadd (%p63_p1), [#allocation10], 4294957056  ;;  %v6326_v0 = vld [vmem:[#allocation8 + $0x38] sm:$0xff]  ;;  %v6325_v1 = vld [vmem:[#allocation8 + $0x30] sm:$0xff]  ;;  %v7005_v20 = vmov 0.0|0.0   ;;  %v1219_v23 = vlaneseq  ;;  %vm7006_vm0 = vmmov 1  }
  0x46   : > { %641 = vmatpush.bf16.msra.mxu0 %v6326_v0  ;;  %6620 = vmatpush.bf16.msra.mxu1 %v6326_v0  ;;  %v6324_v2 = vld [vmem:[#allocation8 + $0x28] sm:$0xff]  ;;  %v6323_v3 = vld [vmem:[#allocation8 + $0x20] sm:$0xff]  ;;  %v6322_v4 = vld [vmem:[#allocation8 + $0x18] sm:$0xff]  ;;  %849 = vst [vmem:[#allocation2 + $0x4] sm:$0xf] %v7005_v20  ;;  %v887_v25 = vunpack.c.l.b16 %v7005_v20  ;;  %v7007_v34 = vmov 0  }
  0x47   : > { %v6321_v5 = vld [vmem:[#allocation8 + $0x10] sm:$0xff]  ;;  %v6320_v6 = vld [vmem:[#allocation8 + $0x8] sm:$0xff]  ;;  %v6319_v7 = vld [vmem:[#allocation8] sm:$0xff]  ;;  %850 = vst [vmem:[#allocation2 + $0x10] sm:$0xf] %v7005_v20  ;;  %v7226_v26 = vshrl.u32 %v1219_v23, 7  ;;  %v7249_v51 = vunpack.c.l.b16 %v7007_v34  ;;  %v7261_v57 = vunpack.c.h.b16 %v7007_v34 }
  0x48   : > { %v6327_v8 = vld [vmem:[%s7192_s14] sm:$0xff]  ;;  %v6328_v9 = vld [vmem:[%s7192_s14 + $0x8] sm:$0xff]  ;;  %v6329_v10 = vld [vmem:[%s7192_s14 + $0x10] sm:$0xff]  ;;  %883 = vst [vmem:[#allocation2 + $0x19c] sm:$0xf] %v7005_v20  ;;  %v889_v28 = vpack.c.b16 %v887_v25, %v887_v25  ;;  %vm1137_vm5 = vcmask 1040384  }
  0x49   : > { %v6330_v11 = vld [vmem:[%s7192_s14 + $0x18] sm:$0xff]  ;;  %v6340_v12 = vld [vmem:[%s7192_s14 + $0x68] sm:$0xff]  ;;  %v6331_v13 = vld [vmem:[%s7192_s14 + $0x20] sm:$0xff]  ;;  %884 = vst [vmem:[#allocation2 + $0x1a8] sm:$0xf] %v7005_v20  ;;  %v1221_v29 = vadd.s32 8, %v7226_v26 }
  0x4a   : > { %642 = vmatpush.bf16.msra.mxu0 %v6325_v1  ;;  %6621 = vmatpush.bf16.msra.mxu1 %v6325_v1  ;;  %v6341_v14 = vld [vmem:[%s7192_s14 + $0x70] sm:$0xff]  ;;  %v6332_v15 = vld [vmem:[%s7192_s14 + $0x28] sm:$0xff]  ;;  %v6342_v16 = vld [vmem:[%s7192_s14 + $0x78] sm:$0xff]  ;;  %v1222_v30 = vadd.s32 16, %v7226_v26  ;;  %v891_v31 = vshrl.u32 %v889_v28, 16  ;;  %v1255_v32 = vadd.s32 280, %v7226_v26 }
  0x4b   : > { %v6333_v17 = vld [vmem:[%s7192_s14 + $0x30] sm:$0xff]  ;;  %v6427_v19 = vld [vmem:[#allocation9 + $0xf8] sm:$0xff]  ;;  %v6425_v24 = vld [vmem:[#allocation9 + $0xe8] sm:$0xff]  ;;  %v1260_v33 = vand.u32 15, %v7226_v26  ;;  %v894_v39 = vshll.u32 %v889_v28, 16  ;;  %v1267_v40 = vand.u32 15, %v1221_v29 }
  0x4c   : > { %v6343_v18 = vld [vmem:[%s7200_s24] sm:$0xff]  ;;  %6628 = vmatpush.bf16.msra.mxu2 %v6427_v19  ;;  %v6334_v22 = vld [vmem:[%s7192_s14 + $0x38] sm:$0xff]  ;;  %vm1797_vm1 = vmpackc.low %vm7006_vm0, %vm7006_vm0  ;;  %v7234_v38 = vrot.slane %v891_v31, 7  ;;  %v1274_v41 = vand.u32 15, %v1222_v30  ;;  %v1505_v42 = vand.u32 15, %v1255_v32  ;;  %vm1214_vm12 = vcmask 1047552  }
  0x4d   : > { %v6426_v21 = vld [vmem:[#allocation9 + $0xf0] sm:$0xff]  ;;  %v6424_v27 = vld [vmem:[#allocation9 + $0xe0] sm:$0xff]  ;;  %v1833_v35 = vsel %vm1797_vm1, 65537, %v7007_v34  ;;  %v6344_v36 = vld [vmem:[%s7200_s24 + $0x8] sm:$0xff]  ;;  %vm1688_vm2 = vcmp.gt.s32.totalorder %v1260_v33, 0  ;;  %v7246_v50 = vrot.slane %v894_v39, 1 }
  0x4e   : > { %643 = vmatpush.bf16.msra.mxu0 %v6324_v2  ;;  %6622 = vmatpush.bf16.msra.mxu1 %v6324_v2  ;;  %v6423_v37 = vld [vmem:[#allocation9 + $0xd8] sm:$0xff]  ;;  %vm1796_vm3 = vmpackc.low %vm1688_vm2, %vm1688_vm2  ;;  %v1869_v43 = vunpack.c.l.b16 %v1833_v35  ;;  %v7239_v44 = vld [vmem:[%s8983_s5] ss:$0 sm:$0xff]  ;;  %v7242_v45 = vor.u32 %v894_v39, %v7234_v38  ;;  %vm979_vm4 = vsmask.f32 256  ;;  %vm7251_vm6 = vcmp.lt.s32.totalorder %v1267_v40, 15 }
  0x4f   : > { %v1832_v46 = vsel %vm1796_vm3, 65537, %v7007_v34  ;;  %v6422_v48 = vld [vmem:[#allocation9 + $0xd0] sm:$0xff]  ;;  %v6335_v49 = vld [vmem:[%s7192_s14 + $0x40] sm:$0xff]  ;;  %vm7256_vm7 = vmand %vm1137_vm5, %vm979_vm4  ;;  %vm2263_vm8 = vcmp.lt.s32.totalorder %v1505_v42, 15  ;;  %vm1145_vm9 = vsmask.f32 7424 }
  0x50   : > { %6629 = vmatpush.bf16.msra.mxu2 %v6426_v21  ;;  %v1868_v47 = vunpack.c.l.b16 %v1832_v46  ;;  %v5525_v56 = vunpack.i.l.s16 %v1869_v43  ;;  %v1139_v59 = vsel %vm7256_vm7, 0, %v7242_v45  ;;  %vm7267_vm10 = vcmp.gt.s32.totalorder %v1274_v41, 0  ;;  %vm2371_vm11 = vmpackc.low %vm2263_vm8, %vm2263_vm8  ;;  %v6421_v63 = vld [vmem:[#allocation9 + $0xc8] sm:$0xff]  ;;  %v6434_v40 = vld [vmem:[#allocation9 + $0x130] sm:$0xff]  ;;  %s8846_s15 = scalar_lea.vmem [#allocation12], %s5414_s4  ;;  %s6524_s26 = sshll.u32 %s6990_s30, 7 }
  0x51   : > { %vm2337_vm15 = vmpackc.low %vm7251_vm6, %vm7251_vm6  ;;  %v2407_v62 = vsel %vm2371_vm11, 65537, %v7007_v34  ;;  %v1224_v30 = vadd.s32 32, %v7226_v26  ;;  %v6433_v52 = vld [vmem:[#allocation9 + $0x128] sm:$0xff]  ;;  %v6400_v60 = vld [vmem:[#allocation9 + $0x38] sm:$0xff]  ;;  %s5255_s29 = scalar_lea.hbm %s8986_s8, %s6524_s26  ;;  %s5256_s18 = sshll.u32 %s8846_s15, 4  ;;  %s5257_s18 = int_to_ptr.vmem [resolvable:$true] %s5256_s18 }
  0x52   : > { %644 = vmatpush.bf16.msra.mxu0 %v6323_v3  ;;  %6623 = vmatpush.bf16.msra.mxu1 %v6323_v3  ;;  %v5524_v55 = vunpack.i.l.s16 %v1868_v47  ;;  %vm7273_vm14 = vcmp.ne.s32.totalorder %v5525_v56, %v7261_v57  ;;  %vm1798_vm1 = vmpackc.low %vm7267_vm10, %vm7267_vm10  ;;  %vm7305_vm3 = vcmp.ne.s32.totalorder %v5525_v56, %v7249_v51  ;;  %s5258_s17 = sshll.u32 %s5255_s29, 4  ;;  %s5241_s30 = scalar_lea.sflag [#allocation5], %s7186_s3  ;;  %s5259_s17 = int_to_ptr.hbm [resolvable:$true] %s5258_s17 }
  0x53   : > { %vm7291_vm2 = vmand %vm1214_vm12, %vm1145_vm9  ;;  %v1288_v42 = vand.u32 15, %v1224_v30  ;;  %v6337_v30 = vld [vmem:[%s7192_s14 + $0x50] sm:$0xff]  ;;  %s6924_s21 = scalar_lea.hbm %s8986_s8, 256 }
  0x54   : > { %6630 = vmatpush.bf16.msra.mxu2 %v6425_v24  ;;  %vm1926_vm13 = vcmp.ne.s32.totalorder %v5524_v55, %v7249_v51 }
  0x55   : > { %vm1928_vm0 = vmpackc.low %vm7273_vm14, %vm1926_vm13  ;;  %vm7336_vm13 = vcmp.gt.s32.totalorder %v1288_v42, 0 }
  0x56   : > { %645 = vmatpush.bf16.msra.mxu0 %v6322_v4  ;;  %6624 = vmatpush.bf16.msra.mxu1 %v6322_v4 }
  0x58   : > { %6631 = vmatpush.bf16.msra.mxu2 %v6424_v27 }
  0x5a   : > { %646 = vmatpush.bf16.msra.mxu0 %v6321_v5  ;;  %6625 = vmatpush.bf16.msra.mxu1 %v6321_v5 }
  0x5c   : > { %6632 = vmatpush.bf16.msra.mxu2 %v6423_v37 }
  0x5e   : > { %647 = vmatpush.bf16.msra.mxu0 %v6320_v6  ;;  %6626 = vmatpush.bf16.msra.mxu1 %v6320_v6 }
  0x60   : > { %6633 = vmatpush.bf16.msra.mxu2 %v6422_v48 }
  0x62   : > { %648 = vmatpush.bf16.msra.mxu0 %v6319_v7  ;;  %6627 = vmatpush.bf16.msra.mxu1 %v6319_v7 }
  0x64   : > { %6634 = vmatpush.bf16.msra.mxu2 %v6421_v63 }
  0x65   : > { %649 = vmatmul.bf16.vlgmr.msra.gmra.mxu0 %v6327_v8  ;;  %714 = vmatmul.bf16.vlgmr.msra.gmra.mxu1 %v6340_v12  ;;  %v6420_v12 = vld [vmem:[#allocation9 + $0xc0] sm:$0xff] }
  0x66   : > { %778 = vmatpush.bf16.msrb.mxu1 %v6326_v0  ;;  %3760 = vmatpush.bf16.msrb.mxu0 %v6400_v60 }
  0x68   : > { %6635 = vmatpush.bf16.msra.mxu2 %v6420_v12 }
  0x6a   : > { %779 = vmatpush.bf16.msrb.mxu1 %v6325_v1  ;;  %v2443_v1 = vunpack.c.l.b16 %v2407_v62 }
  0x6c   : > { %v5595_v8 = vunpack.i.l.s16 %v2443_v1 }
  0x6e   : > { %780 = vmatpush.bf16.msrb.mxu1 %v6324_v2  ;;  %v7284_v2 = vor.u32 %v7246_v50, %v891_v31  ;;  %vm2586_vm5 = vcmp.ne.s32.totalorder %v5595_v8, %v7261_v57 }
  0x6f   : > { %vm2587_vm6 = vmpackc.low %vm2586_vm5, %vm7305_vm3 }
  0x72   : > { %781 = vmatpush.bf16.msrb.mxu1 %v6323_v3  ;;  %v2048_v3 = vsel %vm1928_vm0, %v1139_v59, 0 }
  0x75   : > { %654 = vmatmul.bf16.gmra.mxu0 %v6328_v9  ;;  %719 = vmatmul.bf16.gmra.mxu1 %v6341_v14  ;;  %v1218_v9 = vsel %vm7291_vm2, %v7284_v2, 0 }
  0x76   : > { %782 = vmatpush.bf16.msrb.mxu1 %v6322_v4 }
  0x7a   : > { %783 = vmatpush.bf16.msrb.mxu1 %v6321_v5 }
  0x7e   : > { %784 = vmatpush.bf16.msrb.mxu1 %v6320_v6  ;;  %v2084_v6 = vunpack.c.l.b16 %v2048_v3 }
  0x82   : > { %785 = vmatpush.bf16.msrb.mxu1 %v6319_v7  ;;  %v2085_v7 = vunpack.c.h.b16 %v2048_v3  ;;  %v6432_v3 = vld [vmem:[#allocation9 + $0x120] sm:$0xff] }
  0x84   : > { %v2121_v14 = vpack.c.b16 %v2085_v7, %v2085_v7 }
  0x85   : > { %659 = vmatmul.bf16.gmra.mxu0 %v6329_v10  ;;  %724 = vmatmul.bf16.gmra.mxu1 %v6342_v16  ;;  %v2373_v10 = vsel %vm2337_vm15, 65537, %v7007_v34 }
  0x86   : > { %3333 = vmatpush.bf16.msra.mxu1 %v6427_v19  ;;  %v2605_v19 = vsel %vm2587_vm6, %v1218_v9, 0  ;;  %2193 = vst [vmem:[#allocation2 + $0xc] sm:$0xf] %v2121_v14  ;;  %v2409_v20 = vunpack.c.l.b16 %v2373_v10 }
  0x88   : > { %v5561_v32 = vunpack.i.l.s16 %v2409_v20 }
  0x8a   : > { %3334 = vmatpush.bf16.msra.mxu1 %v6426_v21  ;;  %v2658_v21 = vunpack.c.l.b16 %v2605_v19  ;;  %vm2467_vm10 = vcmp.ne.s32.totalorder %v5561_v32, %v7261_v57  ;;  %v6430_v32 = vld [vmem:[#allocation9 + $0x110] sm:$0xff] }
  0x8b   : > { %vm2468_vm15 = vmpackc.low %vm2467_vm10, %vm7305_vm3 }
  0x8c   : > { %v2694_v28 = vpack.c.b16 %v2658_v21, %v2658_v21 }
  0x8e   : > { %3335 = vmatpush.bf16.msra.mxu1 %v6425_v24  ;;  %2766 = vst [vmem:[#allocation2 + $0x1a0] sm:$0xf] %v2694_v28 }
  0x92   : > { %3336 = vmatpush.bf16.msra.mxu1 %v6424_v27  ;;  %v6435_v27 = vld [vmem:[#allocation9 + $0x138] sm:$0xff] }
  0x93   : > { %6636 = vmatpush.bf16.msra.mxu3 %v6435_v27 }
  0x95   : > { %664 = vmatmul.bf16.gmra.mxu0 %v6330_v11  ;;  %786 = vmatmul.bf16.vlgmr.msrb.gmra.mxu1 %v6343_v18 }
  0x96   : > { %3337 = vmatpush.bf16.msra.mxu1 %v6423_v37  ;;  %v6336_v37 = vld [vmem:[%s7192_s14 + $0x48] sm:$0xff] }
  0x97   : > { %6637 = vmatpush.bf16.msra.mxu3 %v6434_v40 }
  0x9a   : > { %3338 = vmatpush.bf16.msra.mxu1 %v6422_v48 }
  0x9b   : > { %6638 = vmatpush.bf16.msra.mxu3 %v6433_v52 }
  0x9e   : > { %3339 = vmatpush.bf16.msra.mxu1 %v6421_v63  ;;  %v1225_v63 = vadd.s32 40, %v7226_v26 }
  0x9f   : > { %6639 = vmatpush.bf16.msra.mxu3 %v6432_v3 }
  0xa2   : > { %3340 = vmatpush.bf16.msra.mxu1 %v6420_v12 }
  0xa5   : > { %669 = vmatmul.bf16.gmra.mxu0 %v6331_v13  ;;  %791 = vmatmul.bf16.gmra.mxu1 %v6344_v36  ;;  %v2120_v13 = vpack.c.b16 %v2084_v6, %v2084_v6 }
  0xa6   : > { %3422 = vmatpush.bf16.msrb.mxu1 %v6435_v27 }
  0xa7   : > { %2192 = vst [vmem:[#allocation2] sm:$0xf] %v2120_v13 }
  0xaa   : > { %3423 = vmatpush.bf16.msrb.mxu1 %v6434_v40  ;;  %v6397_v40 = vld [vmem:[#allocation9 + $0x20] sm:$0xff] }
  0xae   : > { %3424 = vmatpush.bf16.msrb.mxu1 %v6433_v52 }
  0xb2   : > { %3425 = vmatpush.bf16.msrb.mxu1 %v6432_v3 }
  0xb5   : > { %674 = vmatmul.bf16.gmra.mxu0 %v6332_v15  ;;  %v1223_v15 = vadd.s32 24, %v7226_v26 }
  0xb7   : > { %v1281_v25 = vand.u32 15, %v1223_v15  ;;  %v1226_v15 = vadd.s32 48, %v7226_v26 }
  0xb9   : > { %vm7322_vm8 = vcmp.lt.s32.totalorder %v1281_v25, 15  ;;  %v6398_v25 = vld [vmem:[#allocation9 + $0x28] sm:$0xff]  ;;  %v1302_v28 = vand.u32 15, %v1226_v15 }
  0xba   : > { %vm2339_vm11 = vmpackc.low %vm7322_vm8, %vm7322_vm8 }
  0xbb   : > { %v2375_v59 = vsel %vm2339_vm11, 65537, %v7007_v34  ;;  %vm7380_vm6 = vcmp.gt.s32.totalorder %v1302_v28, 0 }
  0xbc   : > { %v2411_v7 = vunpack.c.l.b16 %v2375_v59  ;;  %v6396_v59 = vld [vmem:[#allocation9 + $0x18] sm:$0xff] }
  0xc5   : > { %679 = vmatmul.bf16.gmra.mxu0 %v6333_v17  ;;  %v1834_v17 = vsel %vm1798_vm1, 65537, %v7007_v34  ;;  %vm1800_vm1 = vmpackc.low %vm7336_vm13, %vm7336_vm13 }
  0xc6   : > { %v1870_v24 = vunpack.c.l.b16 %v1834_v17  ;;  %v1836_v14 = vsel %vm1800_vm1, 65537, %v7007_v34 }
  0xc8   : > { %v5526_v36 = vunpack.i.l.s16 %v1870_v24  ;;  %v1872_v24 = vunpack.c.l.b16 %v1836_v14 }
  0xca   : > { %vm1933_vm12 = vcmp.ne.s32.totalorder %v5526_v36, %v7249_v51 }
  0xcb   : > { %vm7351_vm0 = vmpackc.low %vm7273_vm14, %vm1933_vm12 }
  0xcc   : > { %vm1802_vm12 = vmpackc.low %vm7380_vm6, %vm7380_vm6 }
  0xd5   : > { %684 = vmatmul.bf16.gmra.mxu0 %v6334_v22  ;;  %v2659_v22 = vunpack.c.h.b16 %v2605_v19 }
  0xd7   : > { %v2695_v29 = vpack.c.b16 %v2659_v22, %v2659_v22 }
  0xd9   : > { %2767 = vst [vmem:[#allocation2 + $0x1ac] sm:$0xf] %v2695_v29  ;;  %v5563_v29 = vunpack.i.l.s16 %v2411_v7  ;;  %v1838_v7 = vsel %vm1802_vm12, 65537, %v7007_v34 }
  0xdb   : > { %vm2474_vm10 = vcmp.ne.s32.totalorder %v5563_v29, %v7261_v57 }
  0xdc   : > { %vm2475_vm13 = vmpackc.low %vm2474_vm10, %vm7305_vm3 }
  0xe2   : > { %v650_v53 = vpop.f32.mrf.mxu0 }
  0xe3   : > { %v651_v58 = vadd.f32 %v7239_v44, %v650_v53 }
  0xe5   : > { %v730_v0 = vmax.f32 %v651_v58, 0.0  ;;  %689 = vmatmul.bf16.gmra.mxu0 %v6335_v49 }
  0xe7   : > { %v815_v4 = vpack.c.bf16 %v730_v0, %v730_v0 }
  0xe9   : > { %851 = vst [vmem:[#allocation2 + $0x1c] sm:$0xf] %v815_v4  ;;  %v931_v33 = vunpack.c.l.b16 %v815_v4 }
  0xea   : > { %v652_v16 = vpop.f32.mrf.mxu0 }
  0xeb   : > { %v653_v18 = vadd.f32 %v7239_v44, %v652_v16  ;;  %v1295_v16 = vand.u32 15, %v1225_v63 }
  0xed   : > { %v731_v23 = vmax.f32 %v653_v18, 0.0  ;;  %vm7373_vm5 = vcmp.lt.s32.totalorder %v1295_v16, 15 }
  0xee   : > { %vm2341_vm8 = vmpackc.low %vm7373_vm5, %vm7373_vm5 }
  0xef   : > { %v816_v31 = vpack.c.bf16 %v731_v23, %v731_v23 }
  0xf1   : > { %852 = vst [vmem:[#allocation2 + $0x28] sm:$0xf] %v816_v31  ;;  %v932_v35 = vunpack.c.l.b16 %v816_v31 }
  0xf2   : > { %v655_v41 = vpop.f32.mrf.mxu0 }
  0xf3   : > { %v7326_v43 = vpack.c.b16 %v932_v35, %v931_v33  ;;  %v656_v46 = vadd.f32 %v7239_v44, %v655_v41 }
  0xf5   : > { %v981_v47 = vshrl.u32 %v7326_v43, 16  ;;  %v984_v48 = vshll.u32 %v7326_v43, 16  ;;  %v732_v49 = vmax.f32 %v656_v46, 0.0  ;;  %694 = vmatmul.bf16.gmra.mxu0 %v6336_v37  ;;  %v5528_v37 = vunpack.i.l.s16 %v1872_v24 }
  0xf7   : > { %v7342_v55 = vrot.slane %v981_v47, 7  ;;  %v7344_v56 = vrot.slane %v984_v48, 1  ;;  %v817_v58 = vpack.c.bf16 %v732_v49, %v732_v49  ;;  %vm1940_vm11 = vcmp.ne.s32.totalorder %v5528_v37, %v7249_v51 }
  0xf9   : > { %v986_v0 = vor.u32 %v984_v48, %v7342_v55  ;;  %v1216_v1 = vsel %vm7291_vm2, %v7284_v2, %v7344_v56  ;;  %853 = vst [vmem:[#allocation2 + $0x34] sm:$0xf] %v817_v58  ;;  %v6399_v2 = vld [vmem:[#allocation9 + $0x30] sm:$0xff]  ;;  %v933_v33 = vunpack.c.l.b16 %v817_v58  ;;  %v6429_v48 = vld [vmem:[#allocation9 + $0x108] sm:$0xff]  ;;  %v2377_v58 = vsel %vm2341_vm8, 65537, %v7007_v34 }
  0xfa   : > { %v2588_v4 = vsel %vm2468_vm15, %v1216_v1, 0  ;;  %v657_v6 = vpop.f32.mrf.mxu0  ;;  %3761 = vmatpush.bf16.msrb.mxu0 %v6399_v2  ;;  %v1147_v60 = vor.u32 %v7344_v56, %v981_v47  ;;  %v1227_v1 = vadd.s32 56, %v7226_v26  ;;  %vm7416_vm15 = vmpackc.low %vm7273_vm14, %vm1940_vm11  ;;  %v6395_v2 = vld [vmem:[#allocation9 + $0x10] sm:$0xff] }
  0xfb   : > { %v1140_v8 = vsel %vm7256_vm7, %v7234_v38, %v986_v0  ;;  %v2624_v9 = vunpack.c.l.b16 %v2588_v4  ;;  %v2625_v10 = vunpack.c.h.b16 %v2588_v4  ;;  %v658_v12 = vadd.f32 %v7239_v44, %v657_v6  ;;  %v6431_v38 = vld [vmem:[#allocation9 + $0x118] sm:$0xff]  ;;  %v6428_v4 = vld [vmem:[#allocation9 + $0x100] sm:$0xff] }
  0xfc   : > { %v2049_v13 = vsel %vm7351_vm0, %v1140_v8, 0  ;;  %6640 = vmatpush.bf16.msra.mxu3 %v6431_v38  ;;  %3426 = vmatpush.bf16.msrb.mxu1 %v6431_v38  ;;  %v1309_v16 = vand.u32 15, %v1227_v1 }
  0xfd   : > { %v2086_v17 = vunpack.c.l.b16 %v2049_v13  ;;  %v2087_v18 = vunpack.c.h.b16 %v2049_v13  ;;  %v2660_v19 = vpack.c.b16 %v2624_v9, %v2624_v9  ;;  %v2661_v20 = vpack.c.b16 %v2625_v10, %v2625_v10 }
  0xfe   : > { %v733_v21 = vmax.f32 %v658_v12, 0.0  ;;  %3762 = vmatpush.bf16.msrb.mxu0 %v6398_v25  ;;  %v2413_v12 = vunpack.c.l.b16 %v2377_v58  ;;  %vm7435_vm0 = vcmp.lt.s32.totalorder %v1309_v16, 15  ;;  %v1229_v58 = vadd.s32 72, %v7226_v26 }
  0xff   : > { %v2122_v22 = vpack.c.b16 %v2086_v17, %v2086_v17  ;;  %v2123_v23 = vpack.c.b16 %v2087_v18, %v2087_v18  ;;  %2732 = vst [vmem:[#allocation2 + $0x8] sm:$0xf] %v2660_v19  ;;  %v1874_v19 = vunpack.c.l.b16 %v1838_v7  ;;  %vm2343_vm1 = vmpackc.low %vm7435_vm0, %vm7435_vm0 }
 0x100   : > { %2733 = vst [vmem:[#allocation2 + $0x14] sm:$0xf] %v2661_v20  ;;  %v818_v27 = vpack.c.bf16 %v733_v21, %v733_v21  ;;  %6641 = vmatpush.bf16.msra.mxu3 %v6430_v32  ;;  %3427 = vmatpush.bf16.msrb.mxu1 %v6430_v32  ;;  %v1228_v20 = vadd.s32 64, %v7226_v26  ;;  %v5565_v28 = vunpack.i.l.s16 %v2413_v12  ;;  %v1323_v7 = vand.u32 15, %v1229_v58 }
 0x101   : > { %2194 = vst [vmem:[#allocation2 + $0x18] sm:$0xf] %v2122_v22  ;;  %v5530_v32 = vunpack.i.l.s16 %v1874_v19 }
 0x102   : > { %2195 = vst [vmem:[#allocation2 + $0x24] sm:$0xf] %v2123_v23  ;;  %v934_v35 = vunpack.c.l.b16 %v818_v27  ;;  %v660_v36 = vpop.f32.mrf.mxu0  ;;  %3763 = vmatpush.bf16.msrb.mxu0 %v6397_v40  ;;  %v6393_v40 = vld [vmem:[#allocation9] sm:$0xff]  ;;  %vm2481_vm5 = vcmp.ne.s32.totalorder %v5565_v28, %v7261_v57 }
 0x103   : > { %854 = vst [vmem:[#allocation2 + $0x40] sm:$0xf] %v818_v27  ;;  %v661_v39 = vadd.f32 %v7239_v44, %v660_v36  ;;  %v1316_v36 = vand.u32 15, %v1228_v20  ;;  %vm1947_vm6 = vcmp.ne.s32.totalorder %v5530_v32, %v7249_v51  ;;  %vm2482_vm10 = vmpackc.low %vm2481_vm5, %vm7305_vm3  ;;  %v6339_v28 = vld [vmem:[%s7192_s14 + $0x60] sm:$0xff] }
 0x104   : > { %v7378_v41 = vpack.c.b16 %v934_v35, %v933_v33  ;;  %6642 = vmatpush.bf16.msra.mxu3 %v6429_v48  ;;  %3428 = vmatpush.bf16.msrb.mxu1 %v6429_v48  ;;  %v6338_v33 = vld [vmem:[%s7192_s14 + $0x58] sm:$0xff]  ;;  %vm7469_vm11 = vmpackc.low %vm7273_vm14, %vm1947_vm6 }
 0x105   : > { %v734_v46 = vmax.f32 %v661_v39, 0.0  ;;  %699 = vmatmul.bf16.gmra.mxu0 %v6337_v30  ;;  %vm7450_vm8 = vcmp.gt.s32.totalorder %v1316_v36, 0  ;;  %v1231_v36 = vadd.s32 88, %v7226_v26 }
 0x106   : > { %v988_v49 = vshrl.u32 %v7378_v41, 16  ;;  %v991_v52 = vshll.u32 %v7378_v41, 16  ;;  %3764 = vmatpush.bf16.msrb.mxu0 %v6396_v59  ;;  %v1230_v41 = vadd.s32 80, %v7226_v26  ;;  %vm1804_vm12 = vmpackc.low %vm7450_vm8, %vm7450_vm8 }
 0x107   : > { %v819_v53 = vpack.c.bf16 %v734_v46, %v734_v46 }
 0x108   : > { %v7400_v62 = vrot.slane %v988_v49, 7  ;;  %v7402_v63 = vrot.slane %v991_v52, 1  ;;  %v5598_v0 = vld [vmem:[#allocation2 + $0x18] sm:$0xf]  ;;  %6643 = vmatpush.bf16.msra.mxu3 %v6428_v4  ;;  %3429 = vmatpush.bf16.msrb.mxu1 %v6428_v4 }
 0x109   : > { %855 = vst [vmem:[#allocation2 + $0x4c] sm:$0xf] %v819_v53  ;;  %v6349_v3 = vld [vmem:[#allocation2 + $0x20] sm:$0xf0]  ;;  %v935_v30 = vunpack.c.l.b16 %v819_v53  ;;  %v2379_v53 = vsel %vm2343_vm1, 65537, %v7007_v34 }
 0x10a   : > { %v993_v43 = vor.u32 %v991_v52, %v7400_v62  ;;  %v1149_v47 = vsel %vm1145_vm9, %v1147_v60, %v7402_v63  ;;  %v662_v6 = vpop.f32.mrf.mxu0  ;;  %v7426_v8 = vor.u32 %v6349_v3, %v5598_v0  ;;  %3765 = vmatpush.bf16.msrb.mxu0 %v6395_v2  ;;  %v1150_v59 = vor.u32 %v7402_v63, %v988_v49 }
 0x10b   : > { %v2589_v9 = vsel %vm2475_vm13, %v1149_v47, 0  ;;  %v663_v10 = vadd.f32 %v7239_v44, %v662_v6  ;;  %v2415_v56 = vunpack.c.l.b16 %v2379_v53  ;;  %vm7489_vm13 = vcmp.lt.s32.totalorder %v1323_v7, 15 }
 0x10c   : > { %v994_v13 = vsel %vm979_vm4, %v7342_v55, %v993_v43  ;;  %v2626_v14 = vunpack.c.l.b16 %v2589_v9  ;;  %v2627_v15 = vunpack.c.h.b16 %v2589_v9  ;;  %3341 = vmatmul.bf16.vlgmr.msra.gmra.mxu1 %v7426_v8  ;;  %v6394_v55 = vld [vmem:[#allocation9 + $0x8] sm:$0xff]  ;;  %vm2345_vm0 = vmpackc.low %vm7489_vm13, %vm7489_vm13 }
 0x10d   : > { %v2050_v17 = vsel %vm7416_vm15, %v994_v13, 0  ;;  %v735_v18 = vmax.f32 %v663_v10, 0.0  ;;  %v715_v13 = vpop.f32.mrf.mxu1  ;;  %v2381_v53 = vsel %vm2345_vm0, 65537, %v7007_v34 }
 0x10e   : > { %v2088_v38 = vunpack.c.l.b16 %v2050_v17  ;;  %v2089_v21 = vunpack.c.h.b16 %v2050_v17  ;;  %v2662_v22 = vpack.c.b16 %v2626_v14, %v2626_v14  ;;  %v2663_v23 = vpack.c.b16 %v2627_v15, %v2627_v15  ;;  %3766 = vmatpush.bf16.msrb.mxu0 %v6394_v55 }
 0x10f   : > { %v820_v24 = vpack.c.bf16 %v735_v18, %v735_v18  ;;  %v1840_v15 = vsel %vm1804_vm12, 65537, %v7007_v34  ;;  %v1330_v17 = vand.u32 15, %v1230_v41  ;;  %v716_v32 = vadd.f32 %v7239_v44, %v715_v13 }
 0x110   : > { %v2124_v25 = vpack.c.b16 %v2088_v38, %v2088_v38  ;;  %v2125_v27 = vpack.c.b16 %v2089_v21, %v2089_v21  ;;  %2734 = vst [vmem:[#allocation2 + $0x20] sm:$0xf] %v2662_v22 }
 0x111   : > { %2735 = vst [vmem:[#allocation2 + $0x2c] sm:$0xf] %v2663_v23  ;;  %v936_v31 = vunpack.c.l.b16 %v820_v24  ;;  %v1876_v23 = vunpack.c.l.b16 %v1840_v15  ;;  %vm7493_vm15 = vcmp.gt.s32.totalorder %v1330_v17, 0 }
 0x112   : > { %2196 = vst [vmem:[#allocation2 + $0x30] sm:$0xf] %v2124_v25  ;;  %v665_v35 = vpop.f32.mrf.mxu0  ;;  %3767 = vmatpush.bf16.msrb.mxu0 %v6393_v40  ;;  %vm1806_vm1 = vmpackc.low %vm7493_vm15, %vm7493_vm15  ;;  %v6346_v25 = vld [vmem:[#allocation2 + $0x8] sm:$0xf0] }
 0x113   : > { %2197 = vst [vmem:[#allocation2 + $0x3c] sm:$0xf] %v2125_v27  ;;  %v7440_v37 = vpack.c.b16 %v936_v31, %v935_v30  ;;  %v666_v39 = vadd.f32 %v7239_v44, %v665_v35  ;;  %v5567_v27 = vunpack.i.l.s16 %v2415_v56 }
 0x114   : > { %856 = vst [vmem:[#allocation2 + $0x58] sm:$0xf] %v820_v24 }
 0x115   : > { %v996_v42 = vshrl.u32 %v7440_v37, 16  ;;  %v999_v46 = vshll.u32 %v7440_v37, 16  ;;  %v736_v48 = vmax.f32 %v666_v39, 0.0  ;;  %704 = vmatmul.bf16.gmra.mxu0 %v6338_v33  ;;  %v5532_v33 = vunpack.i.l.s16 %v1876_v23 }
 0x116   : > { %v1232_v39 = vadd.s32 96, %v7226_v26  ;;  %vm2488_vm5 = vcmp.ne.s32.totalorder %v5567_v27, %v7261_v57  ;;  %v2417_v37 = vunpack.c.l.b16 %v2381_v53  ;;  %v6348_v53 = vld [vmem:[#allocation2 + $0x1c] sm:$0xf] }
 0x117   : > { %v7461_v60 = vrot.slane %v996_v42, 7  ;;  %v7463_v0 = vrot.slane %v999_v46, 1  ;;  %v821_v1 = vpack.c.bf16 %v736_v48, %v736_v48  ;;  %v7510_v48 = vpop.f32.mrf.mxu1  ;;  %vm1954_vm6 = vcmp.ne.s32.totalorder %v5532_v33, %v7249_v51  ;;  %vm2489_vm8 = vmpackc.low %vm2488_vm5, %vm7305_vm3 }
 0x118   : > { %v5569_v24 = vunpack.i.l.s16 %v2417_v37  ;;  %v718_v37 = vadd.f32 %v7239_v44, %v7510_v48 }
 0x119   : > { %v1001_v49 = vor.u32 %v999_v46, %v7461_v60  ;;  %v1152_v63 = vsel %vm1145_vm9, %v1150_v59, %v7463_v0  ;;  %857 = vst [vmem:[#allocation2 + $0x64] sm:$0xf] %v821_v1  ;;  %v5610_v4 = vld [vmem:[#allocation2 + $0x30] sm:$0xf]  ;;  %v937_v29 = vunpack.c.l.b16 %v821_v1  ;;  %v756_v46 = vmax.f32 %v716_v32, 0.0 }
 0x11a   : > { %v2590_v43 = vsel %vm2482_vm10, %v1152_v63, 0  ;;  %v667_v47 = vpop.f32.mrf.mxu0  ;;  %v6352_v6 = vld [vmem:[#allocation2 + $0x38] sm:$0xf0]  ;;  %v1842_v1 = vsel %vm1806_vm1, 65537, %v7007_v34  ;;  %v1344_v63 = vand.u32 15, %v1232_v39  ;;  %vm1956_vm10 = vmpackc.low %vm7273_vm14, %vm1954_vm6  ;;  %vm2495_vm1 = vcmp.ne.s32.totalorder %v5569_v24, %v7261_v57 }
 0x11b   : > { %v1002_v9 = vsel %vm979_vm4, %v7400_v62, %v1001_v49  ;;  %v2628_v10 = vunpack.c.l.b16 %v2590_v43  ;;  %v2629_v12 = vunpack.c.h.b16 %v2590_v43  ;;  %v668_v2 = vadd.f32 %v7239_v44, %v667_v47  ;;  %v5600_v32 = vld [vmem:[#allocation2 + $0x24] sm:$0xf0]  ;;  %vm7601_vm5 = vmpackc.low %vm2495_vm1, %vm7305_vm3 }
 0x11c   : > { %v2051_v14 = vsel %vm7469_vm11, %v1002_v9, 0  ;;  %v7486_v16 = vor.u32 %v6352_v6, %v5610_v4  ;;  %v7517_v3 = vpack.c.bf16 %v756_v46, %v756_v46  ;;  %v1337_v49 = vand.u32 15, %v1231_v36 }
 0x11d   : > { %v2090_v18 = vunpack.c.l.b16 %v2051_v14  ;;  %v2091_v19 = vunpack.c.h.b16 %v2051_v14  ;;  %v2664_v20 = vpack.c.b16 %v2628_v10, %v2628_v10  ;;  %v2665_v38 = vpack.c.b16 %v2629_v12, %v2629_v12 }
 0x11e   : > { %v737_v21 = vmax.f32 %v668_v2, 0.0  ;;  %3346 = vmatmul.bf16.gmra.mxu1 %v7486_v16  ;;  %v1153_v4 = vor.u32 %v7463_v0, %v996_v42  ;;  %877 = vst [vmem:[#allocation2 + $0x154] sm:$0xf] %v7517_v3  ;;  %v1878_v6 = vunpack.c.l.b16 %v1842_v1  ;;  %vm7549_vm11 = vcmp.lt.s32.totalorder %v1337_v49, 15 }
 0x11f   : > { %v2126_v62 = vpack.c.b16 %v2090_v18, %v2090_v18  ;;  %v2127_v22 = vpack.c.b16 %v2091_v19, %v2091_v19  ;;  %2736 = vst [vmem:[#allocation2 + $0x38] sm:$0xf] %v2664_v20  ;;  %vm7555_vm12 = vcmp.gt.s32.totalorder %v1344_v63, 0  ;;  %vm2347_vm13 = vmpackc.low %vm7549_vm11, %vm7549_vm11  ;;  %v7581_v49 = vor.u32 %v6348_v53, %v5600_v32  ;;  %v6442_v63 = vld [vmem:[#allocation9 + $0x170] sm:$0xff] }
 0x120   : > { %2737 = vst [vmem:[#allocation2 + $0x44] sm:$0xf] %v2665_v38  ;;  %v822_v55 = vpack.c.bf16 %v737_v21, %v737_v21  ;;  %v6357_v12 = vld [vmem:[#allocation2 + $0x64] sm:$0xf]  ;;  %v720_v21 = vpop.f32.mrf.mxu1  ;;  %v7559_v23 = vunpack.i.l.s16 %v1878_v6  ;;  %vm1808_vm15 = vmpackc.low %vm7555_vm12, %vm7555_vm12  ;;  %v6408_v6 = vld [vmem:[#allocation9 + $0x78] sm:$0xff]  ;;  %v757_v48 = vmax.f32 %v718_v37, 0.0 }
 0x121   : > { %2198 = vst [vmem:[#allocation2 + $0x48] sm:$0xf] %v2126_v62  ;;  %3849 = vmatpush.bf16.msrb.mxu2 %v6408_v6  ;;  %v6441_v38 = vld [vmem:[#allocation9 + $0x168] sm:$0xff]  ;;  %v6440_v6 = vld [vmem:[#allocation9 + $0x160] sm:$0xff] }
 0x122   : > { %2199 = vst [vmem:[#allocation2 + $0x54] sm:$0xf] %v2127_v22  ;;  %v938_v30 = vunpack.c.l.b16 %v822_v55  ;;  %v670_v31 = vpop.f32.mrf.mxu0  ;;  %vm1961_vm0 = vcmp.ne.s32.totalorder %v7559_v23, %v7249_v51  ;;  %v842_v24 = vpack.c.bf16 %v757_v48, %v757_v48 }
 0x123   : > { %858 = vst [vmem:[#allocation2 + $0x70] sm:$0xf] %v822_v55  ;;  %v671_v35 = vadd.f32 %v7239_v44, %v670_v31  ;;  %v5886_v55 = vld [vmem:[#allocation2] sm:$0xf] }
 0x124   : > { %v7508_v40 = vpack.c.b16 %v938_v30, %v937_v29  ;;  %v6443_v30 = vld [vmem:[#allocation9 + $0x178] sm:$0xff]  ;;  %v5887_v36 = vor.u32 %v6346_v25, %v5886_v55  ;;  %v6351_v55 = vld [vmem:[#allocation2 + $0x34] sm:$0xf]  ;;  %878 = vst [vmem:[#allocation2 + $0x160] sm:$0xf] %v842_v24 }
 0x125   : > { %v738_v52 = vmax.f32 %v671_v35, 0.0  ;;  %709 = vmatmul.bf16.gmra.mxu0 %v6339_v28  ;;  %3511 = vmatpush.bf16.msra.mxu1 %v6443_v30  ;;  %v6354_v25 = vld [vmem:[#allocation2 + $0x4c] sm:$0xf] }
 0x126   : > { %v1004_v58 = vshrl.u32 %v7508_v40, 16  ;;  %v1007_v59 = vshll.u32 %v7508_v40, 16  ;;  %v5624_v40 = vld [vmem:[#allocation2 + $0x54] sm:$0xf0] }
 0x127   : > { %v7520_v41 = vpack.c.bf16 %v738_v52, %v738_v52  ;;  %v2383_v52 = vsel %vm2347_vm13, 65537, %v7007_v34 }
 0x128   : > { %v7527_v43 = vrot.slane %v1004_v58, 7  ;;  %v7529_v47 = vrot.slane %v1007_v59, 1  ;;  %v5622_v56 = vld [vmem:[#allocation2 + $0x48] sm:$0xf] }
 0x129   : > { %859 = vst [vmem:[#allocation2 + $0x7c] sm:$0xf] %v7520_v41  ;;  %v6355_v7 = vld [vmem:[#allocation2 + $0x50] sm:$0xf0]  ;;  %v939_v39 = vunpack.c.l.b16 %v7520_v41  ;;  %v1844_v41 = vsel %vm1808_vm15, 65537, %v7007_v34  ;;  %3512 = vmatpush.bf16.msra.mxu1 %v6442_v63 }
 0x12a   : > { %v1009_v42 = vor.u32 %v1007_v59, %v7527_v43  ;;  %v1155_v0 = vsel %vm1145_vm9, %v1153_v4, %v7529_v47  ;;  %v672_v9 = vpop.f32.mrf.mxu0  ;;  %v7544_v10 = vor.u32 %v6355_v7, %v5622_v56  ;;  %v5636_v2 = vld [vmem:[#allocation2 + $0x6c] sm:$0xf0]  ;;  %v1233_v59 = vadd.s32 104, %v7226_v26 }
 0x12b   : > { %v2591_v13 = vsel %vm2489_vm8, %v1155_v0, 0  ;;  %v673_v14 = vadd.f32 %v7239_v44, %v672_v9  ;;  %v7547_v15 = vor.u32 %v6357_v12, %v5636_v2  ;;  %v721_v7 = vadd.f32 %v7239_v44, %v720_v21  ;;  %v7593_v2 = vpop.f32.mrf.mxu1 }
 0x12c   : > { %v1010_v18 = vsel %vm979_vm4, %v7461_v60, %v1009_v42  ;;  %v2630_v19 = vunpack.c.l.b16 %v2591_v13  ;;  %v2631_v20 = vunpack.c.h.b16 %v2591_v13  ;;  %v1156_v42 = vor.u32 %v7529_v47, %v1004_v58 }
 0x12d   : > { %v2052_v62 = vsel %vm1956_vm10, %v1010_v18, 0  ;;  %v739_v22 = vmax.f32 %v673_v14, 0.0  ;;  %3445 = vmatmul.bf16.vlgmr.msra.gmra.mxu3 %v7547_v15  ;;  %v2419_v0 = vunpack.c.l.b16 %v2383_v52  ;;  %v1234_v9 = vadd.s32 112, %v7226_v26  ;;  %v5612_v18 = vld [vmem:[#allocation2 + $0x3c] sm:$0xf0]  ;;  %vm7625_vm10 = vmpackc.low %vm7273_vm14, %vm1961_vm0  ;;  %3513 = vmatpush.bf16.msra.mxu1 %v6441_v38 }
 0x12e   : > { %v2092_v27 = vunpack.c.l.b16 %v2052_v62  ;;  %v2093_v28 = vunpack.c.h.b16 %v2052_v62  ;;  %v2666_v29 = vpack.c.b16 %v2630_v19, %v2630_v19  ;;  %v2667_v60 = vpack.c.b16 %v2631_v20, %v2631_v20  ;;  %3351 = vmatmul.bf16.gmra.mxu1 %v7544_v10 }
 0x12f   : > { %v824_v31 = vpack.c.bf16 %v739_v22, %v739_v22  ;;  %v1351_v12 = vand.u32 15, %v1233_v59  ;;  %v1880_v58 = vunpack.c.l.b16 %v1844_v41  ;;  %v758_v47 = vmax.f32 %v721_v7, 0.0 }
 0x130   : > { %v2128_v33 = vpack.c.b16 %v2092_v27, %v2092_v27  ;;  %v2129_v35 = vpack.c.b16 %v2093_v28, %v2093_v28  ;;  %2738 = vst [vmem:[#allocation2 + $0x50] sm:$0xf] %v2666_v29  ;;  %v1358_v19 = vand.u32 15, %v1234_v9  ;;  %v957_v27 = vunpack.c.l.b16 %v7517_v3  ;;  %v6360_v32 = vld [vmem:[#allocation2 + $0x7c] sm:$0xf] }
 0x131   : > { %2739 = vst [vmem:[#allocation2 + $0x5c] sm:$0xf] %v2667_v60  ;;  %v940_v46 = vunpack.c.l.b16 %v824_v31  ;;  %vm7605_vm6 = vcmp.lt.s32.totalorder %v1351_v12, 15  ;;  %v7630_v28 = vunpack.i.l.s16 %v2419_v0  ;;  %v7636_v60 = vor.u32 %v6351_v55, %v5612_v18  ;;  %v5606_v12 = vld [vmem:[#allocation2 + $0x20] sm:$0xf]  ;;  %3514 = vmatpush.bf16.msra.mxu1 %v6440_v6 }
 0x132   : > { %2200 = vst [vmem:[#allocation2 + $0x60] sm:$0xf] %v2128_v33  ;;  %v675_v1 = vpop.f32.mrf.mxu0  ;;  %vm2349_vm8 = vmpackc.low %vm7605_vm6, %vm7605_vm6  ;;  %vm7632_vm11 = vcmp.gt.s32.totalorder %v1358_v19, 0  ;;  %v7642_v33 = vpack.c.bf16 %v758_v47, %v758_v47  ;;  %v958_v52 = vunpack.c.l.b16 %v842_v24  ;;  %v1236_v6 = vadd.s32 128, %v7226_v26 }
 0x133   : > { %2201 = vst [vmem:[#allocation2 + $0x6c] sm:$0xf] %v2129_v35  ;;  %v7583_v4 = vpack.c.b16 %v940_v46, %v939_v39  ;;  %v676_v56 = vadd.f32 %v7239_v44, %v675_v1  ;;  %vm1810_vm12 = vmpackc.low %vm7632_vm11, %vm7632_vm11  ;;  %v2385_v3 = vsel %vm2349_vm8, 65537, %v7007_v34  ;;  %v7655_v39 = vunpack.i.l.s16 %v1880_v58  ;;  %v725_v9 = vpop.f32.mrf.mxu1 }
 0x134   : > { %860 = vst [vmem:[#allocation2 + $0x88] sm:$0xf] %v824_v31  ;;  %v1846_v53 = vsel %vm1810_vm12, 65537, %v7007_v34  ;;  %v7668_v0 = vpack.c.b16 %v958_v52, %v957_v27  ;;  %v2421_v55 = vunpack.c.l.b16 %v2385_v3  ;;  %v6439_v27 = vld [vmem:[#allocation9 + $0x158] sm:$0xff]  ;;  %vm2502_vm15 = vcmp.ne.s32.totalorder %v7630_v28, %v7261_v57 }
 0x135   : > { %v1012_v13 = vshrl.u32 %v7583_v4, 16  ;;  %v1015_v14 = vshll.u32 %v7583_v4, 16  ;;  %v740_v17 = vmax.f32 %v676_v56, 0.0  ;;  %3768 = vmatmul.bf16.vlgmr.msrb.gmra.mxu0 %v5887_v36  ;;  %879 = vst [vmem:[#allocation2 + $0x16c] sm:$0xf] %v7642_v33  ;;  %v1882_v20 = vunpack.c.l.b16 %v1846_v53  ;;  %3515 = vmatpush.bf16.msra.mxu1 %v6439_v27  ;;  %vm7721_vm0 = vmpackc.low %vm2502_vm15, %vm7305_vm3 }
 0x136   : > { %v1084_v47 = vshrl.u32 %v7668_v0, 16  ;;  %v1087_v19 = vshll.u32 %v7668_v0, 16  ;;  %vm1968_vm13 = vcmp.ne.s32.totalorder %v7655_v39, %v7249_v51  ;;  %v7766_v39 = vld [vmem:[%s8983_s5] ss:$0 sm:$0xff] }
 0x137   : > { %v7611_v21 = vrot.slane %v1012_v13, 7  ;;  %v7613_v62 = vrot.slane %v1015_v14, 1  ;;  %v7615_v22 = vpack.c.bf16 %v740_v17, %v740_v17  ;;  %v7695_v4 = vunpack.i.l.s16 %v1882_v20 }
 0x138   : > { %v7693_v52 = vrot.slane %v1087_v19, 1 }
 0x139   : > { %v1017_v30 = vor.u32 %v1015_v14, %v7611_v21  ;;  %v1158_v23 = vsel %vm1145_vm9, %v1156_v42, %v7613_v62  ;;  %861 = vst [vmem:[#allocation2 + $0x94] sm:$0xf] %v7615_v22  ;;  %v5634_v31 = vld [vmem:[#allocation2 + $0x60] sm:$0xf]  ;;  %v941_v3 = vunpack.c.l.b16 %v7615_v22  ;;  %v723_v22 = vadd.f32 %v7239_v44, %v7593_v2 }
 0x13a   : > { %v2592_v35 = vsel %vm7601_vm5, %v1158_v23, 0  ;;  %v677_v36 = vpop.f32.mrf.mxu0  ;;  %v6358_v46 = vld [vmem:[#allocation2 + $0x68] sm:$0xf0]  ;;  %v7679_v23 = vrot.slane %v1084_v47, 7  ;;  %v7710_v2 = vadd.s32 120, %v7226_v26  ;;  %v7730_v20 = vor.u32 %v7693_v52, %v1084_v47 }
 0x13b   : > { %v1018_v59 = vsel %vm979_vm4, %v7527_v43, %v1017_v30  ;;  %v2632_v1 = vunpack.c.l.b16 %v2592_v35  ;;  %v2633_v41 = vunpack.c.h.b16 %v2592_v35  ;;  %v678_v63 = vadd.f32 %v7239_v44, %v677_v36  ;;  %v5648_v56 = vld [vmem:[#allocation2 + $0x84] sm:$0xf0]  ;;  %v6350_v43 = vld [vmem:[#allocation2 + $0x28] sm:$0xf0] }
 0x13c   : > { %v2053_v37 = vsel %vm7625_vm10, %v1018_v59, 0  ;;  %v7664_v7 = vor.u32 %v6358_v46, %v5634_v31  ;;  %v7666_v42 = vor.u32 %v6360_v32, %v5648_v56  ;;  %v7675_v29 = vor.u32 %v6350_v43, %v5606_v12  ;;  %v6407_v59 = vld [vmem:[#allocation9 + $0x70] sm:$0xff]  ;;  %v7712_v43 = vpop.f32.mrf.mxu1  ;;  %vm7751_vm10 = vmpackc.low %vm7273_vm14, %vm1968_vm13 }
 0x13d   : > { %v2094_v14 = vunpack.c.l.b16 %v2053_v37  ;;  %v2095_v17 = vunpack.c.h.b16 %v2053_v37  ;;  %v2668_v48 = vpack.c.b16 %v2632_v1, %v2632_v1  ;;  %v2669_v18 = vpack.c.b16 %v2633_v41, %v2633_v41  ;;  %v6438_v1 = vld [vmem:[#allocation9 + $0x150] sm:$0xff]  ;;  %3850 = vmatpush.bf16.msrb.mxu2 %v6407_v59 }
 0x13e   : > { %v741_v58 = vmax.f32 %v678_v63, 0.0  ;;  %3356 = vmatmul.bf16.vlgmr.msra.gmra.mxu2 %v7664_v7  ;;  %3430 = vmatmul.bf16.vlgmr.msrb.gmra.mxu1 %v7581_v49  ;;  %v7681_v31 = vor.u32 %v6354_v25, %v5624_v40  ;;  %v1159_v32 = vor.u32 %v7613_v62, %v1012_v13  ;;  %v959_v35 = vunpack.c.l.b16 %v7642_v33 }
 0x13f   : > { %v2130_v38 = vpack.c.b16 %v2094_v14, %v2094_v14  ;;  %v2131_v24 = vpack.c.b16 %v2095_v17, %v2095_v17  ;;  %2740 = vst [vmem:[#allocation2 + $0x68] sm:$0xf] %v2668_v48  ;;  %3450 = vmatmul.bf16.gmra.mxu3 %v7666_v42  ;;  %v7691_v46 = vor.u32 %v1087_v19, %v7679_v23  ;;  %v7698_v62 = vunpack.i.l.s16 %v2421_v55 }
 0x140   : > { %2741 = vst [vmem:[#allocation2 + $0x74] sm:$0xf] %v2669_v18  ;;  %v826_v30 = vpack.c.bf16 %v741_v58, %v741_v58  ;;  %v1249_v33 = vadd.s32 232, %v7226_v26  ;;  %v1250_v63 = vadd.s32 240, %v7226_v26  ;;  %v726_v56 = vadd.f32 %v7239_v44, %v725_v9  ;;  %3516 = vmatpush.bf16.msra.mxu1 %v6438_v1 }
 0x141   : > { %2202 = vst [vmem:[#allocation2 + $0x78] sm:$0xf] %v2130_v38  ;;  %v759_v0 = vmax.f32 %v723_v22, 0.0  ;;  %v1372_v40 = vand.u32 15, %v1236_v6  ;;  %v1365_v47 = vand.u32 15, %v7710_v2  ;;  %vm2509_vm12 = vcmp.ne.s32.totalorder %v7698_v62, %v7261_v57 }
 0x142   : > { %2203 = vst [vmem:[#allocation2 + $0x84] sm:$0xf] %v2131_v24  ;;  %v942_v36 = vunpack.c.l.b16 %v826_v30  ;;  %v680_v53 = vpop.f32.mrf.mxu0  ;;  %v1463_v12 = vand.u32 15, %v1249_v33  ;;  %v1470_v48 = vand.u32 15, %v1250_v63  ;;  %v760_v18 = vmax.f32 %v726_v56, 0.0 }
 0x143   : > { %862 = vst [vmem:[#allocation2 + $0xa0] sm:$0xf] %v826_v30  ;;  %v681_v13 = vadd.f32 %v7239_v44, %v680_v53  ;;  %v844_v9 = vpack.c.bf16 %v759_v0, %v759_v0  ;;  %v6363_v24 = vld [vmem:[#allocation2 + $0x94] sm:$0xf]  ;;  %vm7757_vm11 = vcmp.gt.s32.totalorder %v1372_v40, 0  ;;  %vm1975_vm13 = vcmp.ne.s32.totalorder %v7695_v4, %v7249_v51 }
 0x144   : > { %v7703_v41 = vpack.c.b16 %v942_v36, %v941_v3  ;;  %vm2257_vm1 = vcmp.lt.s32.totalorder %v1463_v12, 15  ;;  %vm7732_vm5 = vcmp.gt.s32.totalorder %v1470_v48, 0  ;;  %v7741_v30 = vpack.c.bf16 %v760_v18, %v760_v18  ;;  %v787_v48 = vpop.f32.mrf.mxu1  ;;  %vm1812_vm15 = vmpackc.low %vm7757_vm11, %vm7757_vm11 }
 0x145   : > { %v742_v37 = vmax.f32 %v681_v13, 0.0  ;;  %3773 = vmatmul.bf16.gmra.mxu0 %v7426_v8  ;;  %vm2365_vm6 = vmpackc.low %vm2257_vm1, %vm2257_vm1  ;;  %v960_v25 = vunpack.c.l.b16 %v844_v9  ;;  %880 = vst [vmem:[#allocation2 + $0x178] sm:$0xf] %v844_v9  ;;  %v1848_v59 = vsel %vm1812_vm15, 65537, %v7007_v34  ;;  %v1252_v62 = vadd.s32 256, %v7226_v26 }
 0x146   : > { %v1020_v14 = vshrl.u32 %v7703_v41, 16  ;;  %v1023_v17 = vshll.u32 %v7703_v41, 16  ;;  %vm1826_vm8 = vmpackc.low %vm7732_vm5, %vm7732_vm5  ;;  %v2401_v27 = vsel %vm2365_vm6, 65537, %v7007_v34  ;;  %881 = vst [vmem:[#allocation2 + $0x184] sm:$0xf] %v7741_v30 }
 0x147   : > { %v7725_v8 = vpack.c.bf16 %v742_v37, %v742_v37  ;;  %v977_v63 = vpack.c.b16 %v960_v25, %v959_v35  ;;  %v1862_v0 = vsel %vm1826_vm8, 65537, %v7007_v34  ;;  %vm2510_vm11 = vmpackc.low %vm2509_vm12, %vm7305_vm3 }
 0x148   : > { %v7727_v58 = vrot.slane %v1020_v14, 7  ;;  %v1160_v19 = vrot.slane %v1023_v17, 1  ;;  %v5646_v38 = vld [vmem:[#allocation2 + $0x78] sm:$0xf]  ;;  %v1898_v55 = vunpack.c.l.b16 %v1862_v0  ;;  %vm7837_vm12 = vmpackc.low %vm7273_vm14, %vm1975_vm13 }
 0x149   : > { %863 = vst [vmem:[#allocation2 + $0xac] sm:$0xf] %v7725_v8  ;;  %v6361_v28 = vld [vmem:[#allocation2 + $0x80] sm:$0xf0]  ;;  %v1092_v2 = vshrl.u32 %v977_v63, 16  ;;  %v943_v40 = vunpack.c.l.b16 %v7725_v8 }
 0x14a   : > { %v1025_v3 = vor.u32 %v1023_v17, %v7727_v58  ;;  %v1161_v36 = vsel %vm1145_vm9, %v1159_v32, %v1160_v19  ;;  %v682_v13 = vpop.f32.mrf.mxu0  ;;  %v7755_v22 = vor.u32 %v6361_v28, %v5646_v38  ;;  %v5660_v33 = vld [vmem:[#allocation2 + $0x9c] sm:$0xf0]  ;;  %v1095_v17 = vshll.u32 %v977_v63, 16 }
 0x14b   : > { %v2593_v32 = vsel %vm7721_vm0, %v1161_v36, 0  ;;  %v683_v1 = vadd.f32 %v7766_v39, %v682_v13  ;;  %v7769_v41 = vor.u32 %v6363_v24, %v5660_v33  ;;  %v7790_v24 = vrot.slane %v1092_v2, 7 }
 0x14c   : > { %v1026_v56 = vsel %vm979_vm4, %v7611_v21, %v1025_v3  ;;  %v2634_v6 = vunpack.c.l.b16 %v2593_v32  ;;  %v2635_v37 = vunpack.c.h.b16 %v2593_v32  ;;  %v1162_v28 = vor.u32 %v1160_v19, %v1020_v14 }
 0x14d   : > { %v2054_v35 = vsel %vm7751_vm10, %v1026_v56, 0  ;;  %v743_v12 = vmax.f32 %v683_v1, 0.0  ;;  %v2437_v36 = vunpack.c.l.b16 %v2401_v27  ;;  %v1097_v13 = vor.u32 %v1095_v17, %v7790_v24 }
 0x14e   : > { %v2096_v21 = vunpack.c.l.b16 %v2054_v35  ;;  %v2097_v18 = vunpack.c.h.b16 %v2054_v35  ;;  %v2670_v44 = vpack.c.b16 %v2634_v6, %v2634_v6  ;;  %v2671_v9 = vpack.c.b16 %v2635_v37, %v2635_v37  ;;  %3361 = vmatmul.bf16.gmra.mxu2 %v7755_v22  ;;  %3435 = vmatmul.bf16.gmra.mxu1 %v7636_v60 }
 0x14f   : > { %v828_v38 = vpack.c.bf16 %v743_v12, %v743_v12  ;;  %3455 = vmatmul.bf16.gmra.mxu3 %v7769_v41  ;;  %v1187_v8 = vrot.slane %v1095_v17, 1  ;;  %v961_v33 = vunpack.c.l.b16 %v7741_v30  ;;  %v5554_v32 = vunpack.i.l.s16 %v1898_v55  ;;  %v6437_v12 = vld [vmem:[#allocation9 + $0x148] sm:$0xff]  ;;  %v789_v17 = vpop.f32.mrf.mxu1 }
 0x150   : > { %v2132_v25 = vpack.c.b16 %v2096_v21, %v2096_v21  ;;  %v2133_v3 = vpack.c.b16 %v2097_v18, %v2097_v18  ;;  %2742 = vst [vmem:[#allocation2 + $0x80] sm:$0xf] %v2670_v44  ;;  %v5589_v1 = vunpack.i.l.s16 %v2437_v36  ;;  %vm2243_vm0 = vcmp.lt.s32.totalorder %v1365_v47, 15  ;;  %3517 = vmatpush.bf16.msra.mxu1 %v6437_v12 }
 0x151   : > { %2743 = vst [vmem:[#allocation2 + $0x8c] sm:$0xf] %v2671_v9  ;;  %v944_v53 = vunpack.c.l.b16 %v828_v38  ;;  %v1098_v19 = vsel %vm979_vm4, %v7679_v23, %v1097_v13  ;;  %v1884_v56 = vunpack.c.l.b16 %v1848_v59  ;;  %vm2351_vm1 = vmpackc.low %vm2243_vm0, %vm2243_vm0  ;;  %vm2031_vm5 = vcmp.ne.s32.totalorder %v5554_v32, %v7249_v51  ;;  %v6436_v13 = vld [vmem:[#allocation9 + $0x140] sm:$0xff] }
 0x152   : > { %2204 = vst [vmem:[#allocation2 + $0x90] sm:$0xf] %v2132_v25  ;;  %v685_v63 = vpop.f32.mrf.mxu0  ;;  %vm2565_vm6 = vcmp.ne.s32.totalorder %v5589_v1, %v7261_v57  ;;  %v2387_v6 = vsel %vm2351_vm1, 65537, %v7007_v34  ;;  %v7806_v37 = vadd.f32 %v7766_v39, %v7712_v43  ;;  %v1188_v23 = vsel %vm1145_vm9, %v7730_v20, %v1187_v8  ;;  %vm2033_vm8 = vmpackc.low %vm7273_vm14, %vm2031_vm5 }
 0x153   : > { %2205 = vst [vmem:[#allocation2 + $0x9c] sm:$0xf] %v2133_v3  ;;  %v969_v14 = vpack.c.b16 %v944_v53, %v943_v40  ;;  %v686_v27 = vadd.f32 %v7766_v39, %v685_v63  ;;  %v7813_v48 = vor.u32 %v1187_v8, %v1092_v2  ;;  %v2063_v21 = vsel %vm2033_vm8, %v1098_v19, 0  ;;  %vm2566_vm10 = vmpackc.low %vm2565_vm6, %vm7305_vm3 }
 0x154   : > { %864 = vst [vmem:[#allocation2 + $0xb8] sm:$0xf] %v828_v38  ;;  %v7817_v43 = vunpack.i.l.s16 %v1884_v56  ;;  %v2423_v18 = vunpack.c.l.b16 %v2387_v6  ;;  %v2115_v9 = vunpack.c.h.b16 %v2063_v21  ;;  %v2602_v2 = vsel %vm2566_vm10, %v1188_v23, 0  ;;  %3518 = vmatpush.bf16.msra.mxu1 %v6436_v13 }
 0x155   : > { %v1028_v47 = vshrl.u32 %v969_v14, 16  ;;  %v1031_v0 = vshll.u32 %v969_v14, 16  ;;  %v744_v35 = vmax.f32 %v686_v27, 0.0  ;;  %3778 = vmatmul.bf16.gmra.mxu0 %v7486_v16  ;;  %v2114_v16 = vunpack.c.l.b16 %v2063_v21  ;;  %v6366_v21 = vld [vmem:[#allocation2 + $0xac] sm:$0xf] }
 0x156   : > { %v761_v38 = vmax.f32 %v7806_v37, 0.0  ;;  %v1251_v55 = vadd.s32 248, %v7226_v26  ;;  %v7841_v53 = vunpack.i.l.s16 %v2423_v18  ;;  %v2151_v32 = vpack.c.b16 %v2115_v9, %v2115_v9 }
 0x157   : > { %v7819_v44 = vrot.slane %v1028_v47, 7  ;;  %v1163_v20 = vrot.slane %v1031_v0, 1  ;;  %v7826_v40 = vpack.c.bf16 %v744_v35, %v744_v35  ;;  %v2150_v36 = vpack.c.b16 %v2114_v16, %v2114_v16  ;;  %v792_v18 = vpop.f32.mrf.mxu1 }
 0x158   : > { %v2652_v1 = vunpack.c.l.b16 %v2602_v2  ;;  %v2653_v63 = vunpack.c.h.b16 %v2602_v2  ;;  %2223 = vst [vmem:[#allocation2 + $0x174] sm:$0xf] %v2151_v32  ;;  %vm1982_vm13 = vcmp.ne.s32.totalorder %v7817_v43, %v7249_v51  ;;  %v1253_v13 = vadd.s32 264, %v7226_v26 }
 0x159   : > { %v1033_v25 = vor.u32 %v1031_v0, %v7819_v44  ;;  %v1164_v3 = vsel %vm1145_vm9, %v1162_v28, %v1163_v20  ;;  %865 = vst [vmem:[#allocation2 + $0xc4] sm:$0xf] %v7826_v40  ;;  %v5658_v59 = vld [vmem:[#allocation2 + $0x90] sm:$0xf]  ;;  %v7846_v14 = vor.u32 %v1163_v20, %v1028_v47  ;;  %v945_v23 = vunpack.c.l.b16 %v7826_v40 }
 0x15a   : > { %v2594_v8 = vsel %vm2510_vm11, %v1164_v3, 0  ;;  %v687_v28 = vpop.f32.mrf.mxu0  ;;  %2222 = vst [vmem:[#allocation2 + $0x168] sm:$0xf] %v2150_v36  ;;  %v6364_v56 = vld [vmem:[#allocation2 + $0x98] sm:$0xf0]  ;;  %v2688_v0 = vpack.c.b16 %v2652_v1, %v2652_v1  ;;  %v2689_v20 = vpack.c.b16 %v2653_v63, %v2653_v63  ;;  %v846_v40 = vpack.c.bf16 %v761_v38, %v761_v38 }
 0x15b   : > { %v1034_v4 = vsel %vm979_vm4, %v7727_v58, %v1033_v25  ;;  %v2636_v19 = vunpack.c.l.b16 %v2594_v8  ;;  %v2637_v27 = vunpack.c.h.b16 %v2594_v8  ;;  %v5672_v6 = vld [vmem:[#allocation2 + $0xb4] sm:$0xf0]  ;;  %v688_v35 = vadd.f32 %v7766_v39, %v687_v28 }
 0x15c   : > { %v2055_v37 = vsel %vm7837_vm12, %v1034_v4, 0  ;;  %2760 = vst [vmem:[#allocation2 + $0x158] sm:$0xf] %v2688_v0  ;;  %v7852_v9 = vor.u32 %v6364_v56, %v5658_v59  ;;  %v7855_v2 = vor.u32 %v6366_v21, %v5672_v6  ;;  %v1254_v8 = vadd.s32 272, %v7226_v26 }
 0x15d   : > { %v2098_v12 = vunpack.c.l.b16 %v2055_v37  ;;  %v2099_v17 = vunpack.c.h.b16 %v2055_v37  ;;  %v2672_v58 = vpack.c.b16 %v2636_v19, %v2636_v19  ;;  %v2673_v47 = vpack.c.b16 %v2637_v27, %v2637_v27  ;;  %2761 = vst [vmem:[#allocation2 + $0x164] sm:$0xf] %v2689_v20 }
 0x15e   : > { %v745_v16 = vmax.f32 %v688_v35, 0.0  ;;  %3440 = vmatmul.bf16.gmra.mxu1 %v7681_v31  ;;  %3366 = vmatmul.bf16.gmra.mxu2 %v7852_v9  ;;  %v1477_v32 = vand.u32 15, %v1251_v55  ;;  %vm2516_vm15 = vcmp.ne.s32.totalorder %v7841_v53, %v7261_v57  ;;  %v962_v1 = vunpack.c.l.b16 %v846_v40  ;;  %882 = vst [vmem:[#allocation2 + $0x190] sm:$0xf] %v846_v40 }
 0x15f   : > { %v2134_v25 = vpack.c.b16 %v2098_v12, %v2098_v12  ;;  %v2135_v3 = vpack.c.b16 %v2099_v17, %v2099_v17  ;;  %2744 = vst [vmem:[#allocation2 + $0x98] sm:$0xf] %v2672_v58  ;;  %3460 = vmatmul.bf16.gmra.mxu3 %v7855_v2  ;;  %v1484_v63 = vand.u32 15, %v1252_v62  ;;  %v7867_v38 = vadd.s32 136, %v7226_v26 }
 0x160   : > { %2745 = vst [vmem:[#allocation2 + $0xa4] sm:$0xf] %v2673_v47  ;;  %v830_v36 = vpack.c.bf16 %v745_v16, %v745_v16  ;;  %v1491_v59 = vand.u32 15, %v1253_v13  ;;  %v1498_v4 = vand.u32 15, %v1254_v8  ;;  %vm7869_vm0 = vcmp.lt.s32.totalorder %v1477_v32, 15  ;;  %v6406_v13 = vld [vmem:[#allocation9 + $0x68] sm:$0xff] }
 0x161   : > { %2206 = vst [vmem:[#allocation2 + $0xa8] sm:$0xf] %v2134_v25  ;;  %v978_v55 = vpack.c.b16 %v962_v1, %v961_v33  ;;  %vm1720_vm1 = vcmp.gt.s32.totalorder %v1484_v63, 0  ;;  %vm2367_vm5 = vmpackc.low %vm7869_vm0, %vm7869_vm0  ;;  %v7882_v6 = vadd.s32 144, %v7226_v26  ;;  %v1379_v30 = vand.u32 15, %v7867_v38  ;;  %3851 = vmatpush.bf16.msrb.mxu2 %v6406_v13 }
 0x162   : > { %2207 = vst [vmem:[#allocation2 + $0xb4] sm:$0xf] %v2135_v3  ;;  %v946_v28 = vunpack.c.l.b16 %v830_v36  ;;  %v690_v27 = vpop.f32.mrf.mxu0  ;;  %vm1722_vm6 = vcmp.gt.s32.totalorder %v1498_v4, 0  ;;  %vm1828_vm8 = vmpackc.low %vm1720_vm1, %vm1720_vm1  ;;  %vm7886_vm10 = vcmp.lt.s32.totalorder %v1491_v59, 15  ;;  %v2403_v17 = vsel %vm2367_vm5, 65537, %v7007_v34 }
 0x163   : > { %v7879_v56 = vadd.f32 %v7766_v39, %v690_v27  ;;  %866 = vst [vmem:[#allocation2 + $0xd0] sm:$0xf] %v830_v36  ;;  %v1100_v33 = vshrl.u32 %v978_v55, 16  ;;  %v1103_v35 = vshll.u32 %v978_v55, 16  ;;  %vm1830_vm11 = vmpackc.low %vm1722_vm6, %vm1722_vm6  ;;  %v1864_v12 = vsel %vm1828_vm8, 65537, %v7007_v34 }
 0x164   : > { %v7884_v37 = vpack.c.b16 %v946_v28, %v945_v23  ;;  %v794_v23 = vpop.f32.mrf.mxu1  ;;  %v1866_v21 = vsel %vm1830_vm11, 65537, %v7007_v34  ;;  %v1900_v18 = vunpack.c.l.b16 %v1864_v12  ;;  %vm2369_vm12 = vmpackc.low %vm7886_vm10, %vm7886_vm10  ;;  %v2439_v36 = vunpack.c.l.b16 %v2403_v17 }
 0x165   : > { %3783 = vmatmul.bf16.gmra.mxu0 %v7544_v10  ;;  %v1102_v20 = vrot.slane %v1100_v33, 7  ;;  %v1190_v16 = vrot.slane %v1103_v35, 1  ;;  %v1902_v25 = vunpack.c.l.b16 %v1866_v21  ;;  %v2405_v3 = vsel %vm2369_vm12, 65537, %v7007_v34  ;;  %vm2517_vm0 = vmpackc.low %vm2516_vm15, %vm7305_vm3 }
 0x166   : > { %v1036_v58 = vshrl.u32 %v7884_v37, 16  ;;  %v1039_v47 = vshll.u32 %v7884_v37, 16  ;;  %v5556_v62 = vunpack.i.l.s16 %v1900_v18  ;;  %v2441_v63 = vunpack.c.l.b16 %v2405_v3  ;;  %vm1984_vm15 = vmpackc.low %vm7273_vm14, %vm1982_vm13 }
 0x167   : > { %v1105_v8 = vor.u32 %v1103_v35, %v1102_v20  ;;  %v1141_v32 = vsel %vm7256_vm7, %v1102_v20, %v7242_v45  ;;  %v7915_v1 = vor.u32 %v1190_v16, %v1100_v33  ;;  %v1191_v53 = vsel %vm1145_vm9, %v7813_v48, %v1190_v16 }
 0x168   : > { %v7903_v10 = vrot.slane %v1036_v58, 7  ;;  %v7905_v40 = vrot.slane %v1039_v47, 1  ;;  %vm2038_vm7 = vcmp.ne.s32.totalorder %v5556_v62, %v7249_v51  ;;  %v5558_v43 = vunpack.i.l.s16 %v1902_v25 }
 0x169   : > { %v1106_v4 = vsel %vm979_vm4, %v7790_v24, %v1105_v8  ;;  %vm2040_vm1 = vmpackc.low %vm7273_vm14, %vm2038_vm7  ;;  %v5593_v25 = vunpack.i.l.s16 %v2441_v63  ;;  %v746_v3 = vmax.f32 %v7879_v56, 0.0  ;;  %vm7951_vm8 = vcmp.lt.s32.totalorder %v1379_v30, 15 }
 0x16a   : > { %v1041_v28 = vor.u32 %v1039_v47, %v7903_v10  ;;  %v1167_v59 = vsel %vm1145_vm9, %v7846_v14, %v7905_v40  ;;  %v692_v45 = vpop.f32.mrf.mxu0  ;;  %v1217_v14 = vsel %vm7291_vm2, %v7915_v1, %v7246_v50  ;;  %v2064_v55 = vsel %vm2040_vm1, %v1106_v4, 0  ;;  %v5670_v1 = vld [vmem:[#allocation2 + $0xa8] sm:$0xf]  ;;  %vm2353_vm11 = vmpackc.low %vm7951_vm8, %vm7951_vm8 }
 0x16b   : > { %v2595_v54 = vsel %vm2517_vm0, %v1167_v59, 0  ;;  %vm2045_vm13 = vcmp.ne.s32.totalorder %v5558_v43, %v7249_v51  ;;  %v2116_v33 = vunpack.c.l.b16 %v2064_v55  ;;  %v2117_v24 = vunpack.c.h.b16 %v2064_v55 }
 0x16c   : > { %v1042_v48 = vsel %vm979_vm4, %v7819_v44, %v1041_v28  ;;  %v2638_v19 = vunpack.c.l.b16 %v2595_v54  ;;  %v2639_v27 = vunpack.c.h.b16 %v2595_v54  ;;  %vm2047_vm2 = vmpackc.low %vm7273_vm14, %vm2045_vm13  ;;  %v5591_v47 = vunpack.i.l.s16 %v2439_v36 }
 0x16d   : > { %v2056_v0 = vsel %vm1984_vm15, %v1042_v48, 0  ;;  %v2065_v50 = vsel %vm2047_vm2, %v1141_v32, 0  ;;  %v2152_v23 = vpack.c.b16 %v2116_v33, %v2116_v33  ;;  %v2153_v44 = vpack.c.b16 %v2117_v24, %v2117_v24 }
 0x16e   : > { %v2100_v35 = vunpack.c.l.b16 %v2056_v0  ;;  %v2101_v12 = vunpack.c.h.b16 %v2056_v0  ;;  %v2674_v17 = vpack.c.b16 %v2638_v19, %v2638_v19  ;;  %v2675_v5 = vpack.c.b16 %v2639_v27, %v2639_v27  ;;  %3519 = vmatmul.bf16.vlgmr.msra.gmra.mxu1 %v7675_v29  ;;  %v5684_v27 = vld [vmem:[#allocation2 + $0xcc] sm:$0xf0] }
 0x16f   : > { %v2118_v20 = vunpack.c.l.b16 %v2065_v50  ;;  %v2119_v16 = vunpack.c.h.b16 %v2065_v50  ;;  %vm2572_vm5 = vcmp.ne.s32.totalorder %v5591_v47, %v7261_v57  ;;  %v693_v62 = vadd.f32 %v7766_v39, %v692_v45  ;;  %v6405_v45 = vld [vmem:[#allocation9 + $0x60] sm:$0xff]  ;;  %2224 = vst [vmem:[#allocation2 + $0x180] sm:$0xf] %v2152_v23  ;;  %v6369_v23 = vld [vmem:[#allocation2 + $0xc4] sm:$0xf] }
 0x170   : > { %v2136_v21 = vpack.c.b16 %v2100_v35, %v2100_v35  ;;  %v2137_v18 = vpack.c.b16 %v2101_v12, %v2101_v12  ;;  %2746 = vst [vmem:[#allocation2 + $0xb0] sm:$0xf] %v2674_v17  ;;  %vm2573_vm6 = vmpackc.low %vm2572_vm5, %vm7305_vm3  ;;  %v1386_v36 = vand.u32 15, %v7882_v6  ;;  %vm2579_vm10 = vcmp.ne.s32.totalorder %v5593_v25, %v7261_v57  ;;  %3852 = vmatpush.bf16.msrb.mxu2 %v6405_v45  ;;  %v5618_v35 = vld [vmem:[#allocation2 + $0x38] sm:$0xf] }
 0x171   : > { %2747 = vst [vmem:[#allocation2 + $0xbc] sm:$0xf] %v2675_v5  ;;  %v2154_v13 = vpack.c.b16 %v2118_v20, %v2118_v20  ;;  %v2155_v8 = vpack.c.b16 %v2119_v16, %v2119_v16  ;;  %v2603_v56 = vsel %vm2573_vm6, %v1191_v53, 0  ;;  %v831_v28 = vpack.c.bf16 %v746_v3, %v746_v3  ;;  %vm2580_vm12 = vmpackc.low %vm2579_vm10, %vm7305_vm3  ;;  %v6367_v53 = vld [vmem:[#allocation2 + $0xb0] sm:$0xf0] }
 0x172   : > { %2208 = vst [vmem:[#allocation2 + $0xc0] sm:$0xf] %v2136_v21  ;;  %v695_v63 = vpop.f32.mrf.mxu0  ;;  %v747_v59 = vmax.f32 %v693_v62, 0.0  ;;  %v2654_v38 = vunpack.c.l.b16 %v2603_v56  ;;  %v2655_v6 = vunpack.c.h.b16 %v2603_v56  ;;  %vm7961_vm0 = vcmp.gt.s32.totalorder %v1386_v36, 0  ;;  %v6353_v12 = vld [vmem:[#allocation2 + $0x40] sm:$0xf0] }
 0x173   : > { %2209 = vst [vmem:[#allocation2 + $0xcc] sm:$0xf] %v2137_v18  ;;  %v2389_v54 = vsel %vm2353_vm11, 65537, %v7007_v34  ;;  %v2604_v4 = vsel %vm2580_vm12, %v1217_v14, 0  ;;  %v947_v43 = vunpack.c.l.b16 %v831_v28  ;;  %vm1814_vm15 = vmpackc.low %vm7961_vm0, %vm7961_vm0  ;;  %v7971_v50 = vor.u32 %v6367_v53, %v5670_v1 }
 0x174   : > { %2225 = vst [vmem:[#allocation2 + $0x18c] sm:$0xf] %v2153_v44  ;;  %v832_v48 = vpack.c.bf16 %v747_v59, %v747_v59  ;;  %v2425_v19 = vunpack.c.l.b16 %v2389_v54  ;;  %v2656_v55 = vunpack.c.l.b16 %v2604_v4  ;;  %v2657_v0 = vunpack.c.h.b16 %v2604_v4 }
 0x175   : > { %3788 = vmatmul.bf16.gmra.mxu0 %v7664_v7  ;;  %2226 = vst [vmem:[#allocation2 + $0x198] sm:$0xf] %v2154_v13  ;;  %v2690_v33 = vpack.c.b16 %v2654_v38, %v2654_v38  ;;  %v2691_v24 = vpack.c.b16 %v2655_v6, %v2655_v6  ;;  %v1850_v17 = vsel %vm1814_vm15, 65537, %v7007_v34  ;;  %v7973_v21 = vor.u32 %v6369_v23, %v5684_v27 }
 0x176   : > { %2227 = vst [vmem:[#allocation2 + $0x1a4] sm:$0xf] %v2155_v8  ;;  %v948_v14 = vunpack.c.l.b16 %v832_v48  ;;  %v5577_v5 = vunpack.i.l.s16 %v2425_v19  ;;  %v2692_v44 = vpack.c.b16 %v2656_v55, %v2656_v55  ;;  %v2693_v47 = vpack.c.b16 %v2657_v0, %v2657_v0  ;;  %3371 = vmatmul.bf16.gmra.mxu2 %v7971_v50 }
 0x177   : > { %2762 = vst [vmem:[#allocation2 + $0x170] sm:$0xf] %v2690_v33  ;;  %v1886_v7 = vunpack.c.l.b16 %v1850_v17  ;;  %v696_v20 = vadd.f32 %v7766_v39, %v695_v63  ;;  %v1239_v16 = vadd.s32 152, %v7226_v26  ;;  %3465 = vmatmul.bf16.gmra.mxu3 %v7973_v21  ;;  %v1240_v62 = vadd.s32 160, %v7226_v26 }
 0x178   : > { %2763 = vst [vmem:[#allocation2 + $0x17c] sm:$0xf] %v2691_v24  ;;  %v7975_v18 = vpack.c.b16 %v948_v14, %v947_v43  ;;  %vm2523_vm7 = vcmp.ne.s32.totalorder %v5577_v5, %v7261_v57  ;;  %v7983_v13 = vor.u32 %v6353_v12, %v5618_v35  ;;  %v1168_v63 = vor.u32 %v7905_v40, %v1036_v58 }
 0x179   : > { %2764 = vst [vmem:[#allocation2 + $0x188] sm:$0xf] %v2692_v44  ;;  %v5542_v25 = vunpack.i.l.s16 %v1886_v7  ;;  %v748_v32 = vmax.f32 %v696_v20, 0.0  ;;  %v1393_v56 = vand.u32 15, %v1239_v16  ;;  %v1400_v59 = vand.u32 15, %v1240_v62  ;;  %vm2524_vm13 = vmpackc.low %vm2523_vm7, %vm7305_vm3 }
 0x17a   : > { %v697_v3 = vpop.f32.mrf.mxu0  ;;  %2765 = vst [vmem:[#allocation2 + $0x194] sm:$0xf] %v2693_v47  ;;  %v1044_v8 = vshrl.u32 %v7975_v18, 16  ;;  %v1047_v36 = vshll.u32 %v7975_v18, 16  ;;  %v1242_v30 = vadd.s32 176, %v7226_v26 }
 0x17b   : > { %v698_v1 = vadd.f32 %v7766_v39, %v697_v3  ;;  %867 = vst [vmem:[#allocation2 + $0xdc] sm:$0xf] %v831_v28  ;;  %vm1989_vm1 = vcmp.ne.s32.totalorder %v5542_v25, %v7249_v51  ;;  %v833_v6 = vpack.c.bf16 %v748_v32, %v748_v32  ;;  %vm1708_vm5 = vcmp.gt.s32.totalorder %v1400_v59, 0  ;;  %v5682_v35 = vld [vmem:[#allocation2 + $0xc0] sm:$0xf] }
 0x17c   : > { %868 = vst [vmem:[#allocation2 + $0xe8] sm:$0xf] %v832_v48  ;;  %v7994_v45 = vrot.slane %v1044_v8, 7  ;;  %v1169_v38 = vrot.slane %v1047_v36, 1  ;;  %vm8002_vm2 = vmpackc.low %vm7273_vm14, %vm1989_vm1  ;;  %vm8006_vm6 = vcmp.lt.s32.totalorder %v1393_v56, 15  ;;  %v1241_v28 = vadd.s32 168, %v7226_v26 }
 0x17d   : > { %v749_v37 = vmax.f32 %v698_v1, 0.0  ;;  %869 = vst [vmem:[#allocation2 + $0xf4] sm:$0xf] %v833_v6  ;;  %v949_v4 = vunpack.c.l.b16 %v833_v6  ;;  %vm1816_vm8 = vmpackc.low %vm1708_vm5, %vm1708_vm5  ;;  %v6370_v12 = vld [vmem:[#allocation2 + $0xc8] sm:$0xf0]  ;;  %v1414_v44 = vand.u32 15, %v1242_v30 }
 0x17e   : > { %3524 = vmatmul.bf16.gmra.mxu1 %v7983_v13  ;;  %v1049_v54 = vor.u32 %v1047_v36, %v7994_v45  ;;  %v1170_v53 = vsel %vm1145_vm9, %v1168_v63, %v1169_v38  ;;  %v1852_v19 = vsel %vm1816_vm8, 65537, %v7007_v34  ;;  %vm2355_vm10 = vmpackc.low %vm8006_vm6, %vm8006_vm6  ;;  %v1407_v27 = vand.u32 15, %v1241_v28  ;;  %v5630_v28 = vld [vmem:[#allocation2 + $0x50] sm:$0xf] }
 0x17f   : > { %v2596_v43 = vsel %vm2524_vm13, %v1170_v53, 0  ;;  %v834_v48 = vpack.c.bf16 %v749_v37, %v749_v37  ;;  %v1888_v24 = vunpack.c.l.b16 %v1852_v19  ;;  %v2391_v5 = vsel %vm2355_vm10, 65537, %v7007_v34 }
 0x180   : > { %v1050_v55 = vsel %vm979_vm4, %v7903_v10, %v1049_v54  ;;  %v2640_v0 = vunpack.c.l.b16 %v2596_v43  ;;  %v2641_v33 = vunpack.c.h.b16 %v2596_v43  ;;  %v2427_v3 = vunpack.c.l.b16 %v2391_v5  ;;  %v6356_v54 = vld [vmem:[#allocation2 + $0x58] sm:$0xf0] }
 0x181   : > { %v2057_v14 = vsel %vm8002_vm2, %v1050_v55, 0  ;;  %870 = vst [vmem:[#allocation2 + $0x100] sm:$0xf] %v834_v48  ;;  %v950_v17 = vunpack.c.l.b16 %v834_v48  ;;  %v5544_v10 = vunpack.i.l.s16 %v1888_v24  ;;  %v8027_v63 = vor.u32 %v6370_v12, %v5682_v35 }
 0x182   : > { %v700_v23 = vpop.f32.mrf.mxu0  ;;  %v2102_v47 = vunpack.c.l.b16 %v2057_v14  ;;  %v2103_v7 = vunpack.c.h.b16 %v2057_v14  ;;  %v2676_v20 = vpack.c.b16 %v2640_v0, %v2640_v0  ;;  %v2677_v16 = vpack.c.b16 %v2641_v33, %v2641_v33  ;;  %v6372_v56 = vld [vmem:[#allocation2 + $0xdc] sm:$0xf] }
 0x183   : > { %v8024_v25 = vpack.c.b16 %v950_v17, %v949_v4  ;;  %v5696_v62 = vld [vmem:[#allocation2 + $0xe4] sm:$0xf0]  ;;  %v701_v36 = vadd.f32 %v7766_v39, %v700_v23  ;;  %vm8030_vm11 = vcmp.gt.s32.totalorder %v1414_v44, 0  ;;  %v5579_v58 = vunpack.i.l.s16 %v2427_v3 }
 0x184   : > { %v2138_v32 = vpack.c.b16 %v2102_v47, %v2102_v47  ;;  %v2139_v1 = vpack.c.b16 %v2103_v7, %v2103_v7  ;;  %2748 = vst [vmem:[#allocation2 + $0xc8] sm:$0xf] %v2676_v20  ;;  %v8036_v40 = vor.u32 %v6372_v56, %v5696_v62  ;;  %vm1818_vm12 = vmpackc.low %vm8030_vm11, %vm8030_vm11  ;;  %vm1996_vm0 = vcmp.ne.s32.totalorder %v5544_v10, %v7249_v51 }
 0x185   : > { %3793 = vmatmul.bf16.gmra.mxu0 %v7755_v22  ;;  %2749 = vst [vmem:[#allocation2 + $0xd4] sm:$0xf] %v2677_v16  ;;  %v1052_v6 = vshrl.u32 %v8024_v25, 16  ;;  %v1055_v37 = vshll.u32 %v8024_v25, 16  ;;  %v1171_v22 = vor.u32 %v1169_v38, %v1044_v8  ;;  %v750_v30 = vmax.f32 %v701_v36, 0.0  ;;  %vm1998_vm2 = vmpackc.low %vm7273_vm14, %vm1996_vm0 }
 0x186   : > { %2210 = vst [vmem:[#allocation2 + $0xd8] sm:$0xf] %v2138_v32  ;;  %vm2249_vm15 = vcmp.lt.s32.totalorder %v1407_v27, 15  ;;  %vm2530_vm7 = vcmp.ne.s32.totalorder %v5579_v58, %v7261_v57  ;;  %v1854_v43 = vsel %vm1818_vm12, 65537, %v7007_v34  ;;  %3376 = vmatmul.bf16.gmra.mxu2 %v8027_v63  ;;  %v8067_v24 = vor.u32 %v6356_v54, %v5630_v28  ;;  %v5642_v25 = vld [vmem:[#allocation2 + $0x68] sm:$0xf] }
 0x187   : > { %2211 = vst [vmem:[#allocation2 + $0xe4] sm:$0xf] %v2139_v1  ;;  %v8046_v53 = vrot.slane %v1052_v6, 7  ;;  %v8048_v4 = vrot.slane %v1055_v37, 1  ;;  %vm2357_vm1 = vmpackc.low %vm2249_vm15, %vm2249_vm15  ;;  %v835_v18 = vpack.c.bf16 %v750_v30, %v750_v30  ;;  %3470 = vmatmul.bf16.gmra.mxu3 %v8036_v40  ;;  %v1890_v33 = vunpack.c.l.b16 %v1854_v43 }
 0x188   : > { %vm2531_vm13 = vmpackc.low %vm2530_vm7, %vm7305_vm3  ;;  %v2393_v38 = vsel %vm2357_vm1, 65537, %v7007_v34  ;;  %v1243_v10 = vadd.s32 184, %v7226_v26  ;;  %v1244_v3 = vadd.s32 192, %v7226_v26  ;;  %v5708_v43 = vld [vmem:[#allocation2 + $0xfc] sm:$0xf0] }
 0x189   : > { %v8055_v8 = vpop.f32.mrf.mxu1  ;;  %v1057_v48 = vor.u32 %v1055_v37, %v8046_v53  ;;  %v1173_v19 = vsel %vm1145_vm9, %v1171_v22, %v8048_v4  ;;  %871 = vst [vmem:[#allocation2 + $0x10c] sm:$0xf] %v835_v18  ;;  %v2429_v17 = vunpack.c.l.b16 %v2393_v38  ;;  %v951_v1 = vunpack.c.l.b16 %v835_v18  ;;  %v6404_v18 = vld [vmem:[#allocation9 + $0x58] sm:$0xff] }
 0x18a   : > { %v702_v27 = vpop.f32.mrf.mxu0  ;;  %v2597_v55 = vsel %vm2531_vm13, %v1173_v19, 0  ;;  %v1421_v58 = vand.u32 15, %v1243_v10  ;;  %v1428_v30 = vand.u32 15, %v1244_v3  ;;  %3853 = vmatpush.bf16.msrb.mxu2 %v6404_v18 }
 0x18b   : > { %v703_v0 = vadd.f32 %v7766_v39, %v702_v27  ;;  %v1058_v35 = vsel %vm979_vm4, %v7994_v45, %v1057_v48  ;;  %v2642_v12 = vunpack.c.l.b16 %v2597_v55  ;;  %v2643_v14 = vunpack.c.h.b16 %v2597_v55 }
 0x18c   : > { %v2058_v5 = vsel %vm1998_vm2, %v1058_v35, 0  ;;  %v5546_v45 = vunpack.i.l.s16 %v1890_v33  ;;  %v5581_v32 = vunpack.i.l.s16 %v2429_v17  ;;  %vm8079_vm5 = vcmp.lt.s32.totalorder %v1421_v58, 15 }
 0x18d   : > { %v751_v23 = vmax.f32 %v703_v0, 0.0  ;;  %v2104_v44 = vunpack.c.l.b16 %v2058_v5  ;;  %v2105_v47 = vunpack.c.h.b16 %v2058_v5  ;;  %v2678_v7 = vpack.c.b16 %v2642_v12, %v2642_v12  ;;  %v5694_v59 = vld [vmem:[#allocation2 + $0xd8] sm:$0xf]  ;;  %v6375_v0 = vld [vmem:[#allocation2 + $0xf4] sm:$0xf]  ;;  %vm2359_vm11 = vmpackc.low %vm8079_vm5, %vm8079_vm5 }
 0x18e   : > { %v2679_v20 = vpack.c.b16 %v2643_v14, %v2643_v14  ;;  %3529 = vmatmul.bf16.gmra.mxu1 %v8067_v24  ;;  %v6373_v28 = vld [vmem:[#allocation2 + $0xe0] sm:$0xf0]  ;;  %vm2003_vm6 = vcmp.ne.s32.totalorder %v5546_v45, %v7249_v51  ;;  %vm2537_vm8 = vcmp.ne.s32.totalorder %v5581_v32, %v7261_v57  ;;  %v8090_v35 = vor.u32 %v6375_v0, %v5708_v43 }
 0x18f   : > { %v836_v16 = vpack.c.bf16 %v751_v23, %v751_v23  ;;  %v2140_v62 = vpack.c.b16 %v2104_v44, %v2104_v44  ;;  %v2141_v36 = vpack.c.b16 %v2105_v47, %v2105_v47  ;;  %2750 = vst [vmem:[#allocation2 + $0xe0] sm:$0xf] %v2678_v7  ;;  %v8087_v55 = vor.u32 %v6373_v28, %v5694_v59  ;;  %vm2538_vm12 = vmpackc.low %vm2537_vm8, %vm7305_vm3  ;;  %v6359_v47 = vld [vmem:[#allocation2 + $0x70] sm:$0xf0] }
 0x190   : > { %2751 = vst [vmem:[#allocation2 + $0xec] sm:$0xf] %v2679_v20  ;;  %vm8092_vm10 = vcmp.gt.s32.totalorder %v1428_v30, 0  ;;  %v1174_v14 = vor.u32 %v8048_v4, %v1052_v6  ;;  %vm8114_vm0 = vmpackc.low %vm7273_vm14, %vm2003_vm6  ;;  %v2395_v44 = vsel %vm2359_vm11, 65537, %v7007_v34  ;;  %v1246_v43 = vadd.s32 208, %v7226_v26 }
 0x191   : > { %v952_v56 = vunpack.c.l.b16 %v836_v16  ;;  %v8074_v37 = vpop.f32.mrf.mxu1  ;;  %2212 = vst [vmem:[#allocation2 + $0xf0] sm:$0xf] %v2140_v62  ;;  %vm1820_vm15 = vmpackc.low %vm8092_vm10, %vm8092_vm10  ;;  %v1248_v0 = vadd.s32 224, %v7226_v26 }
 0x192   : > { %v705_v22 = vpop.f32.mrf.mxu0  ;;  %2213 = vst [vmem:[#allocation2 + $0xfc] sm:$0xf] %v2141_v36  ;;  %v1856_v32 = vsel %vm1820_vm15, 65537, %v7007_v34 }
 0x193   : > { %v8076_v54 = vpack.c.b16 %v952_v56, %v951_v1  ;;  %v706_v38 = vadd.f32 %v7766_v39, %v705_v22  ;;  %872 = vst [vmem:[#allocation2 + $0x118] sm:$0xf] %v836_v16  ;;  %v2431_v1 = vunpack.c.l.b16 %v2395_v44  ;;  %v8135_v56 = vor.u32 %v6359_v47, %v5642_v25 }
 0x195   : > { %v1060_v19 = vshrl.u32 %v8076_v54, 16  ;;  %v1063_v27 = vshll.u32 %v8076_v54, 16  ;;  %v752_v33 = vmax.f32 %v706_v38, 0.0  ;;  %3798 = vmatmul.bf16.gmra.mxu0 %v7852_v9  ;;  %v1247_v38 = vadd.s32 216, %v7226_v26 }
 0x196   : > { %3381 = vmatmul.bf16.gmra.mxu2 %v8087_v55  ;;  %v5583_v25 = vunpack.i.l.s16 %v2431_v1 }
 0x197   : > { %v8104_v17 = vrot.slane %v1060_v19, 7  ;;  %v8106_v9 = vrot.slane %v1063_v27, 1  ;;  %v837_v5 = vpack.c.bf16 %v752_v33, %v752_v33  ;;  %3475 = vmatmul.bf16.gmra.mxu3 %v8090_v35  ;;  %v1449_v23 = vand.u32 15, %v1247_v38 }
 0x198   : > { %vm2544_vm6 = vcmp.ne.s32.totalorder %v5583_v25, %v7261_v57 }
 0x199   : > { %v1065_v6 = vor.u32 %v1063_v27, %v8104_v17  ;;  %v1176_v4 = vsel %vm1145_vm9, %v1174_v14, %v8106_v9  ;;  %873 = vst [vmem:[#allocation2 + $0x124] sm:$0xf] %v837_v5  ;;  %v1892_v27 = vunpack.c.l.b16 %v1856_v32  ;;  %v1442_v14 = vand.u32 15, %v1246_v43 }
 0x19a   : > { %v2598_v7 = vsel %vm2538_vm12, %v1176_v4, 0  ;;  %v707_v20 = vpop.f32.mrf.mxu0  ;;  %v1456_v4 = vand.u32 15, %v1248_v0  ;;  %v953_v44 = vunpack.c.l.b16 %v837_v5  ;;  %vm8162_vm5 = vcmp.lt.s32.totalorder %v1449_v23, 15  ;;  %v6403_v23 = vld [vmem:[#allocation9 + $0x50] sm:$0xff] }
 0x19b   : > { %v1066_v16 = vsel %vm979_vm4, %v8046_v53, %v1065_v6  ;;  %v2644_v10 = vunpack.c.l.b16 %v2598_v7  ;;  %v2645_v3 = vunpack.c.h.b16 %v2598_v7  ;;  %v8129_v62 = vpop.f32.mrf.mxu1  ;;  %v708_v36 = vadd.f32 %v7766_v39, %v707_v20  ;;  %v5706_v6 = vld [vmem:[#allocation2 + $0xf0] sm:$0xf]  ;;  %v6376_v7 = vld [vmem:[#allocation2 + $0xf8] sm:$0xf0]  ;;  %vm2363_vm12 = vmpackc.low %vm8162_vm5, %vm8162_vm5  ;;  %3854 = vmatpush.bf16.msrb.mxu2 %v6403_v23 }
 0x19c   : > { %v2059_v45 = vsel %vm8114_vm0, %v1066_v16, 0  ;;  %v1245_v53 = vadd.s32 200, %v7226_v26  ;;  %vm8142_vm7 = vcmp.gt.s32.totalorder %v1442_v14, 0  ;;  %v5548_v26 = vunpack.i.l.s16 %v1892_v27  ;;  %vm2545_vm0 = vmpackc.low %vm2544_vm6, %vm7305_vm3  ;;  %v6362_v27 = vld [vmem:[#allocation2 + $0x88] sm:$0xf0] }
 0x19d   : > { %v2106_v59 = vunpack.c.l.b16 %v2059_v45  ;;  %v2107_v58 = vunpack.c.h.b16 %v2059_v45  ;;  %v2680_v28 = vpack.c.b16 %v2644_v10, %v2644_v10  ;;  %v2681_v22 = vpack.c.b16 %v2645_v3, %v2645_v3  ;;  %v5720_v10 = vld [vmem:[#allocation2 + $0x114] sm:$0xf0]  ;;  %vm1822_vm2 = vmpackc.low %vm8142_vm7, %vm8142_vm7 }
 0x19e   : > { %v753_v30 = vmax.f32 %v708_v36, 0.0  ;;  %3534 = vmatmul.bf16.gmra.mxu1 %v8135_v56  ;;  %v1435_v12 = vand.u32 15, %v1245_v53  ;;  %vm8149_vm1 = vcmp.gt.s32.totalorder %v1456_v4, 0  ;;  %vm2010_vm11 = vcmp.ne.s32.totalorder %v5548_v26, %v7249_v51  ;;  %v6753_v4 = vld [vmem:[%s8983_s5] ss:$0 sm:$0xff] }
 0x19f   : > { %v2142_v48 = vpack.c.b16 %v2106_v59, %v2106_v59  ;;  %v2143_v18 = vpack.c.b16 %v2107_v58, %v2107_v58  ;;  %2752 = vst [vmem:[#allocation2 + $0xf8] sm:$0xf] %v2680_v28  ;;  %v6378_v59 = vld [vmem:[#allocation2 + $0x10c] sm:$0xf]  ;;  %vm1824_vm8 = vmpackc.low %vm8149_vm1, %vm8149_vm1  ;;  %v1177_v43 = vor.u32 %v8106_v9, %v1060_v19  ;;  %v2399_v14 = vsel %vm2363_vm12, 65537, %v7007_v34 }
 0x1a0   : > { %2753 = vst [vmem:[#allocation2 + $0x104] sm:$0xf] %v2681_v22  ;;  %v838_v33 = vpack.c.bf16 %v753_v30, %v753_v30  ;;  %vm8153_vm13 = vcmp.lt.s32.totalorder %v1435_v12, 15  ;;  %v8175_v30 = vor.u32 %v6378_v59, %v5720_v10  ;;  %vm8207_vm15 = vmpackc.low %vm7273_vm14, %vm2010_vm11  ;;  %v1858_v12 = vsel %vm1822_vm2, 65537, %v7007_v34 }
 0x1a1   : > { %2214 = vst [vmem:[#allocation2 + $0x108] sm:$0xf] %v2142_v48  ;;  %vm2361_vm10 = vmpackc.low %vm8153_vm13, %vm8153_vm13  ;;  %v1894_v45 = vunpack.c.l.b16 %v1858_v12  ;;  %v2435_v5 = vunpack.c.l.b16 %v2399_v14 }
 0x1a2   : > { %2215 = vst [vmem:[#allocation2 + $0x114] sm:$0xf] %v2143_v18  ;;  %v954_v47 = vunpack.c.l.b16 %v838_v33  ;;  %v710_v20 = vpop.f32.mrf.mxu0  ;;  %v1860_v18 = vsel %vm1824_vm8, 65537, %v7007_v34  ;;  %v2397_v54 = vsel %vm2361_vm10, 65537, %v7007_v34 }
 0x1a3   : > { %874 = vst [vmem:[#allocation2 + $0x130] sm:$0xf] %v838_v33  ;;  %v8146_v3 = vpop.f32.mrf.mxu1  ;;  %v711_v36 = vadd.f32 %v7766_v39, %v710_v20  ;;  %v8167_v39 = vor.u32 %v6376_v7, %v5706_v6  ;;  %v2433_v10 = vunpack.c.l.b16 %v2397_v54  ;;  %v5550_v0 = vunpack.i.l.s16 %v1894_v45  ;;  %v6365_v45 = vld [vmem:[#allocation2 + $0xa0] sm:$0xf0] }
 0x1a4   : > { %v8157_v32 = vpack.c.b16 %v954_v47, %v953_v44  ;;  %v1896_v47 = vunpack.c.l.b16 %v1860_v18 }
 0x1a5   : > { %v754_v58 = vmax.f32 %v711_v36, 0.0  ;;  %3803 = vmatmul.bf16.gmra.mxu0 %v7971_v50  ;;  %v5654_v50 = vld [vmem:[#allocation2 + $0x80] sm:$0xf]  ;;  %vm2017_vm13 = vcmp.ne.s32.totalorder %v5550_v0, %v7249_v51 }
 0x1a6   : > { %v1068_v28 = vshrl.u32 %v8157_v32, 16  ;;  %v1071_v22 = vshll.u32 %v8157_v32, 16  ;;  %3386 = vmatmul.bf16.gmra.mxu2 %v8167_v39  ;;  %v8229_v7 = vor.u32 %v6362_v27, %v5654_v50  ;;  %v5585_v27 = vunpack.i.l.s16 %v2433_v10  ;;  %vm8264_vm8 = vmpackc.low %vm7273_vm14, %vm2017_vm13 }
 0x1a7   : > { %v839_v53 = vpack.c.bf16 %v754_v58, %v754_v58  ;;  %3480 = vmatmul.bf16.gmra.mxu3 %v8175_v30 }
 0x1a8   : > { %v8189_v38 = vrot.slane %v1068_v28, 7  ;;  %v8191_v48 = vrot.slane %v1071_v22, 1  ;;  %v5718_v12 = vld [vmem:[#allocation2 + $0x108] sm:$0xf]  ;;  %vm2551_vm1 = vcmp.ne.s32.totalorder %v5585_v27, %v7261_v57 }
 0x1a9   : > { %875 = vst [vmem:[#allocation2 + $0x13c] sm:$0xf] %v839_v53  ;;  %v6379_v14 = vld [vmem:[#allocation2 + $0x110] sm:$0xf0]  ;;  %vm2552_vm6 = vmpackc.low %vm2551_vm1, %vm7305_vm3 }
 0x1aa   : > { %v1073_v19 = vor.u32 %v1071_v22, %v8189_v38  ;;  %v1179_v9 = vsel %vm1145_vm9, %v1177_v43, %v8191_v48  ;;  %v712_v33 = vpop.f32.mrf.mxu0  ;;  %v5552_v43 = vunpack.i.l.s16 %v1896_v47 }
 0x1ab   : > { %v2599_v25 = vsel %vm2545_vm0, %v1179_v9, 0  ;;  %v8224_v6 = vpop.f32.mrf.mxu1  ;;  %v713_v44 = vadd.f32 %v6753_v4, %v712_v33  ;;  %v5587_v33 = vunpack.i.l.s16 %v2435_v5  ;;  %v5732_v4 = vld [vmem:[#allocation2 + $0x12c] sm:$0xf0] }
 0x1ac   : > { %v1074_v20 = vsel %vm979_vm4, %v8104_v17, %v1073_v19  ;;  %v2646_v16 = vunpack.c.l.b16 %v2599_v25  ;;  %v2647_v26 = vunpack.c.h.b16 %v2599_v25  ;;  %v955_v19 = vunpack.c.l.b16 %v839_v53 }
 0x1ad   : > { %v2060_v34 = vsel %vm8207_vm15, %v1074_v20, 0  ;;  %v755_v36 = vmax.f32 %v713_v44, 0.0  ;;  %vm2024_vm7 = vcmp.ne.s32.totalorder %v5552_v43, %v7249_v51  ;;  %v8245_v20 = vor.u32 %v6379_v14, %v5718_v12 }
 0x1ae   : > { %v2108_v1 = vunpack.c.l.b16 %v2060_v34  ;;  %v2109_v59 = vunpack.c.h.b16 %v2060_v34  ;;  %v2682_v58 = vpack.c.b16 %v2646_v16, %v2646_v16  ;;  %v2683_v22 = vpack.c.b16 %v2647_v26, %v2647_v26  ;;  %3539 = vmatmul.bf16.gmra.mxu1 %v8229_v7  ;;  %v6381_v16 = vld [vmem:[#allocation2 + $0x124] sm:$0xf]  ;;  %vm8250_vm2 = vmpackc.low %vm7273_vm14, %vm2024_vm7 }
 0x1af   : > { %v840_v50 = vpack.c.bf16 %v755_v36, %v755_v36  ;;  %vm2558_vm5 = vcmp.ne.s32.totalorder %v5587_v33, %v7261_v57  ;;  %v8255_v10 = vor.u32 %v6381_v16, %v5732_v4  ;;  %v1180_v34 = vor.u32 %v8191_v48, %v1068_v28 }
 0x1b0   : > { %v2144_v18 = vpack.c.b16 %v2108_v1, %v2108_v1  ;;  %v2145_v17 = vpack.c.b16 %v2109_v59, %v2109_v59  ;;  %2754 = vst [vmem:[#allocation2 + $0x110] sm:$0xf] %v2682_v58  ;;  %v8236_v54 = vpop.f32.mrf.mxu3  ;;  %vm2559_vm10 = vmpackc.low %vm2558_vm5, %vm7305_vm3 }
 0x1b1   : > { %2755 = vst [vmem:[#allocation2 + $0x11c] sm:$0xf] %v2683_v22  ;;  %v956_v9 = vunpack.c.l.b16 %v840_v50 }
 0x1b2   : > { %2216 = vst [vmem:[#allocation2 + $0x120] sm:$0xf] %v2144_v18  ;;  %v8238_v23 = vpop.f32.mrf.mxu0 }
 0x1b3   : > { %2217 = vst [vmem:[#allocation2 + $0x12c] sm:$0xf] %v2145_v17  ;;  %v975_v25 = vpack.c.b16 %v956_v9, %v955_v19  ;;  %v8241_v44 = vpop.f32.mrf.mxu1 }
 0x1b4   : > { %876 = vst [vmem:[#allocation2 + $0x148] sm:$0xf] %v840_v50  ;;  %v6416_v50 = vld [vmem:[#allocation9 + $0xb8] sm:$0xff] }
 0x1b5   : > { %v1076_v47 = vshrl.u32 %v975_v25, 16  ;;  %v1079_v53 = vshll.u32 %v975_v25, 16  ;;  %3808 = vmatmul.bf16.gmra.mxu0 %v8027_v63  ;;  %9109 = vst [vmem:[#allocation24_spill] sm:$0xff] %v8255_v10  ;;  %v5666_v63 = vld [vmem:[#allocation2 + $0x98] sm:$0xf]  ;;  %3938 = vmatpush.bf16.msrb.mxu3 %v6416_v50 }
 0x1b6   : > { %3391 = vmatmul.bf16.gmra.mxu2 %v8245_v20  ;;  %v8281_v22 = vor.u32 %v6365_v45, %v5666_v63  ;;  %v6384_v50 = vld [vmem:[#allocation2 + $0x13c] sm:$0xf] }
 0x1b7   : > { %v1078_v51 = vrot.slane %v1076_v47, 7  ;;  %v1181_v36 = vrot.slane %v1079_v53, 1  ;;  %3485 = vmatmul.bf16.gmra.mxu3 %v8255_v10 }
 0x1b8   : > { %v8268_v57 = vpop.f32.mrf.mxu3 }
 0x1b9   : > { %v1081_v1 = vor.u32 %v1079_v53, %v1078_v51  ;;  %v1090_v32 = vsel %vm979_vm4, %v1078_v51, %v7691_v46  ;;  %v1182_v28 = vsel %vm1145_vm9, %v1180_v34, %v1181_v36  ;;  %v1183_v48 = vor.u32 %v1181_v36, %v1076_v47  ;;  %v6402_v46 = vld [vmem:[#allocation9 + $0x48] sm:$0xff]  ;;  %v5730_v45 = vld [vmem:[#allocation2 + $0x120] sm:$0xf] }
 0x1ba   : > { %v2062_v61 = vsel %vm8250_vm2, %v1090_v32, 0  ;;  %v2600_v59 = vsel %vm2552_vm6, %v1182_v28, 0  ;;  %v8279_v58 = vpop.f32.mrf.mxu0  ;;  %3855 = vmatpush.bf16.msrb.mxu2 %v6402_v46  ;;  %v6382_v5 = vld [vmem:[#allocation2 + $0x128] sm:$0xf0] }
 0x1bb   : > { %v1082_v43 = vsel %vm979_vm4, %v8189_v38, %v1081_v1  ;;  %v1185_v11 = vsel %vm1145_vm9, %v1183_v48, %v7693_v52  ;;  %v2112_v18 = vunpack.c.l.b16 %v2062_v61  ;;  %v2113_v17 = vunpack.c.h.b16 %v2062_v61  ;;  %v3431_v27 = vpop.f32.mrf.mxu1  ;;  %v5744_v48 = vld [vmem:[#allocation2 + $0x144] sm:$0xf0] }
 0x1bc   : > { %v2061_v19 = vsel %vm8264_vm8, %v1082_v43, 0  ;;  %v2601_v9 = vsel %vm2559_vm10, %v1185_v11, 0  ;;  %v2648_v0 = vunpack.c.l.b16 %v2600_v59  ;;  %v2649_v33 = vunpack.c.h.b16 %v2600_v59  ;;  %v5678_v43 = vld [vmem:[#allocation2 + $0xb0] sm:$0xf]  ;;  %v6368_v11 = vld [vmem:[#allocation2 + $0xb8] sm:$0xf0] }
 0x1bd   : > { %v2110_v12 = vunpack.c.l.b16 %v2061_v19  ;;  %v2111_v14 = vunpack.c.h.b16 %v2061_v19  ;;  %v2148_v25 = vpack.c.b16 %v2112_v18, %v2112_v18  ;;  %v2149_v4 = vpack.c.b16 %v2113_v17, %v2113_v17  ;;  %v6415_v17 = vld [vmem:[#allocation9 + $0xb0] sm:$0xff] }
 0x1be   : > { %v2650_v47 = vunpack.c.l.b16 %v2601_v9  ;;  %v2651_v38 = vunpack.c.h.b16 %v2601_v9  ;;  %3544 = vmatmul.bf16.gmra.mxu1 %v8281_v22  ;;  %v2684_v16 = vpack.c.b16 %v2648_v0, %v2648_v0  ;;  %v8291_v26 = vadd.f32 %v3431_v27, %v8055_v8  ;;  %3939 = vmatpush.bf16.msrb.mxu3 %v6415_v17  ;;  %v6414_v0 = vld [vmem:[#allocation9 + $0xa8] sm:$0xff] }
 0x1bf   : > { %v2146_v52 = vpack.c.b16 %v2110_v12, %v2110_v12  ;;  %v2147_v53 = vpack.c.b16 %v2111_v14, %v2111_v14  ;;  %2220 = vst [vmem:[#allocation2 + $0x150] sm:$0xf] %v2148_v25  ;;  %v2685_v34 = vpack.c.b16 %v2649_v33, %v2649_v33  ;;  %v8301_v59 = vor.u32 %v6382_v5, %v5730_v45  ;;  %v6413_v33 = vld [vmem:[#allocation9 + $0xa0] sm:$0xff]  ;;  %v6412_v5 = vld [vmem:[#allocation9 + $0x98] sm:$0xff] }
 0x1c0   : > { %2221 = vst [vmem:[#allocation2 + $0x15c] sm:$0xf] %v2149_v4  ;;  %v2686_v51 = vpack.c.b16 %v2650_v47, %v2650_v47  ;;  %v2687_v63 = vpack.c.b16 %v2651_v38, %v2651_v38  ;;  %v8304_v46 = vor.u32 %v6384_v50, %v5744_v48  ;;  %v8316_v9 = vor.u32 %v6368_v11, %v5678_v43  ;;  %v6401_v50 = vld [vmem:[#allocation9 + $0x40] sm:$0xff]  ;;  %v6410_v43 = vld [vmem:[#allocation9 + $0x88] sm:$0xff] }
 0x1c1   : > { %2218 = vst [vmem:[#allocation2 + $0x138] sm:$0xf] %v2146_v52  ;;  %v3357_v36 = vpop.f32.mrf.mxu2  ;;  %v6387_v52 = vld [vmem:[#allocation2 + $0x154] sm:$0xf]  ;;  %3856 = vmatpush.bf16.msrb.mxu2 %v6401_v50 }
 0x1c2   : > { %2219 = vst [vmem:[#allocation2 + $0x144] sm:$0xf] %v2147_v53  ;;  %v8294_v1 = vadd.f32 %v8236_v54, %v3357_v36  ;;  %v3451_v32 = vpop.f32.mrf.mxu3  ;;  %v8296_v28 = vpop.f32.mrf.mxu0  ;;  %3940 = vmatpush.bf16.msrb.mxu3 %v6414_v0  ;;  %v5756_v53 = vld [vmem:[#allocation2 + $0x15c] sm:$0xf0]  ;;  %v5690_v36 = vld [vmem:[#allocation2 + $0xc8] sm:$0xf] }
 0x1c3   : > { %2756 = vst [vmem:[#allocation2 + $0x128] sm:$0xf] %v2684_v16  ;;  %v3433_v61 = vpop.f32.mrf.mxu1 }
 0x1c4   : > { %2757 = vst [vmem:[#allocation2 + $0x134] sm:$0xf] %v2685_v34  ;;  %v8299_v8 = vadd.f32 %v3433_v61, %v8074_v37  ;;  %v8329_v34 = vor.u32 %v6387_v52, %v5756_v53 }
 0x1c5   : > { %2758 = vst [vmem:[#allocation2 + $0x140] sm:$0xf] %v2686_v51  ;;  %3813 = vmatmul.bf16.gmra.mxu0 %v8087_v55 }
 0x1c6   : > { %2759 = vst [vmem:[#allocation2 + $0x14c] sm:$0xf] %v2687_v63  ;;  %3396 = vmatmul.bf16.gmra.mxu2 %v8301_v59  ;;  %3941 = vmatpush.bf16.msrb.mxu3 %v6413_v33  ;;  %v6371_v63 = vld [vmem:[#allocation2 + $0xd0] sm:$0xf0]  ;;  %v6390_v33 = vld [vmem:[#allocation2 + $0x16c] sm:$0xf] }
 0x1c7   : > { %9112 = vst [vmem:[#allocation25_spill] sm:$0xff] %v8304_v46  ;;  %3490 = vmatmul.bf16.gmra.mxu3 %v8304_v46  ;;  %v8340_v61 = vor.u32 %v6371_v63, %v5690_v36 }
 0x1c8   : > { %v5742_v14 = vld [vmem:[#allocation2 + $0x138] sm:$0xf]  ;;  %9113 = vst [vmem:[#allocation26_spill] sm:$0xff] %v8329_v34 }
 0x1c9   : > { %v3359_v54 = vpop.f32.mrf.mxu2 }
 0x1ca   : > { %v8309_v18 = vadd.f32 %v8268_v57, %v3359_v54  ;;  %v8311_v37 = vpop.f32.mrf.mxu0  ;;  %v3453_v27 = vpop.f32.mrf.mxu3  ;;  %v6385_v57 = vld [vmem:[#allocation2 + $0x140] sm:$0xf0]  ;;  %3942 = vmatpush.bf16.msrb.mxu3 %v6412_v5 }
 0x1cb   : > { %v3436_v19 = vpop.f32.mrf.mxu1 }
 0x1cc   : > { %v8314_v55 = vadd.f32 %v3436_v19, %v8129_v62  ;;  %v8326_v62 = vor.u32 %v6385_v57, %v5742_v14  ;;  %v6388_v19 = vld [vmem:[#allocation2 + $0x158] sm:$0xf0]  ;;  %v6409_v57 = vld [vmem:[#allocation9 + $0x80] sm:$0xff] }
 0x1ce   : > { %3549 = vmatmul.bf16.gmra.mxu1 %v8316_v9 }
 0x1d1   : > { %v3362_v12 = vpop.f32.mrf.mxu2 }
 0x1d2   : > { %v8319_v25 = vadd.f32 %v3451_v32, %v3362_v12  ;;  %v8321_v4 = vpop.f32.mrf.mxu0  ;;  %v3456_v16 = vpop.f32.mrf.mxu3  ;;  %v5768_v12 = vld [vmem:[#allocation2 + $0x174] sm:$0xf0] }
 0x1d3   : > { %v3438_v47 = vpop.f32.mrf.mxu1  ;;  %v8353_v52 = vor.u32 %v6390_v33, %v5768_v12 }
 0x1d4   : > { %v8324_v38 = vadd.f32 %v3438_v47, %v8146_v3 }
 0x1d5   : > { %3818 = vmatmul.bf16.gmra.mxu0 %v8167_v39  ;;  %v6411_v39 = vld [vmem:[#allocation9 + $0x90] sm:$0xff]  ;;  %9114 = vst [vmem:[#allocation27_spill] sm:$0xff] %v8353_v52 }
 0x1d6   : > { %3401 = vmatmul.bf16.gmra.mxu2 %v8326_v62  ;;  %3943 = vmatpush.bf16.msrb.mxu3 %v6411_v39 }
 0x1d7   : > { %3495 = vmatmul.bf16.gmra.mxu3 %v8329_v34  ;;  %v6418_v34 = vld [vmem:[#allocation2 + $0x188] sm:$0xf0] }
 0x1d9   : > { %v3364_v51 = vpop.f32.mrf.mxu2 }
 0x1da   : > { %v8333_v45 = vadd.f32 %v3453_v27, %v3364_v51  ;;  %v8335_v3 = vpop.f32.mrf.mxu0  ;;  %v3458_v54 = vpop.f32.mrf.mxu3  ;;  %v5754_v27 = vld [vmem:[#allocation2 + $0x150] sm:$0xf]  ;;  %3944 = vmatpush.bf16.msrb.mxu3 %v6410_v43  ;;  %v6374_v51 = vld [vmem:[#allocation2 + $0xe8] sm:$0xf0]  ;;  %v5766_v43 = vld [vmem:[#allocation2 + $0x168] sm:$0xf] }
 0x1db   : > { %v3441_v32 = vpop.f32.mrf.mxu1  ;;  %v8351_v47 = vor.u32 %v6388_v19, %v5754_v27  ;;  %v6417_v19 = vld [vmem:[#allocation2 + $0x184] sm:$0xf] }
 0x1dc   : > { %v8338_v48 = vadd.f32 %v3441_v32, %v8224_v6 }
 0x1de   : > { %3554 = vmatmul.bf16.gmra.mxu1 %v8340_v61  ;;  %3945 = vmatpush.bf16.msrb.mxu3 %v6409_v57  ;;  %v6377_v57 = vld [vmem:[#allocation2 + $0x100] sm:$0xf0] }
 0x1e1   : > { %v3367_v17 = vpop.f32.mrf.mxu2 }
 0x1e2   : > { %v8343_v11 = vpop.f32.mrf.mxu0  ;;  %v8345_v0 = vadd.f32 %v3456_v16, %v3367_v17  ;;  %v3461_v53 = vpop.f32.mrf.mxu3  ;;  %v5702_v16 = vld [vmem:[#allocation2 + $0xe0] sm:$0xf]  ;;  %v6391_v17 = vld [vmem:[#allocation2 + $0x170] sm:$0xf0] }
 0x1e3   : > { %v3443_v6 = vpop.f32.mrf.mxu1 }
 0x1e4   : > { %v8348_v14 = vadd.f32 %v3443_v6, %v8241_v44  ;;  %v5780_v6 = vld [vmem:[#allocation2 + $0x18c] sm:$0xf0] }
 0x1e5   : > { %3823 = vmatmul.bf16.gmra.mxu0 %v8245_v20  ;;  %v8361_v20 = vor.u32 %v6374_v51, %v5702_v16  ;;  %v5783_v12 = vor.u32 %v6417_v19, %v5780_v6  ;;  %v6515_v51 = vld [vmem:[#allocation9 + $0x238] sm:$0xff] }
 0x1e6   : > { %3406 = vmatmul.bf16.gmra.mxu2 %v8351_v47 }
 0x1e7   : > { %3500 = vmatmul.bf16.gmra.mxu3 %v8353_v52  ;;  %4718 = vmatpush.bf16.msra.mxu2 %v6515_v51  ;;  %v5894_v51 = vld [vmem:[#allocation2 + $0x8] sm:$0xf] }
 0x1e9   : > { %v3369_v63 = vpop.f32.mrf.mxu2 }
 0x1ea   : > { %v8357_v36 = vpop.f32.mrf.mxu0  ;;  %v8359_v44 = vadd.f32 %v3458_v54, %v3369_v63  ;;  %v3463_v50 = vpop.f32.mrf.mxu3  ;;  %v8373_v54 = vor.u32 %v6391_v17, %v5766_v43  ;;  %v6499_v43 = vld [vmem:[#allocation9 + $0x1b8] sm:$0xff] }
 0x1eb   : > { %v3520_v5 = vpop.f32.mrf.mxu1  ;;  %v6507_v17 = vld [vmem:[#allocation9 + $0x1f8] sm:$0xff]  ;;  %4540 = vmatpush.bf16.msrb.mxu1 %v6499_v43 }
 0x1ec   : > { %v8364_v32 = vadd.f32 %v3520_v5, %v8291_v26  ;;  %v5714_v26 = vld [vmem:[#allocation2 + $0xf8] sm:$0xf]  ;;  %4629 = vmatpush.bf16.msra.mxu0 %v6507_v17  ;;  %v5726_v17 = vld [vmem:[#allocation2 + $0x110] sm:$0xf] }
 0x1ed   : > { %v8378_v52 = vor.u32 %v6377_v57, %v5714_v26 }
 0x1ee   : > { %3559 = vmatmul.bf16.gmra.mxu1 %v8361_v20 }
 0x1f2   : > { %v8367_v39 = vpop.f32.mrf.mxu0 }
 0x1f3   : > { %9115 = vst [vmem:[#allocation28_spill] sm:$0xff] %v8367_v39  ;;  %v3522_v27 = vpop.f32.mrf.mxu1 }
 0x1f4   : > { %v8370_v33 = vadd.f32 %v3522_v27, %v8299_v8 }
 0x1f5   : > { %3828 = vmatmul.bf16.gmra.mxu0 %v8301_v59 }
 0x1f6   : > { %3411 = vmatmul.bf16.gmra.mxu2 %v8373_v54 }
 0x1f7   : > { %3505 = vmatmul.bf16.gmra.mxu3 %v5783_v12  ;;  %v5778_v12 = vld [vmem:[#allocation2 + $0x180] sm:$0xf] }
 0x1f8   : > { %v5779_v46 = vor.u32 %v6418_v34, %v5778_v12  ;;  %v6345_v34 = vld [vmem:[#allocation2 + $0x4] sm:$0xf]  ;;  %v5888_v12 = vld [vmem:[#allocation2 + $0xc] sm:$0xf0] }
 0x1f9   : > { %v3372_v63 = vpop.f32.mrf.mxu2 }
 0x1fa   : > { %v8376_v16 = vpop.f32.mrf.mxu0  ;;  %v8380_v8 = vadd.f32 %v3461_v53, %v3372_v63  ;;  %v3466_v27 = vpop.f32.mrf.mxu3  ;;  %v6347_v63 = vld [vmem:[#allocation2 + $0x10] sm:$0xf0] }
 0x1fb   : > { %9116 = vst [vmem:[#allocation29_spill] sm:$0xff] %v8376_v16  ;;  %v3525_v5 = vpop.f32.mrf.mxu1  ;;  %v5895_v43 = vor.u32 %v6347_v63, %v5894_v51 }
 0x1fc   : > { %v8383_v59 = vadd.f32 %v3525_v5, %v8314_v55  ;;  %v6506_v5 = vld [vmem:[#allocation9 + $0x1f0] sm:$0xff] }
 0x1fd   : > { %4630 = vmatpush.bf16.msra.mxu0 %v6506_v5 }
 0x1fe   : > { %3564 = vmatmul.bf16.gmra.mxu1 %v8378_v52 }
 0x201   : > { %v3374_v6 = vpop.f32.mrf.mxu2 }
 0x202   : > { %v8386_v19 = vpop.f32.mrf.mxu0  ;;  %v8388_v57 = vadd.f32 %v3463_v50, %v3374_v6  ;;  %v3468_v53 = vpop.f32.mrf.mxu3 }
 0x203   : > { %9117 = vst [vmem:[#allocation30_spill] sm:$0xff] %v8386_v19  ;;  %v3527_v26 = vpop.f32.mrf.mxu1  ;;  %v6380_v19 = vld [vmem:[#allocation2 + $0x118] sm:$0xf0] }
 0x204   : > { %v8391_v55 = vadd.f32 %v3527_v26, %v8324_v38  ;;  %v8394_v50 = vor.u32 %v6380_v19, %v5726_v17  ;;  %v5738_v17 = vld [vmem:[#allocation2 + $0x128] sm:$0xf] }
 0x205   : > { %3833 = vmatmul.bf16.gmra.mxu0 %v8326_v62  ;;  %v6505_v62 = vld [vmem:[#allocation9 + $0x1e8] sm:$0xff] }
 0x206   : > { %3416 = vmatmul.bf16.gmra.mxu2 %v5779_v46  ;;  %4631 = vmatpush.bf16.msra.mxu0 %v6505_v62  ;;  %v6504_v46 = vld [vmem:[#allocation9 + $0x1e0] sm:$0xff] }
 0x207   : > { %3946 = vmatmul.bf16.vlgmr.msrb.gmra.mxu3 %v5895_v43  ;;  %v6502_v43 = vld [vmem:[#allocation9 + $0x1d0] sm:$0xff]  ;;  %v6383_v62 = vld [vmem:[#allocation2 + $0x130] sm:$0xf0] }
 0x209   : > { %v3377_v16 = vpop.f32.mrf.mxu2 }
 0x20a   : > { %v8396_v6 = vadd.f32 %v3466_v27, %v3377_v16  ;;  %v3471_v10 = vpop.f32.mrf.mxu3  ;;  %v8401_v26 = vpop.f32.mrf.mxu0  ;;  %4632 = vmatpush.bf16.msra.mxu0 %v6504_v46  ;;  %v5891_v27 = vor.u32 %v6345_v34, %v5888_v12  ;;  %v6514_v46 = vld [vmem:[#allocation9 + $0x230] sm:$0xff]  ;;  %v8413_v34 = vor.u32 %v6383_v62, %v5738_v17 }
 0x20b   : > { %v3530_v39 = vpop.f32.mrf.mxu1  ;;  %9118 = vst [vmem:[#allocation31_spill] sm:$0xff] %v8401_v26  ;;  %4719 = vmatpush.bf16.msra.mxu2 %v6514_v46 }
 0x20c   : > { %v8399_v38 = vadd.f32 %v3530_v39, %v8338_v48  ;;  %v6503_v48 = vld [vmem:[#allocation9 + $0x1d8] sm:$0xff] }
 0x20e   : > { %3569 = vmatmul.bf16.gmra.mxu1 %v8394_v50  ;;  %4633 = vmatpush.bf16.msra.mxu0 %v6503_v48  ;;  %v6498_v48 = vld [vmem:[#allocation9 + $0x1b0] sm:$0xff] }
 0x20f   : > { %4541 = vmatpush.bf16.msrb.mxu1 %v6498_v48 }
 0x211   : > { %v3379_v51 = vpop.f32.mrf.mxu2 }
 0x212   : > { %v8404_v19 = vadd.f32 %v3468_v53, %v3379_v51  ;;  %v3473_v16 = vpop.f32.mrf.mxu3  ;;  %v8410_v39 = vpop.f32.mrf.mxu0  ;;  %4634 = vmatpush.bf16.msra.mxu0 %v6502_v43 }
 0x213   : > { %v3532_v63 = vpop.f32.mrf.mxu1  ;;  %9119 = vst [vmem:[#allocation32_spill] sm:$0xff] %v8410_v39 }
 0x214   : > { %v8407_v5 = vadd.f32 %v3532_v63, %v8348_v14  ;;  %v6501_v63 = vld [vmem:[#allocation9 + $0x1c8] sm:$0xff] }
 0x215   : > { %3838 = vmatmul.bf16.gmra.mxu0 %v8351_v47 }
 0x216   : > { %3857 = vmatmul.bf16.vlgmr.msrb.gmra.mxu2 %v5891_v27  ;;  %4635 = vmatpush.bf16.msra.mxu0 %v6501_v63 }
 0x217   : > { %3951 = vmatmul.bf16.gmra.mxu3 %v7675_v29  ;;  %v6500_v29 = vld [vmem:[#allocation9 + $0x1c0] sm:$0xff] }
 0x219   : > { %v3382_v53 = vpop.f32.mrf.mxu2 }
 0x21a   : > { %v8415_v14 = vadd.f32 %v3471_v10, %v3382_v53  ;;  %v3476_v47 = vpop.f32.mrf.mxu3  ;;  %v8421_v27 = vpop.f32.mrf.mxu0  ;;  %4636 = vmatpush.bf16.msra.mxu0 %v6500_v29  ;;  %v6386_v53 = vld [vmem:[#allocation2 + $0x148] sm:$0xf0] }
 0x21b   : > { %v3535_v51 = vpop.f32.mrf.mxu1  ;;  %9120 = vst [vmem:[#allocation33_spill] sm:$0xff] %v8421_v27 }
 0x21c   : > { %v8418_v12 = vadd.f32 %v3535_v51, %v8294_v1  ;;  %v5750_v1 = vld [vmem:[#allocation2 + $0x140] sm:$0xf] }
 0x21d   : > { %v8433_v29 = vor.u32 %v6386_v53, %v5750_v1  ;;  %v6513_v53 = vld [vmem:[#allocation9 + $0x228] sm:$0xff] }
 0x21e   : > { %3574 = vmatmul.bf16.gmra.mxu1 %v8413_v34  ;;  %4720 = vmatpush.bf16.msra.mxu2 %v6513_v53 }
 0x221   : > { %v3384_v43 = vpop.f32.mrf.mxu2 }
 0x222   : > { %v8423_v62 = vadd.f32 %v3473_v16, %v3384_v43  ;;  %v3478_v10 = vpop.f32.mrf.mxu3  ;;  %v8431_v51 = vpop.f32.mrf.mxu0 }
 0x223   : > { %v3537_v17 = vpop.f32.mrf.mxu1  ;;  %9121 = vst [vmem:[#allocation34_spill] sm:$0xff] %v8431_v51 }
 0x224   : > { %v8426_v46 = vadd.f32 %v3537_v17, %v8309_v18 }
 0x225   : > { %3843 = vmatmul.bf16.gmra.mxu0 %v8373_v54  ;;  %v5996_v54 = vld [vmem:[#allocation2 + $0x3c] sm:$0xf0] }
 0x226   : > { %3862 = vmatmul.bf16.gmra.mxu2 %v7581_v49  ;;  %v6444_v49 = vld [vmem:[#allocation2 + $0x34] sm:$0xf] }
 0x227   : > { %3956 = vmatmul.bf16.gmra.mxu3 %v7983_v13  ;;  %v5999_v17 = vor.u32 %v6444_v49, %v5996_v54 }
 0x229   : > { %v3387_v63 = vpop.f32.mrf.mxu2 }
 0x22a   : > { %v8435_v16 = vadd.f32 %v3476_v47, %v3387_v63  ;;  %v3481_v43 = vpop.f32.mrf.mxu3  ;;  %v8443_v26 = vpop.f32.mrf.mxu0  ;;  %v6389_v47 = vld [vmem:[#allocation2 + $0x160] sm:$0xf0] }
 0x22b   : > { %v3540_v48 = vpop.f32.mrf.mxu1  ;;  %9122 = vst [vmem:[#allocation35_spill] sm:$0xff] %v8443_v26 }
 0x22c   : > { %v8438_v18 = vadd.f32 %v3540_v48, %v8319_v25  ;;  %v5762_v25 = vld [vmem:[#allocation2 + $0x158] sm:$0xf] }
 0x22d   : > { %v8450_v54 = vor.u32 %v6389_v47, %v5762_v25 }
 0x22e   : > { %3579 = vmatmul.bf16.gmra.mxu1 %v8433_v29 }
 0x231   : > { %v3389_v27 = vpop.f32.mrf.mxu2 }
 0x232   : > { %v8441_v13 = vadd.f32 %v3478_v10, %v3389_v27  ;;  %v3483_v51 = vpop.f32.mrf.mxu3 }
 0x233   : > { %v3542_v39 = vpop.f32.mrf.mxu1 }
 0x234   : > { %v8446_v1 = vadd.f32 %v3542_v39, %v8333_v45  ;;  %v6497_v45 = vld [vmem:[#allocation9 + $0x1a8] sm:$0xff] }
 0x235   : > { %4637 = vmatmul.bf16.vlgmr.msra.gmra.mxu0 %v5999_v17  ;;  %4542 = vmatpush.bf16.msrb.mxu1 %v6497_v45  ;;  %v6008_v39 = vld [vmem:[#allocation2 + $0x54] sm:$0xf0]  ;;  %v6495_v45 = vld [vmem:[#allocation9 + $0x198] sm:$0xff] }
 0x236   : > { %9123 = vst [vmem:[#allocation36_spill] sm:$0xff] %v8446_v1  ;;  %3867 = vmatmul.bf16.gmra.mxu2 %v7636_v60  ;;  %v8458_v60 = vpop.f32.mrf.mxu0 }
 0x237   : > { %3961 = vmatmul.bf16.gmra.mxu3 %v8067_v24  ;;  %9124 = vst [vmem:[#allocation37_spill] sm:$0xff] %v8458_v60  ;;  %v6447_v24 = vld [vmem:[#allocation2 + $0x4c] sm:$0xf] }
 0x238   : > { %v6011_v17 = vor.u32 %v6447_v24, %v6008_v39 }
 0x239   : > { %v3392_v63 = vpop.f32.mrf.mxu2 }
 0x23a   : > { %v8452_v27 = vadd.f32 %v3481_v43, %v3392_v63  ;;  %v3486_v10 = vpop.f32.mrf.mxu3  ;;  %v5774_v63 = vld [vmem:[#allocation2 + $0x170] sm:$0xf] }
 0x23b   : > { %v3545_v48 = vpop.f32.mrf.mxu1 }
 0x23c   : > { %v8455_v49 = vadd.f32 %v3545_v48, %v8345_v0  ;;  %v6496_v0 = vld [vmem:[#allocation9 + $0x1a0] sm:$0xff]  ;;  %v6392_v48 = vld [vmem:[#allocation2 + $0x178] sm:$0xf0] }
 0x23d   : > { %4543 = vmatpush.bf16.msrb.mxu1 %v6496_v0  ;;  %v6493_v0 = vld [vmem:[#allocation9 + $0x188] sm:$0xff] }
 0x23e   : > { %3584 = vmatmul.bf16.gmra.mxu1 %v8450_v54  ;;  %v8465_v53 = vpop.f32.mrf.mxu0 }
 0x23f   : > { %9126 = vst [vmem:[#allocation39_spill] sm:$0xff] %v8465_v53  ;;  %v6450_v53 = vld [vmem:[#allocation2 + $0x64] sm:$0xf] }
 0x241   : > { %v3394_v26 = vpop.f32.mrf.mxu2  ;;  %4544 = vmatpush.bf16.msrb.mxu1 %v6495_v45 }
 0x242   : > { %v8460_v25 = vadd.f32 %v3483_v51, %v3394_v26  ;;  %v3488_v47 = vpop.f32.mrf.mxu3  ;;  %v8469_v26 = vor.u32 %v6392_v48, %v5774_v63 }
 0x243   : > { %v3547_v1 = vpop.f32.mrf.mxu1 }
 0x244   : > { %v8463_v43 = vadd.f32 %v3547_v1, %v8359_v44 }
 0x245   : > { %4642 = vmatmul.bf16.gmra.mxu0 %v6011_v17  ;;  %v6494_v17 = vld [vmem:[#allocation9 + $0x190] sm:$0xff] }
 0x246   : > { %9125 = vst [vmem:[#allocation38_spill] sm:$0xff] %v8463_v43  ;;  %3872 = vmatmul.bf16.gmra.mxu2 %v7681_v31  ;;  %v6020_v31 = vld [vmem:[#allocation2 + $0x6c] sm:$0xf0]  ;;  %4545 = vmatpush.bf16.msrb.mxu1 %v6494_v17 }
 0x247   : > { %3966 = vmatmul.bf16.gmra.mxu3 %v8135_v56  ;;  %v8477_v56 = vpop.f32.mrf.mxu0  ;;  %v6023_v60 = vor.u32 %v6450_v53, %v6020_v31  ;;  %v6512_v17 = vld [vmem:[#allocation9 + $0x220] sm:$0xff] }
 0x248   : > { %9128 = vst [vmem:[#allocation41_spill] sm:$0xff] %v8477_v56  ;;  %4721 = vmatpush.bf16.msra.mxu2 %v6512_v17 }
 0x249   : > { %v3397_v39 = vpop.f32.mrf.mxu2 }
 0x24a   : > { %v8471_v51 = vadd.f32 %v3486_v10, %v3397_v39  ;;  %v3491_v44 = vpop.f32.mrf.mxu3  ;;  %4546 = vmatpush.bf16.msrb.mxu1 %v6493_v0  ;;  %v5786_v39 = vld [vmem:[#allocation2 + $0x188] sm:$0xf] }
 0x24b   : > { %v3550_v24 = vpop.f32.mrf.mxu1  ;;  %v6032_v0 = vld [vmem:[#allocation2 + $0x84] sm:$0xf0] }
 0x24c   : > { %v8474_v1 = vadd.f32 %v3550_v24, %v8380_v8  ;;  %v6492_v8 = vld [vmem:[#allocation9 + $0x180] sm:$0xff] }
 0x24d   : > { %v6419_v24 = vld [vmem:[#allocation2 + $0x190] sm:$0xf0] }
 0x24e   : > { %9127 = vst [vmem:[#allocation40_spill] sm:$0xff] %v8474_v1  ;;  %3589 = vmatmul.bf16.gmra.mxu1 %v8469_v26  ;;  %v5787_v56 = vor.u32 %v6419_v24, %v5786_v39 }
 0x24f   : > { %4547 = vmatpush.bf16.msrb.mxu1 %v6492_v8 }
 0x251   : > { %v3399_v43 = vpop.f32.mrf.mxu2 }
 0x252   : > { %v8479_v48 = vadd.f32 %v3488_v47, %v3399_v43  ;;  %v3493_v10 = vpop.f32.mrf.mxu3  ;;  %v8486_v47 = vpop.f32.mrf.mxu0 }
 0x253   : > { %v3552_v63 = vpop.f32.mrf.mxu1  ;;  %9130 = vst [vmem:[#allocation43_spill] sm:$0xff] %v8486_v47 }
 0x254   : > { %v8482_v45 = vadd.f32 %v3552_v63, %v8388_v57 }
 0x255   : > { %4647 = vmatmul.bf16.gmra.mxu0 %v6023_v60 }
 0x256   : > { %9129 = vst [vmem:[#allocation42_spill] sm:$0xff] %v8482_v45  ;;  %3877 = vmatmul.bf16.gmra.mxu2 %v7547_v15  ;;  %v6453_v15 = vld [vmem:[#allocation2 + $0x7c] sm:$0xf] }
 0x257   : > { %3971 = vmatmul.bf16.gmra.mxu3 %v8229_v7  ;;  %v6035_v63 = vor.u32 %v6453_v15, %v6032_v0  ;;  %v6456_v15 = vld [vmem:[#allocation2 + $0x94] sm:$0xf] }
 0x259   : > { %v3402_v53 = vpop.f32.mrf.mxu2 }
 0x25a   : > { %v8488_v43 = vadd.f32 %v3491_v44, %v3402_v53  ;;  %v3496_v57 = vpop.f32.mrf.mxu3  ;;  %v8498_v24 = vpop.f32.mrf.mxu0  ;;  %v5994_v44 = vld [vmem:[#allocation2 + $0x30] sm:$0xf] }
 0x25b   : > { %v3555_v31 = vpop.f32.mrf.mxu1  ;;  %9131 = vst [vmem:[#allocation44_spill] sm:$0xff] %v8498_v24 }
 0x25c   : > { %v8491_v60 = vadd.f32 %v3555_v31, %v8396_v6  ;;  %v6445_v6 = vld [vmem:[#allocation2 + $0x38] sm:$0xf0] }
 0x25d   : > { %v5995_v53 = vor.u32 %v6445_v6, %v5994_v44  ;;  %v6511_v44 = vld [vmem:[#allocation9 + $0x218] sm:$0xff] }
 0x25e   : > { %3594 = vmatmul.bf16.gmra.mxu1 %v5787_v56  ;;  %4722 = vmatpush.bf16.msra.mxu2 %v6511_v44 }
 0x261   : > { %v3404_v8 = vpop.f32.mrf.mxu2 }
 0x262   : > { %v8493_v7 = vadd.f32 %v3493_v10, %v3404_v8  ;;  %v3498_v1 = vpop.f32.mrf.mxu3 }
 0x263   : > { %v3557_v45 = vpop.f32.mrf.mxu1 }
 0x264   : > { %v8496_v39 = vadd.f32 %v3557_v45, %v8404_v19  ;;  %v6044_v19 = vld [vmem:[#allocation2 + $0x9c] sm:$0xf0]  ;;  %v8507_v45 = vpop.f32.mrf.mxu0 }
 0x265   : > { %4652 = vmatmul.bf16.gmra.mxu0 %v6035_v63  ;;  %9132 = vst [vmem:[#allocation45_spill] sm:$0xff] %v8507_v45  ;;  %v6047_v63 = vor.u32 %v6456_v15, %v6044_v19  ;;  %v6056_v15 = vld [vmem:[#allocation2 + $0xb4] sm:$0xf0] }
 0x266   : > { %3882 = vmatmul.bf16.gmra.mxu2 %v7666_v42 }
 0x267   : > { %3976 = vmatmul.bf16.gmra.mxu3 %v8281_v22 }
 0x269   : > { %v3407_v56 = vpop.f32.mrf.mxu2 }
 0x26a   : > { %v8502_v31 = vadd.f32 %v3496_v57, %v3407_v56  ;;  %v3501_v10 = vpop.f32.mrf.mxu3  ;;  %v6006_v57 = vld [vmem:[#allocation2 + $0x48] sm:$0xf] }
 0x26b   : > { %v3560_v17 = vpop.f32.mrf.mxu1 }
 0x26c   : > { %v8505_v0 = vadd.f32 %v3560_v17, %v8415_v14  ;;  %v6448_v14 = vld [vmem:[#allocation2 + $0x50] sm:$0xf0]  ;;  %v8516_v6 = vpop.f32.mrf.mxu0 }
 0x26d   : > { %9133 = vst [vmem:[#allocation46_spill] sm:$0xff] %v8516_v6 }
 0x26e   : > { %4548 = vmatmul.bf16.vlgmr.msrb.gmra.mxu1 %v5995_v53  ;;  %v6007_v53 = vor.u32 %v6448_v14, %v6006_v57 }
 0x271   : > { %v3409_v42 = vpop.f32.mrf.mxu2 }
 0x272   : > { %v8509_v24 = vadd.f32 %v3498_v1, %v3409_v42  ;;  %v3503_v22 = vpop.f32.mrf.mxu3 }
 0x273   : > { %v3562_v8 = vpop.f32.mrf.mxu1 }
 0x274   : > { %v8512_v47 = vadd.f32 %v3562_v8, %v8423_v62 }
 0x275   : > { %4657 = vmatmul.bf16.gmra.mxu0 %v6047_v63 }
 0x276   : > { %3887 = vmatmul.bf16.gmra.mxu2 %v7769_v41  ;;  %v6459_v41 = vld [vmem:[#allocation2 + $0xac] sm:$0xf] }
 0x277   : > { %3981 = vmatmul.bf16.gmra.mxu3 %v8316_v9  ;;  %v6059_v63 = vor.u32 %v6459_v41, %v6056_v15  ;;  %v8523_v9 = vpop.f32.mrf.mxu0  ;;  %v6068_v41 = vld [vmem:[#allocation2 + $0xcc] sm:$0xf0] }
 0x278   : > { %9134 = vst [vmem:[#allocation47_spill] sm:$0xff] %v8523_v9 }
 0x279   : > { %v3412_v56 = vpop.f32.mrf.mxu2 }
 0x27a   : > { %v8518_v1 = vadd.f32 %v3501_v10, %v3412_v56  ;;  %v3506_v19 = vpop.f32.mrf.mxu3  ;;  %v6018_v10 = vld [vmem:[#allocation2 + $0x60] sm:$0xf] }
 0x27b   : > { %v3565_v17 = vpop.f32.mrf.mxu1 }
 0x27c   : > { %v8521_v62 = vadd.f32 %v3565_v17, %v8435_v16  ;;  %v6451_v16 = vld [vmem:[#allocation2 + $0x68] sm:$0xf0] }
 0x27d   : > { %v6019_v56 = vor.u32 %v6451_v16, %v6018_v10  ;;  %v6454_v16 = vld [vmem:[#allocation2 + $0x80] sm:$0xf0] }
 0x27e   : > { %4553 = vmatmul.bf16.gmra.mxu1 %v6007_v53 }
 0x27f   : > { %v8537_v15 = vpop.f32.mrf.mxu0 }
 0x281   : > { %v3414_v42 = vpop.f32.mrf.mxu2 }
 0x282   : > { %v8525_v45 = vadd.f32 %v3503_v22, %v3414_v42  ;;  %v3508_v6 = vpop.f32.mrf.mxu3 }
 0x283   : > { %v3567_v8 = vpop.f32.mrf.mxu1 }
 0x284   : > { %v8528_v57 = vadd.f32 %v3567_v8, %v8441_v13  ;;  %v6523_v13 = vld [vmem:[#allocation11 + $0x38] sm:$0xff] }
 0x285   : > { %4662 = vmatmul.bf16.gmra.mxu0 %v6059_v63  ;;  %4991 = vmatpush.bf16.msra.mxu3 %v6523_v13 }
 0x286   : > { %3892 = vmatmul.bf16.gmra.mxu2 %v7855_v2  ;;  %v6462_v2 = vld [vmem:[#allocation2 + $0xc4] sm:$0xf] }
 0x287   : > { %3986 = vmatmul.bf16.gmra.mxu3 %v8340_v61  ;;  %v6071_v63 = vor.u32 %v6462_v2, %v6068_v41  ;;  %v8544_v10 = vpop.f32.mrf.mxu0 }
 0x288   : > { %9135 = vst [vmem:[#allocation48_spill] sm:$0xff] %v8544_v10 }
 0x289   : > { %v3417_v14 = vpop.f32.mrf.mxu2 }
 0x28a   : > { %v8532_v17 = vadd.f32 %v3506_v19, %v3417_v14  ;;  %v3947_v53 = vpop.f32.mrf.mxu3  ;;  %v6510_v14 = vld [vmem:[#allocation9 + $0x210] sm:$0xff] }
 0x28b   : > { %v3570_v44 = vpop.f32.mrf.mxu1  ;;  %4723 = vmatpush.bf16.msra.mxu2 %v6510_v14 }
 0x28c   : > { %v8535_v22 = vadd.f32 %v3570_v44, %v8452_v27  ;;  %v6030_v27 = vld [vmem:[#allocation2 + $0x78] sm:$0xf]  ;;  %v3770_v44 = vadd.f32 %v8238_v23, %v8364_v32 }
 0x28d   : > { %v6031_v13 = vor.u32 %v6454_v16, %v6030_v27 }
 0x28e   : > { %4558 = vmatmul.bf16.gmra.mxu1 %v6019_v56 }
 0x291   : > { %v3419_v42 = vpop.f32.mrf.mxu2 }
 0x292   : > { %v8539_v61 = vadd.f32 %v3508_v6, %v3419_v42  ;;  %v3949_v9 = vpop.f32.mrf.mxu3  ;;  %v6465_v42 = vld [vmem:[#allocation2 + $0xdc] sm:$0xf] }
 0x293   : > { %v3572_v8 = vpop.f32.mrf.mxu1 }
 0x294   : > { %v8542_v19 = vadd.f32 %v3572_v8, %v8460_v25  ;;  %v8555_v8 = vpop.f32.mrf.mxu0 }
 0x295   : > { %4667 = vmatmul.bf16.gmra.mxu0 %v6071_v63 }
 0x296   : > { %3897 = vmatmul.bf16.gmra.mxu2 %v7973_v21  ;;  %v6080_v21 = vld [vmem:[#allocation2 + $0xe4] sm:$0xf0] }
 0x297   : > { %3991 = vmatmul.bf16.gmra.mxu3 %v8361_v20  ;;  %v3772_v20 = vadd.f32 %v8279_v58, %v8370_v33  ;;  %v6083_v23 = vor.u32 %v6465_v42, %v6080_v21  ;;  %v3775_v58 = vadd.f32 %v8296_v28, %v8383_v59  ;;  %v6092_v21 = vld [vmem:[#allocation2 + $0xfc] sm:$0xf0]  ;;  %v3777_v28 = vadd.f32 %v8311_v37, %v8391_v55  ;;  %v6509_v37 = vld [vmem:[#allocation9 + $0x208] sm:$0xff] }
 0x298   : > { %v3780_v55 = vadd.f32 %v8321_v4, %v8399_v38  ;;  %4724 = vmatpush.bf16.msra.mxu2 %v6509_v37 }
 0x299   : > { %v3858_v56 = vpop.f32.mrf.mxu2 }
 0x29a   : > { %v3859_v41 = vadd.f32 %v3858_v56, %v3770_v44  ;;  %v3952_v25 = vpop.f32.mrf.mxu3  ;;  %v6457_v44 = vld [vmem:[#allocation2 + $0x98] sm:$0xf0] }
 0x29b   : > { %v3575_v6 = vpop.f32.mrf.mxu1 }
 0x29c   : > { %v8551_v2 = vadd.f32 %v3575_v6, %v8471_v51  ;;  %v8553_v63 = vadd.f32 %v3947_v53, %v3859_v41  ;;  %v6042_v53 = vld [vmem:[#allocation2 + $0x90] sm:$0xf] }
 0x29d   : > { %v6043_v6 = vor.u32 %v6457_v44, %v6042_v53  ;;  %v6054_v53 = vld [vmem:[#allocation2 + $0xa8] sm:$0xf]  ;;  %v6460_v44 = vld [vmem:[#allocation2 + $0xb0] sm:$0xf0] }
 0x29e   : > { %4563 = vmatmul.bf16.gmra.mxu1 %v6031_v13  ;;  %v8568_v13 = vpop.f32.mrf.mxu0 }
 0x2a1   : > { %v3860_v32 = vpop.f32.mrf.mxu2 }
 0x2a2   : > { %v3861_v27 = vadd.f32 %v3860_v32, %v3772_v20  ;;  %v3954_v16 = vpop.f32.mrf.mxu3 }
 0x2a3   : > { %v3577_v10 = vpop.f32.mrf.mxu1 }
 0x2a4   : > { %v8560_v14 = vadd.f32 %v3577_v10, %v8479_v48  ;;  %v8562_v51 = vadd.f32 %v3949_v9, %v3861_v27 }
 0x2a5   : > { %4672 = vmatmul.bf16.gmra.mxu0 %v6083_v23 }
 0x2a6   : > { %3902 = vmatmul.bf16.gmra.mxu2 %v8036_v40  ;;  %v6522_v40 = vld [vmem:[#allocation11 + $0x30] sm:$0xff] }
 0x2a7   : > { %3996 = vmatmul.bf16.gmra.mxu3 %v8378_v52  ;;  %v6468_v52 = vld [vmem:[#allocation2 + $0xf4] sm:$0xf] }
 0x2a8   : > { %4992 = vmatpush.bf16.msra.mxu3 %v6522_v40  ;;  %v6095_v59 = vor.u32 %v6468_v52, %v6092_v21  ;;  %v3782_v21 = vadd.f32 %v8335_v3, %v8407_v5  ;;  %v3785_v3 = vadd.f32 %v8343_v11, %v8418_v12 }
 0x2a9   : > { %v3863_v33 = vpop.f32.mrf.mxu2 }
 0x2aa   : > { %v3864_v41 = vadd.f32 %v3863_v33, %v3775_v58  ;;  %v3957_v48 = vpop.f32.mrf.mxu3 }
 0x2ab   : > { %v3580_v56 = vpop.f32.mrf.mxu1 }
 0x2ac   : > { %v8571_v10 = vadd.f32 %v3580_v56, %v8488_v43  ;;  %v8573_v9 = vadd.f32 %v3952_v25, %v3864_v41  ;;  %v8580_v43 = vpop.f32.mrf.mxu0  ;;  %v6055_v56 = vor.u32 %v6460_v44, %v6054_v53 }
 0x2ae   : > { %4568 = vmatmul.bf16.gmra.mxu1 %v6043_v6 }
 0x2b1   : > { %v3865_v42 = vpop.f32.mrf.mxu2 }
 0x2b2   : > { %v3866_v23 = vadd.f32 %v3865_v42, %v3777_v28  ;;  %v3959_v32 = vpop.f32.mrf.mxu3 }
 0x2b3   : > { %v3582_v20 = vpop.f32.mrf.mxu1 }
 0x2b4   : > { %v8578_v27 = vadd.f32 %v3582_v20, %v8493_v7  ;;  %v8582_v25 = vadd.f32 %v3954_v16, %v3866_v23  ;;  %v8593_v40 = vpop.f32.mrf.mxu0  ;;  %v6463_v20 = vld [vmem:[#allocation2 + $0xc8] sm:$0xf0] }
 0x2b5   : > { %4677 = vmatmul.bf16.gmra.mxu0 %v6095_v59 }
 0x2b6   : > { %3907 = vmatmul.bf16.gmra.mxu2 %v8090_v35  ;;  %v6104_v35 = vld [vmem:[#allocation2 + $0x114] sm:$0xf0] }
 0x2b7   : > { %4001 = vmatmul.bf16.gmra.mxu3 %v8394_v50  ;;  %v6471_v50 = vld [vmem:[#allocation2 + $0x10c] sm:$0xf] }
 0x2b8   : > { %v6107_v4 = vor.u32 %v6471_v50, %v6104_v35 }
 0x2b9   : > { %v3868_v58 = vpop.f32.mrf.mxu2 }
 0x2ba   : > { %v3869_v7 = vadd.f32 %v3868_v58, %v3780_v55  ;;  %v3962_v6 = vpop.f32.mrf.mxu3  ;;  %v6116_v58 = vld [vmem:[#allocation2 + $0x12c] sm:$0xf0] }
 0x2bb   : > { %v3585_v33 = vpop.f32.mrf.mxu1 }
 0x2bc   : > { %v8589_v41 = vadd.f32 %v3585_v33, %v8502_v31  ;;  %v8591_v16 = vadd.f32 %v3957_v48, %v3869_v7  ;;  %v6066_v48 = vld [vmem:[#allocation2 + $0xc0] sm:$0xf]  ;;  %v8604_v23 = vpop.f32.mrf.mxu0  ;;  %v3787_v33 = vadd.f32 %v8357_v36, %v8426_v46  ;;  %v6508_v36 = vld [vmem:[#allocation9 + $0x200] sm:$0xff] }
 0x2bd   : > { %v6067_v44 = vor.u32 %v6463_v20, %v6066_v48  ;;  %v9137_v46 = vld [vmem:[#allocation28_spill] sm:$0xff]  ;;  %4725 = vmatpush.bf16.msra.mxu2 %v6508_v36 }
 0x2be   : > { %4573 = vmatmul.bf16.gmra.mxu1 %v6055_v56 }
 0x2c1   : > { %v3870_v38 = vpop.f32.mrf.mxu2 }
 0x2c2   : > { %v3871_v28 = vadd.f32 %v3870_v38, %v3782_v21  ;;  %v3964_v59 = vpop.f32.mrf.mxu3  ;;  %v9136_v21 = vld [vmem:[#allocation24_spill] sm:$0xff]  ;;  %v6466_v38 = vld [vmem:[#allocation2 + $0xe0] sm:$0xf0] }
 0x2c3   : > { %v3587_v52 = vpop.f32.mrf.mxu1 }
 0x2c4   : > { %v8598_v42 = vadd.f32 %v3587_v52, %v8509_v24  ;;  %v8600_v31 = vadd.f32 %v3959_v32, %v3871_v28  ;;  %v8615_v7 = vpop.f32.mrf.mxu0  ;;  %v3790_v52 = vadd.f32 %v9137_v46, %v8438_v18 }
 0x2c5   : > { %4682 = vmatmul.bf16.gmra.mxu0 %v6107_v4  ;;  %v6078_v4 = vld [vmem:[#allocation2 + $0xd8] sm:$0xf] }
 0x2c6   : > { %3912 = vmatmul.bf16.gmra.mxu2 %v8175_v30  ;;  %v6521_v30 = vld [vmem:[#allocation11 + $0x28] sm:$0xff]  ;;  %v6079_v20 = vor.u32 %v6466_v38, %v6078_v4  ;;  %v9141_v4 = vld [vmem:[#allocation30_spill] sm:$0xff] }
 0x2c7   : > { %4006 = vmatmul.bf16.gmra.mxu3 %v8413_v34  ;;  %v6474_v34 = vld [vmem:[#allocation2 + $0x124] sm:$0xf]  ;;  %v3795_v38 = vadd.f32 %v9141_v4, %v8455_v49  ;;  %v9146_v4 = vld [vmem:[#allocation40_spill] sm:$0xff] }
 0x2c8   : > { %4993 = vmatpush.bf16.msra.mxu3 %v6521_v30  ;;  %v6119_v56 = vor.u32 %v6474_v34, %v6116_v58  ;;  %v9139_v30 = vld [vmem:[#allocation29_spill] sm:$0xff] }
 0x2c9   : > { %v3873_v5 = vpop.f32.mrf.mxu2 }
 0x2ca   : > { %v3874_v37 = vadd.f32 %v3873_v5, %v3785_v3  ;;  %v3967_v24 = vpop.f32.mrf.mxu3 }
 0x2cb   : > { %v3590_v53 = vpop.f32.mrf.mxu1 }
 0x2cc   : > { %v8609_v55 = vadd.f32 %v3590_v53, %v8518_v1  ;;  %v8611_v32 = vadd.f32 %v3962_v6, %v3874_v37  ;;  %v6477_v37 = vld [vmem:[#allocation2 + $0x13c] sm:$0xf] }
 0x2ce   : > { %4578 = vmatmul.bf16.gmra.mxu1 %v6067_v44  ;;  %v6128_v44 = vld [vmem:[#allocation2 + $0x144] sm:$0xf0] }
 0x2cf   : > { %v6131_v34 = vor.u32 %v6477_v37, %v6128_v44  ;;  %v6480_v44 = vld [vmem:[#allocation2 + $0x154] sm:$0xf]  ;;  %v6140_v37 = vld [vmem:[#allocation2 + $0x15c] sm:$0xf0] }
 0x2d1   : > { %v3875_v11 = vpop.f32.mrf.mxu2 }
 0x2d2   : > { %v3876_v35 = vadd.f32 %v3875_v11, %v3787_v33  ;;  %v8617_v50 = vpop.f32.mrf.mxu3 }
 0x2d3   : > { %v3592_v12 = vpop.f32.mrf.mxu1 }
 0x2d4   : > { %v8620_v1 = vadd.f32 %v3592_v12, %v8525_v45  ;;  %v8622_v6 = vadd.f32 %v3964_v59, %v3876_v35  ;;  %v4638_v59 = vpop.f32.mrf.mxu0  ;;  %v9140_v35 = vld [vmem:[#allocation25_spill] sm:$0xff] }
 0x2d5   : > { %4687 = vmatmul.bf16.gmra.mxu0 %v6119_v56 }
 0x2d6   : > { %3917 = vmatmul.bf16.gmra.mxu2 %v9136_v21  ;;  %v6469_v21 = vld [vmem:[#allocation2 + $0xf8] sm:$0xf0] }
 0x2d7   : > { %4011 = vmatmul.bf16.gmra.mxu3 %v8433_v29  ;;  %v9138_v29 = vld [vmem:[#allocation36_spill] sm:$0xff] }
 0x2d8   : > { %v3792_v58 = vadd.f32 %v9139_v30, %v9138_v29  ;;  %v9142_v30 = vld [vmem:[#allocation38_spill] sm:$0xff] }
 0x2d9   : > { %v3878_v28 = vpop.f32.mrf.mxu2 }
 0x2da   : > { %v3879_v3 = vadd.f32 %v3878_v28, %v3790_v52  ;;  %v3972_v45 = vpop.f32.mrf.mxu3 }
 0x2db   : > { %v3595_v48 = vpop.f32.mrf.mxu1 }
 0x2dc   : > { %v8629_v5 = vadd.f32 %v3595_v48, %v8532_v17  ;;  %v8631_v53 = vadd.f32 %v3967_v24, %v3879_v3  ;;  %v4640_v17 = vpop.f32.mrf.mxu0  ;;  %v6090_v24 = vld [vmem:[#allocation2 + $0xf0] sm:$0xf] }
 0x2dd   : > { %v6091_v52 = vor.u32 %v6469_v21, %v6090_v24  ;;  %v6520_v3 = vld [vmem:[#allocation11 + $0x20] sm:$0xff]  ;;  %v6102_v24 = vld [vmem:[#allocation2 + $0x108] sm:$0xf] }
 0x2de   : > { %4583 = vmatmul.bf16.gmra.mxu1 %v6079_v20  ;;  %4994 = vmatpush.bf16.msra.mxu3 %v6520_v3  ;;  %v6472_v21 = vld [vmem:[#allocation2 + $0x110] sm:$0xf0] }
 0x2e1   : > { %v3880_v18 = vpop.f32.mrf.mxu2 }
 0x2e2   : > { %v8635_v56 = vadd.f32 %v3880_v18, %v3792_v58  ;;  %v8637_v11 = vpop.f32.mrf.mxu3 }
 0x2e3   : > { %v3597_v33 = vpop.f32.mrf.mxu1 }
 0x2e4   : > { %v8640_v12 = vadd.f32 %v3597_v33, %v8539_v61  ;;  %v4643_v29 = vpop.f32.mrf.mxu0 }
 0x2e5   : > { %4692 = vmatmul.bf16.gmra.mxu0 %v6131_v34  ;;  %v6143_v34 = vor.u32 %v6480_v44, %v6140_v37 }
 0x2e6   : > { %3922 = vmatmul.bf16.gmra.mxu2 %v9140_v35 }
 0x2e7   : > { %4016 = vmatmul.bf16.gmra.mxu3 %v8450_v54  ;;  %v9143_v54 = vld [vmem:[#allocation31_spill] sm:$0xff] }
 0x2e8   : > { %v3797_v58 = vadd.f32 %v9143_v54, %v9142_v30  ;;  %v6483_v54 = vld [vmem:[#allocation2 + $0x16c] sm:$0xf] }
 0x2e9   : > { %v3883_v36 = vpop.f32.mrf.mxu2 }
 0x2ea   : > { %v3884_v28 = vadd.f32 %v3883_v36, %v3795_v38  ;;  %v3977_v48 = vpop.f32.mrf.mxu3  ;;  %v9147_v38 = vld [vmem:[#allocation32_spill] sm:$0xff] }
 0x2eb   : > { %v4549_v46 = vpop.f32.mrf.mxu1  ;;  %v3800_v36 = vadd.f32 %v9147_v38, %v9146_v4 }
 0x2ec   : > { %v8646_v20 = vadd.f32 %v4638_v59, %v4549_v46  ;;  %v8648_v61 = vadd.f32 %v3972_v45, %v3884_v28  ;;  %v9145_v45 = vld [vmem:[#allocation26_spill] sm:$0xff]  ;;  %v6103_v28 = vor.u32 %v6472_v21, %v6102_v24  ;;  %v4645_v3 = vpop.f32.mrf.mxu0  ;;  %v9153_v21 = vld [vmem:[#allocation27_spill] sm:$0xff] }
 0x2ee   : > { %4588 = vmatmul.bf16.gmra.mxu1 %v6091_v52 }
 0x2f1   : > { %v3885_v49 = vpop.f32.mrf.mxu2 }
 0x2f2   : > { %v8652_v33 = vadd.f32 %v3885_v49, %v3797_v58  ;;  %v8654_v35 = vpop.f32.mrf.mxu3  ;;  %v6152_v58 = vld [vmem:[#allocation2 + $0x174] sm:$0xf0] }
 0x2f3   : > { %v4551_v18 = vpop.f32.mrf.mxu1  ;;  %9144 = vst [vmem:[#allocation24_spill] sm:$0xff] %v8654_v35  ;;  %v9150_v49 = vld [vmem:[#allocation33_spill] sm:$0xff] }
 0x2f4   : > { %v8656_v59 = vadd.f32 %v4640_v17, %v4551_v18 }
 0x2f5   : > { %4697 = vmatmul.bf16.gmra.mxu0 %v6143_v34  ;;  %v9149_v34 = vld [vmem:[#allocation42_spill] sm:$0xff] }
 0x2f6   : > { %3927 = vmatmul.bf16.gmra.mxu2 %v9145_v45  ;;  %v3802_v18 = vadd.f32 %v9150_v49, %v9149_v34 }
 0x2f7   : > { %4021 = vmatmul.bf16.gmra.mxu3 %v8469_v26  ;;  %v6155_v26 = vor.u32 %v6483_v54, %v6152_v58 }
 0x2f9   : > { %v3888_v46 = vpop.f32.mrf.mxu2 }
 0x2fa   : > { %v3889_v44 = vadd.f32 %v3888_v46, %v3800_v36  ;;  %v3982_v37 = vpop.f32.mrf.mxu3  ;;  %v6475_v36 = vld [vmem:[#allocation2 + $0x128] sm:$0xf0]  ;;  %v9154_v46 = vld [vmem:[#allocation34_spill] sm:$0xff] }
 0x2fb   : > { %v4554_v52 = vpop.f32.mrf.mxu1 }
 0x2fc   : > { %v8662_v30 = vadd.f32 %v4643_v29, %v4554_v52  ;;  %v8664_v17 = vadd.f32 %v3977_v48, %v3889_v44  ;;  %v4648_v29 = vpop.f32.mrf.mxu0  ;;  %v6114_v48 = vld [vmem:[#allocation2 + $0x120] sm:$0xf]  ;;  %v3805_v52 = vadd.f32 %v9154_v46, %v8491_v60  ;;  %v6002_v46 = vld [vmem:[#allocation2 + $0x38] sm:$0xf] }
 0x2fd   : > { %v6115_v54 = vor.u32 %v6475_v36, %v6114_v48 }
 0x2fe   : > { %4593 = vmatmul.bf16.gmra.mxu1 %v6103_v28  ;;  %9148 = vst [vmem:[#allocation28_spill] sm:$0xff] %v8664_v17  ;;  %v6446_v17 = vld [vmem:[#allocation2 + $0x40] sm:$0xf0] }
 0x301   : > { %v3890_v45 = vpop.f32.mrf.mxu2 }
 0x302   : > { %v8668_v4 = vadd.f32 %v3890_v45, %v3802_v18  ;;  %v8670_v38 = vpop.f32.mrf.mxu3 }
 0x303   : > { %v4556_v35 = vpop.f32.mrf.mxu1  ;;  %9152 = vst [vmem:[#allocation29_spill] sm:$0xff] %v8670_v38 }
 0x304   : > { %9151 = vst [vmem:[#allocation36_spill] sm:$0xff] %v8668_v4  ;;  %v8672_v24 = vadd.f32 %v4645_v3, %v4556_v35  ;;  %v6519_v35 = vld [vmem:[#allocation11 + $0x18] sm:$0xff]  ;;  %v6486_v3 = vld [vmem:[#allocation2 + $0x184] sm:$0xf]  ;;  %v4650_v45 = vpop.f32.mrf.mxu0 }
 0x305   : > { %4702 = vmatmul.bf16.gmra.mxu0 %v6155_v26  ;;  %v6164_v26 = vld [vmem:[#allocation2 + $0x18c] sm:$0xf0]  ;;  %4995 = vmatpush.bf16.msra.mxu3 %v6519_v35 }
 0x306   : > { %3932 = vmatmul.bf16.gmra.mxu2 %v9153_v21  ;;  %v9156_v21 = vld [vmem:[#allocation35_spill] sm:$0xff]  ;;  %v6167_v4 = vor.u32 %v6486_v3, %v6164_v26 }
 0x307   : > { %v3807_v38 = vadd.f32 %v9156_v21, %v8496_v39 }
 0x309   : > { %v3893_v28 = vpop.f32.mrf.mxu2 }
 0x30a   : > { %v3894_v58 = vadd.f32 %v3893_v28, %v3805_v52  ;;  %v3987_v34 = vpop.f32.mrf.mxu3  ;;  %v6126_v28 = vld [vmem:[#allocation2 + $0x138] sm:$0xf] }
 0x30b   : > { %v4559_v44 = vpop.f32.mrf.mxu1 }
 0x30c   : > { %v8677_v49 = vadd.f32 %v4648_v29, %v4559_v44  ;;  %v8679_v18 = vadd.f32 %v3982_v37, %v3894_v58  ;;  %v6003_v37 = vor.u32 %v6446_v17, %v6002_v46  ;;  %v6478_v44 = vld [vmem:[#allocation2 + $0x140] sm:$0xf0]  ;;  %v9158_v58 = vld [vmem:[#allocation37_spill] sm:$0xff]  ;;  %v6014_v46 = vld [vmem:[#allocation2 + $0x50] sm:$0xf] }
 0x30d   : > { %v3810_v39 = vadd.f32 %v9158_v58, %v8505_v0  ;;  %v6127_v26 = vor.u32 %v6478_v44, %v6126_v28  ;;  %v6138_v28 = vld [vmem:[#allocation2 + $0x150] sm:$0xf]  ;;  %v6481_v44 = vld [vmem:[#allocation2 + $0x158] sm:$0xf0] }
 0x30e   : > { %4598 = vmatmul.bf16.gmra.mxu1 %v6115_v54  ;;  %9155 = vst [vmem:[#allocation25_spill] sm:$0xff] %v8679_v18  ;;  %v4653_v54 = vpop.f32.mrf.mxu0 }
 0x311   : > { %v3895_v60 = vpop.f32.mrf.mxu2 }
 0x312   : > { %v8683_v36 = vadd.f32 %v3895_v60, %v3807_v38  ;;  %v8685_v29 = vpop.f32.mrf.mxu3 }
 0x313   : > { %v4561_v48 = vpop.f32.mrf.mxu1  ;;  %9157 = vst [vmem:[#allocation30_spill] sm:$0xff] %v8685_v29 }
 0x314   : > { %v8687_v52 = vadd.f32 %v4650_v45, %v4561_v48  ;;  %v6449_v48 = vld [vmem:[#allocation2 + $0x58] sm:$0xf0] }
 0x315   : > { %4707 = vmatmul.bf16.gmra.mxu0 %v6167_v4  ;;  %v9159_v4 = vld [vmem:[#allocation39_spill] sm:$0xff]  ;;  %v6015_v0 = vor.u32 %v6449_v48, %v6014_v46  ;;  %v6452_v46 = vld [vmem:[#allocation2 + $0x70] sm:$0xf0] }
 0x316   : > { %4726 = vmatmul.bf16.vlgmr.msra.gmra.mxu2 %v6003_v37  ;;  %v3812_v17 = vadd.f32 %v9159_v4, %v8512_v47 }
 0x319   : > { %v3898_v35 = vpop.f32.mrf.mxu2 }
 0x31a   : > { %v3899_v21 = vadd.f32 %v3898_v35, %v3810_v39  ;;  %v3992_v18 = vpop.f32.mrf.mxu3 }
 0x31b   : > { %v4564_v3 = vpop.f32.mrf.mxu1 }
 0x31c   : > { %v8691_v38 = vadd.f32 %v4653_v54, %v4564_v3  ;;  %v8693_v60 = vadd.f32 %v3987_v34, %v3899_v21  ;;  %v9161_v54 = vld [vmem:[#allocation41_spill] sm:$0xff]  ;;  %v6139_v34 = vor.u32 %v6481_v44, %v6138_v28  ;;  %v9162_v21 = vld [vmem:[#allocation43_spill] sm:$0xff]  ;;  %v6484_v44 = vld [vmem:[#allocation2 + $0x170] sm:$0xf0] }
 0x31d   : > { %v3815_v58 = vadd.f32 %v9161_v54, %v8521_v62  ;;  %v3817_v4 = vadd.f32 %v9162_v21, %v8528_v57  ;;  %v6150_v28 = vld [vmem:[#allocation2 + $0x168] sm:$0xf]  ;;  %v9165_v54 = vld [vmem:[#allocation44_spill] sm:$0xff] }
 0x31e   : > { %4603 = vmatmul.bf16.gmra.mxu1 %v6127_v26  ;;  %v6518_v26 = vld [vmem:[#allocation11 + $0x10] sm:$0xff] }
 0x31f   : > { %4996 = vmatpush.bf16.msra.mxu3 %v6518_v26  ;;  %v9166_v26 = vld [vmem:[#allocation45_spill] sm:$0xff] }
 0x320   : > { %v3822_v21 = vadd.f32 %v9166_v26, %v8542_v19 }
 0x321   : > { %v3900_v45 = vpop.f32.mrf.mxu2 }
 0x322   : > { %v8697_v37 = vadd.f32 %v3900_v45, %v3812_v17  ;;  %v8699_v29 = vpop.f32.mrf.mxu3  ;;  %v6026_v45 = vld [vmem:[#allocation2 + $0x68] sm:$0xf] }
 0x323   : > { %9160 = vst [vmem:[#allocation38_spill] sm:$0xff] %v8699_v29  ;;  %v6027_v62 = vor.u32 %v6452_v46, %v6026_v45  ;;  %v6176_v29 = vld [vmem:[#allocation2 + $0x1a4] sm:$0xf0] }
 0x326   : > { %4731 = vmatmul.bf16.gmra.mxu2 %v6015_v0 }
 0x329   : > { %v3903_v39 = vpop.f32.mrf.mxu2 }
 0x32a   : > { %v3904_v35 = vadd.f32 %v3903_v39, %v3815_v58  ;;  %v3997_v3 = vpop.f32.mrf.mxu3  ;;  %v6151_v39 = vor.u32 %v6484_v44, %v6150_v28  ;;  %v6162_v28 = vld [vmem:[#allocation2 + $0x180] sm:$0xf]  ;;  %v6487_v44 = vld [vmem:[#allocation2 + $0x188] sm:$0xf0] }
 0x32c   : > { %v8703_v47 = vadd.f32 %v3992_v18, %v3904_v35  ;;  %v3820_v18 = vadd.f32 %v9165_v54, %v8535_v22  ;;  %v8721_v54 = vpop.f32.mrf.mxu0 }
 0x32e   : > { %4608 = vmatmul.bf16.gmra.mxu1 %v6139_v34 }
 0x331   : > { %v3905_v17 = vpop.f32.mrf.mxu2 }
 0x332   : > { %v8707_v48 = vadd.f32 %v3905_v17, %v3817_v4  ;;  %v8709_v0 = vpop.f32.mrf.mxu3  ;;  %v6038_v17 = vld [vmem:[#allocation2 + $0x80] sm:$0xf] }
 0x333   : > { %9164 = vst [vmem:[#allocation26_spill] sm:$0xff] %v8709_v0  ;;  %v6455_v0 = vld [vmem:[#allocation2 + $0x88] sm:$0xf0] }
 0x334   : > { %9163 = vst [vmem:[#allocation31_spill] sm:$0xff] %v8707_v48  ;;  %v6039_v46 = vor.u32 %v6455_v0, %v6038_v17  ;;  %v6517_v0 = vld [vmem:[#allocation11 + $0x8] sm:$0xff] }
 0x335   : > { %4997 = vmatpush.bf16.msra.mxu3 %v6517_v0  ;;  %v6050_v17 = vld [vmem:[#allocation2 + $0x98] sm:$0xf] }
 0x336   : > { %4736 = vmatmul.bf16.gmra.mxu2 %v6027_v62  ;;  %v6489_v62 = vld [vmem:[#allocation2 + $0x19c] sm:$0xf] }
 0x337   : > { %v6179_v22 = vor.u32 %v6489_v62, %v6176_v29  ;;  %v9168_v29 = vld [vmem:[#allocation47_spill] sm:$0xff] }
 0x339   : > { %v3908_v58 = vpop.f32.mrf.mxu2  ;;  %4712 = vmatmul.bf16.gmra.mxu0 %v6179_v22 }
 0x33a   : > { %v3909_v34 = vadd.f32 %v3908_v58, %v3820_v18  ;;  %v4002_v35 = vpop.f32.mrf.mxu3  ;;  %v6163_v58 = vor.u32 %v6487_v44, %v6162_v28  ;;  %v3830_v28 = vadd.f32 %v8537_v15, %v8571_v10  ;;  %v3835_v10 = vadd.f32 %v8555_v8, %v8589_v41 }
 0x33b   : > { %v3840_v8 = vadd.f32 %v8580_v43, %v8609_v55 }
 0x33c   : > { %v8713_v57 = vadd.f32 %v3997_v3, %v3909_v34  ;;  %v9167_v3 = vld [vmem:[#allocation46_spill] sm:$0xff] }
 0x33d   : > { %v3825_v19 = vadd.f32 %v9167_v3, %v8551_v2  ;;  %v6174_v2 = vld [vmem:[#allocation2 + $0x198] sm:$0xf]  ;;  %v6490_v3 = vld [vmem:[#allocation2 + $0x1a0] sm:$0xf0] }
 0x33e   : > { %4613 = vmatmul.bf16.gmra.mxu1 %v6151_v39 }
 0x341   : > { %v3910_v4 = vpop.f32.mrf.mxu2 }
 0x342   : > { %v8717_v45 = vadd.f32 %v3910_v4, %v3822_v21  ;;  %v8719_v48 = vpop.f32.mrf.mxu3  ;;  %v3827_v21 = vadd.f32 %v9168_v29, %v8560_v14 }
 0x346   : > { %4741 = vmatmul.bf16.gmra.mxu2 %v6039_v46  ;;  %v6458_v46 = vld [vmem:[#allocation2 + $0xa0] sm:$0xf0] }
 0x347   : > { %v6051_v22 = vor.u32 %v6458_v46, %v6050_v17 }
 0x349   : > { %v3913_v18 = vpop.f32.mrf.mxu2 }
 0x34a   : > { %v3914_v39 = vadd.f32 %v3913_v18, %v3825_v19  ;;  %v4007_v26 = vpop.f32.mrf.mxu3  ;;  %v6175_v19 = vor.u32 %v6490_v3, %v6174_v2 }
 0x34c   : > { %v8725_v34 = vadd.f32 %v4002_v35, %v3914_v39  ;;  %v9169_v39 = vld [vmem:[#allocation48_spill] sm:$0xff] }
 0x34d   : > { %v3832_v0 = vadd.f32 %v9169_v39, %v8578_v27  ;;  %v3837_v27 = vadd.f32 %v8568_v13, %v8598_v42  ;;  %v6086_v42 = vld [vmem:[#allocation2 + $0xe0] sm:$0xf] }
 0x34e   : > { %4618 = vmatmul.bf16.gmra.mxu1 %v6163_v58  ;;  %v8735_v58 = vpop.f32.mrf.mxu1 }
 0x351   : > { %v3915_v4 = vpop.f32.mrf.mxu2 }
 0x352   : > { %v8729_v62 = vadd.f32 %v3915_v4, %v3827_v21  ;;  %v8733_v35 = vpop.f32.mrf.mxu3  ;;  %v6062_v21 = vld [vmem:[#allocation2 + $0xb0] sm:$0xf]  ;;  %v6461_v4 = vld [vmem:[#allocation2 + $0xb8] sm:$0xf0] }
 0x353   : > { %v6063_v15 = vor.u32 %v6461_v4, %v6062_v21 }
 0x356   : > { %4746 = vmatmul.bf16.gmra.mxu2 %v6051_v22 }
 0x359   : > { %v3918_v44 = vpop.f32.mrf.mxu2 }
 0x35a   : > { %v3919_v18 = vadd.f32 %v3918_v44, %v3830_v28  ;;  %v4012_v46 = vpop.f32.mrf.mxu3 }
 0x35c   : > { %v8737_v14 = vadd.f32 %v4007_v26, %v3919_v18  ;;  %v6516_v26 = vld [vmem:[#allocation11] sm:$0xff] }
 0x35d   : > { %4998 = vmatpush.bf16.msra.mxu3 %v6516_v26  ;;  %v6464_v18 = vld [vmem:[#allocation2 + $0xd0] sm:$0xf0]  ;;  %v3845_v26 = vadd.f32 %v8604_v23, %v8629_v5  ;;  %v8776_v5 = vld [vmem:[%s8984_s6] ss:$0 sm:$0xff] }
 0x35e   : > { %4623 = vmatmul.bf16.gmra.mxu1 %v6175_v19  ;;  %v6074_v19 = vld [vmem:[#allocation2 + $0xc8] sm:$0xf] }
 0x361   : > { %v3920_v29 = vpop.f32.mrf.mxu2 }
 0x362   : > { %v8741_v17 = vadd.f32 %v3920_v29, %v3832_v0  ;;  %v8747_v28 = vpop.f32.mrf.mxu3  ;;  %v6075_v0 = vor.u32 %v6464_v18, %v6074_v19  ;;  %v6098_v19 = vld [vmem:[#allocation2 + $0xf8] sm:$0xf]  ;;  %v6470_v18 = vld [vmem:[#allocation2 + $0x100] sm:$0xf0] }
 0x366   : > { %4751 = vmatmul.bf16.gmra.mxu2 %v6063_v15 }
 0x369   : > { %v3923_v22 = vpop.f32.mrf.mxu2 }
 0x36a   : > { %v3924_v2 = vadd.f32 %v3923_v22, %v3835_v10  ;;  %v4017_v29 = vpop.f32.mrf.mxu3  ;;  %v6467_v10 = vld [vmem:[#allocation2 + $0xe8] sm:$0xf0] }
 0x36c   : > { %v8745_v3 = vadd.f32 %v4012_v46, %v3924_v2  ;;  %v3842_v46 = vadd.f32 %v8593_v40, %v8620_v1  ;;  %v6087_v2 = vor.u32 %v6467_v10, %v6086_v42  ;;  %v3847_v40 = vadd.f32 %v8615_v7, %v8640_v12  ;;  %v6473_v7 = vld [vmem:[#allocation2 + $0x118] sm:$0xf0] }
 0x371   : > { %v3925_v44 = vpop.f32.mrf.mxu2 }
 0x372   : > { %v8751_v39 = vadd.f32 %v3925_v44, %v3837_v27  ;;  %v8759_v15 = vpop.f32.mrf.mxu3 }
 0x376   : > { %4756 = vmatmul.bf16.gmra.mxu2 %v6075_v0 }
 0x379   : > { %v3928_v41 = vpop.f32.mrf.mxu2 }
 0x37a   : > { %v3929_v21 = vadd.f32 %v3928_v41, %v3840_v8  ;;  %v4022_v27 = vpop.f32.mrf.mxu3 }
 0x37c   : > { %v8755_v4 = vadd.f32 %v4017_v29, %v3929_v21  ;;  %v6099_v29 = vor.u32 %v6470_v18, %v6098_v19  ;;  %v6122_v18 = vld [vmem:[#allocation2 + $0x128] sm:$0xf] }
 0x381   : > { %v3930_v13 = vpop.f32.mrf.mxu2 }
 0x382   : > { %v8761_v22 = vadd.f32 %v3930_v13, %v3842_v46  ;;  %v6110_v46 = vld [vmem:[#allocation2 + $0x110] sm:$0xf] }
 0x383   : > { %v6111_v10 = vor.u32 %v6473_v7, %v6110_v46 }
 0x386   : > { %4761 = vmatmul.bf16.gmra.mxu2 %v6087_v2 }
 0x389   : > { %v3933_v43 = vpop.f32.mrf.mxu2 }
 0x38a   : > { %v3934_v55 = vadd.f32 %v3933_v43, %v3845_v26  ;;  %v4658_v43 = vpop.f32.mrf.mxu0 }
 0x38c   : > { %v8765_v44 = vadd.f32 %v4022_v27, %v3934_v55 }
 0x391   : > { %v3935_v1 = vpop.f32.mrf.mxu2 }
 0x392   : > { %v8769_v0 = vadd.f32 %v3935_v1, %v3847_v40 }
 0x396   : > { %4766 = vmatmul.bf16.gmra.mxu2 %v6099_v29 }
 0x399   : > { %v4727_v8 = vpop.f32.mrf.mxu2 }
 0x39a   : > { %v4728_v41 = vadd.f32 %v4727_v8, %v8646_v20  ;;  %v8782_v20 = vpop.f32.mrf.mxu1  ;;  %v4660_v8 = vpop.f32.mrf.mxu0 }
 0x39c   : > { %v4807_v23 = vadd.f32 %v4728_v41, %v8553_v63 }
 0x39e   : > { %v4843_v13 = vadd.f32 %v8776_v5, %v4807_v23 }
 0x3a0   : > { %v4875_v63 = vmax.f32 %v4843_v13, 0.0 }
 0x3a1   : > { %v4729_v21 = vpop.f32.mrf.mxu2 }
 0x3a2   : > { %v4730_v12 = vadd.f32 %v4729_v21, %v8656_v59  ;;  %v4571_v59 = vpop.f32.mrf.mxu1 }
 0x3a4   : > { %v4808_v42 = vadd.f32 %v4730_v12, %v8562_v51  ;;  %v6476_v51 = vld [vmem:[#allocation2 + $0x130] sm:$0xf0] }
 0x3a5   : > { %v6123_v21 = vor.u32 %v6476_v51, %v6122_v18 }
 0x3a6   : > { %v4844_v2 = vadd.f32 %v8776_v5, %v4808_v42  ;;  %4771 = vmatmul.bf16.gmra.mxu2 %v6111_v10 }
 0x3a8   : > { %v4876_v26 = vmax.f32 %v4844_v2, 0.0 }
 0x3a9   : > { %v4732_v55 = vpop.f32.mrf.mxu2 }
 0x3aa   : > { %v4907_v27 = vpack.c.bf16 %v4876_v26, %v4875_v63  ;;  %v4733_v40 = vadd.f32 %v4732_v55, %v8662_v30  ;;  %v4574_v42 = vpop.f32.mrf.mxu1  ;;  %v6134_v63 = vld [vmem:[#allocation2 + $0x140] sm:$0xf]  ;;  %v6479_v26 = vld [vmem:[#allocation2 + $0x148] sm:$0xf0] }
 0x3ac   : > { %v4809_v1 = vadd.f32 %v4733_v40, %v8573_v9  ;;  %4999 = vmatmul.bf16.vlgmr.msra.gmra.mxu3 %v4907_v27  ;;  %v6135_v40 = vor.u32 %v6479_v26, %v6134_v63 }
 0x3ae   : > { %v4845_v41 = vadd.f32 %v8776_v5, %v4809_v1 }
 0x3b0   : > { %v4877_v7 = vmax.f32 %v4845_v41, 0.0 }
 0x3b1   : > { %v4734_v19 = vpop.f32.mrf.mxu2 }
 0x3b2   : > { %v4735_v29 = vadd.f32 %v4734_v19, %v8672_v24  ;;  %v4663_v24 = vpop.f32.mrf.mxu0  ;;  %v4576_v1 = vpop.f32.mrf.mxu1 }
 0x3b4   : > { %v4810_v23 = vadd.f32 %v4735_v29, %v8582_v25 }
 0x3b6   : > { %v4846_v46 = vadd.f32 %v8776_v5, %v4810_v23  ;;  %4776 = vmatmul.bf16.gmra.mxu2 %v6123_v21  ;;  %v4656_v21 = vadd.f32 %v8721_v54, %v8735_v58 }
 0x3b8   : > { %v4878_v30 = vmax.f32 %v4846_v46, 0.0 }
 0x3b9   : > { %v4737_v12 = vpop.f32.mrf.mxu2 }
 0x3ba   : > { %v4738_v9 = vadd.f32 %v4737_v12, %v8677_v49  ;;  %v4908_v13 = vpack.c.bf16 %v4878_v30, %v4877_v7  ;;  %v4665_v49 = vpop.f32.mrf.mxu0  ;;  %v6146_v7 = vld [vmem:[#allocation2 + $0x158] sm:$0xf]  ;;  %v6482_v30 = vld [vmem:[#allocation2 + $0x160] sm:$0xf0] }
 0x3bc   : > { %v4811_v10 = vadd.f32 %v4738_v9, %v8591_v16  ;;  %5004 = vmatmul.bf16.gmra.mxu3 %v4908_v13 }
 0x3be   : > { %v4847_v55 = vadd.f32 %v8776_v5, %v4811_v10  ;;  %v6147_v10 = vor.u32 %v6482_v30, %v6146_v7 }
 0x3c0   : > { %v4879_v18 = vmax.f32 %v4847_v55, 0.0 }
 0x3c1   : > { %v4739_v2 = vpop.f32.mrf.mxu2 }
 0x3c2   : > { %v4740_v25 = vadd.f32 %v4739_v2, %v8687_v52  ;;  %v4579_v52 = vpop.f32.mrf.mxu1 }
 0x3c4   : > { %v4812_v27 = vadd.f32 %v4740_v25, %v8600_v31  ;;  %v4668_v31 = vpop.f32.mrf.mxu0  ;;  %v4659_v25 = vadd.f32 %v4658_v43, %v8782_v20 }
 0x3c6   : > { %v4848_v19 = vadd.f32 %v8776_v5, %v4812_v27  ;;  %4781 = vmatmul.bf16.gmra.mxu2 %v6135_v40  ;;  %v4661_v27 = vadd.f32 %v4660_v8, %v4571_v59 }
 0x3c8   : > { %v4880_v51 = vmax.f32 %v4848_v19, 0.0 }
 0x3c9   : > { %v4742_v16 = vpop.f32.mrf.mxu2 }
 0x3ca   : > { %v4743_v29 = vadd.f32 %v4742_v16, %v8691_v38  ;;  %v4909_v41 = vpack.c.bf16 %v4880_v51, %v4879_v18  ;;  %v4581_v63 = vpop.f32.mrf.mxu1  ;;  %v6158_v18 = vld [vmem:[#allocation2 + $0x170] sm:$0xf]  ;;  %v3970_v51 = vadd.f32 %v8617_v50, %v8635_v56  ;;  %v4666_v50 = vadd.f32 %v4665_v49, %v4576_v1 }
 0x3cc   : > { %v4813_v23 = vadd.f32 %v4743_v29, %v8611_v32  ;;  %5009 = vmatmul.bf16.gmra.mxu3 %v4909_v41  ;;  %v4670_v58 = vpop.f32.mrf.mxu0 }
 0x3ce   : > { %v4849_v9 = vadd.f32 %v8776_v5, %v4813_v23 }
 0x3d0   : > { %v4881_v2 = vmax.f32 %v4849_v9, 0.0 }
 0x3d1   : > { %v4744_v46 = vpop.f32.mrf.mxu2 }
 0x3d2   : > { %v4745_v12 = vadd.f32 %v4744_v46, %v4656_v21  ;;  %v4584_v29 = vpop.f32.mrf.mxu1 }
 0x3d4   : > { %v4814_v13 = vadd.f32 %v4745_v12, %v8622_v6  ;;  %v6485_v6 = vld [vmem:[#allocation2 + $0x178] sm:$0xf0]  ;;  %v4673_v20 = vpop.f32.mrf.mxu0 }
 0x3d5   : > { %v6159_v21 = vor.u32 %v6485_v6, %v6158_v18  ;;  %v6182_v18 = vld [vmem:[#allocation2 + $0x1a0] sm:$0xf]  ;;  %v6491_v6 = vld [vmem:[#allocation2 + $0x1a8] sm:$0xf0] }
 0x3d6   : > { %v4850_v38 = vadd.f32 %v8776_v5, %v4814_v13  ;;  %4786 = vmatmul.bf16.gmra.mxu2 %v6147_v10  ;;  %v6170_v10 = vld [vmem:[#allocation2 + $0x188] sm:$0xf] }
 0x3d8   : > { %v4882_v32 = vmax.f32 %v4850_v38, 0.0  ;;  %v6488_v38 = vld [vmem:[#allocation2 + $0x190] sm:$0xf0] }
 0x3d9   : > { %v4747_v26 = vpop.f32.mrf.mxu2 }
 0x3da   : > { %v4910_v54 = vpack.c.bf16 %v4882_v32, %v4881_v2  ;;  %v4748_v55 = vadd.f32 %v4747_v26, %v4659_v25  ;;  %v4586_v12 = vpop.f32.mrf.mxu1  ;;  %v3975_v2 = vadd.f32 %v8637_v11, %v8652_v33  ;;  %v4671_v11 = vadd.f32 %v4670_v58, %v4581_v63  ;;  %v9170_v33 = vld [vmem:[#allocation28_spill] sm:$0xff] }
 0x3db   : > { %v4674_v63 = vadd.f32 %v4673_v20, %v4584_v29 }
 0x3dc   : > { %5014 = vmatmul.bf16.gmra.mxu3 %v4910_v54  ;;  %v4815_v40 = vadd.f32 %v4748_v55, %v8631_v53  ;;  %v4664_v53 = vadd.f32 %v4663_v24, %v4574_v42  ;;  %v4675_v9 = vpop.f32.mrf.mxu0  ;;  %v6171_v54 = vor.u32 %v6488_v38, %v6170_v10 }
 0x3dd   : > { %v4676_v38 = vadd.f32 %v4675_v9, %v4586_v12 }
 0x3de   : > { %v4851_v41 = vadd.f32 %v8776_v5, %v4815_v40 }
 0x3e0   : > { %v4883_v46 = vmax.f32 %v4851_v41, 0.0 }
 0x3e1   : > { %v4749_v19 = vpop.f32.mrf.mxu2 }
 0x3e2   : > { %v4750_v16 = vadd.f32 %v4749_v19, %v4661_v27  ;;  %v4589_v24 = vpop.f32.mrf.mxu1 }
 0x3e4   : > { %v4816_v23 = vadd.f32 %v4750_v16, %v3970_v51  ;;  %v4678_v1 = vpop.f32.mrf.mxu0 }
 0x3e6   : > { %v4852_v43 = vadd.f32 %v8776_v5, %v4816_v23  ;;  %4791 = vmatmul.bf16.gmra.mxu2 %v6159_v21  ;;  %v9171_v23 = vld [vmem:[#allocation36_spill] sm:$0xff] }
 0x3e7   : > { %v9172_v21 = vld [vmem:[#allocation24_spill] sm:$0xff] }
 0x3e8   : > { %v4884_v59 = vmax.f32 %v4852_v43, 0.0  ;;  %v3980_v43 = vadd.f32 %v9172_v21, %v9171_v23 }
 0x3e9   : > { %v4752_v8 = vpop.f32.mrf.mxu2 }
 0x3ea   : > { %v4911_v7 = vpack.c.bf16 %v4884_v59, %v4883_v46  ;;  %v4753_v30 = vadd.f32 %v4752_v8, %v4664_v53  ;;  %v4591_v16 = vpop.f32.mrf.mxu1  ;;  %v6183_v59 = vor.u32 %v6491_v6, %v6182_v18  ;;  %v4679_v18 = vadd.f32 %v4678_v1, %v4589_v24  ;;  %v8829_v24 = vpop.f32.mrf.mxu3 }
 0x3ec   : > { %5019 = vmatmul.bf16.gmra.mxu3 %v4911_v7  ;;  %v4817_v56 = vadd.f32 %v4753_v30, %v8648_v61  ;;  %v4669_v61 = vadd.f32 %v4668_v31, %v4579_v52  ;;  %v4680_v8 = vpop.f32.mrf.mxu0 }
 0x3ee   : > { %v4853_v26 = vadd.f32 %v8776_v5, %v4817_v56 }
 0x3f0   : > { %v4885_v55 = vmax.f32 %v4853_v26, 0.0 }
 0x3f1   : > { %v4754_v13 = vpop.f32.mrf.mxu2 }
 0x3f2   : > { %v4755_v32 = vadd.f32 %v4754_v13, %v4666_v50  ;;  %v4594_v56 = vpop.f32.mrf.mxu1 }
 0x3f4   : > { %v4818_v25 = vadd.f32 %v4755_v32, %v3975_v2  ;;  %v4683_v10 = vpop.f32.mrf.mxu0  ;;  %v9173_v2 = vld [vmem:[#allocation25_spill] sm:$0xff] }
 0x3f6   : > { %v4854_v42 = vadd.f32 %v8776_v5, %v4818_v25  ;;  %4796 = vmatmul.bf16.gmra.mxu2 %v6171_v54  ;;  %v9174_v25 = vld [vmem:[#allocation29_spill] sm:$0xff] }
 0x3f7   : > { %v3985_v54 = vadd.f32 %v9174_v25, %v8683_v36 }
 0x3f8   : > { %v4886_v27 = vmax.f32 %v4854_v42, 0.0 }
 0x3f9   : > { %v4757_v49 = vpop.f32.mrf.mxu2 }
 0x3fa   : > { %v4912_v40 = vpack.c.bf16 %v4886_v27, %v4885_v55  ;;  %v4758_v19 = vadd.f32 %v4757_v49, %v4669_v61  ;;  %v4596_v49 = vpop.f32.mrf.mxu1 }
 0x3fc   : > { %5024 = vmatmul.bf16.gmra.mxu3 %v4912_v40  ;;  %v4819_v51 = vadd.f32 %v4758_v19, %v9170_v33  ;;  %v4685_v29 = vpop.f32.mrf.mxu0 }
 0x3fe   : > { %v4855_v53 = vadd.f32 %v8776_v5, %v4819_v51 }
 0x400   : > { %v4887_v31 = vmax.f32 %v4855_v53, 0.0 }
 0x401   : > { %v4759_v41 = vpop.f32.mrf.mxu2 }
 0x402   : > { %v4760_v46 = vadd.f32 %v4759_v41, %v4671_v11  ;;  %v4599_v9 = vpop.f32.mrf.mxu1  ;;  %v4681_v11 = vadd.f32 %v4680_v8, %v4591_v16  ;;  %v9175_v41 = vld [vmem:[#allocation30_spill] sm:$0xff]  ;;  %v4684_v8 = vadd.f32 %v4683_v10, %v4594_v56 }
 0x403   : > { %v3990_v23 = vadd.f32 %v9175_v41, %v8697_v37  ;;  %v4686_v37 = vadd.f32 %v4685_v29, %v4596_v49 }
 0x404   : > { %v4820_v7 = vadd.f32 %v4760_v46, %v3980_v43  ;;  %v4688_v36 = vpop.f32.mrf.mxu0 }
 0x406   : > { %v4856_v52 = vadd.f32 %v8776_v5, %v4820_v7  ;;  %4801 = vmatmul.bf16.gmra.mxu2 %v6183_v59 }
 0x408   : > { %v4888_v30 = vmax.f32 %v4856_v52, 0.0 }
 0x409   : > { %v4762_v50 = vpop.f32.mrf.mxu2 }
 0x40a   : > { %v4913_v58 = vpack.c.bf16 %v4888_v30, %v4887_v31  ;;  %v4763_v13 = vadd.f32 %v4762_v50, %v4674_v63  ;;  %v4601_v7 = vpop.f32.mrf.mxu1  ;;  %v8835_v63 = vld [vmem:[%s8985_s7] ss:$0 sm:$0xff] }
 0x40c   : > { %5029 = vmatmul.bf16.gmra.mxu3 %v4913_v58  ;;  %v4821_v32 = vadd.f32 %v4763_v13, %v9173_v2  ;;  %v4690_v52 = vpop.f32.mrf.mxu0  ;;  %v462_v58 = vld [vmem:[%s7192_s14] sm:$0xff]   ;;  %v9177_v2 = vld [vmem:[#allocation38_spill] sm:$0xff] }
 0x40e   : > { %v4857_v55 = vadd.f32 %v8776_v5, %v4821_v32 }
 0x410   : > { %v4889_v20 = vmax.f32 %v4857_v55, 0.0 }
 0x411   : > { %v4764_v26 = vpop.f32.mrf.mxu2 }
 0x412   : > { %v4765_v42 = vadd.f32 %v4764_v26, %v4676_v38  ;;  %v9176_v38 = vld [vmem:[#allocation31_spill] sm:$0xff]  ;;  %v4604_v56 = vpop.f32.mrf.mxu1 }
 0x413   : > { %v3995_v32 = vadd.f32 %v9177_v2, %v9176_v38 }
 0x414   : > { %v4822_v27 = vadd.f32 %v4765_v42, %v3985_v54  ;;  %v5080_v54 = vunpack.c.l.bf16 %v462_v58  ;;  %v4693_v55 = vpop.f32.mrf.mxu0 }
 0x416   : > { %v4858_v61 = vadd.f32 %v8776_v5, %v4822_v27  ;;  %v5081_v27 = vunpack.c.h.bf16 %v462_v58 }
 0x418   : > { %v4890_v40 = vmax.f32 %v4858_v61, 0.0 }
 0x419   : > { %v4767_v19 = vpop.f32.mrf.mxu2 }
 0x41a   : > { %v4914_v6 = vpack.c.bf16 %v4890_v40, %v4889_v20  ;;  %v4768_v12 = vadd.f32 %v4767_v19, %v4679_v18  ;;  %v4689_v18 = vadd.f32 %v4688_v36, %v4599_v9  ;;  %v4606_v41 = vpop.f32.mrf.mxu1  ;;  %v9178_v36 = vld [vmem:[#allocation26_spill] sm:$0xff] }
 0x41c   : > { %5034 = vmatmul.bf16.gmra.mxu3 %v4914_v6  ;;  %v4823_v33 = vadd.f32 %v4768_v12, %v8693_v60 }
 0x41e   : > { %v4859_v43 = vadd.f32 %v8776_v5, %v4823_v33 }
 0x420   : > { %v4891_v1 = vmax.f32 %v4859_v43, 0.0 }
 0x421   : > { %v4769_v51 = vpop.f32.mrf.mxu2 }
 0x422   : > { %v4770_v21 = vadd.f32 %v4769_v51, %v4681_v11 }
 0x424   : > { %v4824_v46 = vadd.f32 %v4770_v21, %v3990_v23  ;;  %v4695_v21 = vpop.f32.mrf.mxu0 }
 0x426   : > { %v4860_v59 = vadd.f32 %v8776_v5, %v4824_v46  ;;  %v4691_v46 = vadd.f32 %v4690_v52, %v4601_v7 }
 0x428   : > { %v4892_v53 = vmax.f32 %v4860_v59, 0.0 }
 0x429   : > { %v4772_v16 = vpop.f32.mrf.mxu2 }
 0x42a   : > { %v4915_v60 = vpack.c.bf16 %v4892_v53, %v4891_v1  ;;  %v4773_v31 = vadd.f32 %v4772_v16, %v4684_v8  ;;  %v464_v1 = vld [vmem:[%s7192_s14 + $0x8] sm:$0xff]   ;;  %v4000_v53 = vadd.f32 %v9178_v36, %v8717_v45 }
 0x42b   : > { %v5083_v52 = vunpack.c.h.bf16 %v464_v1 }
 0x42c   : > { %5039 = vmatmul.bf16.gmra.mxu3 %v4915_v60  ;;  %v4825_v50 = vadd.f32 %v4773_v31, %v8703_v47  ;;  %v5082_v31 = vunpack.c.l.bf16 %v464_v1  ;;  %v4698_v45 = vpop.f32.mrf.mxu0 }
 0x42e   : > { %v4861_v10 = vadd.f32 %v8776_v5, %v4825_v50 }
 0x42f   : > { %v5000_v30 = vpop.f32.mrf.mxu3 }
 0x430   : > { %v5001_v25 = vadd.f32 %v8835_v63, %v5000_v30  ;;  %v4893_v61 = vmax.f32 %v4861_v10, 0.0 }
 0x431   : > { %v4774_v13 = vpop.f32.mrf.mxu2 }
 0x432   : > { %v4775_v26 = vadd.f32 %v4774_v13, %v4686_v37  ;;  %v5112_v29 = vadd.f32 %v5080_v54, %v5001_v25  ;;  %v4609_v37 = vpop.f32.mrf.mxu1 }
 0x434   : > { %v4826_v42 = vadd.f32 %v4775_v26, %v3995_v32  ;;  %v5144_v11 = vmax.f32 %v5112_v29, 0.0  ;;  %v4694_v32 = vadd.f32 %v4693_v55, %v4604_v56  ;;  %v4700_v56 = vpop.f32.mrf.mxu0 }
 0x436   : > { %v4862_v47 = vadd.f32 %v8776_v5, %v4826_v42 }
 0x437   : > { %v5002_v49 = vpop.f32.mrf.mxu3 }
 0x438   : > { %v4894_v20 = vmax.f32 %v4862_v47, 0.0  ;;  %v5003_v40 = vadd.f32 %v8835_v63, %v5002_v49  ;;  %v4696_v49 = vadd.f32 %v4695_v21, %v4606_v41 }
 0x439   : > { %v4777_v19 = vpop.f32.mrf.mxu2 }
 0x43a   : > { %v5113_v6 = vadd.f32 %v5081_v27, %v5003_v40  ;;  %v4916_v12 = vpack.c.bf16 %v4894_v20, %v4893_v61  ;;  %v4778_v51 = vadd.f32 %v4777_v19, %v4689_v18  ;;  %v4611_v29 = vpop.f32.mrf.mxu1  ;;  %v466_v20 = vld [vmem:[%s7192_s14 + $0x10] sm:$0xff]   ;;  %v4005_v19 = vadd.f32 %v8719_v48, %v8729_v62 }
 0x43b   : > { %v4699_v62 = vadd.f32 %v4698_v45, %v4609_v37 }
 0x43c   : > { %v5145_v33 = vmax.f32 %v5113_v6, 0.0  ;;  %5044 = vmatmul.bf16.gmra.mxu3 %v4916_v12  ;;  %v4827_v59 = vadd.f32 %v4778_v51, %v8713_v57  ;;  %v5084_v12 = vunpack.c.l.bf16 %v466_v20  ;;  %v5085_v51 = vunpack.c.h.bf16 %v466_v20 }
 0x43e   : > { %v6528_v23 = vpack.c.bf16 %v5145_v33, %v5144_v11  ;;  %v4863_v8 = vadd.f32 %v8776_v5, %v4827_v59 }
 0x43f   : > { %v5005_v43 = vpop.f32.mrf.mxu3 }
 0x440   : > { %6529 = vst [vmem:[%s8846_s15] sm:$0xff] %v6528_v23   ;;  %v5006_v60 = vadd.f32 %v8835_v63, %v5005_v43  ;;  %v4895_v58 = vmax.f32 %v4863_v8, 0.0 }
 0x441   : > { %v4779_v9 = vpop.f32.mrf.mxu2 }
 0x442   : > { %v4780_v16 = vadd.f32 %v4779_v9, %v4691_v46  ;;  %v5114_v57 = vadd.f32 %v5082_v31, %v5006_v60  ;;  %v4614_v1 = vpop.f32.mrf.mxu1  ;;  %v4701_v31 = vadd.f32 %v4700_v56, %v4611_v29 }
 0x444   : > { %v4828_v30 = vadd.f32 %v4780_v16, %v4000_v53  ;;  %v5146_v25 = vmax.f32 %v5114_v57, 0.0  ;;  %v4703_v16 = vpop.f32.mrf.mxu0 }
 0x446   : > { %v4864_v7 = vadd.f32 %v8776_v5, %v4828_v30 }
 0x447   : > { %v5007_v50 = vpop.f32.mrf.mxu3 }
 0x448   : > { %v4896_v13 = vmax.f32 %v4864_v7, 0.0  ;;  %v5008_v38 = vadd.f32 %v8835_v63, %v5007_v50  ;;  %v468_v7 = vld [vmem:[%s7192_s14 + $0x18] sm:$0xff]   ;;  %v4010_v50 = vadd.f32 %v8733_v35, %v8741_v17  ;;  %v4704_v17 = vadd.f32 %v4703_v16, %v4614_v1 }
 0x449   : > { %v4782_v2 = vpop.f32.mrf.mxu2 }
 0x44a   : > { %v5115_v26 = vadd.f32 %v5083_v52, %v5008_v38  ;;  %v4917_v10 = vpack.c.bf16 %v4896_v13, %v4895_v58  ;;  %v4783_v42 = vadd.f32 %v4782_v2, %v4694_v32  ;;  %v5086_v13 = vunpack.c.l.bf16 %v468_v7  ;;  %v4616_v45 = vpop.f32.mrf.mxu1 }
 0x44b   : > { %v5087_v32 = vunpack.c.h.bf16 %v468_v7 }
 0x44c   : > { %v5147_v54 = vmax.f32 %v5115_v26, 0.0  ;;  %5049 = vmatmul.bf16.gmra.mxu3 %v4917_v10  ;;  %v4829_v61 = vadd.f32 %v4783_v42, %v8725_v34  ;;  %v4705_v26 = vpop.f32.mrf.mxu0 }
 0x44e   : > { %v6533_v47 = vpack.c.bf16 %v5147_v54, %v5146_v25  ;;  %v4865_v55 = vadd.f32 %v8776_v5, %v4829_v61 }
 0x44f   : > { %v5010_v27 = vpop.f32.mrf.mxu3 }
 0x450   : > { %6605 = vst [vmem:[%s8846_s15 + $0x8] sm:$0xff] %v6533_v47   ;;  %v5011_v6 = vadd.f32 %v8835_v63, %v5010_v27  ;;  %v4897_v23 = vmax.f32 %v4865_v55, 0.0 }
 0x451   : > { %v4784_v40 = vpop.f32.mrf.mxu2 }
 0x452   : > { %v4785_v18 = vadd.f32 %v4784_v40, %v4696_v49  ;;  %v5116_v34 = vadd.f32 %v5084_v12, %v5011_v6  ;;  %v4619_v40 = vpop.f32.mrf.mxu1  ;;  %v470_v6 = vld [vmem:[%s7192_s14 + $0x20] sm:$0xff]  }
 0x454   : > { %v4830_v11 = vadd.f32 %v4785_v18, %v4005_v19  ;;  %v5148_v9 = vmax.f32 %v5116_v34, 0.0  ;;  %v4706_v18 = vadd.f32 %v4705_v26, %v4616_v45  ;;  %v4708_v55 = vpop.f32.mrf.mxu0 }
 0x456   : > { %v4866_v33 = vadd.f32 %v8776_v5, %v4830_v11  ;;  %v4015_v11 = vadd.f32 %v8747_v28, %v8751_v39  ;;  %v4709_v39 = vadd.f32 %v4708_v55, %v4619_v40  ;;  %v474_v55 = vld [vmem:[%s7192_s14 + $0x30] sm:$0xff]  }
 0x457   : > { %v5012_v41 = vpop.f32.mrf.mxu3 }
 0x458   : > { %v4898_v21 = vmax.f32 %v4866_v33, 0.0  ;;  %v5013_v43 = vadd.f32 %v8835_v63, %v5012_v41 }
 0x459   : > { %v4787_v48 = vpop.f32.mrf.mxu2 }
 0x45a   : > { %v5117_v46 = vadd.f32 %v5085_v51, %v5013_v43  ;;  %v4918_v59 = vpack.c.bf16 %v4898_v21, %v4897_v23  ;;  %v4788_v53 = vadd.f32 %v4787_v48, %v4699_v62  ;;  %v5088_v23 = vunpack.c.l.bf16 %v470_v6  ;;  %v4621_v1 = vpop.f32.mrf.mxu1 }
 0x45b   : > { %v5089_v43 = vunpack.c.h.bf16 %v470_v6 }
 0x45c   : > { %v5149_v36 = vmax.f32 %v5117_v46, 0.0  ;;  %5054 = vmatmul.bf16.gmra.mxu3 %v4918_v59  ;;  %v4831_v30 = vadd.f32 %v4788_v53, %v8737_v14  ;;  %v4710_v53 = vpop.f32.mrf.mxu0 }
 0x45d   : > { %v4711_v7 = vadd.f32 %v4710_v53, %v4621_v1 }
 0x45e   : > { %v6538_v8 = vpack.c.bf16 %v5149_v36, %v5148_v9  ;;  %v4867_v58 = vadd.f32 %v8776_v5, %v4831_v30 }
 0x45f   : > { %v5015_v60 = vpop.f32.mrf.mxu3 }
 0x460   : > { %6606 = vst [vmem:[%s8846_s15 + $0x10] sm:$0xff] %v6538_v8   ;;  %v5016_v57 = vadd.f32 %v8835_v63, %v5015_v60  ;;  %v4899_v25 = vmax.f32 %v4867_v58, 0.0  ;;  %v4020_v58 = vadd.f32 %v8759_v15, %v8761_v22 }
 0x461   : > { %v4789_v52 = vpop.f32.mrf.mxu2 }
 0x462   : > { %v4790_v37 = vadd.f32 %v4789_v52, %v4701_v31  ;;  %v5118_v14 = vadd.f32 %v5086_v13, %v5016_v57  ;;  %v4624_v13 = vpop.f32.mrf.mxu1 }
 0x464   : > { %v4832_v38 = vadd.f32 %v4790_v37, %v4010_v50  ;;  %v5150_v49 = vmax.f32 %v5118_v14, 0.0  ;;  %v472_v50 = vld [vmem:[%s7192_s14 + $0x28] sm:$0xff]  }
 0x466   : > { %v4868_v2 = vadd.f32 %v8776_v5, %v4832_v38  ;;  %v4713_v38 = vpop.f32.mrf.mxu0 }
 0x467   : > { %v5017_v10 = vpop.f32.mrf.mxu3  ;;  %v4714_v22 = vadd.f32 %v4713_v38, %v4624_v13 }
 0x468   : > { %v4900_v54 = vmax.f32 %v4868_v2, 0.0  ;;  %v5018_v42 = vadd.f32 %v8835_v63, %v5017_v10 }
 0x469   : > { %v4792_v35 = vpop.f32.mrf.mxu2 }
 0x46a   : > { %v5119_v47 = vadd.f32 %v5087_v32, %v5018_v42  ;;  %v4919_v27 = vpack.c.bf16 %v4900_v54, %v4899_v25  ;;  %v4793_v29 = vadd.f32 %v4792_v35, %v4704_v17  ;;  %v5090_v32 = vunpack.c.l.bf16 %v472_v50 }
 0x46b   : > { %v5091_v25 = vunpack.c.h.bf16 %v472_v50  ;;  %v478_v50 = vld [vmem:[%s7192_s14 + $0x40] sm:$0xff]  }
 0x46c   : > { %v5151_v61 = vmax.f32 %v5119_v47, 0.0  ;;  %5059 = vmatmul.bf16.gmra.mxu3 %v4919_v27  ;;  %v4833_v56 = vadd.f32 %v4793_v29, %v8745_v3  ;;  %v4626_v29 = vpop.f32.mrf.mxu1 }
 0x46e   : > { %v6543_v20 = vpack.c.bf16 %v5151_v61, %v5150_v49  ;;  %v4869_v51 = vadd.f32 %v8776_v5, %v4833_v56 }
 0x46f   : > { %v5020_v19 = vpop.f32.mrf.mxu3 }
 0x470   : > { %6607 = vst [vmem:[%s8846_s15 + $0x18] sm:$0xff] %v6543_v20   ;;  %v5021_v41 = vadd.f32 %v8835_v63, %v5020_v19  ;;  %v4901_v62 = vmax.f32 %v4869_v51, 0.0  ;;  %v4715_v20 = vpop.f32.mrf.mxu0 }
 0x471   : > { %v4794_v12 = vpop.f32.mrf.mxu2 }
 0x472   : > { %v4795_v33 = vadd.f32 %v4794_v12, %v4706_v18  ;;  %v5120_v46 = vadd.f32 %v5088_v23, %v5021_v41  ;;  %v4716_v18 = vadd.f32 %v4715_v20, %v4626_v29  ;;  %v4025_v12 = vadd.f32 %v8829_v24, %v8769_v0  ;;  %v482_v29 = vld [vmem:[%s7192_s14 + $0x50] sm:$0xff]  }
 0x473   : > { %v5092_v41 = vunpack.c.l.bf16 %v474_v55 }
 0x474   : > { %v4834_v34 = vadd.f32 %v4795_v33, %v4015_v11  ;;  %v5152_v16 = vmax.f32 %v5120_v46, 0.0 }
 0x476   : > { %v4870_v21 = vadd.f32 %v8776_v5, %v4834_v34 }
 0x477   : > { %v5022_v48 = vpop.f32.mrf.mxu3 }
 0x478   : > { %v4902_v3 = vmax.f32 %v4870_v21, 0.0  ;;  %v5023_v59 = vadd.f32 %v8835_v63, %v5022_v48  ;;  %v5093_v21 = vunpack.c.h.bf16 %v474_v55 }
 0x479   : > { %v4797_v28 = vpop.f32.mrf.mxu2 }
 0x47a   : > { %v5121_v9 = vadd.f32 %v5089_v43, %v5023_v59  ;;  %v4920_v36 = vpack.c.bf16 %v4902_v3, %v4901_v62  ;;  %v4798_v60 = vadd.f32 %v4797_v28, %v4709_v39  ;;  %v476_v39 = vld [vmem:[%s7192_s14 + $0x38] sm:$0xff]  }
 0x47c   : > { %v5153_v8 = vmax.f32 %v5121_v9, 0.0  ;;  %5064 = vmatmul.bf16.gmra.mxu3 %v4920_v36  ;;  %v4835_v52 = vadd.f32 %v4798_v60, %v8755_v4  ;;  %v5094_v9 = vunpack.c.l.bf16 %v476_v39  ;;  %v5095_v36 = vunpack.c.h.bf16 %v476_v39 }
 0x47e   : > { %v6548_v31 = vpack.c.bf16 %v5153_v8, %v5152_v16  ;;  %v4871_v45 = vadd.f32 %v8776_v5, %v4835_v52 }
 0x47f   : > { %v5025_v30 = vpop.f32.mrf.mxu3 }
 0x480   : > { %6608 = vst [vmem:[%s8846_s15 + $0x20] sm:$0xff] %v6548_v31   ;;  %v5026_v2 = vadd.f32 %v8835_v63, %v5025_v30  ;;  %v4903_v54 = vmax.f32 %v4871_v45, 0.0 }
 0x481   : > { %v4799_v37 = vpop.f32.mrf.mxu2 }
 0x482   : > { %v4800_v57 = vadd.f32 %v4799_v37, %v4711_v7  ;;  %v5122_v4 = vadd.f32 %v5090_v32, %v5026_v2 }
 0x484   : > { %v4836_v26 = vadd.f32 %v4800_v57, %v4020_v58  ;;  %v5154_v27 = vmax.f32 %v5122_v4, 0.0  ;;  %v5096_v58 = vunpack.c.l.bf16 %v478_v50  ;;  %v5097_v57 = vunpack.c.h.bf16 %v478_v50 }
 0x486   : > { %v4872_v10 = vadd.f32 %v8776_v5, %v4836_v26 }
 0x487   : > { %v5027_v14 = vpop.f32.mrf.mxu3 }
 0x488   : > { %v4904_v42 = vmax.f32 %v4872_v10, 0.0  ;;  %v5028_v35 = vadd.f32 %v8835_v63, %v5027_v14  ;;  %v480_v14 = vld [vmem:[%s7192_s14 + $0x48] sm:$0xff]  }
 0x489   : > { %v4802_v15 = vpop.f32.mrf.mxu2  ;;  %v5098_v4 = vunpack.c.l.bf16 %v480_v14 }
 0x48a   : > { %v5123_v17 = vadd.f32 %v5091_v25, %v5028_v35  ;;  %v4921_v47 = vpack.c.bf16 %v4904_v42, %v4903_v54  ;;  %v4803_v61 = vadd.f32 %v4802_v15, %v4714_v22  ;;  %v5099_v42 = vunpack.c.h.bf16 %v480_v14 }
 0x48c   : > { %v5155_v49 = vmax.f32 %v5123_v17, 0.0  ;;  %5069 = vmatmul.bf16.gmra.mxu3 %v4921_v47  ;;  %v4837_v56 = vadd.f32 %v4803_v61, %v8765_v44 }
 0x48e   : > { %v6553_v40 = vpack.c.bf16 %v5155_v49, %v5154_v27  ;;  %v4873_v33 = vadd.f32 %v8776_v5, %v4837_v56 }
 0x48f   : > { %v5030_v19 = vpop.f32.mrf.mxu3 }
 0x490   : > { %6609 = vst [vmem:[%s8846_s15 + $0x28] sm:$0xff] %v6553_v40   ;;  %v5031_v51 = vadd.f32 %v8835_v63, %v5030_v19  ;;  %v4905_v48 = vmax.f32 %v4873_v33, 0.0  ;;  %v5100_v40 = vunpack.c.l.bf16 %v482_v29  ;;  %v5101_v19 = vunpack.c.h.bf16 %v482_v29 }
 0x491   : > { %v4804_v6 = vpop.f32.mrf.mxu2 }
 0x492   : > { %v4805_v11 = vadd.f32 %v4804_v6, %v4716_v18  ;;  %v5124_v44 = vadd.f32 %v5092_v41, %v5031_v51  ;;  %v484_v41 = vld [vmem:[%s7192_s14 + $0x58] sm:$0xff]  }
 0x494   : > { %v4838_v23 = vadd.f32 %v4805_v11, %v4025_v12  ;;  %v5156_v24 = vmax.f32 %v5124_v44, 0.0 }
 0x496   : > { %v4874_v34 = vadd.f32 %v8776_v5, %v4838_v23 }
 0x497   : > { %v5032_v43 = vpop.f32.mrf.mxu3 }
 0x498   : > { %v4906_v62 = vmax.f32 %v4874_v34, 0.0  ;;  %v5033_v46 = vadd.f32 %v8835_v63, %v5032_v43  ;;  %v5102_v34 = vunpack.c.l.bf16 %v484_v41 }
 0x49a   : > { %v5125_v3 = vadd.f32 %v5093_v21, %v5033_v46  ;;  %v4922_v0 = vpack.c.bf16 %v4906_v62, %v4905_v48  ;;  %v5103_v21 = vunpack.c.h.bf16 %v484_v41 }
 0x49c   : > { %v5157_v59 = vmax.f32 %v5125_v3, 0.0  ;;  %5074 = vmatmul.bf16.gmra.mxu3 %v4922_v0 }
 0x49e   : > { %v6558_v1 = vpack.c.bf16 %v5157_v59, %v5156_v24  ;;  %v486_v59 = vld [vmem:[%s7192_s14 + $0x60] sm:$0xff]  }
 0x49f   : > { %v5035_v28 = vpop.f32.mrf.mxu3  ;;  %v5105_v39 = vunpack.c.h.bf16 %v486_v59 }
 0x4a0   : > { %6610 = vst [vmem:[%s8846_s15 + $0x30] sm:$0xff] %v6558_v1   ;;  %v5036_v5 = vadd.f32 %v8835_v63, %v5035_v28  ;;  %v5104_v28 = vunpack.c.l.bf16 %v486_v59 }
 0x4a2   : > { %v5126_v16 = vadd.f32 %v5094_v9, %v5036_v5 }
 0x4a4   : > { %v5158_v31 = vmax.f32 %v5126_v16, 0.0 }
 0x4a7   : > { %v5037_v53 = vpop.f32.mrf.mxu3 }
 0x4a8   : > { %v5038_v8 = vadd.f32 %v8835_v63, %v5037_v53 }
 0x4aa   : > { %v5127_v60 = vadd.f32 %v5095_v36, %v5038_v8 }
 0x4ac   : > { %v5159_v30 = vmax.f32 %v5127_v60, 0.0 }
 0x4ae   : > { %v6563_v7 = vpack.c.bf16 %v5159_v30, %v5158_v31  ;;  %v488_v30 = vld [vmem:[%s7192_s14 + $0x68] sm:$0xff]  }
 0x4af   : > { %v5040_v52 = vpop.f32.mrf.mxu3  ;;  %v5107_v50 = vunpack.c.h.bf16 %v488_v30 }
 0x4b0   : > { %6611 = vst [vmem:[%s8846_s15 + $0x38] sm:$0xff] %v6563_v7   ;;  %v5041_v37 = vadd.f32 %v8835_v63, %v5040_v52  ;;  %v5106_v52 = vunpack.c.l.bf16 %v488_v30 }
 0x4b2   : > { %v5128_v38 = vadd.f32 %v5096_v58, %v5041_v37 }
 0x4b4   : > { %v5160_v32 = vmax.f32 %v5128_v38, 0.0 }
 0x4b7   : > { %v5042_v13 = vpop.f32.mrf.mxu3 }
 0x4b8   : > { %v5043_v45 = vadd.f32 %v8835_v63, %v5042_v13 }
 0x4ba   : > { %v5129_v2 = vadd.f32 %v5097_v57, %v5043_v45 }
 0x4bc   : > { %v5161_v26 = vmax.f32 %v5129_v2, 0.0 }
 0x4be   : > { %v6568_v10 = vpack.c.bf16 %v5161_v26, %v5160_v32  ;;  %v490_v26 = vld [vmem:[%s7192_s14 + $0x70] sm:$0xff]  }
 0x4bf   : > { %v5045_v25 = vpop.f32.mrf.mxu3  ;;  %v5109_v14 = vunpack.c.h.bf16 %v490_v26 }
 0x4c0   : > { %6612 = vst [vmem:[%s8846_s15 + $0x40] sm:$0xff] %v6568_v10   ;;  %v5046_v54 = vadd.f32 %v8835_v63, %v5045_v25  ;;  %v5108_v25 = vunpack.c.l.bf16 %v490_v26 }
 0x4c2   : > { %v5130_v15 = vadd.f32 %v5098_v4, %v5046_v54 }
 0x4c4   : > { %v5162_v47 = vmax.f32 %v5130_v15, 0.0 }
 0x4c7   : > { %v5047_v35 = vpop.f32.mrf.mxu3 }
 0x4c8   : > { %v5048_v22 = vadd.f32 %v8835_v63, %v5047_v35 }
 0x4ca   : > { %v5131_v17 = vadd.f32 %v5099_v42, %v5048_v22 }
 0x4cc   : > { %v5163_v27 = vmax.f32 %v5131_v17, 0.0 }
 0x4ce   : > { %v6573_v49 = vpack.c.bf16 %v5163_v27, %v5162_v47  ;;  %v492_v27 = vld [vmem:[%s7192_s14 + $0x78] sm:$0xff]   ;;  %s6918_s14 = sshra.s32 %s5259_s17, 4  ;;  %s6919_s14 = int_to_ptr.hbm [resolvable:$true] %s6918_s14 }
 0x4cf   : > { %v5050_v61 = vpop.f32.mrf.mxu3  ;;  %v5111_v29 = vunpack.c.h.bf16 %v492_v27  ;;  %s6920_s24 = scalar_lea.hbm %s6919_s14, 128  ;;  %p6925_p10 = scmp.lt.s32.totalorder %s6919_s14, %s8986_s8 }
 0x4d0   : > { %6613 = vst [vmem:[%s8846_s15 + $0x48] sm:$0xff] %v6573_v49   ;;  %v5051_v20 = vadd.f32 %v8835_v63, %v5050_v61  ;;  %v5110_v61 = vunpack.c.l.bf16 %v492_v27  ;;  %p6921_p1 = scmp.ne.s32.totalorder %s6919_s14, %s6920_s24  ;;  %p6926_p12 = scmp.lt.s32.totalorder %s6924_s21, %s6920_s24 }
 0x4d2   : > { %v5132_v56 = vadd.f32 %v5100_v40, %v5051_v20  ;;  %p6922_p4 = pnand %p6921_p1, %p7155_p5  ;;  %p6927_p13 = por %p6926_p12, %p6925_p10 }
 0x4d4   : > { %v5164_v12 = vmax.f32 %v5132_v56, 0.0  ;;  %p6923_p8 = pneg %p6922_p4 }
 0x4d6   : > { %p6928_p0 = pnand %p6927_p13, %p6923_p8 }
 0x4d7   : > { %v5052_v18 = vpop.f32.mrf.mxu3 }
 0x4d8   : > { %v5053_v55 = vadd.f32 %v8835_v63, %v5052_v18 }
 0x4da   : > { %v5133_v6 = vadd.f32 %v5101_v19, %v5053_v55 }
 0x4dc   : > { %v5165_v11 = vmax.f32 %v5133_v6, 0.0 }
 0x4de   : > { %v6578_v33 = vpack.c.bf16 %v5165_v11, %v5164_v12 }
 0x4df   : > { %v5055_v51 = vpop.f32.mrf.mxu3 }
 0x4e0   : > { %6614 = vst [vmem:[%s8846_s15 + $0x50] sm:$0xff] %v6578_v33   ;;  %v5056_v23 = vadd.f32 %v8835_v63, %v5055_v51 }
 0x4e2   : > { %v5134_v48 = vadd.f32 %v5102_v34, %v5056_v23 }
 0x4e4   : > { %v5166_v46 = vmax.f32 %v5134_v48, 0.0 }
 0x4e7   : > { %v5057_v43 = vpop.f32.mrf.mxu3 }
 0x4e8   : > { %v5058_v44 = vadd.f32 %v8835_v63, %v5057_v43 }
 0x4ea   : > { %v5135_v62 = vadd.f32 %v5103_v21, %v5058_v44 }
 0x4ec   : > { %v5167_v3 = vmax.f32 %v5135_v62, 0.0 }
 0x4ee   : > { %v6583_v0 = vpack.c.bf16 %v5167_v3, %v5166_v46 }
 0x4ef   : > { %v5060_v24 = vpop.f32.mrf.mxu3 }
 0x4f0   : > { %6615 = vst [vmem:[%s8846_s15 + $0x58] sm:$0xff] %v6583_v0   ;;  %v5061_v1 = vadd.f32 %v8835_v63, %v5060_v24 }
 0x4f2   : > { %v5136_v9 = vadd.f32 %v5104_v28, %v5061_v1 }
 0x4f4   : > { %v5168_v16 = vmax.f32 %v5136_v9, 0.0 }
 0x4f7   : > { %v5062_v5 = vpop.f32.mrf.mxu3 }
 0x4f8   : > { %v5063_v36 = vadd.f32 %v8835_v63, %v5062_v5 }
 0x4fa   : > { %v5137_v53 = vadd.f32 %v5105_v39, %v5063_v36 }
 0x4fc   : > { %v5169_v8 = vmax.f32 %v5137_v53, 0.0 }
 0x4fe   : > { %v6588_v60 = vpack.c.bf16 %v5169_v8, %v5168_v16 }
 0x4ff   : > { %v5065_v31 = vpop.f32.mrf.mxu3 }
 0x500   : > { %6616 = vst [vmem:[%s8846_s15 + $0x60] sm:$0xff] %v6588_v60   ;;  %v5066_v7 = vadd.f32 %v8835_v63, %v5065_v31 }
 0x502   : > { %v5138_v58 = vadd.f32 %v5106_v52, %v5066_v7 }
 0x504   : > { %v5170_v38 = vmax.f32 %v5138_v58, 0.0 }
 0x507   : > { %v5067_v37 = vpop.f32.mrf.mxu3 }
 0x508   : > { %v5068_v57 = vadd.f32 %v8835_v63, %v5067_v37 }
 0x50a   : > { %v5139_v13 = vadd.f32 %v5107_v50, %v5068_v57 }
 0x50c   : > { %v5171_v45 = vmax.f32 %v5139_v13, 0.0 }
 0x50e   : > { %v6593_v2 = vpack.c.bf16 %v5171_v45, %v5170_v38 }
 0x50f   : > { %v5070_v32 = vpop.f32.mrf.mxu3 }
 0x510   : > { %6617 = vst [vmem:[%s8846_s15 + $0x68] sm:$0xff] %v6593_v2   ;;  %v5071_v10 = vadd.f32 %v8835_v63, %v5070_v32 }
 0x512   : > { %v5140_v4 = vadd.f32 %v5108_v25, %v5071_v10 }
 0x514   : > { %v5172_v15 = vmax.f32 %v5140_v4, 0.0 }
 0x517   : > { %v5072_v54 = vpop.f32.mrf.mxu3 }
 0x518   : > { %v5073_v42 = vadd.f32 %v8835_v63, %v5072_v54 }
 0x51a   : > { %v5141_v35 = vadd.f32 %v5109_v14, %v5073_v42 }
 0x51c   : > { %v5173_v22 = vmax.f32 %v5141_v35, 0.0 }
 0x51e   : > { %v6598_v17 = vpack.c.bf16 %v5173_v22, %v5172_v15 }
 0x51f   : > { %v5075_v47 = vpop.f32.mrf.mxu3 }
 0x520   : > { %6618 = vst [vmem:[%s8846_s15 + $0x70] sm:$0xff] %v6598_v17   ;;  %v5076_v49 = vadd.f32 %v8835_v63, %v5075_v47 }
 0x522   : > { %v5142_v40 = vadd.f32 %v5110_v61, %v5076_v49 }
 0x524   : > { %v5174_v56 = vmax.f32 %v5142_v40, 0.0 }
 0x527   : > { %v5077_v20 = vpop.f32.mrf.mxu3 }
 0x528   : > { %v5078_v19 = vadd.f32 %v8835_v63, %v5077_v20 }
 0x52a   : > { %v5143_v18 = vadd.f32 %v5111_v29, %v5078_v19 }
 0x52c   : > { %v5175_v55 = vmax.f32 %v5143_v18, 0.0 }
 0x52e   : > { %v6603_v6 = vpack.c.bf16 %v5175_v55, %v5174_v56 }
 0x530   : > { %6619 = vst [vmem:[%s8846_s15 + $0x78] sm:$0xff] %v6603_v6  }
 0x531   : > { %6931 = shalt.err (!%p6928_p0)
}
 0x532   : > { %s7008_s3 = smov 64   ;;  %s7009_s23 = smov 4  }
 0x533   : > { %6660 = dma.vmem_to_hbm [thread:$0]  (%p7155_p5), %s5257_s18, 2048, %s5259_s17, %s5241_s30, %s7008_s3, %s7008_s3, %s7009_s23  }
 0x534 PF: > { %s9180_s2 = sld [smem:[#allocation18_spill]]  ;;  %p6680_p3 = pnand %p5406_p11, %p7100_p6 }
 0x536   : > { %p6681_p7 = pneg %p6680_p3 }
 0x53a   : > { %s5273_s22 = sand.u32 1, %s9180_s2  }
 0x53b   : > { %s5274_s19 = scalar_lea.sflag [#allocation5], %s5273_s22 }
 0x53c   : > { %6973 = dma.done.wait (%p6681_p7), %s5274_s19, 2048  }
 0x53d   : > { %6975 = vsyncadd (%p6681_p7), %s5274_s19, 4294965248  ;;  %s28_s10 = sadd.s32 1, %s6998_s10   ;;  %s9182_s15 = sld [smem:[#allocation19_spill]] }
 0x53e   : > { %p25_p9 = scmp.ge.s32.totalorder %s28_s10, 4   ;;  %s9183_s29 = sld [smem:[#allocation23_spill]] }
 0x53f   : > { %s9184_s26 = sld [smem:[#allocation21_spill]]  ;;  %s9185_s27 = smov %s6982_s28 }
 0x540   : > { %s9187_s30 = smov %s6994_s9 }
 0x541   :  { %27 = sbr.rel (!%p25_p9) target bundleno = 13 (0xd), region = 124 }
 0x543   : > { %s9186_s28 = smov %s9182_s15 }
 0x545   : > { %s9188_s9 = smov %s9184_s26 }
 0x546   :  { %5280 = vsyncpa [#allocation4], 1 }
 0x547   :  { %5282 = vsyncpa [#allocation4 + $0x1], 1 }
 0x548   :  { %5283 = vsyncpa [#allocation7], 1 }
 0x549   :  { %5285 = vsyncpa [#allocation7 + $0x1], 1 }
 0x54a   :  { %5286 = vsyncpa [#allocation10], 1 }
 0x54b   :  { %5287 = vsyncpa [#allocation5], 1 }
 0x54c   :  { %5289 = vsyncpa [#allocation5 + $0x1], 1 }

// kernel: tpu_custom_call.1
= control target key start
LH: loop header
LB: loop body
LE: loop exit
PB: predicated region body
PF: predicated region fallthrough
CT: control target
= control target key end

     0   :  { %s8978_s0 = inlined_call_operand.hbm [shape: bf16[2,16,16,128], index: 0, kind: input, shape index: {}]   ;;  %s8979_s1 = inlined_call_operand.hbm [shape: bf16[2,1,2,16,128], index: 1, kind: input, shape index: {}]   ;;  %s8980_s2 = inlined_call_operand.hbm [shape: bf16[128,128], index: 2, kind: input, shape index: {}]   ;;  %s8981_s3 = inlined_call_operand.hbm [shape: bf16[3,384,128], index: 3, kind: input, shape index: {}]   ;;  %s8982_s4 = inlined_call_operand.hbm [shape: bf16[128,128], index: 4, kind: input, shape index: {}]   ;;  %s8983_s5 = inlined_call_operand.vmem [shape: f32[1,128], index: 5, kind: input, shape index: {}]   ;;  %s8984_s6 = inlined_call_operand.vmem [shape: f32[1,128], index: 6, kind: input, shape index: {}]   ;;  %s8985_s7 = inlined_call_operand.vmem [shape: f32[1,128], index: 7, kind: input, shape index: {}]   ;;  %s8986_s8 = inlined_call_operand.hbm [shape: bf16[2,16,16,128], index: 8, kind: output, shape index: {}]  }
   0x1   :  { %9001 = sst [smem:[#allocation49_spill]] %s8980_s2 }
   0x2   :  { %9002 = sst [smem:[#allocation50_spill]] %s8981_s3 }
   0x3   :  { %9003 = sst [smem:[#allocation51_spill]] %s8982_s4 }
   0x4   :  { %13 = vsyncpa [#allocation4], 0 }
   0x5   :  { %15 = vsyncpa [#allocation4 + $0x1], 0 }
   0x6   :  { %16 = vsyncpa [#allocation7], 0 }
   0x7   :  { %18 = vsyncpa [#allocation7 + $0x1], 0 }
   0x8   :  { %19 = vsyncpa [#allocation10], 0 }
   0x9   :  { %20 = vsyncpa [#allocation5], 0 }
   0xa   :  { %22 = vsyncpa [#allocation5 + $0x1], 0  ;;  %s7055_s27 = smov 0   ;;  %s7057_s28 = smov 0  }
   0xb   :  { %s7059_s29 = smov 0   ;;  %s7061_s30 = smov 0  }
   0xc   :  { %s7063_s9 = smov 0   ;;  %s7065_s10 = smov 0  }
   0xd LB: > { %9004 = sst [smem:[#allocation18_spill]] %s6978_s27  ;;  %s7086_s11 = sadd.s32 4294967295, %s6998_s10   ;;  %s6998_s10 = sphi %s7065_s10, %s28_s10   ;;  %s6994_s9 = sphi %s7063_s9, %s9188_s9   ;;  %s6990_s30 = sphi %s7061_s30, %s9187_s30   ;;  %s6986_s29 = sphi %s7059_s29, %s9183_s29   ;;  %s6982_s28 = sphi %s7057_s28, %s9186_s28   ;;  %s6978_s27 = sphi %s7055_s27, %s9185_s27  }
   0xe   : > { %9005 = sst [smem:[#allocation19_spill]] %s6986_s29  ;;  %s5401_s12 = sadd.s32 4294967294, %s6998_s10  }
   0xf   : > { %p62_p0 = scmp.ne.s32.totalorder %s6982_s28, %s6978_s27  ;;  %p63_p1 = scmp.eq.s32.totalorder %s7086_s11, 0 }
  0x10   : > { %p242_p2 = scmp.eq.s32.totalorder %s7086_s11, 1  ;;  %p248_p3 = scmp.eq.s32.totalorder %s5401_s12, 1 }
  0x11   : > { %p7095_p4 = por %p63_p1, %p62_p0  ;;  %p5402_p5 = scmp.ge.s32.totalorder %s6998_s10, 1 }
  0x12   : > { %p7100_p6 = por %p248_p3, %p62_p0  ;;  %p255_p7 = scmp.lt.s32.totalorder %s6998_s10, 3 }
  0x13   : > { %s9009_s2 = sld [smem:[#allocation49_spill]]  ;;  %s7000_s19 = smov [#allocation8]  }
  0x14   : > { %s9007_s14 = scalar_select %p7100_p6, 1, 0 }
  0x15   : > { %p7108_p8 = pnand %p5402_p5, %p255_p7  ;;  %s268_s20 = sshll.u32 %s7000_s19, 4  ;;  %s269_s20 = int_to_ptr.vmem [resolvable:$true] %s268_s20 }
  0x16   : > { %9008 = sst [smem:[#allocation20_spill]] %s9007_s14  ;;  %p5406_p11 = scmp.ge.s32.totalorder %s6998_s10, 2 }
  0x17   : > { %p6662_p9 = pneg %p7108_p8  ;;  %s9012_s3 = sld [smem:[#allocation50_spill]] }
  0x18   : > { %s8987_s25 = smov 64   ;;  %s8989_s26 = smov 4  }
  0x19   : > { %s266_s17 = sshll.u32 %s9009_s2, 4  ;;  %p7116_p10 = pnand %p6662_p9, %p63_p1  ;;  %s267_s17 = int_to_ptr.hbm [resolvable:$true] %s266_s17 }
  0x1a   : > { %s7003_s12 = smov [#allocation9]   ;;  %s9013_s4 = sld [smem:[#allocation51_spill]] }
  0x1b   : > { %6665 = dma.hbm_to_vmem [thread:$0]  (!%p7116_p10), %s267_s17, 1024, %s269_s20, [#allocation7], %s8987_s25, %s8987_s25, %s8989_s26  }
  0x1c   : > { %s282_s15 = sshll.u32 %s7003_s12, 4  ;;  %s7004_s23 = smov [#allocation11]   ;;  %s283_s15 = int_to_ptr.vmem [resolvable:$true] %s282_s15 }
  0x1d   : > { %s280_s24 = sshll.u32 %s9012_s3, 4  ;;  %s296_s2 = sshll.u32 %s7004_s23, 4  ;;  %s281_s24 = int_to_ptr.hbm [resolvable:$true] %s280_s24  ;;  %s297_s2 = int_to_ptr.vmem [resolvable:$true] %s296_s2 }
  0x1e   : > { %6668 = dma.hbm_to_vmem [thread:$0]  (!%p7116_p10), %s281_s24, 9216, %s283_s15, [#allocation10], %s8987_s25, %s8987_s25, %s8989_s26  }
  0x1f   : > { %s40_s17 = sadd.s32 1, %s6994_s9  ;;  %s49_s20 = sadd.s32 1, %s6986_s29 }
  0x20   : > { %s294_s22 = sshll.u32 %s9013_s4, 4  ;;  %p42_p12 = scmp.ge.s32.totalorder %s40_s17, 2  ;;  %s295_s22 = int_to_ptr.hbm [resolvable:$true] %s294_s22 }
  0x21   : > { %6671 = dma.hbm_to_vmem [thread:$0]  (!%p7116_p10), %s295_s22, 1024, %s297_s2, [#allocation10], %s8987_s25, %s8987_s25, %s8989_s26  }
  0x22   : > { %p56_p13 = scmp.ne.s32.totalorder %s6986_s29, %s6982_s28  ;;  %p57_p0 = scmp.eq.s32.totalorder %s6998_s10, 0 }
  0x23   : > { %s9190_s17 = smov (%p42_p12, %s40_s17), 0  ;;  %p6686_p7 = scmp.lt.s32.totalorder %s6998_s10, 2 }
  0x24   : > { %9014 = sst [smem:[#allocation21_spill]] %s9190_s17  ;;  %p7149_p3 = por %p57_p0, %p56_p13 }
  0x25   : > { %p7155_p5 = por %p242_p2, %p56_p13  ;;  %s44_s2 = ssub.s32 %s6994_s9, %s9190_s17 }
  0x26   : > { %p47_p9 = scmp.eq.s32.totalorder %s44_s2, 0  ;;  %s319_s12 = sand.u32 1, %s6986_s29  }
  0x27   : > { %s9016_s21 = scalar_select %p7155_p5, 1, 0 }
  0x28   : > { %s5407_s15 = sshll.u32 %s319_s12, 7  ;;  %s6317_s19 = sshll.u32 %s6994_s9, 7 }
  0x29   : > { %9017 = sst [smem:[#allocation22_spill]] %s9016_s21  ;;  %s331_s25 = scalar_lea.hbm %s8978_s0, %s6317_s19 }
  0x2a   : > { %s7164_s16 = scalar_select %p47_p9, %s6986_s29, %s49_s20  }
  0x2b   : > { %s323_s26 = scalar_lea.vmem [#allocation3], %s5407_s15  ;;  %s332_s4 = sshll.u32 %s331_s25, 4  ;;  %s333_s4 = int_to_ptr.hbm [resolvable:$true] %s332_s4 }
  0x2c   : > { %9018 = sst [smem:[#allocation23_spill]] %s7164_s16  ;;  %s334_s3 = sshll.u32 %s323_s26, 4  ;;  %s335_s3 = int_to_ptr.vmem [resolvable:$true] %s334_s3 }
  0x2d   : > { %p6673_p2 = pnand %p6686_p7, %p7149_p3  ;;  %s344_s17 = sand.u32 1, %s6998_s10  }
  0x2e   : > { %s5410_s14 = sshll.u32 %s319_s12, 4  ;;  %s320_s2 = scalar_lea.sflag [#allocation4], %s319_s12 }
  0x2f   : > { %s9019_s27 = smov 4   ;;  %s9020_s21 = smov 64  }
  0x30   : > { %6675 = dma.hbm_to_vmem [thread:$0]  (!%p6673_p2), %s333_s4, 2048, %s335_s3, %s320_s2, %s9020_s21, %s9020_s21, %s9019_s27  }
  0x31   : > { %s6318_s20 = sshll.u32 %s6994_s9, 4  ;;  %s348_s19 = scalar_lea.vmem [#allocation6], %s5410_s14 }
  0x32   : > { %s355_s22 = scalar_lea.hbm %s8979_s1, %s6318_s20  ;;  %s358_s15 = sshll.u32 %s348_s19, 4  ;;  %s359_s15 = int_to_ptr.vmem [resolvable:$true] %s358_s15 }
  0x33   : > { %s356_s26 = sshll.u32 %s355_s22, 4  ;;  %s345_s25 = scalar_lea.sflag [#allocation7], %s344_s17  ;;  %s357_s26 = int_to_ptr.hbm [resolvable:$true] %s356_s26 }
  0x34   : > { %6678 = dma.hbm_to_vmem [thread:$0]  (!%p6673_p2), %s357_s26, 256, %s359_s15, %s345_s25, %s9020_s21, %s9020_s21, %s9019_s27  }
  0x35   : > { %370 = sbr.rel (%p7108_p8) target bundleno = 1332 (0x534), region = 52 }
  0x3a   : > { %s7186_s3 = sand.u32 1, %s6982_s28  }
  0x3b   : > { %s5414_s4 = sshll.u32 %s7186_s3, 7  ;;  %s373_s29 = scalar_lea.sflag [#allocation4], %s7186_s3 }
  0x3c   : > { %s7192_s14 = scalar_lea.vmem [#allocation3], %s5414_s4 }
  0x3d   : > { %6957 = dma.done.wait (%p7095_p4), %s373_s29, 2048  }
  0x3e   : > { %6959 = vsyncadd (%p7095_p4), %s373_s29, 4294965248  ;;  %s382_s27 = sand.u32 1, %s7086_s11   ;;  %s5415_s18 = sshll.u32 %s7186_s3, 4 }
  0x3f   : > { %s383_s17 = scalar_lea.sflag [#allocation7], %s382_s27  ;;  %s7200_s24 = scalar_lea.vmem [#allocation6], %s5415_s18 }
  0x40   : > { %6961 = dma.done.wait (%p7095_p4), %s383_s17, 256  }
  0x41   : > { %6963 = vsyncadd (%p7095_p4), %s383_s17, 4294967040 }
  0x42   : > { %6965 = dma.done.wait (%p63_p1), [#allocation7], 1024  }
  0x43   : > { %6967 = vsyncadd (%p63_p1), [#allocation7], 4294966272 }
  0x44   : > { %6969 = dma.done.wait (%p63_p1), [#allocation10], 10240  }
  0x45   : > { %6971 = vsyncadd (%p63_p1), [#allocation10], 4294957056  ;;  %v6326_v0 = vld [vmem:[#allocation8 + $0x38] sm:$0xff]  ;;  %v6325_v1 = vld [vmem:[#allocation8 + $0x30] sm:$0xff]  ;;  %v7005_v20 = vmov 0.0|0.0   ;;  %v1219_v23 = vlaneseq  ;;  %vm7006_vm0 = vmmov 1  }
  0x46   : > { %641 = vmatpush.bf16.msra.mxu0 %v6326_v0  ;;  %6620 = vmatpush.bf16.msra.mxu1 %v6326_v0  ;;  %v6324_v2 = vld [vmem:[#allocation8 + $0x28] sm:$0xff]  ;;  %v6323_v3 = vld [vmem:[#allocation8 + $0x20] sm:$0xff]  ;;  %v6322_v4 = vld [vmem:[#allocation8 + $0x18] sm:$0xff]  ;;  %849 = vst [vmem:[#allocation2 + $0x4] sm:$0xf] %v7005_v20  ;;  %v887_v25 = vunpack.c.l.b16 %v7005_v20  ;;  %v7007_v34 = vmov 0  }
  0x47   : > { %v6321_v5 = vld [vmem:[#allocation8 + $0x10] sm:$0xff]  ;;  %v6320_v6 = vld [vmem:[#allocation8 + $0x8] sm:$0xff]  ;;  %v6319_v7 = vld [vmem:[#allocation8] sm:$0xff]  ;;  %850 = vst [vmem:[#allocation2 + $0x10] sm:$0xf] %v7005_v20  ;;  %v7226_v26 = vshrl.u32 %v1219_v23, 7  ;;  %v7249_v51 = vunpack.c.l.b16 %v7007_v34  ;;  %v7261_v57 = vunpack.c.h.b16 %v7007_v34 }
  0x48   : > { %v6327_v8 = vld [vmem:[%s7192_s14] sm:$0xff]  ;;  %v6328_v9 = vld [vmem:[%s7192_s14 + $0x8] sm:$0xff]  ;;  %v6329_v10 = vld [vmem:[%s7192_s14 + $0x10] sm:$0xff]  ;;  %883 = vst [vmem:[#allocation2 + $0x19c] sm:$0xf] %v7005_v20  ;;  %v889_v28 = vpack.c.b16 %v887_v25, %v887_v25  ;;  %vm1137_vm5 = vcmask 1040384  }
  0x49   : > { %v6330_v11 = vld [vmem:[%s7192_s14 + $0x18] sm:$0xff]  ;;  %v6340_v12 = vld [vmem:[%s7192_s14 + $0x68] sm:$0xff]  ;;  %v6331_v13 = vld [vmem:[%s7192_s14 + $0x20] sm:$0xff]  ;;  %884 = vst [vmem:[#allocation2 + $0x1a8] sm:$0xf] %v7005_v20  ;;  %v1221_v29 = vadd.s32 8, %v7226_v26 }
  0x4a   : > { %642 = vmatpush.bf16.msra.mxu0 %v6325_v1  ;;  %6621 = vmatpush.bf16.msra.mxu1 %v6325_v1  ;;  %v6341_v14 = vld [vmem:[%s7192_s14 + $0x70] sm:$0xff]  ;;  %v6332_v15 = vld [vmem:[%s7192_s14 + $0x28] sm:$0xff]  ;;  %v6342_v16 = vld [vmem:[%s7192_s14 + $0x78] sm:$0xff]  ;;  %v1222_v30 = vadd.s32 16, %v7226_v26  ;;  %v891_v31 = vshrl.u32 %v889_v28, 16  ;;  %v1255_v32 = vadd.s32 280, %v7226_v26 }
  0x4b   : > { %v6333_v17 = vld [vmem:[%s7192_s14 + $0x30] sm:$0xff]  ;;  %v6427_v19 = vld [vmem:[#allocation9 + $0xf8] sm:$0xff]  ;;  %v6425_v24 = vld [vmem:[#allocation9 + $0xe8] sm:$0xff]  ;;  %v1260_v33 = vand.u32 15, %v7226_v26  ;;  %v894_v39 = vshll.u32 %v889_v28, 16  ;;  %v1267_v40 = vand.u32 15, %v1221_v29 }
  0x4c   : > { %v6343_v18 = vld [vmem:[%s7200_s24] sm:$0xff]  ;;  %6628 = vmatpush.bf16.msra.mxu2 %v6427_v19  ;;  %v6334_v22 = vld [vmem:[%s7192_s14 + $0x38] sm:$0xff]  ;;  %vm1797_vm1 = vmpackc.low %vm7006_vm0, %vm7006_vm0  ;;  %v7234_v38 = vrot.slane %v891_v31, 7  ;;  %v1274_v41 = vand.u32 15, %v1222_v30  ;;  %v1505_v42 = vand.u32 15, %v1255_v32  ;;  %vm1214_vm12 = vcmask 1047552  }
  0x4d   : > { %v6426_v21 = vld [vmem:[#allocation9 + $0xf0] sm:$0xff]  ;;  %v6424_v27 = vld [vmem:[#allocation9 + $0xe0] sm:$0xff]  ;;  %v1833_v35 = vsel %vm1797_vm1, 65537, %v7007_v34  ;;  %v6344_v36 = vld [vmem:[%s7200_s24 + $0x8] sm:$0xff]  ;;  %vm1688_vm2 = vcmp.gt.s32.totalorder %v1260_v33, 0  ;;  %v7246_v50 = vrot.slane %v894_v39, 1 }
  0x4e   : > { %643 = vmatpush.bf16.msra.mxu0 %v6324_v2  ;;  %6622 = vmatpush.bf16.msra.mxu1 %v6324_v2  ;;  %v6423_v37 = vld [vmem:[#allocation9 + $0xd8] sm:$0xff]  ;;  %vm1796_vm3 = vmpackc.low %vm1688_vm2, %vm1688_vm2  ;;  %v1869_v43 = vunpack.c.l.b16 %v1833_v35  ;;  %v7239_v44 = vld [vmem:[%s8983_s5] ss:$0 sm:$0xff]  ;;  %v7242_v45 = vor.u32 %v894_v39, %v7234_v38  ;;  %vm979_vm4 = vsmask.f32 256  ;;  %vm7251_vm6 = vcmp.lt.s32.totalorder %v1267_v40, 15 }
  0x4f   : > { %v1832_v46 = vsel %vm1796_vm3, 65537, %v7007_v34  ;;  %v6422_v48 = vld [vmem:[#allocation9 + $0xd0] sm:$0xff]  ;;  %v6335_v49 = vld [vmem:[%s7192_s14 + $0x40] sm:$0xff]  ;;  %vm7256_vm7 = vmand %vm1137_vm5, %vm979_vm4  ;;  %vm2263_vm8 = vcmp.lt.s32.totalorder %v1505_v42, 15  ;;  %vm1145_vm9 = vsmask.f32 7424 }
  0x50   : > { %6629 = vmatpush.bf16.msra.mxu2 %v6426_v21  ;;  %v1868_v47 = vunpack.c.l.b16 %v1832_v46  ;;  %v5525_v56 = vunpack.i.l.s16 %v1869_v43  ;;  %v1139_v59 = vsel %vm7256_vm7, 0, %v7242_v45  ;;  %vm7267_vm10 = vcmp.gt.s32.totalorder %v1274_v41, 0  ;;  %vm2371_vm11 = vmpackc.low %vm2263_vm8, %vm2263_vm8  ;;  %v6421_v63 = vld [vmem:[#allocation9 + $0xc8] sm:$0xff]  ;;  %v6434_v40 = vld [vmem:[#allocation9 + $0x130] sm:$0xff]  ;;  %s8846_s15 = scalar_lea.vmem [#allocation12], %s5414_s4  ;;  %s6524_s26 = sshll.u32 %s6990_s30, 7 }
  0x51   : > { %vm2337_vm15 = vmpackc.low %vm7251_vm6, %vm7251_vm6  ;;  %v2407_v62 = vsel %vm2371_vm11, 65537, %v7007_v34  ;;  %v1224_v30 = vadd.s32 32, %v7226_v26  ;;  %v6433_v52 = vld [vmem:[#allocation9 + $0x128] sm:$0xff]  ;;  %v6400_v60 = vld [vmem:[#allocation9 + $0x38] sm:$0xff]  ;;  %s5255_s29 = scalar_lea.hbm %s8986_s8, %s6524_s26  ;;  %s5256_s18 = sshll.u32 %s8846_s15, 4  ;;  %s5257_s18 = int_to_ptr.vmem [resolvable:$true] %s5256_s18 }
  0x52   : > { %644 = vmatpush.bf16.msra.mxu0 %v6323_v3  ;;  %6623 = vmatpush.bf16.msra.mxu1 %v6323_v3  ;;  %v5524_v55 = vunpack.i.l.s16 %v1868_v47  ;;  %vm7273_vm14 = vcmp.ne.s32.totalorder %v5525_v56, %v7261_v57  ;;  %vm1798_vm1 = vmpackc.low %vm7267_vm10, %vm7267_vm10  ;;  %vm7305_vm3 = vcmp.ne.s32.totalorder %v5525_v56, %v7249_v51  ;;  %s5258_s17 = sshll.u32 %s5255_s29, 4  ;;  %s5241_s30 = scalar_lea.sflag [#allocation5], %s7186_s3  ;;  %s5259_s17 = int_to_ptr.hbm [resolvable:$true] %s5258_s17 }
  0x53   : > { %vm7291_vm2 = vmand %vm1214_vm12, %vm1145_vm9  ;;  %v1288_v42 = vand.u32 15, %v1224_v30  ;;  %v6337_v30 = vld [vmem:[%s7192_s14 + $0x50] sm:$0xff]  ;;  %s6924_s21 = scalar_lea.hbm %s8986_s8, 256 }
  0x54   : > { %6630 = vmatpush.bf16.msra.mxu2 %v6425_v24  ;;  %vm1926_vm13 = vcmp.ne.s32.totalorder %v5524_v55, %v7249_v51 }
  0x55   : > { %vm1928_vm0 = vmpackc.low %vm7273_vm14, %vm1926_vm13  ;;  %vm7336_vm13 = vcmp.gt.s32.totalorder %v1288_v42, 0 }
  0x56   : > { %645 = vmatpush.bf16.msra.mxu0 %v6322_v4  ;;  %6624 = vmatpush.bf16.msra.mxu1 %v6322_v4 }
  0x58   : > { %6631 = vmatpush.bf16.msra.mxu2 %v6424_v27 }
  0x5a   : > { %646 = vmatpush.bf16.msra.mxu0 %v6321_v5  ;;  %6625 = vmatpush.bf16.msra.mxu1 %v6321_v5 }
  0x5c   : > { %6632 = vmatpush.bf16.msra.mxu2 %v6423_v37 }
  0x5e   : > { %647 = vmatpush.bf16.msra.mxu0 %v6320_v6  ;;  %6626 = vmatpush.bf16.msra.mxu1 %v6320_v6 }
  0x60   : > { %6633 = vmatpush.bf16.msra.mxu2 %v6422_v48 }
  0x62   : > { %648 = vmatpush.bf16.msra.mxu0 %v6319_v7  ;;  %6627 = vmatpush.bf16.msra.mxu1 %v6319_v7 }
  0x64   : > { %6634 = vmatpush.bf16.msra.mxu2 %v6421_v63 }
  0x65   : > { %649 = vmatmul.bf16.vlgmr.msra.gmra.mxu0 %v6327_v8  ;;  %714 = vmatmul.bf16.vlgmr.msra.gmra.mxu1 %v6340_v12  ;;  %v6420_v12 = vld [vmem:[#allocation9 + $0xc0] sm:$0xff] }
  0x66   : > { %778 = vmatpush.bf16.msrb.mxu1 %v6326_v0  ;;  %3760 = vmatpush.bf16.msrb.mxu0 %v6400_v60 }
  0x68   : > { %6635 = vmatpush.bf16.msra.mxu2 %v6420_v12 }
  0x6a   : > { %779 = vmatpush.bf16.msrb.mxu1 %v6325_v1  ;;  %v2443_v1 = vunpack.c.l.b16 %v2407_v62 }
  0x6c   : > { %v5595_v8 = vunpack.i.l.s16 %v2443_v1 }
  0x6e   : > { %780 = vmatpush.bf16.msrb.mxu1 %v6324_v2  ;;  %v7284_v2 = vor.u32 %v7246_v50, %v891_v31  ;;  %vm2586_vm5 = vcmp.ne.s32.totalorder %v5595_v8, %v7261_v57 }
  0x6f   : > { %vm2587_vm6 = vmpackc.low %vm2586_vm5, %vm7305_vm3 }
  0x72   : > { %781 = vmatpush.bf16.msrb.mxu1 %v6323_v3  ;;  %v2048_v3 = vsel %vm1928_vm0, %v1139_v59, 0 }
  0x75   : > { %654 = vmatmul.bf16.gmra.mxu0 %v6328_v9  ;;  %719 = vmatmul.bf16.gmra.mxu1 %v6341_v14  ;;  %v1218_v9 = vsel %vm7291_vm2, %v7284_v2, 0 }
  0x76   : > { %782 = vmatpush.bf16.msrb.mxu1 %v6322_v4 }
  0x7a   : > { %783 = vmatpush.bf16.msrb.mxu1 %v6321_v5 }
  0x7e   : > { %784 = vmatpush.bf16.msrb.mxu1 %v6320_v6  ;;  %v2084_v6 = vunpack.c.l.b16 %v2048_v3 }
  0x82   : > { %785 = vmatpush.bf16.msrb.mxu1 %v6319_v7  ;;  %v2085_v7 = vunpack.c.h.b16 %v2048_v3  ;;  %v6432_v3 = vld [vmem:[#allocation9 + $0x120] sm:$0xff] }
  0x84   : > { %v2121_v14 = vpack.c.b16 %v2085_v7, %v2085_v7 }
  0x85   : > { %659 = vmatmul.bf16.gmra.mxu0 %v6329_v10  ;;  %724 = vmatmul.bf16.gmra.mxu1 %v6342_v16  ;;  %v2373_v10 = vsel %vm2337_vm15, 65537, %v7007_v34 }
  0x86   : > { %3333 = vmatpush.bf16.msra.mxu1 %v6427_v19  ;;  %v2605_v19 = vsel %vm2587_vm6, %v1218_v9, 0  ;;  %2193 = vst [vmem:[#allocation2 + $0xc] sm:$0xf] %v2121_v14  ;;  %v2409_v20 = vunpack.c.l.b16 %v2373_v10 }
  0x88   : > { %v5561_v32 = vunpack.i.l.s16 %v2409_v20 }
  0x8a   : > { %3334 = vmatpush.bf16.msra.mxu1 %v6426_v21  ;;  %v2658_v21 = vunpack.c.l.b16 %v2605_v19  ;;  %vm2467_vm10 = vcmp.ne.s32.totalorder %v5561_v32, %v7261_v57  ;;  %v6430_v32 = vld [vmem:[#allocation9 + $0x110] sm:$0xff] }
  0x8b   : > { %vm2468_vm15 = vmpackc.low %vm2467_vm10, %vm7305_vm3 }
  0x8c   : > { %v2694_v28 = vpack.c.b16 %v2658_v21, %v2658_v21 }
  0x8e   : > { %3335 = vmatpush.bf16.msra.mxu1 %v6425_v24  ;;  %2766 = vst [vmem:[#allocation2 + $0x1a0] sm:$0xf] %v2694_v28 }
  0x92   : > { %3336 = vmatpush.bf16.msra.mxu1 %v6424_v27  ;;  %v6435_v27 = vld [vmem:[#allocation9 + $0x138] sm:$0xff] }
  0x93   : > { %6636 = vmatpush.bf16.msra.mxu3 %v6435_v27 }
  0x95   : > { %664 = vmatmul.bf16.gmra.mxu0 %v6330_v11  ;;  %786 = vmatmul.bf16.vlgmr.msrb.gmra.mxu1 %v6343_v18 }
  0x96   : > { %3337 = vmatpush.bf16.msra.mxu1 %v6423_v37  ;;  %v6336_v37 = vld [vmem:[%s7192_s14 + $0x48] sm:$0xff] }
  0x97   : > { %6637 = vmatpush.bf16.msra.mxu3 %v6434_v40 }
  0x9a   : > { %3338 = vmatpush.bf16.msra.mxu1 %v6422_v48 }
  0x9b   : > { %6638 = vmatpush.bf16.msra.mxu3 %v6433_v52 }
  0x9e   : > { %3339 = vmatpush.bf16.msra.mxu1 %v6421_v63  ;;  %v1225_v63 = vadd.s32 40, %v7226_v26 }
  0x9f   : > { %6639 = vmatpush.bf16.msra.mxu3 %v6432_v3 }
  0xa2   : > { %3340 = vmatpush.bf16.msra.mxu1 %v6420_v12 }
  0xa5   : > { %669 = vmatmul.bf16.gmra.mxu0 %v6331_v13  ;;  %791 = vmatmul.bf16.gmra.mxu1 %v6344_v36  ;;  %v2120_v13 = vpack.c.b16 %v2084_v6, %v2084_v6 }
  0xa6   : > { %3422 = vmatpush.bf16.msrb.mxu1 %v6435_v27 }
  0xa7   : > { %2192 = vst [vmem:[#allocation2] sm:$0xf] %v2120_v13 }
  0xaa   : > { %3423 = vmatpush.bf16.msrb.mxu1 %v6434_v40  ;;  %v6397_v40 = vld [vmem:[#allocation9 + $0x20] sm:$0xff] }
  0xae   : > { %3424 = vmatpush.bf16.msrb.mxu1 %v6433_v52 }
  0xb2   : > { %3425 = vmatpush.bf16.msrb.mxu1 %v6432_v3 }
  0xb5   : > { %674 = vmatmul.bf16.gmra.mxu0 %v6332_v15  ;;  %v1223_v15 = vadd.s32 24, %v7226_v26 }
  0xb7   : > { %v1281_v25 = vand.u32 15, %v1223_v15  ;;  %v1226_v15 = vadd.s32 48, %v7226_v26 }
  0xb9   : > { %vm7322_vm8 = vcmp.lt.s32.totalorder %v1281_v25, 15  ;;  %v6398_v25 = vld [vmem:[#allocation9 + $0x28] sm:$0xff]  ;;  %v1302_v28 = vand.u32 15, %v1226_v15 }
  0xba   : > { %vm2339_vm11 = vmpackc.low %vm7322_vm8, %vm7322_vm8 }
  0xbb   : > { %v2375_v59 = vsel %vm2339_vm11, 65537, %v7007_v34  ;;  %vm7380_vm6 = vcmp.gt.s32.totalorder %v1302_v28, 0 }
  0xbc   : > { %v2411_v7 = vunpack.c.l.b16 %v2375_v59  ;;  %v6396_v59 = vld [vmem:[#allocation9 + $0x18] sm:$0xff] }
  0xc5   : > { %679 = vmatmul.bf16.gmra.mxu0 %v6333_v17  ;;  %v1834_v17 = vsel %vm1798_vm1, 65537, %v7007_v34  ;;  %vm1800_vm1 = vmpackc.low %vm7336_vm13, %vm7336_vm13 }
  0xc6   : > { %v1870_v24 = vunpack.c.l.b16 %v1834_v17  ;;  %v1836_v14 = vsel %vm1800_vm1, 65537, %v7007_v34 }
  0xc8   : > { %v5526_v36 = vunpack.i.l.s16 %v1870_v24  ;;  %v1872_v24 = vunpack.c.l.b16 %v1836_v14 }
  0xca   : > { %vm1933_vm12 = vcmp.ne.s32.totalorder %v5526_v36, %v7249_v51 }
  0xcb   : > { %vm7351_vm0 = vmpackc.low %vm7273_vm14, %vm1933_vm12 }
  0xcc   : > { %vm1802_vm12 = vmpackc.low %vm7380_vm6, %vm7380_vm6 }
  0xd5   : > { %684 = vmatmul.bf16.gmra.mxu0 %v6334_v22  ;;  %v2659_v22 = vunpack.c.h.b16 %v2605_v19 }
  0xd7   : > { %v2695_v29 = vpack.c.b16 %v2659_v22, %v2659_v22 }
  0xd9   : > { %2767 = vst [vmem:[#allocation2 + $0x1ac] sm:$0xf] %v2695_v29  ;;  %v5563_v29 = vunpack.i.l.s16 %v2411_v7  ;;  %v1838_v7 = vsel %vm1802_vm12, 65537, %v7007_v34 }
  0xdb   : > { %vm2474_vm10 = vcmp.ne.s32.totalorder %v5563_v29, %v7261_v57 }
  0xdc   : > { %vm2475_vm13 = vmpackc.low %vm2474_vm10, %vm7305_vm3 }
  0xe2   : > { %v650_v53 = vpop.f32.mrf.mxu0 }
  0xe3   : > { %v651_v58 = vadd.f32 %v7239_v44, %v650_v53 }
  0xe5   : > { %v730_v0 = vmax.f32 %v651_v58, 0.0  ;;  %689 = vmatmul.bf16.gmra.mxu0 %v6335_v49 }
  0xe7   : > { %v815_v4 = vpack.c.bf16 %v730_v0, %v730_v0 }
  0xe9   : > { %851 = vst [vmem:[#allocation2 + $0x1c] sm:$0xf] %v815_v4  ;;  %v931_v33 = vunpack.c.l.b16 %v815_v4 }
  0xea   : > { %v652_v16 = vpop.f32.mrf.mxu0 }
  0xeb   : > { %v653_v18 = vadd.f32 %v7239_v44, %v652_v16  ;;  %v1295_v16 = vand.u32 15, %v1225_v63 }
  0xed   : > { %v731_v23 = vmax.f32 %v653_v18, 0.0  ;;  %vm7373_vm5 = vcmp.lt.s32.totalorder %v1295_v16, 15 }
  0xee   : > { %vm2341_vm8 = vmpackc.low %vm7373_vm5, %vm7373_vm5 }
  0xef   : > { %v816_v31 = vpack.c.bf16 %v731_v23, %v731_v23 }
  0xf1   : > { %852 = vst [vmem:[#allocation2 + $0x28] sm:$0xf] %v816_v31  ;;  %v932_v35 = vunpack.c.l.b16 %v816_v31 }
  0xf2   : > { %v655_v41 = vpop.f32.mrf.mxu0 }
  0xf3   : > { %v7326_v43 = vpack.c.b16 %v932_v35, %v931_v33  ;;  %v656_v46 = vadd.f32 %v7239_v44, %v655_v41 }
  0xf5   : > { %v981_v47 = vshrl.u32 %v7326_v43, 16  ;;  %v984_v48 = vshll.u32 %v7326_v43, 16  ;;  %v732_v49 = vmax.f32 %v656_v46, 0.0  ;;  %694 = vmatmul.bf16.gmra.mxu0 %v6336_v37  ;;  %v5528_v37 = vunpack.i.l.s16 %v1872_v24 }
  0xf7   : > { %v7342_v55 = vrot.slane %v981_v47, 7  ;;  %v7344_v56 = vrot.slane %v984_v48, 1  ;;  %v817_v58 = vpack.c.bf16 %v732_v49, %v732_v49  ;;  %vm1940_vm11 = vcmp.ne.s32.totalorder %v5528_v37, %v7249_v51 }
  0xf9   : > { %v986_v0 = vor.u32 %v984_v48, %v7342_v55  ;;  %v1216_v1 = vsel %vm7291_vm2, %v7284_v2, %v7344_v56  ;;  %853 = vst [vmem:[#allocation2 + $0x34] sm:$0xf] %v817_v58  ;;  %v6399_v2 = vld [vmem:[#allocation9 + $0x30] sm:$0xff]  ;;  %v933_v33 = vunpack.c.l.b16 %v817_v58  ;;  %v6429_v48 = vld [vmem:[#allocation9 + $0x108] sm:$0xff]  ;;  %v2377_v58 = vsel %vm2341_vm8, 65537, %v7007_v34 }
  0xfa   : > { %v2588_v4 = vsel %vm2468_vm15, %v1216_v1, 0  ;;  %v657_v6 = vpop.f32.mrf.mxu0  ;;  %3761 = vmatpush.bf16.msrb.mxu0 %v6399_v2  ;;  %v1147_v60 = vor.u32 %v7344_v56, %v981_v47  ;;  %v1227_v1 = vadd.s32 56, %v7226_v26  ;;  %vm7416_vm15 = vmpackc.low %vm7273_vm14, %vm1940_vm11  ;;  %v6395_v2 = vld [vmem:[#allocation9 + $0x10] sm:$0xff] }
  0xfb   : > { %v1140_v8 = vsel %vm7256_vm7, %v7234_v38, %v986_v0  ;;  %v2624_v9 = vunpack.c.l.b16 %v2588_v4  ;;  %v2625_v10 = vunpack.c.h.b16 %v2588_v4  ;;  %v658_v12 = vadd.f32 %v7239_v44, %v657_v6  ;;  %v6431_v38 = vld [vmem:[#allocation9 + $0x118] sm:$0xff]  ;;  %v6428_v4 = vld [vmem:[#allocation9 + $0x100] sm:$0xff] }
  0xfc   : > { %v2049_v13 = vsel %vm7351_vm0, %v1140_v8, 0  ;;  %6640 = vmatpush.bf16.msra.mxu3 %v6431_v38  ;;  %3426 = vmatpush.bf16.msrb.mxu1 %v6431_v38  ;;  %v1309_v16 = vand.u32 15, %v1227_v1 }
  0xfd   : > { %v2086_v17 = vunpack.c.l.b16 %v2049_v13  ;;  %v2087_v18 = vunpack.c.h.b16 %v2049_v13  ;;  %v2660_v19 = vpack.c.b16 %v2624_v9, %v2624_v9  ;;  %v2661_v20 = vpack.c.b16 %v2625_v10, %v2625_v10 }
  0xfe   : > { %v733_v21 = vmax.f32 %v658_v12, 0.0  ;;  %3762 = vmatpush.bf16.msrb.mxu0 %v6398_v25  ;;  %v2413_v12 = vunpack.c.l.b16 %v2377_v58  ;;  %vm7435_vm0 = vcmp.lt.s32.totalorder %v1309_v16, 15  ;;  %v1229_v58 = vadd.s32 72, %v7226_v26 }
  0xff   : > { %v2122_v22 = vpack.c.b16 %v2086_v17, %v2086_v17  ;;  %v2123_v23 = vpack.c.b16 %v2087_v18, %v2087_v18  ;;  %2732 = vst [vmem:[#allocation2 + $0x8] sm:$0xf] %v2660_v19  ;;  %v1874_v19 = vunpack.c.l.b16 %v1838_v7  ;;  %vm2343_vm1 = vmpackc.low %vm7435_vm0, %vm7435_vm0 }
 0x100   : > { %2733 = vst [vmem:[#allocation2 + $0x14] sm:$0xf] %v2661_v20  ;;  %v818_v27 = vpack.c.bf16 %v733_v21, %v733_v21  ;;  %6641 = vmatpush.bf16.msra.mxu3 %v6430_v32  ;;  %3427 = vmatpush.bf16.msrb.mxu1 %v6430_v32  ;;  %v1228_v20 = vadd.s32 64, %v7226_v26  ;;  %v5565_v28 = vunpack.i.l.s16 %v2413_v12  ;;  %v1323_v7 = vand.u32 15, %v1229_v58 }
 0x101   : > { %2194 = vst [vmem:[#allocation2 + $0x18] sm:$0xf] %v2122_v22  ;;  %v5530_v32 = vunpack.i.l.s16 %v1874_v19 }
 0x102   : > { %2195 = vst [vmem:[#allocation2 + $0x24] sm:$0xf] %v2123_v23  ;;  %v934_v35 = vunpack.c.l.b16 %v818_v27  ;;  %v660_v36 = vpop.f32.mrf.mxu0  ;;  %3763 = vmatpush.bf16.msrb.mxu0 %v6397_v40  ;;  %v6393_v40 = vld [vmem:[#allocation9] sm:$0xff]  ;;  %vm2481_vm5 = vcmp.ne.s32.totalorder %v5565_v28, %v7261_v57 }
 0x103   : > { %854 = vst [vmem:[#allocation2 + $0x40] sm:$0xf] %v818_v27  ;;  %v661_v39 = vadd.f32 %v7239_v44, %v660_v36  ;;  %v1316_v36 = vand.u32 15, %v1228_v20  ;;  %vm1947_vm6 = vcmp.ne.s32.totalorder %v5530_v32, %v7249_v51  ;;  %vm2482_vm10 = vmpackc.low %vm2481_vm5, %vm7305_vm3  ;;  %v6339_v28 = vld [vmem:[%s7192_s14 + $0x60] sm:$0xff] }
 0x104   : > { %v7378_v41 = vpack.c.b16 %v934_v35, %v933_v33  ;;  %6642 = vmatpush.bf16.msra.mxu3 %v6429_v48  ;;  %3428 = vmatpush.bf16.msrb.mxu1 %v6429_v48  ;;  %v6338_v33 = vld [vmem:[%s7192_s14 + $0x58] sm:$0xff]  ;;  %vm7469_vm11 = vmpackc.low %vm7273_vm14, %vm1947_vm6 }
 0x105   : > { %v734_v46 = vmax.f32 %v661_v39, 0.0  ;;  %699 = vmatmul.bf16.gmra.mxu0 %v6337_v30  ;;  %vm7450_vm8 = vcmp.gt.s32.totalorder %v1316_v36, 0  ;;  %v1231_v36 = vadd.s32 88, %v7226_v26 }
 0x106   : > { %v988_v49 = vshrl.u32 %v7378_v41, 16  ;;  %v991_v52 = vshll.u32 %v7378_v41, 16  ;;  %3764 = vmatpush.bf16.msrb.mxu0 %v6396_v59  ;;  %v1230_v41 = vadd.s32 80, %v7226_v26  ;;  %vm1804_vm12 = vmpackc.low %vm7450_vm8, %vm7450_vm8 }
 0x107   : > { %v819_v53 = vpack.c.bf16 %v734_v46, %v734_v46 }
 0x108   : > { %v7400_v62 = vrot.slane %v988_v49, 7  ;;  %v7402_v63 = vrot.slane %v991_v52, 1  ;;  %v5598_v0 = vld [vmem:[#allocation2 + $0x18] sm:$0xf]  ;;  %6643 = vmatpush.bf16.msra.mxu3 %v6428_v4  ;;  %3429 = vmatpush.bf16.msrb.mxu1 %v6428_v4 }
 0x109   : > { %855 = vst [vmem:[#allocation2 + $0x4c] sm:$0xf] %v819_v53  ;;  %v6349_v3 = vld [vmem:[#allocation2 + $0x20] sm:$0xf0]  ;;  %v935_v30 = vunpack.c.l.b16 %v819_v53  ;;  %v2379_v53 = vsel %vm2343_vm1, 65537, %v7007_v34 }
 0x10a   : > { %v993_v43 = vor.u32 %v991_v52, %v7400_v62  ;;  %v1149_v47 = vsel %vm1145_vm9, %v1147_v60, %v7402_v63  ;;  %v662_v6 = vpop.f32.mrf.mxu0  ;;  %v7426_v8 = vor.u32 %v6349_v3, %v5598_v0  ;;  %3765 = vmatpush.bf16.msrb.mxu0 %v6395_v2  ;;  %v1150_v59 = vor.u32 %v7402_v63, %v988_v49 }
 0x10b   : > { %v2589_v9 = vsel %vm2475_vm13, %v1149_v47, 0  ;;  %v663_v10 = vadd.f32 %v7239_v44, %v662_v6  ;;  %v2415_v56 = vunpack.c.l.b16 %v2379_v53  ;;  %vm7489_vm13 = vcmp.lt.s32.totalorder %v1323_v7, 15 }
 0x10c   : > { %v994_v13 = vsel %vm979_vm4, %v7342_v55, %v993_v43  ;;  %v2626_v14 = vunpack.c.l.b16 %v2589_v9  ;;  %v2627_v15 = vunpack.c.h.b16 %v2589_v9  ;;  %3341 = vmatmul.bf16.vlgmr.msra.gmra.mxu1 %v7426_v8  ;;  %v6394_v55 = vld [vmem:[#allocation9 + $0x8] sm:$0xff]  ;;  %vm2345_vm0 = vmpackc.low %vm7489_vm13, %vm7489_vm13 }
 0x10d   : > { %v2050_v17 = vsel %vm7416_vm15, %v994_v13, 0  ;;  %v735_v18 = vmax.f32 %v663_v10, 0.0  ;;  %v715_v13 = vpop.f32.mrf.mxu1  ;;  %v2381_v53 = vsel %vm2345_vm0, 65537, %v7007_v34 }
 0x10e   : > { %v2088_v38 = vunpack.c.l.b16 %v2050_v17  ;;  %v2089_v21 = vunpack.c.h.b16 %v2050_v17  ;;  %v2662_v22 = vpack.c.b16 %v2626_v14, %v2626_v14  ;;  %v2663_v23 = vpack.c.b16 %v2627_v15, %v2627_v15  ;;  %3766 = vmatpush.bf16.msrb.mxu0 %v6394_v55 }
 0x10f   : > { %v820_v24 = vpack.c.bf16 %v735_v18, %v735_v18  ;;  %v1840_v15 = vsel %vm1804_vm12, 65537, %v7007_v34  ;;  %v1330_v17 = vand.u32 15, %v1230_v41  ;;  %v716_v32 = vadd.f32 %v7239_v44, %v715_v13 }
 0x110   : > { %v2124_v25 = vpack.c.b16 %v2088_v38, %v2088_v38  ;;  %v2125_v27 = vpack.c.b16 %v2089_v21, %v2089_v21  ;;  %2734 = vst [vmem:[#allocation2 + $0x20] sm:$0xf] %v2662_v22 }
 0x111   : > { %2735 = vst [vmem:[#allocation2 + $0x2c] sm:$0xf] %v2663_v23  ;;  %v936_v31 = vunpack.c.l.b16 %v820_v24  ;;  %v1876_v23 = vunpack.c.l.b16 %v1840_v15  ;;  %vm7493_vm15 = vcmp.gt.s32.totalorder %v1330_v17, 0 }
 0x112   : > { %2196 = vst [vmem:[#allocation2 + $0x30] sm:$0xf] %v2124_v25  ;;  %v665_v35 = vpop.f32.mrf.mxu0  ;;  %3767 = vmatpush.bf16.msrb.mxu0 %v6393_v40  ;;  %vm1806_vm1 = vmpackc.low %vm7493_vm15, %vm7493_vm15  ;;  %v6346_v25 = vld [vmem:[#allocation2 + $0x8] sm:$0xf0] }
 0x113   : > { %2197 = vst [vmem:[#allocation2 + $0x3c] sm:$0xf] %v2125_v27  ;;  %v7440_v37 = vpack.c.b16 %v936_v31, %v935_v30  ;;  %v666_v39 = vadd.f32 %v7239_v44, %v665_v35  ;;  %v5567_v27 = vunpack.i.l.s16 %v2415_v56 }
 0x114   : > { %856 = vst [vmem:[#allocation2 + $0x58] sm:$0xf] %v820_v24 }
 0x115   : > { %v996_v42 = vshrl.u32 %v7440_v37, 16  ;;  %v999_v46 = vshll.u32 %v7440_v37, 16  ;;  %v736_v48 = vmax.f32 %v666_v39, 0.0  ;;  %704 = vmatmul.bf16.gmra.mxu0 %v6338_v33  ;;  %v5532_v33 = vunpack.i.l.s16 %v1876_v23 }
 0x116   : > { %v1232_v39 = vadd.s32 96, %v7226_v26  ;;  %vm2488_vm5 = vcmp.ne.s32.totalorder %v5567_v27, %v7261_v57  ;;  %v2417_v37 = vunpack.c.l.b16 %v2381_v53  ;;  %v6348_v53 = vld [vmem:[#allocation2 + $0x1c] sm:$0xf] }
 0x117   : > { %v7461_v60 = vrot.slane %v996_v42, 7  ;;  %v7463_v0 = vrot.slane %v999_v46, 1  ;;  %v821_v1 = vpack.c.bf16 %v736_v48, %v736_v48  ;;  %v7510_v48 = vpop.f32.mrf.mxu1  ;;  %vm1954_vm6 = vcmp.ne.s32.totalorder %v5532_v33, %v7249_v51  ;;  %vm2489_vm8 = vmpackc.low %vm2488_vm5, %vm7305_vm3 }
 0x118   : > { %v5569_v24 = vunpack.i.l.s16 %v2417_v37  ;;  %v718_v37 = vadd.f32 %v7239_v44, %v7510_v48 }
 0x119   : > { %v1001_v49 = vor.u32 %v999_v46, %v7461_v60  ;;  %v1152_v63 = vsel %vm1145_vm9, %v1150_v59, %v7463_v0  ;;  %857 = vst [vmem:[#allocation2 + $0x64] sm:$0xf] %v821_v1  ;;  %v5610_v4 = vld [vmem:[#allocation2 + $0x30] sm:$0xf]  ;;  %v937_v29 = vunpack.c.l.b16 %v821_v1  ;;  %v756_v46 = vmax.f32 %v716_v32, 0.0 }
 0x11a   : > { %v2590_v43 = vsel %vm2482_vm10, %v1152_v63, 0  ;;  %v667_v47 = vpop.f32.mrf.mxu0  ;;  %v6352_v6 = vld [vmem:[#allocation2 + $0x38] sm:$0xf0]  ;;  %v1842_v1 = vsel %vm1806_vm1, 65537, %v7007_v34  ;;  %v1344_v63 = vand.u32 15, %v1232_v39  ;;  %vm1956_vm10 = vmpackc.low %vm7273_vm14, %vm1954_vm6  ;;  %vm2495_vm1 = vcmp.ne.s32.totalorder %v5569_v24, %v7261_v57 }
 0x11b   : > { %v1002_v9 = vsel %vm979_vm4, %v7400_v62, %v1001_v49  ;;  %v2628_v10 = vunpack.c.l.b16 %v2590_v43  ;;  %v2629_v12 = vunpack.c.h.b16 %v2590_v43  ;;  %v668_v2 = vadd.f32 %v7239_v44, %v667_v47  ;;  %v5600_v32 = vld [vmem:[#allocation2 + $0x24] sm:$0xf0]  ;;  %vm7601_vm5 = vmpackc.low %vm2495_vm1, %vm7305_vm3 }
 0x11c   : > { %v2051_v14 = vsel %vm7469_vm11, %v1002_v9, 0  ;;  %v7486_v16 = vor.u32 %v6352_v6, %v5610_v4  ;;  %v7517_v3 = vpack.c.bf16 %v756_v46, %v756_v46  ;;  %v1337_v49 = vand.u32 15, %v1231_v36 }
 0x11d   : > { %v2090_v18 = vunpack.c.l.b16 %v2051_v14  ;;  %v2091_v19 = vunpack.c.h.b16 %v2051_v14  ;;  %v2664_v20 = vpack.c.b16 %v2628_v10, %v2628_v10  ;;  %v2665_v38 = vpack.c.b16 %v2629_v12, %v2629_v12 }
 0x11e   : > { %v737_v21 = vmax.f32 %v668_v2, 0.0  ;;  %3346 = vmatmul.bf16.gmra.mxu1 %v7486_v16  ;;  %v1153_v4 = vor.u32 %v7463_v0, %v996_v42  ;;  %877 = vst [vmem:[#allocation2 + $0x154] sm:$0xf] %v7517_v3  ;;  %v1878_v6 = vunpack.c.l.b16 %v1842_v1  ;;  %vm7549_vm11 = vcmp.lt.s32.totalorder %v1337_v49, 15 }
 0x11f   : > { %v2126_v62 = vpack.c.b16 %v2090_v18, %v2090_v18  ;;  %v2127_v22 = vpack.c.b16 %v2091_v19, %v2091_v19  ;;  %2736 = vst [vmem:[#allocation2 + $0x38] sm:$0xf] %v2664_v20  ;;  %vm7555_vm12 = vcmp.gt.s32.totalorder %v1344_v63, 0  ;;  %vm2347_vm13 = vmpackc.low %vm7549_vm11, %vm7549_vm11  ;;  %v7581_v49 = vor.u32 %v6348_v53, %v5600_v32  ;;  %v6442_v63 = vld [vmem:[#allocation9 + $0x170] sm:$0xff] }
 0x120   : > { %2737 = vst [vmem:[#allocation2 + $0x44] sm:$0xf] %v2665_v38  ;;  %v822_v55 = vpack.c.bf16 %v737_v21, %v737_v21  ;;  %v6357_v12 = vld [vmem:[#allocation2 + $0x64] sm:$0xf]  ;;  %v720_v21 = vpop.f32.mrf.mxu1  ;;  %v7559_v23 = vunpack.i.l.s16 %v1878_v6  ;;  %vm1808_vm15 = vmpackc.low %vm7555_vm12, %vm7555_vm12  ;;  %v6408_v6 = vld [vmem:[#allocation9 + $0x78] sm:$0xff]  ;;  %v757_v48 = vmax.f32 %v718_v37, 0.0 }
 0x121   : > { %2198 = vst [vmem:[#allocation2 + $0x48] sm:$0xf] %v2126_v62  ;;  %3849 = vmatpush.bf16.msrb.mxu2 %v6408_v6  ;;  %v6441_v38 = vld [vmem:[#allocation9 + $0x168] sm:$0xff]  ;;  %v6440_v6 = vld [vmem:[#allocation9 + $0x160] sm:$0xff] }
 0x122   : > { %2199 = vst [vmem:[#allocation2 + $0x54] sm:$0xf] %v2127_v22  ;;  %v938_v30 = vunpack.c.l.b16 %v822_v55  ;;  %v670_v31 = vpop.f32.mrf.mxu0  ;;  %vm1961_vm0 = vcmp.ne.s32.totalorder %v7559_v23, %v7249_v51  ;;  %v842_v24 = vpack.c.bf16 %v757_v48, %v757_v48 }
 0x123   : > { %858 = vst [vmem:[#allocation2 + $0x70] sm:$0xf] %v822_v55  ;;  %v671_v35 = vadd.f32 %v7239_v44, %v670_v31  ;;  %v5886_v55 = vld [vmem:[#allocation2] sm:$0xf] }
 0x124   : > { %v7508_v40 = vpack.c.b16 %v938_v30, %v937_v29  ;;  %v6443_v30 = vld [vmem:[#allocation9 + $0x178] sm:$0xff]  ;;  %v5887_v36 = vor.u32 %v6346_v25, %v5886_v55  ;;  %v6351_v55 = vld [vmem:[#allocation2 + $0x34] sm:$0xf]  ;;  %878 = vst [vmem:[#allocation2 + $0x160] sm:$0xf] %v842_v24 }
 0x125   : > { %v738_v52 = vmax.f32 %v671_v35, 0.0  ;;  %709 = vmatmul.bf16.gmra.mxu0 %v6339_v28  ;;  %3511 = vmatpush.bf16.msra.mxu1 %v6443_v30  ;;  %v6354_v25 = vld [vmem:[#allocation2 + $0x4c] sm:$0xf] }
 0x126   : > { %v1004_v58 = vshrl.u32 %v7508_v40, 16  ;;  %v1007_v59 = vshll.u32 %v7508_v40, 16  ;;  %v5624_v40 = vld [vmem:[#allocation2 + $0x54] sm:$0xf0] }
 0x127   : > { %v7520_v41 = vpack.c.bf16 %v738_v52, %v738_v52  ;;  %v2383_v52 = vsel %vm2347_vm13, 65537, %v7007_v34 }
 0x128   : > { %v7527_v43 = vrot.slane %v1004_v58, 7  ;;  %v7529_v47 = vrot.slane %v1007_v59, 1  ;;  %v5622_v56 = vld [vmem:[#allocation2 + $0x48] sm:$0xf] }
 0x129   : > { %859 = vst [vmem:[#allocation2 + $0x7c] sm:$0xf] %v7520_v41  ;;  %v6355_v7 = vld [vmem:[#allocation2 + $0x50] sm:$0xf0]  ;;  %v939_v39 = vunpack.c.l.b16 %v7520_v41  ;;  %v1844_v41 = vsel %vm1808_vm15, 65537, %v7007_v34  ;;  %3512 = vmatpush.bf16.msra.mxu1 %v6442_v63 }
 0x12a   : > { %v1009_v42 = vor.u32 %v1007_v59, %v7527_v43  ;;  %v1155_v0 = vsel %vm1145_vm9, %v1153_v4, %v7529_v47  ;;  %v672_v9 = vpop.f32.mrf.mxu0  ;;  %v7544_v10 = vor.u32 %v6355_v7, %v5622_v56  ;;  %v5636_v2 = vld [vmem:[#allocation2 + $0x6c] sm:$0xf0]  ;;  %v1233_v59 = vadd.s32 104, %v7226_v26 }
 0x12b   : > { %v2591_v13 = vsel %vm2489_vm8, %v1155_v0, 0  ;;  %v673_v14 = vadd.f32 %v7239_v44, %v672_v9  ;;  %v7547_v15 = vor.u32 %v6357_v12, %v5636_v2  ;;  %v721_v7 = vadd.f32 %v7239_v44, %v720_v21  ;;  %v7593_v2 = vpop.f32.mrf.mxu1 }
 0x12c   : > { %v1010_v18 = vsel %vm979_vm4, %v7461_v60, %v1009_v42  ;;  %v2630_v19 = vunpack.c.l.b16 %v2591_v13  ;;  %v2631_v20 = vunpack.c.h.b16 %v2591_v13  ;;  %v1156_v42 = vor.u32 %v7529_v47, %v1004_v58 }
 0x12d   : > { %v2052_v62 = vsel %vm1956_vm10, %v1010_v18, 0  ;;  %v739_v22 = vmax.f32 %v673_v14, 0.0  ;;  %3445 = vmatmul.bf16.vlgmr.msra.gmra.mxu3 %v7547_v15  ;;  %v2419_v0 = vunpack.c.l.b16 %v2383_v52  ;;  %v1234_v9 = vadd.s32 112, %v7226_v26  ;;  %v5612_v18 = vld [vmem:[#allocation2 + $0x3c] sm:$0xf0]  ;;  %vm7625_vm10 = vmpackc.low %vm7273_vm14, %vm1961_vm0  ;;  %3513 = vmatpush.bf16.msra.mxu1 %v6441_v38 }
 0x12e   : > { %v2092_v27 = vunpack.c.l.b16 %v2052_v62  ;;  %v2093_v28 = vunpack.c.h.b16 %v2052_v62  ;;  %v2666_v29 = vpack.c.b16 %v2630_v19, %v2630_v19  ;;  %v2667_v60 = vpack.c.b16 %v2631_v20, %v2631_v20  ;;  %3351 = vmatmul.bf16.gmra.mxu1 %v7544_v10 }
 0x12f   : > { %v824_v31 = vpack.c.bf16 %v739_v22, %v739_v22  ;;  %v1351_v12 = vand.u32 15, %v1233_v59  ;;  %v1880_v58 = vunpack.c.l.b16 %v1844_v41  ;;  %v758_v47 = vmax.f32 %v721_v7, 0.0 }
 0x130   : > { %v2128_v33 = vpack.c.b16 %v2092_v27, %v2092_v27  ;;  %v2129_v35 = vpack.c.b16 %v2093_v28, %v2093_v28  ;;  %2738 = vst [vmem:[#allocation2 + $0x50] sm:$0xf] %v2666_v29  ;;  %v1358_v19 = vand.u32 15, %v1234_v9  ;;  %v957_v27 = vunpack.c.l.b16 %v7517_v3  ;;  %v6360_v32 = vld [vmem:[#allocation2 + $0x7c] sm:$0xf] }
 0x131   : > { %2739 = vst [vmem:[#allocation2 + $0x5c] sm:$0xf] %v2667_v60  ;;  %v940_v46 = vunpack.c.l.b16 %v824_v31  ;;  %vm7605_vm6 = vcmp.lt.s32.totalorder %v1351_v12, 15  ;;  %v7630_v28 = vunpack.i.l.s16 %v2419_v0  ;;  %v7636_v60 = vor.u32 %v6351_v55, %v5612_v18  ;;  %v5606_v12 = vld [vmem:[#allocation2 + $0x20] sm:$0xf]  ;;  %3514 = vmatpush.bf16.msra.mxu1 %v6440_v6 }
 0x132   : > { %2200 = vst [vmem:[#allocation2 + $0x60] sm:$0xf] %v2128_v33  ;;  %v675_v1 = vpop.f32.mrf.mxu0  ;;  %vm2349_vm8 = vmpackc.low %vm7605_vm6, %vm7605_vm6  ;;  %vm7632_vm11 = vcmp.gt.s32.totalorder %v1358_v19, 0  ;;  %v7642_v33 = vpack.c.bf16 %v758_v47, %v758_v47  ;;  %v958_v52 = vunpack.c.l.b16 %v842_v24  ;;  %v1236_v6 = vadd.s32 128, %v7226_v26 }
 0x133   : > { %2201 = vst [vmem:[#allocation2 + $0x6c] sm:$0xf] %v2129_v35  ;;  %v7583_v4 = vpack.c.b16 %v940_v46, %v939_v39  ;;  %v676_v56 = vadd.f32 %v7239_v44, %v675_v1  ;;  %vm1810_vm12 = vmpackc.low %vm7632_vm11, %vm7632_vm11  ;;  %v2385_v3 = vsel %vm2349_vm8, 65537, %v7007_v34  ;;  %v7655_v39 = vunpack.i.l.s16 %v1880_v58  ;;  %v725_v9 = vpop.f32.mrf.mxu1 }
 0x134   : > { %860 = vst [vmem:[#allocation2 + $0x88] sm:$0xf] %v824_v31  ;;  %v1846_v53 = vsel %vm1810_vm12, 65537, %v7007_v34  ;;  %v7668_v0 = vpack.c.b16 %v958_v52, %v957_v27  ;;  %v2421_v55 = vunpack.c.l.b16 %v2385_v3  ;;  %v6439_v27 = vld [vmem:[#allocation9 + $0x158] sm:$0xff]  ;;  %vm2502_vm15 = vcmp.ne.s32.totalorder %v7630_v28, %v7261_v57 }
 0x135   : > { %v1012_v13 = vshrl.u32 %v7583_v4, 16  ;;  %v1015_v14 = vshll.u32 %v7583_v4, 16  ;;  %v740_v17 = vmax.f32 %v676_v56, 0.0  ;;  %3768 = vmatmul.bf16.vlgmr.msrb.gmra.mxu0 %v5887_v36  ;;  %879 = vst [vmem:[#allocation2 + $0x16c] sm:$0xf] %v7642_v33  ;;  %v1882_v20 = vunpack.c.l.b16 %v1846_v53  ;;  %3515 = vmatpush.bf16.msra.mxu1 %v6439_v27  ;;  %vm7721_vm0 = vmpackc.low %vm2502_vm15, %vm7305_vm3 }
 0x136   : > { %v1084_v47 = vshrl.u32 %v7668_v0, 16  ;;  %v1087_v19 = vshll.u32 %v7668_v0, 16  ;;  %vm1968_vm13 = vcmp.ne.s32.totalorder %v7655_v39, %v7249_v51  ;;  %v7766_v39 = vld [vmem:[%s8983_s5] ss:$0 sm:$0xff] }
 0x137   : > { %v7611_v21 = vrot.slane %v1012_v13, 7  ;;  %v7613_v62 = vrot.slane %v1015_v14, 1  ;;  %v7615_v22 = vpack.c.bf16 %v740_v17, %v740_v17  ;;  %v7695_v4 = vunpack.i.l.s16 %v1882_v20 }
 0x138   : > { %v7693_v52 = vrot.slane %v1087_v19, 1 }
 0x139   : > { %v1017_v30 = vor.u32 %v1015_v14, %v7611_v21  ;;  %v1158_v23 = vsel %vm1145_vm9, %v1156_v42, %v7613_v62  ;;  %861 = vst [vmem:[#allocation2 + $0x94] sm:$0xf] %v7615_v22  ;;  %v5634_v31 = vld [vmem:[#allocation2 + $0x60] sm:$0xf]  ;;  %v941_v3 = vunpack.c.l.b16 %v7615_v22  ;;  %v723_v22 = vadd.f32 %v7239_v44, %v7593_v2 }
 0x13a   : > { %v2592_v35 = vsel %vm7601_vm5, %v1158_v23, 0  ;;  %v677_v36 = vpop.f32.mrf.mxu0  ;;  %v6358_v46 = vld [vmem:[#allocation2 + $0x68] sm:$0xf0]  ;;  %v7679_v23 = vrot.slane %v1084_v47, 7  ;;  %v7710_v2 = vadd.s32 120, %v7226_v26  ;;  %v7730_v20 = vor.u32 %v7693_v52, %v1084_v47 }
 0x13b   : > { %v1018_v59 = vsel %vm979_vm4, %v7527_v43, %v1017_v30  ;;  %v2632_v1 = vunpack.c.l.b16 %v2592_v35  ;;  %v2633_v41 = vunpack.c.h.b16 %v2592_v35  ;;  %v678_v63 = vadd.f32 %v7239_v44, %v677_v36  ;;  %v5648_v56 = vld [vmem:[#allocation2 + $0x84] sm:$0xf0]  ;;  %v6350_v43 = vld [vmem:[#allocation2 + $0x28] sm:$0xf0] }
 0x13c   : > { %v2053_v37 = vsel %vm7625_vm10, %v1018_v59, 0  ;;  %v7664_v7 = vor.u32 %v6358_v46, %v5634_v31  ;;  %v7666_v42 = vor.u32 %v6360_v32, %v5648_v56  ;;  %v7675_v29 = vor.u32 %v6350_v43, %v5606_v12  ;;  %v6407_v59 = vld [vmem:[#allocation9 + $0x70] sm:$0xff]  ;;  %v7712_v43 = vpop.f32.mrf.mxu1  ;;  %vm7751_vm10 = vmpackc.low %vm7273_vm14, %vm1968_vm13 }
 0x13d   : > { %v2094_v14 = vunpack.c.l.b16 %v2053_v37  ;;  %v2095_v17 = vunpack.c.h.b16 %v2053_v37  ;;  %v2668_v48 = vpack.c.b16 %v2632_v1, %v2632_v1  ;;  %v2669_v18 = vpack.c.b16 %v2633_v41, %v2633_v41  ;;  %v6438_v1 = vld [vmem:[#allocation9 + $0x150] sm:$0xff]  ;;  %3850 = vmatpush.bf16.msrb.mxu2 %v6407_v59 }
 0x13e   : > { %v741_v58 = vmax.f32 %v678_v63, 0.0  ;;  %3356 = vmatmul.bf16.vlgmr.msra.gmra.mxu2 %v7664_v7  ;;  %3430 = vmatmul.bf16.vlgmr.msrb.gmra.mxu1 %v7581_v49  ;;  %v7681_v31 = vor.u32 %v6354_v25, %v5624_v40  ;;  %v1159_v32 = vor.u32 %v7613_v62, %v1012_v13  ;;  %v959_v35 = vunpack.c.l.b16 %v7642_v33 }
 0x13f   : > { %v2130_v38 = vpack.c.b16 %v2094_v14, %v2094_v14  ;;  %v2131_v24 = vpack.c.b16 %v2095_v17, %v2095_v17  ;;  %2740 = vst [vmem:[#allocation2 + $0x68] sm:$0xf] %v2668_v48  ;;  %3450 = vmatmul.bf16.gmra.mxu3 %v7666_v42  ;;  %v7691_v46 = vor.u32 %v1087_v19, %v7679_v23  ;;  %v7698_v62 = vunpack.i.l.s16 %v2421_v55 }
 0x140   : > { %2741 = vst [vmem:[#allocation2 + $0x74] sm:$0xf] %v2669_v18  ;;  %v826_v30 = vpack.c.bf16 %v741_v58, %v741_v58  ;;  %v1249_v33 = vadd.s32 232, %v7226_v26  ;;  %v1250_v63 = vadd.s32 240, %v7226_v26  ;;  %v726_v56 = vadd.f32 %v7239_v44, %v725_v9  ;;  %3516 = vmatpush.bf16.msra.mxu1 %v6438_v1 }
 0x141   : > { %2202 = vst [vmem:[#allocation2 + $0x78] sm:$0xf] %v2130_v38  ;;  %v759_v0 = vmax.f32 %v723_v22, 0.0  ;;  %v1372_v40 = vand.u32 15, %v1236_v6  ;;  %v1365_v47 = vand.u32 15, %v7710_v2  ;;  %vm2509_vm12 = vcmp.ne.s32.totalorder %v7698_v62, %v7261_v57 }
 0x142   : > { %2203 = vst [vmem:[#allocation2 + $0x84] sm:$0xf] %v2131_v24  ;;  %v942_v36 = vunpack.c.l.b16 %v826_v30  ;;  %v680_v53 = vpop.f32.mrf.mxu0  ;;  %v1463_v12 = vand.u32 15, %v1249_v33  ;;  %v1470_v48 = vand.u32 15, %v1250_v63  ;;  %v760_v18 = vmax.f32 %v726_v56, 0.0 }
 0x143   : > { %862 = vst [vmem:[#allocation2 + $0xa0] sm:$0xf] %v826_v30  ;;  %v681_v13 = vadd.f32 %v7239_v44, %v680_v53  ;;  %v844_v9 = vpack.c.bf16 %v759_v0, %v759_v0  ;;  %v6363_v24 = vld [vmem:[#allocation2 + $0x94] sm:$0xf]  ;;  %vm7757_vm11 = vcmp.gt.s32.totalorder %v1372_v40, 0  ;;  %vm1975_vm13 = vcmp.ne.s32.totalorder %v7695_v4, %v7249_v51 }
 0x144   : > { %v7703_v41 = vpack.c.b16 %v942_v36, %v941_v3  ;;  %vm2257_vm1 = vcmp.lt.s32.totalorder %v1463_v12, 15  ;;  %vm7732_vm5 = vcmp.gt.s32.totalorder %v1470_v48, 0  ;;  %v7741_v30 = vpack.c.bf16 %v760_v18, %v760_v18  ;;  %v787_v48 = vpop.f32.mrf.mxu1  ;;  %vm1812_vm15 = vmpackc.low %vm7757_vm11, %vm7757_vm11 }
 0x145   : > { %v742_v37 = vmax.f32 %v681_v13, 0.0  ;;  %3773 = vmatmul.bf16.gmra.mxu0 %v7426_v8  ;;  %vm2365_vm6 = vmpackc.low %vm2257_vm1, %vm2257_vm1  ;;  %v960_v25 = vunpack.c.l.b16 %v844_v9  ;;  %880 = vst [vmem:[#allocation2 + $0x178] sm:$0xf] %v844_v9  ;;  %v1848_v59 = vsel %vm1812_vm15, 65537, %v7007_v34  ;;  %v1252_v62 = vadd.s32 256, %v7226_v26 }
 0x146   : > { %v1020_v14 = vshrl.u32 %v7703_v41, 16  ;;  %v1023_v17 = vshll.u32 %v7703_v41, 16  ;;  %vm1826_vm8 = vmpackc.low %vm7732_vm5, %vm7732_vm5  ;;  %v2401_v27 = vsel %vm2365_vm6, 65537, %v7007_v34  ;;  %881 = vst [vmem:[#allocation2 + $0x184] sm:$0xf] %v7741_v30 }
 0x147   : > { %v7725_v8 = vpack.c.bf16 %v742_v37, %v742_v37  ;;  %v977_v63 = vpack.c.b16 %v960_v25, %v959_v35  ;;  %v1862_v0 = vsel %vm1826_vm8, 65537, %v7007_v34  ;;  %vm2510_vm11 = vmpackc.low %vm2509_vm12, %vm7305_vm3 }
 0x148   : > { %v7727_v58 = vrot.slane %v1020_v14, 7  ;;  %v1160_v19 = vrot.slane %v1023_v17, 1  ;;  %v5646_v38 = vld [vmem:[#allocation2 + $0x78] sm:$0xf]  ;;  %v1898_v55 = vunpack.c.l.b16 %v1862_v0  ;;  %vm7837_vm12 = vmpackc.low %vm7273_vm14, %vm1975_vm13 }
 0x149   : > { %863 = vst [vmem:[#allocation2 + $0xac] sm:$0xf] %v7725_v8  ;;  %v6361_v28 = vld [vmem:[#allocation2 + $0x80] sm:$0xf0]  ;;  %v1092_v2 = vshrl.u32 %v977_v63, 16  ;;  %v943_v40 = vunpack.c.l.b16 %v7725_v8 }
 0x14a   : > { %v1025_v3 = vor.u32 %v1023_v17, %v7727_v58  ;;  %v1161_v36 = vsel %vm1145_vm9, %v1159_v32, %v1160_v19  ;;  %v682_v13 = vpop.f32.mrf.mxu0  ;;  %v7755_v22 = vor.u32 %v6361_v28, %v5646_v38  ;;  %v5660_v33 = vld [vmem:[#allocation2 + $0x9c] sm:$0xf0]  ;;  %v1095_v17 = vshll.u32 %v977_v63, 16 }
 0x14b   : > { %v2593_v32 = vsel %vm7721_vm0, %v1161_v36, 0  ;;  %v683_v1 = vadd.f32 %v7766_v39, %v682_v13  ;;  %v7769_v41 = vor.u32 %v6363_v24, %v5660_v33  ;;  %v7790_v24 = vrot.slane %v1092_v2, 7 }
 0x14c   : > { %v1026_v56 = vsel %vm979_vm4, %v7611_v21, %v1025_v3  ;;  %v2634_v6 = vunpack.c.l.b16 %v2593_v32  ;;  %v2635_v37 = vunpack.c.h.b16 %v2593_v32  ;;  %v1162_v28 = vor.u32 %v1160_v19, %v1020_v14 }
 0x14d   : > { %v2054_v35 = vsel %vm7751_vm10, %v1026_v56, 0  ;;  %v743_v12 = vmax.f32 %v683_v1, 0.0  ;;  %v2437_v36 = vunpack.c.l.b16 %v2401_v27  ;;  %v1097_v13 = vor.u32 %v1095_v17, %v7790_v24 }
 0x14e   : > { %v2096_v21 = vunpack.c.l.b16 %v2054_v35  ;;  %v2097_v18 = vunpack.c.h.b16 %v2054_v35  ;;  %v2670_v44 = vpack.c.b16 %v2634_v6, %v2634_v6  ;;  %v2671_v9 = vpack.c.b16 %v2635_v37, %v2635_v37  ;;  %3361 = vmatmul.bf16.gmra.mxu2 %v7755_v22  ;;  %3435 = vmatmul.bf16.gmra.mxu1 %v7636_v60 }
 0x14f   : > { %v828_v38 = vpack.c.bf16 %v743_v12, %v743_v12  ;;  %3455 = vmatmul.bf16.gmra.mxu3 %v7769_v41  ;;  %v1187_v8 = vrot.slane %v1095_v17, 1  ;;  %v961_v33 = vunpack.c.l.b16 %v7741_v30  ;;  %v5554_v32 = vunpack.i.l.s16 %v1898_v55  ;;  %v6437_v12 = vld [vmem:[#allocation9 + $0x148] sm:$0xff]  ;;  %v789_v17 = vpop.f32.mrf.mxu1 }
 0x150   : > { %v2132_v25 = vpack.c.b16 %v2096_v21, %v2096_v21  ;;  %v2133_v3 = vpack.c.b16 %v2097_v18, %v2097_v18  ;;  %2742 = vst [vmem:[#allocation2 + $0x80] sm:$0xf] %v2670_v44  ;;  %v5589_v1 = vunpack.i.l.s16 %v2437_v36  ;;  %vm2243_vm0 = vcmp.lt.s32.totalorder %v1365_v47, 15  ;;  %3517 = vmatpush.bf16.msra.mxu1 %v6437_v12 }
 0x151   : > { %2743 = vst [vmem:[#allocation2 + $0x8c] sm:$0xf] %v2671_v9  ;;  %v944_v53 = vunpack.c.l.b16 %v828_v38  ;;  %v1098_v19 = vsel %vm979_vm4, %v7679_v23, %v1097_v13  ;;  %v1884_v56 = vunpack.c.l.b16 %v1848_v59  ;;  %vm2351_vm1 = vmpackc.low %vm2243_vm0, %vm2243_vm0  ;;  %vm2031_vm5 = vcmp.ne.s32.totalorder %v5554_v32, %v7249_v51  ;;  %v6436_v13 = vld [vmem:[#allocation9 + $0x140] sm:$0xff] }
 0x152   : > { %2204 = vst [vmem:[#allocation2 + $0x90] sm:$0xf] %v2132_v25  ;;  %v685_v63 = vpop.f32.mrf.mxu0  ;;  %vm2565_vm6 = vcmp.ne.s32.totalorder %v5589_v1, %v7261_v57  ;;  %v2387_v6 = vsel %vm2351_vm1, 65537, %v7007_v34  ;;  %v7806_v37 = vadd.f32 %v7766_v39, %v7712_v43  ;;  %v1188_v23 = vsel %vm1145_vm9, %v7730_v20, %v1187_v8  ;;  %vm2033_vm8 = vmpackc.low %vm7273_vm14, %vm2031_vm5 }
 0x153   : > { %2205 = vst [vmem:[#allocation2 + $0x9c] sm:$0xf] %v2133_v3  ;;  %v969_v14 = vpack.c.b16 %v944_v53, %v943_v40  ;;  %v686_v27 = vadd.f32 %v7766_v39, %v685_v63  ;;  %v7813_v48 = vor.u32 %v1187_v8, %v1092_v2  ;;  %v2063_v21 = vsel %vm2033_vm8, %v1098_v19, 0  ;;  %vm2566_vm10 = vmpackc.low %vm2565_vm6, %vm7305_vm3 }
 0x154   : > { %864 = vst [vmem:[#allocation2 + $0xb8] sm:$0xf] %v828_v38  ;;  %v7817_v43 = vunpack.i.l.s16 %v1884_v56  ;;  %v2423_v18 = vunpack.c.l.b16 %v2387_v6  ;;  %v2115_v9 = vunpack.c.h.b16 %v2063_v21  ;;  %v2602_v2 = vsel %vm2566_vm10, %v1188_v23, 0  ;;  %3518 = vmatpush.bf16.msra.mxu1 %v6436_v13 }
 0x155   : > { %v1028_v47 = vshrl.u32 %v969_v14, 16  ;;  %v1031_v0 = vshll.u32 %v969_v14, 16  ;;  %v744_v35 = vmax.f32 %v686_v27, 0.0  ;;  %3778 = vmatmul.bf16.gmra.mxu0 %v7486_v16  ;;  %v2114_v16 = vunpack.c.l.b16 %v2063_v21  ;;  %v6366_v21 = vld [vmem:[#allocation2 + $0xac] sm:$0xf] }
 0x156   : > { %v761_v38 = vmax.f32 %v7806_v37, 0.0  ;;  %v1251_v55 = vadd.s32 248, %v7226_v26  ;;  %v7841_v53 = vunpack.i.l.s16 %v2423_v18  ;;  %v2151_v32 = vpack.c.b16 %v2115_v9, %v2115_v9 }
 0x157   : > { %v7819_v44 = vrot.slane %v1028_v47, 7  ;;  %v1163_v20 = vrot.slane %v1031_v0, 1  ;;  %v7826_v40 = vpack.c.bf16 %v744_v35, %v744_v35  ;;  %v2150_v36 = vpack.c.b16 %v2114_v16, %v2114_v16  ;;  %v792_v18 = vpop.f32.mrf.mxu1 }
 0x158   : > { %v2652_v1 = vunpack.c.l.b16 %v2602_v2  ;;  %v2653_v63 = vunpack.c.h.b16 %v2602_v2  ;;  %2223 = vst [vmem:[#allocation2 + $0x174] sm:$0xf] %v2151_v32  ;;  %vm1982_vm13 = vcmp.ne.s32.totalorder %v7817_v43, %v7249_v51  ;;  %v1253_v13 = vadd.s32 264, %v7226_v26 }
 0x159   : > { %v1033_v25 = vor.u32 %v1031_v0, %v7819_v44  ;;  %v1164_v3 = vsel %vm1145_vm9, %v1162_v28, %v1163_v20  ;;  %865 = vst [vmem:[#allocation2 + $0xc4] sm:$0xf] %v7826_v40  ;;  %v5658_v59 = vld [vmem:[#allocation2 + $0x90] sm:$0xf]  ;;  %v7846_v14 = vor.u32 %v1163_v20, %v1028_v47  ;;  %v945_v23 = vunpack.c.l.b16 %v7826_v40 }
 0x15a   : > { %v2594_v8 = vsel %vm2510_vm11, %v1164_v3, 0  ;;  %v687_v28 = vpop.f32.mrf.mxu0  ;;  %2222 = vst [vmem:[#allocation2 + $0x168] sm:$0xf] %v2150_v36  ;;  %v6364_v56 = vld [vmem:[#allocation2 + $0x98] sm:$0xf0]  ;;  %v2688_v0 = vpack.c.b16 %v2652_v1, %v2652_v1  ;;  %v2689_v20 = vpack.c.b16 %v2653_v63, %v2653_v63  ;;  %v846_v40 = vpack.c.bf16 %v761_v38, %v761_v38 }
 0x15b   : > { %v1034_v4 = vsel %vm979_vm4, %v7727_v58, %v1033_v25  ;;  %v2636_v19 = vunpack.c.l.b16 %v2594_v8  ;;  %v2637_v27 = vunpack.c.h.b16 %v2594_v8  ;;  %v5672_v6 = vld [vmem:[#allocation2 + $0xb4] sm:$0xf0]  ;;  %v688_v35 = vadd.f32 %v7766_v39, %v687_v28 }
 0x15c   : > { %v2055_v37 = vsel %vm7837_vm12, %v1034_v4, 0  ;;  %2760 = vst [vmem:[#allocation2 + $0x158] sm:$0xf] %v2688_v0  ;;  %v7852_v9 = vor.u32 %v6364_v56, %v5658_v59  ;;  %v7855_v2 = vor.u32 %v6366_v21, %v5672_v6  ;;  %v1254_v8 = vadd.s32 272, %v7226_v26 }
 0x15d   : > { %v2098_v12 = vunpack.c.l.b16 %v2055_v37  ;;  %v2099_v17 = vunpack.c.h.b16 %v2055_v37  ;;  %v2672_v58 = vpack.c.b16 %v2636_v19, %v2636_v19  ;;  %v2673_v47 = vpack.c.b16 %v2637_v27, %v2637_v27  ;;  %2761 = vst [vmem:[#allocation2 + $0x164] sm:$0xf] %v2689_v20 }
 0x15e   : > { %v745_v16 = vmax.f32 %v688_v35, 0.0  ;;  %3440 = vmatmul.bf16.gmra.mxu1 %v7681_v31  ;;  %3366 = vmatmul.bf16.gmra.mxu2 %v7852_v9  ;;  %v1477_v32 = vand.u32 15, %v1251_v55  ;;  %vm2516_vm15 = vcmp.ne.s32.totalorder %v7841_v53, %v7261_v57  ;;  %v962_v1 = vunpack.c.l.b16 %v846_v40  ;;  %882 = vst [vmem:[#allocation2 + $0x190] sm:$0xf] %v846_v40 }
 0x15f   : > { %v2134_v25 = vpack.c.b16 %v2098_v12, %v2098_v12  ;;  %v2135_v3 = vpack.c.b16 %v2099_v17, %v2099_v17  ;;  %2744 = vst [vmem:[#allocation2 + $0x98] sm:$0xf] %v2672_v58  ;;  %3460 = vmatmul.bf16.gmra.mxu3 %v7855_v2  ;;  %v1484_v63 = vand.u32 15, %v1252_v62  ;;  %v7867_v38 = vadd.s32 136, %v7226_v26 }
 0x160   : > { %2745 = vst [vmem:[#allocation2 + $0xa4] sm:$0xf] %v2673_v47  ;;  %v830_v36 = vpack.c.bf16 %v745_v16, %v745_v16  ;;  %v1491_v59 = vand.u32 15, %v1253_v13  ;;  %v1498_v4 = vand.u32 15, %v1254_v8  ;;  %vm7869_vm0 = vcmp.lt.s32.totalorder %v1477_v32, 15  ;;  %v6406_v13 = vld [vmem:[#allocation9 + $0x68] sm:$0xff] }
 0x161   : > { %2206 = vst [vmem:[#allocation2 + $0xa8] sm:$0xf] %v2134_v25  ;;  %v978_v55 = vpack.c.b16 %v962_v1, %v961_v33  ;;  %vm1720_vm1 = vcmp.gt.s32.totalorder %v1484_v63, 0  ;;  %vm2367_vm5 = vmpackc.low %vm7869_vm0, %vm7869_vm0  ;;  %v7882_v6 = vadd.s32 144, %v7226_v26  ;;  %v1379_v30 = vand.u32 15, %v7867_v38  ;;  %3851 = vmatpush.bf16.msrb.mxu2 %v6406_v13 }
 0x162   : > { %2207 = vst [vmem:[#allocation2 + $0xb4] sm:$0xf] %v2135_v3  ;;  %v946_v28 = vunpack.c.l.b16 %v830_v36  ;;  %v690_v27 = vpop.f32.mrf.mxu0  ;;  %vm1722_vm6 = vcmp.gt.s32.totalorder %v1498_v4, 0  ;;  %vm1828_vm8 = vmpackc.low %vm1720_vm1, %vm1720_vm1  ;;  %vm7886_vm10 = vcmp.lt.s32.totalorder %v1491_v59, 15  ;;  %v2403_v17 = vsel %vm2367_vm5, 65537, %v7007_v34 }
 0x163   : > { %v7879_v56 = vadd.f32 %v7766_v39, %v690_v27  ;;  %866 = vst [vmem:[#allocation2 + $0xd0] sm:$0xf] %v830_v36  ;;  %v1100_v33 = vshrl.u32 %v978_v55, 16  ;;  %v1103_v35 = vshll.u32 %v978_v55, 16  ;;  %vm1830_vm11 = vmpackc.low %vm1722_vm6, %vm1722_vm6  ;;  %v1864_v12 = vsel %vm1828_vm8, 65537, %v7007_v34 }
 0x164   : > { %v7884_v37 = vpack.c.b16 %v946_v28, %v945_v23  ;;  %v794_v23 = vpop.f32.mrf.mxu1  ;;  %v1866_v21 = vsel %vm1830_vm11, 65537, %v7007_v34  ;;  %v1900_v18 = vunpack.c.l.b16 %v1864_v12  ;;  %vm2369_vm12 = vmpackc.low %vm7886_vm10, %vm7886_vm10  ;;  %v2439_v36 = vunpack.c.l.b16 %v2403_v17 }
 0x165   : > { %3783 = vmatmul.bf16.gmra.mxu0 %v7544_v10  ;;  %v1102_v20 = vrot.slane %v1100_v33, 7  ;;  %v1190_v16 = vrot.slane %v1103_v35, 1  ;;  %v1902_v25 = vunpack.c.l.b16 %v1866_v21  ;;  %v2405_v3 = vsel %vm2369_vm12, 65537, %v7007_v34  ;;  %vm2517_vm0 = vmpackc.low %vm2516_vm15, %vm7305_vm3 }
 0x166   : > { %v1036_v58 = vshrl.u32 %v7884_v37, 16  ;;  %v1039_v47 = vshll.u32 %v7884_v37, 16  ;;  %v5556_v62 = vunpack.i.l.s16 %v1900_v18  ;;  %v2441_v63 = vunpack.c.l.b16 %v2405_v3  ;;  %vm1984_vm15 = vmpackc.low %vm7273_vm14, %vm1982_vm13 }
 0x167   : > { %v1105_v8 = vor.u32 %v1103_v35, %v1102_v20  ;;  %v1141_v32 = vsel %vm7256_vm7, %v1102_v20, %v7242_v45  ;;  %v7915_v1 = vor.u32 %v1190_v16, %v1100_v33  ;;  %v1191_v53 = vsel %vm1145_vm9, %v7813_v48, %v1190_v16 }
 0x168   : > { %v7903_v10 = vrot.slane %v1036_v58, 7  ;;  %v7905_v40 = vrot.slane %v1039_v47, 1  ;;  %vm2038_vm7 = vcmp.ne.s32.totalorder %v5556_v62, %v7249_v51  ;;  %v5558_v43 = vunpack.i.l.s16 %v1902_v25 }
 0x169   : > { %v1106_v4 = vsel %vm979_vm4, %v7790_v24, %v1105_v8  ;;  %vm2040_vm1 = vmpackc.low %vm7273_vm14, %vm2038_vm7  ;;  %v5593_v25 = vunpack.i.l.s16 %v2441_v63  ;;  %v746_v3 = vmax.f32 %v7879_v56, 0.0  ;;  %vm7951_vm8 = vcmp.lt.s32.totalorder %v1379_v30, 15 }
 0x16a   : > { %v1041_v28 = vor.u32 %v1039_v47, %v7903_v10  ;;  %v1167_v59 = vsel %vm1145_vm9, %v7846_v14, %v7905_v40  ;;  %v692_v45 = vpop.f32.mrf.mxu0  ;;  %v1217_v14 = vsel %vm7291_vm2, %v7915_v1, %v7246_v50  ;;  %v2064_v55 = vsel %vm2040_vm1, %v1106_v4, 0  ;;  %v5670_v1 = vld [vmem:[#allocation2 + $0xa8] sm:$0xf]  ;;  %vm2353_vm11 = vmpackc.low %vm7951_vm8, %vm7951_vm8 }
 0x16b   : > { %v2595_v54 = vsel %vm2517_vm0, %v1167_v59, 0  ;;  %vm2045_vm13 = vcmp.ne.s32.totalorder %v5558_v43, %v7249_v51  ;;  %v2116_v33 = vunpack.c.l.b16 %v2064_v55  ;;  %v2117_v24 = vunpack.c.h.b16 %v2064_v55 }
 0x16c   : > { %v1042_v48 = vsel %vm979_vm4, %v7819_v44, %v1041_v28  ;;  %v2638_v19 = vunpack.c.l.b16 %v2595_v54  ;;  %v2639_v27 = vunpack.c.h.b16 %v2595_v54  ;;  %vm2047_vm2 = vmpackc.low %vm7273_vm14, %vm2045_vm13  ;;  %v5591_v47 = vunpack.i.l.s16 %v2439_v36 }
 0x16d   : > { %v2056_v0 = vsel %vm1984_vm15, %v1042_v48, 0  ;;  %v2065_v50 = vsel %vm2047_vm2, %v1141_v32, 0  ;;  %v2152_v23 = vpack.c.b16 %v2116_v33, %v2116_v33  ;;  %v2153_v44 = vpack.c.b16 %v2117_v24, %v2117_v24 }
 0x16e   : > { %v2100_v35 = vunpack.c.l.b16 %v2056_v0  ;;  %v2101_v12 = vunpack.c.h.b16 %v2056_v0  ;;  %v2674_v17 = vpack.c.b16 %v2638_v19, %v2638_v19  ;;  %v2675_v5 = vpack.c.b16 %v2639_v27, %v2639_v27  ;;  %3519 = vmatmul.bf16.vlgmr.msra.gmra.mxu1 %v7675_v29  ;;  %v5684_v27 = vld [vmem:[#allocation2 + $0xcc] sm:$0xf0] }
 0x16f   : > { %v2118_v20 = vunpack.c.l.b16 %v2065_v50  ;;  %v2119_v16 = vunpack.c.h.b16 %v2065_v50  ;;  %vm2572_vm5 = vcmp.ne.s32.totalorder %v5591_v47, %v7261_v57  ;;  %v693_v62 = vadd.f32 %v7766_v39, %v692_v45  ;;  %v6405_v45 = vld [vmem:[#allocation9 + $0x60] sm:$0xff]  ;;  %2224 = vst [vmem:[#allocation2 + $0x180] sm:$0xf] %v2152_v23  ;;  %v6369_v23 = vld [vmem:[#allocation2 + $0xc4] sm:$0xf] }
 0x170   : > { %v2136_v21 = vpack.c.b16 %v2100_v35, %v2100_v35  ;;  %v2137_v18 = vpack.c.b16 %v2101_v12, %v2101_v12  ;;  %2746 = vst [vmem:[#allocation2 + $0xb0] sm:$0xf] %v2674_v17  ;;  %vm2573_vm6 = vmpackc.low %vm2572_vm5, %vm7305_vm3  ;;  %v1386_v36 = vand.u32 15, %v7882_v6  ;;  %vm2579_vm10 = vcmp.ne.s32.totalorder %v5593_v25, %v7261_v57  ;;  %3852 = vmatpush.bf16.msrb.mxu2 %v6405_v45  ;;  %v5618_v35 = vld [vmem:[#allocation2 + $0x38] sm:$0xf] }
 0x171   : > { %2747 = vst [vmem:[#allocation2 + $0xbc] sm:$0xf] %v2675_v5  ;;  %v2154_v13 = vpack.c.b16 %v2118_v20, %v2118_v20  ;;  %v2155_v8 = vpack.c.b16 %v2119_v16, %v2119_v16  ;;  %v2603_v56 = vsel %vm2573_vm6, %v1191_v53, 0  ;;  %v831_v28 = vpack.c.bf16 %v746_v3, %v746_v3  ;;  %vm2580_vm12 = vmpackc.low %vm2579_vm10, %vm7305_vm3  ;;  %v6367_v53 = vld [vmem:[#allocation2 + $0xb0] sm:$0xf0] }
 0x172   : > { %2208 = vst [vmem:[#allocation2 + $0xc0] sm:$0xf] %v2136_v21  ;;  %v695_v63 = vpop.f32.mrf.mxu0  ;;  %v747_v59 = vmax.f32 %v693_v62, 0.0  ;;  %v2654_v38 = vunpack.c.l.b16 %v2603_v56  ;;  %v2655_v6 = vunpack.c.h.b16 %v2603_v56  ;;  %vm7961_vm0 = vcmp.gt.s32.totalorder %v1386_v36, 0  ;;  %v6353_v12 = vld [vmem:[#allocation2 + $0x40] sm:$0xf0] }
 0x173   : > { %2209 = vst [vmem:[#allocation2 + $0xcc] sm:$0xf] %v2137_v18  ;;  %v2389_v54 = vsel %vm2353_vm11, 65537, %v7007_v34  ;;  %v2604_v4 = vsel %vm2580_vm12, %v1217_v14, 0  ;;  %v947_v43 = vunpack.c.l.b16 %v831_v28  ;;  %vm1814_vm15 = vmpackc.low %vm7961_vm0, %vm7961_vm0  ;;  %v7971_v50 = vor.u32 %v6367_v53, %v5670_v1 }
 0x174   : > { %2225 = vst [vmem:[#allocation2 + $0x18c] sm:$0xf] %v2153_v44  ;;  %v832_v48 = vpack.c.bf16 %v747_v59, %v747_v59  ;;  %v2425_v19 = vunpack.c.l.b16 %v2389_v54  ;;  %v2656_v55 = vunpack.c.l.b16 %v2604_v4  ;;  %v2657_v0 = vunpack.c.h.b16 %v2604_v4 }
 0x175   : > { %3788 = vmatmul.bf16.gmra.mxu0 %v7664_v7  ;;  %2226 = vst [vmem:[#allocation2 + $0x198] sm:$0xf] %v2154_v13  ;;  %v2690_v33 = vpack.c.b16 %v2654_v38, %v2654_v38  ;;  %v2691_v24 = vpack.c.b16 %v2655_v6, %v2655_v6  ;;  %v1850_v17 = vsel %vm1814_vm15, 65537, %v7007_v34  ;;  %v7973_v21 = vor.u32 %v6369_v23, %v5684_v27 }
 0x176   : > { %2227 = vst [vmem:[#allocation2 + $0x1a4] sm:$0xf] %v2155_v8  ;;  %v948_v14 = vunpack.c.l.b16 %v832_v48  ;;  %v5577_v5 = vunpack.i.l.s16 %v2425_v19  ;;  %v2692_v44 = vpack.c.b16 %v2656_v55, %v2656_v55  ;;  %v2693_v47 = vpack.c.b16 %v2657_v0, %v2657_v0  ;;  %3371 = vmatmul.bf16.gmra.mxu2 %v7971_v50 }
 0x177   : > { %2762 = vst [vmem:[#allocation2 + $0x170] sm:$0xf] %v2690_v33  ;;  %v1886_v7 = vunpack.c.l.b16 %v1850_v17  ;;  %v696_v20 = vadd.f32 %v7766_v39, %v695_v63  ;;  %v1239_v16 = vadd.s32 152, %v7226_v26  ;;  %3465 = vmatmul.bf16.gmra.mxu3 %v7973_v21  ;;  %v1240_v62 = vadd.s32 160, %v7226_v26 }
 0x178   : > { %2763 = vst [vmem:[#allocation2 + $0x17c] sm:$0xf] %v2691_v24  ;;  %v7975_v18 = vpack.c.b16 %v948_v14, %v947_v43  ;;  %vm2523_vm7 = vcmp.ne.s32.totalorder %v5577_v5, %v7261_v57  ;;  %v7983_v13 = vor.u32 %v6353_v12, %v5618_v35  ;;  %v1168_v63 = vor.u32 %v7905_v40, %v1036_v58 }
 0x179   : > { %2764 = vst [vmem:[#allocation2 + $0x188] sm:$0xf] %v2692_v44  ;;  %v5542_v25 = vunpack.i.l.s16 %v1886_v7  ;;  %v748_v32 = vmax.f32 %v696_v20, 0.0  ;;  %v1393_v56 = vand.u32 15, %v1239_v16  ;;  %v1400_v59 = vand.u32 15, %v1240_v62  ;;  %vm2524_vm13 = vmpackc.low %vm2523_vm7, %vm7305_vm3 }
 0x17a   : > { %v697_v3 = vpop.f32.mrf.mxu0  ;;  %2765 = vst [vmem:[#allocation2 + $0x194] sm:$0xf] %v2693_v47  ;;  %v1044_v8 = vshrl.u32 %v7975_v18, 16  ;;  %v1047_v36 = vshll.u32 %v7975_v18, 16  ;;  %v1242_v30 = vadd.s32 176, %v7226_v26 }
 0x17b   : > { %v698_v1 = vadd.f32 %v7766_v39, %v697_v3  ;;  %867 = vst [vmem:[#allocation2 + $0xdc] sm:$0xf] %v831_v28  ;;  %vm1989_vm1 = vcmp.ne.s32.totalorder %v5542_v25, %v7249_v51  ;;  %v833_v6 = vpack.c.bf16 %v748_v32, %v748_v32  ;;  %vm1708_vm5 = vcmp.gt.s32.totalorder %v1400_v59, 0  ;;  %v5682_v35 = vld [vmem:[#allocation2 + $0xc0] sm:$0xf] }
 0x17c   : > { %868 = vst [vmem:[#allocation2 + $0xe8] sm:$0xf] %v832_v48  ;;  %v7994_v45 = vrot.slane %v1044_v8, 7  ;;  %v1169_v38 = vrot.slane %v1047_v36, 1  ;;  %vm8002_vm2 = vmpackc.low %vm7273_vm14, %vm1989_vm1  ;;  %vm8006_vm6 = vcmp.lt.s32.totalorder %v1393_v56, 15  ;;  %v1241_v28 = vadd.s32 168, %v7226_v26 }
 0x17d   : > { %v749_v37 = vmax.f32 %v698_v1, 0.0  ;;  %869 = vst [vmem:[#allocation2 + $0xf4] sm:$0xf] %v833_v6  ;;  %v949_v4 = vunpack.c.l.b16 %v833_v6  ;;  %vm1816_vm8 = vmpackc.low %vm1708_vm5, %vm1708_vm5  ;;  %v6370_v12 = vld [vmem:[#allocation2 + $0xc8] sm:$0xf0]  ;;  %v1414_v44 = vand.u32 15, %v1242_v30 }
 0x17e   : > { %3524 = vmatmul.bf16.gmra.mxu1 %v7983_v13  ;;  %v1049_v54 = vor.u32 %v1047_v36, %v7994_v45  ;;  %v1170_v53 = vsel %vm1145_vm9, %v1168_v63, %v1169_v38  ;;  %v1852_v19 = vsel %vm1816_vm8, 65537, %v7007_v34  ;;  %vm2355_vm10 = vmpackc.low %vm8006_vm6, %vm8006_vm6  ;;  %v1407_v27 = vand.u32 15, %v1241_v28  ;;  %v5630_v28 = vld [vmem:[#allocation2 + $0x50] sm:$0xf] }
 0x17f   : > { %v2596_v43 = vsel %vm2524_vm13, %v1170_v53, 0  ;;  %v834_v48 = vpack.c.bf16 %v749_v37, %v749_v37  ;;  %v1888_v24 = vunpack.c.l.b16 %v1852_v19  ;;  %v2391_v5 = vsel %vm2355_vm10, 65537, %v7007_v34 }
 0x180   : > { %v1050_v55 = vsel %vm979_vm4, %v7903_v10, %v1049_v54  ;;  %v2640_v0 = vunpack.c.l.b16 %v2596_v43  ;;  %v2641_v33 = vunpack.c.h.b16 %v2596_v43  ;;  %v2427_v3 = vunpack.c.l.b16 %v2391_v5  ;;  %v6356_v54 = vld [vmem:[#allocation2 + $0x58] sm:$0xf0] }
 0x181   : > { %v2057_v14 = vsel %vm8002_vm2, %v1050_v55, 0  ;;  %870 = vst [vmem:[#allocation2 + $0x100] sm:$0xf] %v834_v48  ;;  %v950_v17 = vunpack.c.l.b16 %v834_v48  ;;  %v5544_v10 = vunpack.i.l.s16 %v1888_v24  ;;  %v8027_v63 = vor.u32 %v6370_v12, %v5682_v35 }
 0x182   : > { %v700_v23 = vpop.f32.mrf.mxu0  ;;  %v2102_v47 = vunpack.c.l.b16 %v2057_v14  ;;  %v2103_v7 = vunpack.c.h.b16 %v2057_v14  ;;  %v2676_v20 = vpack.c.b16 %v2640_v0, %v2640_v0  ;;  %v2677_v16 = vpack.c.b16 %v2641_v33, %v2641_v33  ;;  %v6372_v56 = vld [vmem:[#allocation2 + $0xdc] sm:$0xf] }
 0x183   : > { %v8024_v25 = vpack.c.b16 %v950_v17, %v949_v4  ;;  %v5696_v62 = vld [vmem:[#allocation2 + $0xe4] sm:$0xf0]  ;;  %v701_v36 = vadd.f32 %v7766_v39, %v700_v23  ;;  %vm8030_vm11 = vcmp.gt.s32.totalorder %v1414_v44, 0  ;;  %v5579_v58 = vunpack.i.l.s16 %v2427_v3 }
 0x184   : > { %v2138_v32 = vpack.c.b16 %v2102_v47, %v2102_v47  ;;  %v2139_v1 = vpack.c.b16 %v2103_v7, %v2103_v7  ;;  %2748 = vst [vmem:[#allocation2 + $0xc8] sm:$0xf] %v2676_v20  ;;  %v8036_v40 = vor.u32 %v6372_v56, %v5696_v62  ;;  %vm1818_vm12 = vmpackc.low %vm8030_vm11, %vm8030_vm11  ;;  %vm1996_vm0 = vcmp.ne.s32.totalorder %v5544_v10, %v7249_v51 }
 0x185   : > { %3793 = vmatmul.bf16.gmra.mxu0 %v7755_v22  ;;  %2749 = vst [vmem:[#allocation2 + $0xd4] sm:$0xf] %v2677_v16  ;;  %v1052_v6 = vshrl.u32 %v8024_v25, 16  ;;  %v1055_v37 = vshll.u32 %v8024_v25, 16  ;;  %v1171_v22 = vor.u32 %v1169_v38, %v1044_v8  ;;  %v750_v30 = vmax.f32 %v701_v36, 0.0  ;;  %vm1998_vm2 = vmpackc.low %vm7273_vm14, %vm1996_vm0 }
 0x186   : > { %2210 = vst [vmem:[#allocation2 + $0xd8] sm:$0xf] %v2138_v32  ;;  %vm2249_vm15 = vcmp.lt.s32.totalorder %v1407_v27, 15  ;;  %vm2530_vm7 = vcmp.ne.s32.totalorder %v5579_v58, %v7261_v57  ;;  %v1854_v43 = vsel %vm1818_vm12, 65537, %v7007_v34  ;;  %3376 = vmatmul.bf16.gmra.mxu2 %v8027_v63  ;;  %v8067_v24 = vor.u32 %v6356_v54, %v5630_v28  ;;  %v5642_v25 = vld [vmem:[#allocation2 + $0x68] sm:$0xf] }
 0x187   : > { %2211 = vst [vmem:[#allocation2 + $0xe4] sm:$0xf] %v2139_v1  ;;  %v8046_v53 = vrot.slane %v1052_v6, 7  ;;  %v8048_v4 = vrot.slane %v1055_v37, 1  ;;  %vm2357_vm1 = vmpackc.low %vm2249_vm15, %vm2249_vm15  ;;  %v835_v18 = vpack.c.bf16 %v750_v30, %v750_v30  ;;  %3470 = vmatmul.bf16.gmra.mxu3 %v8036_v40  ;;  %v1890_v33 = vunpack.c.l.b16 %v1854_v43 }
 0x188   : > { %vm2531_vm13 = vmpackc.low %vm2530_vm7, %vm7305_vm3  ;;  %v2393_v38 = vsel %vm2357_vm1, 65537, %v7007_v34  ;;  %v1243_v10 = vadd.s32 184, %v7226_v26  ;;  %v1244_v3 = vadd.s32 192, %v7226_v26  ;;  %v5708_v43 = vld [vmem:[#allocation2 + $0xfc] sm:$0xf0] }
 0x189   : > { %v8055_v8 = vpop.f32.mrf.mxu1  ;;  %v1057_v48 = vor.u32 %v1055_v37, %v8046_v53  ;;  %v1173_v19 = vsel %vm1145_vm9, %v1171_v22, %v8048_v4  ;;  %871 = vst [vmem:[#allocation2 + $0x10c] sm:$0xf] %v835_v18  ;;  %v2429_v17 = vunpack.c.l.b16 %v2393_v38  ;;  %v951_v1 = vunpack.c.l.b16 %v835_v18  ;;  %v6404_v18 = vld [vmem:[#allocation9 + $0x58] sm:$0xff] }
 0x18a   : > { %v702_v27 = vpop.f32.mrf.mxu0  ;;  %v2597_v55 = vsel %vm2531_vm13, %v1173_v19, 0  ;;  %v1421_v58 = vand.u32 15, %v1243_v10  ;;  %v1428_v30 = vand.u32 15, %v1244_v3  ;;  %3853 = vmatpush.bf16.msrb.mxu2 %v6404_v18 }
 0x18b   : > { %v703_v0 = vadd.f32 %v7766_v39, %v702_v27  ;;  %v1058_v35 = vsel %vm979_vm4, %v7994_v45, %v1057_v48  ;;  %v2642_v12 = vunpack.c.l.b16 %v2597_v55  ;;  %v2643_v14 = vunpack.c.h.b16 %v2597_v55 }
 0x18c   : > { %v2058_v5 = vsel %vm1998_vm2, %v1058_v35, 0  ;;  %v5546_v45 = vunpack.i.l.s16 %v1890_v33  ;;  %v5581_v32 = vunpack.i.l.s16 %v2429_v17  ;;  %vm8079_vm5 = vcmp.lt.s32.totalorder %v1421_v58, 15 }
 0x18d   : > { %v751_v23 = vmax.f32 %v703_v0, 0.0  ;;  %v2104_v44 = vunpack.c.l.b16 %v2058_v5  ;;  %v2105_v47 = vunpack.c.h.b16 %v2058_v5  ;;  %v2678_v7 = vpack.c.b16 %v2642_v12, %v2642_v12  ;;  %v5694_v59 = vld [vmem:[#allocation2 + $0xd8] sm:$0xf]  ;;  %v6375_v0 = vld [vmem:[#allocation2 + $0xf4] sm:$0xf]  ;;  %vm2359_vm11 = vmpackc.low %vm8079_vm5, %vm8079_vm5 }
 0x18e   : > { %v2679_v20 = vpack.c.b16 %v2643_v14, %v2643_v14  ;;  %3529 = vmatmul.bf16.gmra.mxu1 %v8067_v24  ;;  %v6373_v28 = vld [vmem:[#allocation2 + $0xe0] sm:$0xf0]  ;;  %vm2003_vm6 = vcmp.ne.s32.totalorder %v5546_v45, %v7249_v51  ;;  %vm2537_vm8 = vcmp.ne.s32.totalorder %v5581_v32, %v7261_v57  ;;  %v8090_v35 = vor.u32 %v6375_v0, %v5708_v43 }
 0x18f   : > { %v836_v16 = vpack.c.bf16 %v751_v23, %v751_v23  ;;  %v2140_v62 = vpack.c.b16 %v2104_v44, %v2104_v44  ;;  %v2141_v36 = vpack.c.b16 %v2105_v47, %v2105_v47  ;;  %2750 = vst [vmem:[#allocation2 + $0xe0] sm:$0xf] %v2678_v7  ;;  %v8087_v55 = vor.u32 %v6373_v28, %v5694_v59  ;;  %vm2538_vm12 = vmpackc.low %vm2537_vm8, %vm7305_vm3  ;;  %v6359_v47 = vld [vmem:[#allocation2 + $0x70] sm:$0xf0] }
 0x190   : > { %2751 = vst [vmem:[#allocation2 + $0xec] sm:$0xf] %v2679_v20  ;;  %vm8092_vm10 = vcmp.gt.s32.totalorder %v1428_v30, 0  ;;  %v1174_v14 = vor.u32 %v8048_v4, %v1052_v6  ;;  %vm8114_vm0 = vmpackc.low %vm7273_vm14, %vm2003_vm6  ;;  %v2395_v44 = vsel %vm2359_vm11, 65537, %v7007_v34  ;;  %v1246_v43 = vadd.s32 208, %v7226_v26 }
 0x191   : > { %v952_v56 = vunpack.c.l.b16 %v836_v16  ;;  %v8074_v37 = vpop.f32.mrf.mxu1  ;;  %2212 = vst [vmem:[#allocation2 + $0xf0] sm:$0xf] %v2140_v62  ;;  %vm1820_vm15 = vmpackc.low %vm8092_vm10, %vm8092_vm10  ;;  %v1248_v0 = vadd.s32 224, %v7226_v26 }
 0x192   : > { %v705_v22 = vpop.f32.mrf.mxu0  ;;  %2213 = vst [vmem:[#allocation2 + $0xfc] sm:$0xf] %v2141_v36  ;;  %v1856_v32 = vsel %vm1820_vm15, 65537, %v7007_v34 }
 0x193   : > { %v8076_v54 = vpack.c.b16 %v952_v56, %v951_v1  ;;  %v706_v38 = vadd.f32 %v7766_v39, %v705_v22  ;;  %872 = vst [vmem:[#allocation2 + $0x118] sm:$0xf] %v836_v16  ;;  %v2431_v1 = vunpack.c.l.b16 %v2395_v44  ;;  %v8135_v56 = vor.u32 %v6359_v47, %v5642_v25 }
 0x195   : > { %v1060_v19 = vshrl.u32 %v8076_v54, 16  ;;  %v1063_v27 = vshll.u32 %v8076_v54, 16  ;;  %v752_v33 = vmax.f32 %v706_v38, 0.0  ;;  %3798 = vmatmul.bf16.gmra.mxu0 %v7852_v9  ;;  %v1247_v38 = vadd.s32 216, %v7226_v26 }
 0x196   : > { %3381 = vmatmul.bf16.gmra.mxu2 %v8087_v55  ;;  %v5583_v25 = vunpack.i.l.s16 %v2431_v1 }
 0x197   : > { %v8104_v17 = vrot.slane %v1060_v19, 7  ;;  %v8106_v9 = vrot.slane %v1063_v27, 1  ;;  %v837_v5 = vpack.c.bf16 %v752_v33, %v752_v33  ;;  %3475 = vmatmul.bf16.gmra.mxu3 %v8090_v35  ;;  %v1449_v23 = vand.u32 15, %v1247_v38 }
 0x198   : > { %vm2544_vm6 = vcmp.ne.s32.totalorder %v5583_v25, %v7261_v57 }
 0x199   : > { %v1065_v6 = vor.u32 %v1063_v27, %v8104_v17  ;;  %v1176_v4 = vsel %vm1145_vm9, %v1174_v14, %v8106_v9  ;;  %873 = vst [vmem:[#allocation2 + $0x124] sm:$0xf] %v837_v5  ;;  %v1892_v27 = vunpack.c.l.b16 %v1856_v32  ;;  %v1442_v14 = vand.u32 15, %v1246_v43 }
 0x19a   : > { %v2598_v7 = vsel %vm2538_vm12, %v1176_v4, 0  ;;  %v707_v20 = vpop.f32.mrf.mxu0  ;;  %v1456_v4 = vand.u32 15, %v1248_v0  ;;  %v953_v44 = vunpack.c.l.b16 %v837_v5  ;;  %vm8162_vm5 = vcmp.lt.s32.totalorder %v1449_v23, 15  ;;  %v6403_v23 = vld [vmem:[#allocation9 + $0x50] sm:$0xff] }
 0x19b   : > { %v1066_v16 = vsel %vm979_vm4, %v8046_v53, %v1065_v6  ;;  %v2644_v10 = vunpack.c.l.b16 %v2598_v7  ;;  %v2645_v3 = vunpack.c.h.b16 %v2598_v7  ;;  %v8129_v62 = vpop.f32.mrf.mxu1  ;;  %v708_v36 = vadd.f32 %v7766_v39, %v707_v20  ;;  %v5706_v6 = vld [vmem:[#allocation2 + $0xf0] sm:$0xf]  ;;  %v6376_v7 = vld [vmem:[#allocation2 + $0xf8] sm:$0xf0]  ;;  %vm2363_vm12 = vmpackc.low %vm8162_vm5, %vm8162_vm5  ;;  %3854 = vmatpush.bf16.msrb.mxu2 %v6403_v23 }
 0x19c   : > { %v2059_v45 = vsel %vm8114_vm0, %v1066_v16, 0  ;;  %v1245_v53 = vadd.s32 200, %v7226_v26  ;;  %vm8142_vm7 = vcmp.gt.s32.totalorder %v1442_v14, 0  ;;  %v5548_v26 = vunpack.i.l.s16 %v1892_v27  ;;  %vm2545_vm0 = vmpackc.low %vm2544_vm6, %vm7305_vm3  ;;  %v6362_v27 = vld [vmem:[#allocation2 + $0x88] sm:$0xf0] }
 0x19d   : > { %v2106_v59 = vunpack.c.l.b16 %v2059_v45  ;;  %v2107_v58 = vunpack.c.h.b16 %v2059_v45  ;;  %v2680_v28 = vpack.c.b16 %v2644_v10, %v2644_v10  ;;  %v2681_v22 = vpack.c.b16 %v2645_v3, %v2645_v3  ;;  %v5720_v10 = vld [vmem:[#allocation2 + $0x114] sm:$0xf0]  ;;  %vm1822_vm2 = vmpackc.low %vm8142_vm7, %vm8142_vm7 }
 0x19e   : > { %v753_v30 = vmax.f32 %v708_v36, 0.0  ;;  %3534 = vmatmul.bf16.gmra.mxu1 %v8135_v56  ;;  %v1435_v12 = vand.u32 15, %v1245_v53  ;;  %vm8149_vm1 = vcmp.gt.s32.totalorder %v1456_v4, 0  ;;  %vm2010_vm11 = vcmp.ne.s32.totalorder %v5548_v26, %v7249_v51  ;;  %v6753_v4 = vld [vmem:[%s8983_s5] ss:$0 sm:$0xff] }
 0x19f   : > { %v2142_v48 = vpack.c.b16 %v2106_v59, %v2106_v59  ;;  %v2143_v18 = vpack.c.b16 %v2107_v58, %v2107_v58  ;;  %2752 = vst [vmem:[#allocation2 + $0xf8] sm:$0xf] %v2680_v28  ;;  %v6378_v59 = vld [vmem:[#allocation2 + $0x10c] sm:$0xf]  ;;  %vm1824_vm8 = vmpackc.low %vm8149_vm1, %vm8149_vm1  ;;  %v1177_v43 = vor.u32 %v8106_v9, %v1060_v19  ;;  %v2399_v14 = vsel %vm2363_vm12, 65537, %v7007_v34 }
 0x1a0   : > { %2753 = vst [vmem:[#allocation2 + $0x104] sm:$0xf] %v2681_v22  ;;  %v838_v33 = vpack.c.bf16 %v753_v30, %v753_v30  ;;  %vm8153_vm13 = vcmp.lt.s32.totalorder %v1435_v12, 15  ;;  %v8175_v30 = vor.u32 %v6378_v59, %v5720_v10  ;;  %vm8207_vm15 = vmpackc.low %vm7273_vm14, %vm2010_vm11  ;;  %v1858_v12 = vsel %vm1822_vm2, 65537, %v7007_v34 }
 0x1a1   : > { %2214 = vst [vmem:[#allocation2 + $0x108] sm:$0xf] %v2142_v48  ;;  %vm2361_vm10 = vmpackc.low %vm8153_vm13, %vm8153_vm13  ;;  %v1894_v45 = vunpack.c.l.b16 %v1858_v12  ;;  %v2435_v5 = vunpack.c.l.b16 %v2399_v14 }
 0x1a2   : > { %2215 = vst [vmem:[#allocation2 + $0x114] sm:$0xf] %v2143_v18  ;;  %v954_v47 = vunpack.c.l.b16 %v838_v33  ;;  %v710_v20 = vpop.f32.mrf.mxu0  ;;  %v1860_v18 = vsel %vm1824_vm8, 65537, %v7007_v34  ;;  %v2397_v54 = vsel %vm2361_vm10, 65537, %v7007_v34 }
 0x1a3   : > { %874 = vst [vmem:[#allocation2 + $0x130] sm:$0xf] %v838_v33  ;;  %v8146_v3 = vpop.f32.mrf.mxu1  ;;  %v711_v36 = vadd.f32 %v7766_v39, %v710_v20  ;;  %v8167_v39 = vor.u32 %v6376_v7, %v5706_v6  ;;  %v2433_v10 = vunpack.c.l.b16 %v2397_v54  ;;  %v5550_v0 = vunpack.i.l.s16 %v1894_v45  ;;  %v6365_v45 = vld [vmem:[#allocation2 + $0xa0] sm:$0xf0] }
 0x1a4   : > { %v8157_v32 = vpack.c.b16 %v954_v47, %v953_v44  ;;  %v1896_v47 = vunpack.c.l.b16 %v1860_v18 }
 0x1a5   : > { %v754_v58 = vmax.f32 %v711_v36, 0.0  ;;  %3803 = vmatmul.bf16.gmra.mxu0 %v7971_v50  ;;  %v5654_v50 = vld [vmem:[#allocation2 + $0x80] sm:$0xf]  ;;  %vm2017_vm13 = vcmp.ne.s32.totalorder %v5550_v0, %v7249_v51 }
 0x1a6   : > { %v1068_v28 = vshrl.u32 %v8157_v32, 16  ;;  %v1071_v22 = vshll.u32 %v8157_v32, 16  ;;  %3386 = vmatmul.bf16.gmra.mxu2 %v8167_v39  ;;  %v8229_v7 = vor.u32 %v6362_v27, %v5654_v50  ;;  %v5585_v27 = vunpack.i.l.s16 %v2433_v10  ;;  %vm8264_vm8 = vmpackc.low %vm7273_vm14, %vm2017_vm13 }
 0x1a7   : > { %v839_v53 = vpack.c.bf16 %v754_v58, %v754_v58  ;;  %3480 = vmatmul.bf16.gmra.mxu3 %v8175_v30 }
 0x1a8   : > { %v8189_v38 = vrot.slane %v1068_v28, 7  ;;  %v8191_v48 = vrot.slane %v1071_v22, 1  ;;  %v5718_v12 = vld [vmem:[#allocation2 + $0x108] sm:$0xf]  ;;  %vm2551_vm1 = vcmp.ne.s32.totalorder %v5585_v27, %v7261_v57 }
 0x1a9   : > { %875 = vst [vmem:[#allocation2 + $0x13c] sm:$0xf] %v839_v53  ;;  %v6379_v14 = vld [vmem:[#allocation2 + $0x110] sm:$0xf0]  ;;  %vm2552_vm6 = vmpackc.low %vm2551_vm1, %vm7305_vm3 }
 0x1aa   : > { %v1073_v19 = vor.u32 %v1071_v22, %v8189_v38  ;;  %v1179_v9 = vsel %vm1145_vm9, %v1177_v43, %v8191_v48  ;;  %v712_v33 = vpop.f32.mrf.mxu0  ;;  %v5552_v43 = vunpack.i.l.s16 %v1896_v47 }
 0x1ab   : > { %v2599_v25 = vsel %vm2545_vm0, %v1179_v9, 0  ;;  %v8224_v6 = vpop.f32.mrf.mxu1  ;;  %v713_v44 = vadd.f32 %v6753_v4, %v712_v33  ;;  %v5587_v33 = vunpack.i.l.s16 %v2435_v5  ;;  %v5732_v4 = vld [vmem:[#allocation2 + $0x12c] sm:$0xf0] }
 0x1ac   : > { %v1074_v20 = vsel %vm979_vm4, %v8104_v17, %v1073_v19  ;;  %v2646_v16 = vunpack.c.l.b16 %v2599_v25  ;;  %v2647_v26 = vunpack.c.h.b16 %v2599_v25  ;;  %v955_v19 = vunpack.c.l.b16 %v839_v53 }
 0x1ad   : > { %v2060_v34 = vsel %vm8207_vm15, %v1074_v20, 0  ;;  %v755_v36 = vmax.f32 %v713_v44, 0.0  ;;  %vm2024_vm7 = vcmp.ne.s32.totalorder %v5552_v43, %v7249_v51  ;;  %v8245_v20 = vor.u32 %v6379_v14, %v5718_v12 }
 0x1ae   : > { %v2108_v1 = vunpack.c.l.b16 %v2060_v34  ;;  %v2109_v59 = vunpack.c.h.b16 %v2060_v34  ;;  %v2682_v58 = vpack.c.b16 %v2646_v16, %v2646_v16  ;;  %v2683_v22 = vpack.c.b16 %v2647_v26, %v2647_v26  ;;  %3539 = vmatmul.bf16.gmra.mxu1 %v8229_v7  ;;  %v6381_v16 = vld [vmem:[#allocation2 + $0x124] sm:$0xf]  ;;  %vm8250_vm2 = vmpackc.low %vm7273_vm14, %vm2024_vm7 }
 0x1af   : > { %v840_v50 = vpack.c.bf16 %v755_v36, %v755_v36  ;;  %vm2558_vm5 = vcmp.ne.s32.totalorder %v5587_v33, %v7261_v57  ;;  %v8255_v10 = vor.u32 %v6381_v16, %v5732_v4  ;;  %v1180_v34 = vor.u32 %v8191_v48, %v1068_v28 }
 0x1b0   : > { %v2144_v18 = vpack.c.b16 %v2108_v1, %v2108_v1  ;;  %v2145_v17 = vpack.c.b16 %v2109_v59, %v2109_v59  ;;  %2754 = vst [vmem:[#allocation2 + $0x110] sm:$0xf] %v2682_v58  ;;  %v8236_v54 = vpop.f32.mrf.mxu3  ;;  %vm2559_vm10 = vmpackc.low %vm2558_vm5, %vm7305_vm3 }
 0x1b1   : > { %2755 = vst [vmem:[#allocation2 + $0x11c] sm:$0xf] %v2683_v22  ;;  %v956_v9 = vunpack.c.l.b16 %v840_v50 }
 0x1b2   : > { %2216 = vst [vmem:[#allocation2 + $0x120] sm:$0xf] %v2144_v18  ;;  %v8238_v23 = vpop.f32.mrf.mxu0 }
 0x1b3   : > { %2217 = vst [vmem:[#allocation2 + $0x12c] sm:$0xf] %v2145_v17  ;;  %v975_v25 = vpack.c.b16 %v956_v9, %v955_v19  ;;  %v8241_v44 = vpop.f32.mrf.mxu1 }
 0x1b4   : > { %876 = vst [vmem:[#allocation2 + $0x148] sm:$0xf] %v840_v50  ;;  %v6416_v50 = vld [vmem:[#allocation9 + $0xb8] sm:$0xff] }
 0x1b5   : > { %v1076_v47 = vshrl.u32 %v975_v25, 16  ;;  %v1079_v53 = vshll.u32 %v975_v25, 16  ;;  %3808 = vmatmul.bf16.gmra.mxu0 %v8027_v63  ;;  %9109 = vst [vmem:[#allocation24_spill] sm:$0xff] %v8255_v10  ;;  %v5666_v63 = vld [vmem:[#allocation2 + $0x98] sm:$0xf]  ;;  %3938 = vmatpush.bf16.msrb.mxu3 %v6416_v50 }
 0x1b6   : > { %3391 = vmatmul.bf16.gmra.mxu2 %v8245_v20  ;;  %v8281_v22 = vor.u32 %v6365_v45, %v5666_v63  ;;  %v6384_v50 = vld [vmem:[#allocation2 + $0x13c] sm:$0xf] }
 0x1b7   : > { %v1078_v51 = vrot.slane %v1076_v47, 7  ;;  %v1181_v36 = vrot.slane %v1079_v53, 1  ;;  %3485 = vmatmul.bf16.gmra.mxu3 %v8255_v10 }
 0x1b8   : > { %v8268_v57 = vpop.f32.mrf.mxu3 }
 0x1b9   : > { %v1081_v1 = vor.u32 %v1079_v53, %v1078_v51  ;;  %v1090_v32 = vsel %vm979_vm4, %v1078_v51, %v7691_v46  ;;  %v1182_v28 = vsel %vm1145_vm9, %v1180_v34, %v1181_v36  ;;  %v1183_v48 = vor.u32 %v1181_v36, %v1076_v47  ;;  %v6402_v46 = vld [vmem:[#allocation9 + $0x48] sm:$0xff]  ;;  %v5730_v45 = vld [vmem:[#allocation2 + $0x120] sm:$0xf] }
 0x1ba   : > { %v2062_v61 = vsel %vm8250_vm2, %v1090_v32, 0  ;;  %v2600_v59 = vsel %vm2552_vm6, %v1182_v28, 0  ;;  %v8279_v58 = vpop.f32.mrf.mxu0  ;;  %3855 = vmatpush.bf16.msrb.mxu2 %v6402_v46  ;;  %v6382_v5 = vld [vmem:[#allocation2 + $0x128] sm:$0xf0] }
 0x1bb   : > { %v1082_v43 = vsel %vm979_vm4, %v8189_v38, %v1081_v1  ;;  %v1185_v11 = vsel %vm1145_vm9, %v1183_v48, %v7693_v52  ;;  %v2112_v18 = vunpack.c.l.b16 %v2062_v61  ;;  %v2113_v17 = vunpack.c.h.b16 %v2062_v61  ;;  %v3431_v27 = vpop.f32.mrf.mxu1  ;;  %v5744_v48 = vld [vmem:[#allocation2 + $0x144] sm:$0xf0] }
 0x1bc   : > { %v2061_v19 = vsel %vm8264_vm8, %v1082_v43, 0  ;;  %v2601_v9 = vsel %vm2559_vm10, %v1185_v11, 0  ;;  %v2648_v0 = vunpack.c.l.b16 %v2600_v59  ;;  %v2649_v33 = vunpack.c.h.b16 %v2600_v59  ;;  %v5678_v43 = vld [vmem:[#allocation2 + $0xb0] sm:$0xf]  ;;  %v6368_v11 = vld [vmem:[#allocation2 + $0xb8] sm:$0xf0] }
 0x1bd   : > { %v2110_v12 = vunpack.c.l.b16 %v2061_v19  ;;  %v2111_v14 = vunpack.c.h.b16 %v2061_v19  ;;  %v2148_v25 = vpack.c.b16 %v2112_v18, %v2112_v18  ;;  %v2149_v4 = vpack.c.b16 %v2113_v17, %v2113_v17  ;;  %v6415_v17 = vld [vmem:[#allocation9 + $0xb0] sm:$0xff] }
 0x1be   : > { %v2650_v47 = vunpack.c.l.b16 %v2601_v9  ;;  %v2651_v38 = vunpack.c.h.b16 %v2601_v9  ;;  %3544 = vmatmul.bf16.gmra.mxu1 %v8281_v22  ;;  %v2684_v16 = vpack.c.b16 %v2648_v0, %v2648_v0  ;;  %v8291_v26 = vadd.f32 %v3431_v27, %v8055_v8  ;;  %3939 = vmatpush.bf16.msrb.mxu3 %v6415_v17  ;;  %v6414_v0 = vld [vmem:[#allocation9 + $0xa8] sm:$0xff] }
 0x1bf   : > { %v2146_v52 = vpack.c.b16 %v2110_v12, %v2110_v12  ;;  %v2147_v53 = vpack.c.b16 %v2111_v14, %v2111_v14  ;;  %2220 = vst [vmem:[#allocation2 + $0x150] sm:$0xf] %v2148_v25  ;;  %v2685_v34 = vpack.c.b16 %v2649_v33, %v2649_v33  ;;  %v8301_v59 = vor.u32 %v6382_v5, %v5730_v45  ;;  %v6413_v33 = vld [vmem:[#allocation9 + $0xa0] sm:$0xff]  ;;  %v6412_v5 = vld [vmem:[#allocation9 + $0x98] sm:$0xff] }
 0x1c0   : > { %2221 = vst [vmem:[#allocation2 + $0x15c] sm:$0xf] %v2149_v4  ;;  %v2686_v51 = vpack.c.b16 %v2650_v47, %v2650_v47  ;;  %v2687_v63 = vpack.c.b16 %v2651_v38, %v2651_v38  ;;  %v8304_v46 = vor.u32 %v6384_v50, %v5744_v48  ;;  %v8316_v9 = vor.u32 %v6368_v11, %v5678_v43  ;;  %v6401_v50 = vld [vmem:[#allocation9 + $0x40] sm:$0xff]  ;;  %v6410_v43 = vld [vmem:[#allocation9 + $0x88] sm:$0xff] }
 0x1c1   : > { %2218 = vst [vmem:[#allocation2 + $0x138] sm:$0xf] %v2146_v52  ;;  %v3357_v36 = vpop.f32.mrf.mxu2  ;;  %v6387_v52 = vld [vmem:[#allocation2 + $0x154] sm:$0xf]  ;;  %3856 = vmatpush.bf16.msrb.mxu2 %v6401_v50 }
 0x1c2   : > { %2219 = vst [vmem:[#allocation2 + $0x144] sm:$0xf] %v2147_v53  ;;  %v8294_v1 = vadd.f32 %v8236_v54, %v3357_v36  ;;  %v3451_v32 = vpop.f32.mrf.mxu3  ;;  %v8296_v28 = vpop.f32.mrf.mxu0  ;;  %3940 = vmatpush.bf16.msrb.mxu3 %v6414_v0  ;;  %v5756_v53 = vld [vmem:[#allocation2 + $0x15c] sm:$0xf0]  ;;  %v5690_v36 = vld [vmem:[#allocation2 + $0xc8] sm:$0xf] }
 0x1c3   : > { %2756 = vst [vmem:[#allocation2 + $0x128] sm:$0xf] %v2684_v16  ;;  %v3433_v61 = vpop.f32.mrf.mxu1 }
 0x1c4   : > { %2757 = vst [vmem:[#allocation2 + $0x134] sm:$0xf] %v2685_v34  ;;  %v8299_v8 = vadd.f32 %v3433_v61, %v8074_v37  ;;  %v8329_v34 = vor.u32 %v6387_v52, %v5756_v53 }
 0x1c5   : > { %2758 = vst [vmem:[#allocation2 + $0x140] sm:$0xf] %v2686_v51  ;;  %3813 = vmatmul.bf16.gmra.mxu0 %v8087_v55 }
 0x1c6   : > { %2759 = vst [vmem:[#allocation2 + $0x14c] sm:$0xf] %v2687_v63  ;;  %3396 = vmatmul.bf16.gmra.mxu2 %v8301_v59  ;;  %3941 = vmatpush.bf16.msrb.mxu3 %v6413_v33  ;;  %v6371_v63 = vld [vmem:[#allocation2 + $0xd0] sm:$0xf0]  ;;  %v6390_v33 = vld [vmem:[#allocation2 + $0x16c] sm:$0xf] }
 0x1c7   : > { %9112 = vst [vmem:[#allocation25_spill] sm:$0xff] %v8304_v46  ;;  %3490 = vmatmul.bf16.gmra.mxu3 %v8304_v46  ;;  %v8340_v61 = vor.u32 %v6371_v63, %v5690_v36 }
 0x1c8   : > { %v5742_v14 = vld [vmem:[#allocation2 + $0x138] sm:$0xf]  ;;  %9113 = vst [vmem:[#allocation26_spill] sm:$0xff] %v8329_v34 }
 0x1c9   : > { %v3359_v54 = vpop.f32.mrf.mxu2 }
 0x1ca   : > { %v8309_v18 = vadd.f32 %v8268_v57, %v3359_v54  ;;  %v8311_v37 = vpop.f32.mrf.mxu0  ;;  %v3453_v27 = vpop.f32.mrf.mxu3  ;;  %v6385_v57 = vld [vmem:[#allocation2 + $0x140] sm:$0xf0]  ;;  %3942 = vmatpush.bf16.msrb.mxu3 %v6412_v5 }
 0x1cb   : > { %v3436_v19 = vpop.f32.mrf.mxu1 }
 0x1cc   : > { %v8314_v55 = vadd.f32 %v3436_v19, %v8129_v62  ;;  %v8326_v62 = vor.u32 %v6385_v57, %v5742_v14  ;;  %v6388_v19 = vld [vmem:[#allocation2 + $0x158] sm:$0xf0]  ;;  %v6409_v57 = vld [vmem:[#allocation9 + $0x80] sm:$0xff] }
 0x1ce   : > { %3549 = vmatmul.bf16.gmra.mxu1 %v8316_v9 }
 0x1d1   : > { %v3362_v12 = vpop.f32.mrf.mxu2 }
 0x1d2   : > { %v8319_v25 = vadd.f32 %v3451_v32, %v3362_v12  ;;  %v8321_v4 = vpop.f32.mrf.mxu0  ;;  %v3456_v16 = vpop.f32.mrf.mxu3  ;;  %v5768_v12 = vld [vmem:[#allocation2 + $0x174] sm:$0xf0] }
 0x1d3   : > { %v3438_v47 = vpop.f32.mrf.mxu1  ;;  %v8353_v52 = vor.u32 %v6390_v33, %v5768_v12 }
 0x1d4   : > { %v8324_v38 = vadd.f32 %v3438_v47, %v8146_v3 }
 0x1d5   : > { %3818 = vmatmul.bf16.gmra.mxu0 %v8167_v39  ;;  %v6411_v39 = vld [vmem:[#allocation9 + $0x90] sm:$0xff]  ;;  %9114 = vst [vmem:[#allocation27_spill] sm:$0xff] %v8353_v52 }
 0x1d6   : > { %3401 = vmatmul.bf16.gmra.mxu2 %v8326_v62  ;;  %3943 = vmatpush.bf16.msrb.mxu3 %v6411_v39 }
 0x1d7   : > { %3495 = vmatmul.bf16.gmra.mxu3 %v8329_v34  ;;  %v6418_v34 = vld [vmem:[#allocation2 + $0x188] sm:$0xf0] }
 0x1d9   : > { %v3364_v51 = vpop.f32.mrf.mxu2 }
 0x1da   : > { %v8333_v45 = vadd.f32 %v3453_v27, %v3364_v51  ;;  %v8335_v3 = vpop.f32.mrf.mxu0  ;;  %v3458_v54 = vpop.f32.mrf.mxu3  ;;  %v5754_v27 = vld [vmem:[#allocation2 + $0x150] sm:$0xf]  ;;  %3944 = vmatpush.bf16.msrb.mxu3 %v6410_v43  ;;  %v6374_v51 = vld [vmem:[#allocation2 + $0xe8] sm:$0xf0]  ;;  %v5766_v43 = vld [vmem:[#allocation2 + $0x168] sm:$0xf] }
 0x1db   : > { %v3441_v32 = vpop.f32.mrf.mxu1  ;;  %v8351_v47 = vor.u32 %v6388_v19, %v5754_v27  ;;  %v6417_v19 = vld [vmem:[#allocation2 + $0x184] sm:$0xf] }
 0x1dc   : > { %v8338_v48 = vadd.f32 %v3441_v32, %v8224_v6 }
 0x1de   : > { %3554 = vmatmul.bf16.gmra.mxu1 %v8340_v61  ;;  %3945 = vmatpush.bf16.msrb.mxu3 %v6409_v57  ;;  %v6377_v57 = vld [vmem:[#allocation2 + $0x100] sm:$0xf0] }
 0x1e1   : > { %v3367_v17 = vpop.f32.mrf.mxu2 }
 0x1e2   : > { %v8343_v11 = vpop.f32.mrf.mxu0  ;;  %v8345_v0 = vadd.f32 %v3456_v16, %v3367_v17  ;;  %v3461_v53 = vpop.f32.mrf.mxu3  ;;  %v5702_v16 = vld [vmem:[#allocation2 + $0xe0] sm:$0xf]  ;;  %v6391_v17 = vld [vmem:[#allocation2 + $0x170] sm:$0xf0] }
 0x1e3   : > { %v3443_v6 = vpop.f32.mrf.mxu1 }
 0x1e4   : > { %v8348_v14 = vadd.f32 %v3443_v6, %v8241_v44  ;;  %v5780_v6 = vld [vmem:[#allocation2 + $0x18c] sm:$0xf0] }
 0x1e5   : > { %3823 = vmatmul.bf16.gmra.mxu0 %v8245_v20  ;;  %v8361_v20 = vor.u32 %v6374_v51, %v5702_v16  ;;  %v5783_v12 = vor.u32 %v6417_v19, %v5780_v6  ;;  %v6515_v51 = vld [vmem:[#allocation9 + $0x238] sm:$0xff] }
 0x1e6   : > { %3406 = vmatmul.bf16.gmra.mxu2 %v8351_v47 }
 0x1e7   : > { %3500 = vmatmul.bf16.gmra.mxu3 %v8353_v52  ;;  %4718 = vmatpush.bf16.msra.mxu2 %v6515_v51  ;;  %v5894_v51 = vld [vmem:[#allocation2 + $0x8] sm:$0xf] }
 0x1e9   : > { %v3369_v63 = vpop.f32.mrf.mxu2 }
 0x1ea   : > { %v8357_v36 = vpop.f32.mrf.mxu0  ;;  %v8359_v44 = vadd.f32 %v3458_v54, %v3369_v63  ;;  %v3463_v50 = vpop.f32.mrf.mxu3  ;;  %v8373_v54 = vor.u32 %v6391_v17, %v5766_v43  ;;  %v6499_v43 = vld [vmem:[#allocation9 + $0x1b8] sm:$0xff] }
 0x1eb   : > { %v3520_v5 = vpop.f32.mrf.mxu1  ;;  %v6507_v17 = vld [vmem:[#allocation9 + $0x1f8] sm:$0xff]  ;;  %4540 = vmatpush.bf16.msrb.mxu1 %v6499_v43 }
 0x1ec   : > { %v8364_v32 = vadd.f32 %v3520_v5, %v8291_v26  ;;  %v5714_v26 = vld [vmem:[#allocation2 + $0xf8] sm:$0xf]  ;;  %4629 = vmatpush.bf16.msra.mxu0 %v6507_v17  ;;  %v5726_v17 = vld [vmem:[#allocation2 + $0x110] sm:$0xf] }
 0x1ed   : > { %v8378_v52 = vor.u32 %v6377_v57, %v5714_v26 }
 0x1ee   : > { %3559 = vmatmul.bf16.gmra.mxu1 %v8361_v20 }
 0x1f2   : > { %v8367_v39 = vpop.f32.mrf.mxu0 }
 0x1f3   : > { %9115 = vst [vmem:[#allocation28_spill] sm:$0xff] %v8367_v39  ;;  %v3522_v27 = vpop.f32.mrf.mxu1 }
 0x1f4   : > { %v8370_v33 = vadd.f32 %v3522_v27, %v8299_v8 }
 0x1f5   : > { %3828 = vmatmul.bf16.gmra.mxu0 %v8301_v59 }
 0x1f6   : > { %3411 = vmatmul.bf16.gmra.mxu2 %v8373_v54 }
 0x1f7   : > { %3505 = vmatmul.bf16.gmra.mxu3 %v5783_v12  ;;  %v5778_v12 = vld [vmem:[#allocation2 + $0x180] sm:$0xf] }
 0x1f8   : > { %v5779_v46 = vor.u32 %v6418_v34, %v5778_v12  ;;  %v6345_v34 = vld [vmem:[#allocation2 + $0x4] sm:$0xf]  ;;  %v5888_v12 = vld [vmem:[#allocation2 + $0xc] sm:$0xf0] }
 0x1f9   : > { %v3372_v63 = vpop.f32.mrf.mxu2 }
 0x1fa   : > { %v8376_v16 = vpop.f32.mrf.mxu0  ;;  %v8380_v8 = vadd.f32 %v3461_v53, %v3372_v63  ;;  %v3466_v27 = vpop.f32.mrf.mxu3  ;;  %v6347_v63 = vld [vmem:[#allocation2 + $0x10] sm:$0xf0] }
 0x1fb   : > { %9116 = vst [vmem:[#allocation29_spill] sm:$0xff] %v8376_v16  ;;  %v3525_v5 = vpop.f32.mrf.mxu1  ;;  %v5895_v43 = vor.u32 %v6347_v63, %v5894_v51 }
 0x1fc   : > { %v8383_v59 = vadd.f32 %v3525_v5, %v8314_v55  ;;  %v6506_v5 = vld [vmem:[#allocation9 + $0x1f0] sm:$0xff] }
 0x1fd   : > { %4630 = vmatpush.bf16.msra.mxu0 %v6506_v5 }
 0x1fe   : > { %3564 = vmatmul.bf16.gmra.mxu1 %v8378_v52 }
 0x201   : > { %v3374_v6 = vpop.f32.mrf.mxu2 }
 0x202   : > { %v8386_v19 = vpop.f32.mrf.mxu0  ;;  %v8388_v57 = vadd.f32 %v3463_v50, %v3374_v6  ;;  %v3468_v53 = vpop.f32.mrf.mxu3 }
 0x203   : > { %9117 = vst [vmem:[#allocation30_spill] sm:$0xff] %v8386_v19  ;;  %v3527_v26 = vpop.f32.mrf.mxu1  ;;  %v6380_v19 = vld [vmem:[#allocation2 + $0x118] sm:$0xf0] }
 0x204   : > { %v8391_v55 = vadd.f32 %v3527_v26, %v8324_v38  ;;  %v8394_v50 = vor.u32 %v6380_v19, %v5726_v17  ;;  %v5738_v17 = vld [vmem:[#allocation2 + $0x128] sm:$0xf] }
 0x205   : > { %3833 = vmatmul.bf16.gmra.mxu0 %v8326_v62  ;;  %v6505_v62 = vld [vmem:[#allocation9 + $0x1e8] sm:$0xff] }
 0x206   : > { %3416 = vmatmul.bf16.gmra.mxu2 %v5779_v46  ;;  %4631 = vmatpush.bf16.msra.mxu0 %v6505_v62  ;;  %v6504_v46 = vld [vmem:[#allocation9 + $0x1e0] sm:$0xff] }
 0x207   : > { %3946 = vmatmul.bf16.vlgmr.msrb.gmra.mxu3 %v5895_v43  ;;  %v6502_v43 = vld [vmem:[#allocation9 + $0x1d0] sm:$0xff]  ;;  %v6383_v62 = vld [vmem:[#allocation2 + $0x130] sm:$0xf0] }
 0x209   : > { %v3377_v16 = vpop.f32.mrf.mxu2 }
 0x20a   : > { %v8396_v6 = vadd.f32 %v3466_v27, %v3377_v16  ;;  %v3471_v10 = vpop.f32.mrf.mxu3  ;;  %v8401_v26 = vpop.f32.mrf.mxu0  ;;  %4632 = vmatpush.bf16.msra.mxu0 %v6504_v46  ;;  %v5891_v27 = vor.u32 %v6345_v34, %v5888_v12  ;;  %v6514_v46 = vld [vmem:[#allocation9 + $0x230] sm:$0xff]  ;;  %v8413_v34 = vor.u32 %v6383_v62, %v5738_v17 }
 0x20b   : > { %v3530_v39 = vpop.f32.mrf.mxu1  ;;  %9118 = vst [vmem:[#allocation31_spill] sm:$0xff] %v8401_v26  ;;  %4719 = vmatpush.bf16.msra.mxu2 %v6514_v46 }
 0x20c   : > { %v8399_v38 = vadd.f32 %v3530_v39, %v8338_v48  ;;  %v6503_v48 = vld [vmem:[#allocation9 + $0x1d8] sm:$0xff] }
 0x20e   : > { %3569 = vmatmul.bf16.gmra.mxu1 %v8394_v50  ;;  %4633 = vmatpush.bf16.msra.mxu0 %v6503_v48  ;;  %v6498_v48 = vld [vmem:[#allocation9 + $0x1b0] sm:$0xff] }
 0x20f   : > { %4541 = vmatpush.bf16.msrb.mxu1 %v6498_v48 }
 0x211   : > { %v3379_v51 = vpop.f32.mrf.mxu2 }
 0x212   : > { %v8404_v19 = vadd.f32 %v3468_v53, %v3379_v51  ;;  %v3473_v16 = vpop.f32.mrf.mxu3  ;;  %v8410_v39 = vpop.f32.mrf.mxu0  ;;  %4634 = vmatpush.bf16.msra.mxu0 %v6502_v43 }
 0x213   : > { %v3532_v63 = vpop.f32.mrf.mxu1  ;;  %9119 = vst [vmem:[#allocation32_spill] sm:$0xff] %v8410_v39 }
 0x214   : > { %v8407_v5 = vadd.f32 %v3532_v63, %v8348_v14  ;;  %v6501_v63 = vld [vmem:[#allocation9 + $0x1c8] sm:$0xff] }
 0x215   : > { %3838 = vmatmul.bf16.gmra.mxu0 %v8351_v47 }
 0x216   : > { %3857 = vmatmul.bf16.vlgmr.msrb.gmra.mxu2 %v5891_v27  ;;  %4635 = vmatpush.bf16.msra.mxu0 %v6501_v63 }
 0x217   : > { %3951 = vmatmul.bf16.gmra.mxu3 %v7675_v29  ;;  %v6500_v29 = vld [vmem:[#allocation9 + $0x1c0] sm:$0xff] }
 0x219   : > { %v3382_v53 = vpop.f32.mrf.mxu2 }
 0x21a   : > { %v8415_v14 = vadd.f32 %v3471_v10, %v3382_v53  ;;  %v3476_v47 = vpop.f32.mrf.mxu3  ;;  %v8421_v27 = vpop.f32.mrf.mxu0  ;;  %4636 = vmatpush.bf16.msra.mxu0 %v6500_v29  ;;  %v6386_v53 = vld [vmem:[#allocation2 + $0x148] sm:$0xf0] }
 0x21b   : > { %v3535_v51 = vpop.f32.mrf.mxu1  ;;  %9120 = vst [vmem:[#allocation33_spill] sm:$0xff] %v8421_v27 }
 0x21c   : > { %v8418_v12 = vadd.f32 %v3535_v51, %v8294_v1  ;;  %v5750_v1 = vld [vmem:[#allocation2 + $0x140] sm:$0xf] }
 0x21d   : > { %v8433_v29 = vor.u32 %v6386_v53, %v5750_v1  ;;  %v6513_v53 = vld [vmem:[#allocation9 + $0x228] sm:$0xff] }
 0x21e   : > { %3574 = vmatmul.bf16.gmra.mxu1 %v8413_v34  ;;  %4720 = vmatpush.bf16.msra.mxu2 %v6513_v53 }
 0x221   : > { %v3384_v43 = vpop.f32.mrf.mxu2 }
 0x222   : > { %v8423_v62 = vadd.f32 %v3473_v16, %v3384_v43  ;;  %v3478_v10 = vpop.f32.mrf.mxu3  ;;  %v8431_v51 = vpop.f32.mrf.mxu0 }
 0x223   : > { %v3537_v17 = vpop.f32.mrf.mxu1  ;;  %9121 = vst [vmem:[#allocation34_spill] sm:$0xff] %v8431_v51 }
 0x224   : > { %v8426_v46 = vadd.f32 %v3537_v17, %v8309_v18 }
 0x225   : > { %3843 = vmatmul.bf16.gmra.mxu0 %v8373_v54  ;;  %v5996_v54 = vld [vmem:[#allocation2 + $0x3c] sm:$0xf0] }
 0x226   : > { %3862 = vmatmul.bf16.gmra.mxu2 %v7581_v49  ;;  %v6444_v49 = vld [vmem:[#allocation2 + $0x34] sm:$0xf] }
 0x227   : > { %3956 = vmatmul.bf16.gmra.mxu3 %v7983_v13  ;;  %v5999_v17 = vor.u32 %v6444_v49, %v5996_v54 }
 0x229   : > { %v3387_v63 = vpop.f32.mrf.mxu2 }
 0x22a   : > { %v8435_v16 = vadd.f32 %v3476_v47, %v3387_v63  ;;  %v3481_v43 = vpop.f32.mrf.mxu3  ;;  %v8443_v26 = vpop.f32.mrf.mxu0  ;;  %v6389_v47 = vld [vmem:[#allocation2 + $0x160] sm:$0xf0] }
 0x22b   : > { %v3540_v48 = vpop.f32.mrf.mxu1  ;;  %9122 = vst [vmem:[#allocation35_spill] sm:$0xff] %v8443_v26 }
 0x22c   : > { %v8438_v18 = vadd.f32 %v3540_v48, %v8319_v25  ;;  %v5762_v25 = vld [vmem:[#allocation2 + $0x158] sm:$0xf] }
 0x22d   : > { %v8450_v54 = vor.u32 %v6389_v47, %v5762_v25 }
 0x22e   : > { %3579 = vmatmul.bf16.gmra.mxu1 %v8433_v29 }
 0x231   : > { %v3389_v27 = vpop.f32.mrf.mxu2 }
 0x232   : > { %v8441_v13 = vadd.f32 %v3478_v10, %v3389_v27  ;;  %v3483_v51 = vpop.f32.mrf.mxu3 }
 0x233   : > { %v3542_v39 = vpop.f32.mrf.mxu1 }
 0x234   : > { %v8446_v1 = vadd.f32 %v3542_v39, %v8333_v45  ;;  %v6497_v45 = vld [vmem:[#allocation9 + $0x1a8] sm:$0xff] }
 0x235   : > { %4637 = vmatmul.bf16.vlgmr.msra.gmra.mxu0 %v5999_v17  ;;  %4542 = vmatpush.bf16.msrb.mxu1 %v6497_v45  ;;  %v6008_v39 = vld [vmem:[#allocation2 + $0x54] sm:$0xf0]  ;;  %v6495_v45 = vld [vmem:[#allocation9 + $0x198] sm:$0xff] }
 0x236   : > { %9123 = vst [vmem:[#allocation36_spill] sm:$0xff] %v8446_v1  ;;  %3867 = vmatmul.bf16.gmra.mxu2 %v7636_v60  ;;  %v8458_v60 = vpop.f32.mrf.mxu0 }
 0x237   : > { %3961 = vmatmul.bf16.gmra.mxu3 %v8067_v24  ;;  %9124 = vst [vmem:[#allocation37_spill] sm:$0xff] %v8458_v60  ;;  %v6447_v24 = vld [vmem:[#allocation2 + $0x4c] sm:$0xf] }
 0x238   : > { %v6011_v17 = vor.u32 %v6447_v24, %v6008_v39 }
 0x239   : > { %v3392_v63 = vpop.f32.mrf.mxu2 }
 0x23a   : > { %v8452_v27 = vadd.f32 %v3481_v43, %v3392_v63  ;;  %v3486_v10 = vpop.f32.mrf.mxu3  ;;  %v5774_v63 = vld [vmem:[#allocation2 + $0x170] sm:$0xf] }
 0x23b   : > { %v3545_v48 = vpop.f32.mrf.mxu1 }
 0x23c   : > { %v8455_v49 = vadd.f32 %v3545_v48, %v8345_v0  ;;  %v6496_v0 = vld [vmem:[#allocation9 + $0x1a0] sm:$0xff]  ;;  %v6392_v48 = vld [vmem:[#allocation2 + $0x178] sm:$0xf0] }
 0x23d   : > { %4543 = vmatpush.bf16.msrb.mxu1 %v6496_v0  ;;  %v6493_v0 = vld [vmem:[#allocation9 + $0x188] sm:$0xff] }
 0x23e   : > { %3584 = vmatmul.bf16.gmra.mxu1 %v8450_v54  ;;  %v8465_v53 = vpop.f32.mrf.mxu0 }
 0x23f   : > { %9126 = vst [vmem:[#allocation39_spill] sm:$0xff] %v8465_v53  ;;  %v6450_v53 = vld [vmem:[#allocation2 + $0x64] sm:$0xf] }
 0x241   : > { %v3394_v26 = vpop.f32.mrf.mxu2  ;;  %4544 = vmatpush.bf16.msrb.mxu1 %v6495_v45 }
 0x242   : > { %v8460_v25 = vadd.f32 %v3483_v51, %v3394_v26  ;;  %v3488_v47 = vpop.f32.mrf.mxu3  ;;  %v8469_v26 = vor.u32 %v6392_v48, %v5774_v63 }
 0x243   : > { %v3547_v1 = vpop.f32.mrf.mxu1 }
 0x244   : > { %v8463_v43 = vadd.f32 %v3547_v1, %v8359_v44 }
 0x245   : > { %4642 = vmatmul.bf16.gmra.mxu0 %v6011_v17  ;;  %v6494_v17 = vld [vmem:[#allocation9 + $0x190] sm:$0xff] }
 0x246   : > { %9125 = vst [vmem:[#allocation38_spill] sm:$0xff] %v8463_v43  ;;  %3872 = vmatmul.bf16.gmra.mxu2 %v7681_v31  ;;  %v6020_v31 = vld [vmem:[#allocation2 + $0x6c] sm:$0xf0]  ;;  %4545 = vmatpush.bf16.msrb.mxu1 %v6494_v17 }
 0x247   : > { %3966 = vmatmul.bf16.gmra.mxu3 %v8135_v56  ;;  %v8477_v56 = vpop.f32.mrf.mxu0  ;;  %v6023_v60 = vor.u32 %v6450_v53, %v6020_v31  ;;  %v6512_v17 = vld [vmem:[#allocation9 + $0x220] sm:$0xff] }
 0x248   : > { %9128 = vst [vmem:[#allocation41_spill] sm:$0xff] %v8477_v56  ;;  %4721 = vmatpush.bf16.msra.mxu2 %v6512_v17 }
 0x249   : > { %v3397_v39 = vpop.f32.mrf.mxu2 }
 0x24a   : > { %v8471_v51 = vadd.f32 %v3486_v10, %v3397_v39  ;;  %v3491_v44 = vpop.f32.mrf.mxu3  ;;  %4546 = vmatpush.bf16.msrb.mxu1 %v6493_v0  ;;  %v5786_v39 = vld [vmem:[#allocation2 + $0x188] sm:$0xf] }
 0x24b   : > { %v3550_v24 = vpop.f32.mrf.mxu1  ;;  %v6032_v0 = vld [vmem:[#allocation2 + $0x84] sm:$0xf0] }
 0x24c   : > { %v8474_v1 = vadd.f32 %v3550_v24, %v8380_v8  ;;  %v6492_v8 = vld [vmem:[#allocation9 + $0x180] sm:$0xff] }
 0x24d   : > { %v6419_v24 = vld [vmem:[#allocation2 + $0x190] sm:$0xf0] }
 0x24e   : > { %9127 = vst [vmem:[#allocation40_spill] sm:$0xff] %v8474_v1  ;;  %3589 = vmatmul.bf16.gmra.mxu1 %v8469_v26  ;;  %v5787_v56 = vor.u32 %v6419_v24, %v5786_v39 }
 0x24f   : > { %4547 = vmatpush.bf16.msrb.mxu1 %v6492_v8 }
 0x251   : > { %v3399_v43 = vpop.f32.mrf.mxu2 }
 0x252   : > { %v8479_v48 = vadd.f32 %v3488_v47, %v3399_v43  ;;  %v3493_v10 = vpop.f32.mrf.mxu3  ;;  %v8486_v47 = vpop.f32.mrf.mxu0 }
 0x253   : > { %v3552_v63 = vpop.f32.mrf.mxu1  ;;  %9130 = vst [vmem:[#allocation43_spill] sm:$0xff] %v8486_v47 }
 0x254   : > { %v8482_v45 = vadd.f32 %v3552_v63, %v8388_v57 }
 0x255   : > { %4647 = vmatmul.bf16.gmra.mxu0 %v6023_v60 }
 0x256   : > { %9129 = vst [vmem:[#allocation42_spill] sm:$0xff] %v8482_v45  ;;  %3877 = vmatmul.bf16.gmra.mxu2 %v7547_v15  ;;  %v6453_v15 = vld [vmem:[#allocation2 + $0x7c] sm:$0xf] }
 0x257   : > { %3971 = vmatmul.bf16.gmra.mxu3 %v8229_v7  ;;  %v6035_v63 = vor.u32 %v6453_v15, %v6032_v0  ;;  %v6456_v15 = vld [vmem:[#allocation2 + $0x94] sm:$0xf] }
 0x259   : > { %v3402_v53 = vpop.f32.mrf.mxu2 }
 0x25a   : > { %v8488_v43 = vadd.f32 %v3491_v44, %v3402_v53  ;;  %v3496_v57 = vpop.f32.mrf.mxu3  ;;  %v8498_v24 = vpop.f32.mrf.mxu0  ;;  %v5994_v44 = vld [vmem:[#allocation2 + $0x30] sm:$0xf] }
 0x25b   : > { %v3555_v31 = vpop.f32.mrf.mxu1  ;;  %9131 = vst [vmem:[#allocation44_spill] sm:$0xff] %v8498_v24 }
 0x25c   : > { %v8491_v60 = vadd.f32 %v3555_v31, %v8396_v6  ;;  %v6445_v6 = vld [vmem:[#allocation2 + $0x38] sm:$0xf0] }
 0x25d   : > { %v5995_v53 = vor.u32 %v6445_v6, %v5994_v44  ;;  %v6511_v44 = vld [vmem:[#allocation9 + $0x218] sm:$0xff] }
 0x25e   : > { %3594 = vmatmul.bf16.gmra.mxu1 %v5787_v56  ;;  %4722 = vmatpush.bf16.msra.mxu2 %v6511_v44 }
 0x261   : > { %v3404_v8 = vpop.f32.mrf.mxu2 }
 0x262   : > { %v8493_v7 = vadd.f32 %v3493_v10, %v3404_v8  ;;  %v3498_v1 = vpop.f32.mrf.mxu3 }
 0x263   : > { %v3557_v45 = vpop.f32.mrf.mxu1 }
 0x264   : > { %v8496_v39 = vadd.f32 %v3557_v45, %v8404_v19  ;;  %v6044_v19 = vld [vmem:[#allocation2 + $0x9c] sm:$0xf0]  ;;  %v8507_v45 = vpop.f32.mrf.mxu0 }
 0x265   : > { %4652 = vmatmul.bf16.gmra.mxu0 %v6035_v63  ;;  %9132 = vst [vmem:[#allocation45_spill] sm:$0xff] %v8507_v45  ;;  %v6047_v63 = vor.u32 %v6456_v15, %v6044_v19  ;;  %v6056_v15 = vld [vmem:[#allocation2 + $0xb4] sm:$0xf0] }
 0x266   : > { %3882 = vmatmul.bf16.gmra.mxu2 %v7666_v42 }
 0x267   : > { %3976 = vmatmul.bf16.gmra.mxu3 %v8281_v22 }
 0x269   : > { %v3407_v56 = vpop.f32.mrf.mxu2 }
 0x26a   : > { %v8502_v31 = vadd.f32 %v3496_v57, %v3407_v56  ;;  %v3501_v10 = vpop.f32.mrf.mxu3  ;;  %v6006_v57 = vld [vmem:[#allocation2 + $0x48] sm:$0xf] }
 0x26b   : > { %v3560_v17 = vpop.f32.mrf.mxu1 }
 0x26c   : > { %v8505_v0 = vadd.f32 %v3560_v17, %v8415_v14  ;;  %v6448_v14 = vld [vmem:[#allocation2 + $0x50] sm:$0xf0]  ;;  %v8516_v6 = vpop.f32.mrf.mxu0 }
 0x26d   : > { %9133 = vst [vmem:[#allocation46_spill] sm:$0xff] %v8516_v6 }
 0x26e   : > { %4548 = vmatmul.bf16.vlgmr.msrb.gmra.mxu1 %v5995_v53  ;;  %v6007_v53 = vor.u32 %v6448_v14, %v6006_v57 }
 0x271   : > { %v3409_v42 = vpop.f32.mrf.mxu2 }
 0x272   : > { %v8509_v24 = vadd.f32 %v3498_v1, %v3409_v42  ;;  %v3503_v22 = vpop.f32.mrf.mxu3 }
 0x273   : > { %v3562_v8 = vpop.f32.mrf.mxu1 }
 0x274   : > { %v8512_v47 = vadd.f32 %v3562_v8, %v8423_v62 }
 0x275   : > { %4657 = vmatmul.bf16.gmra.mxu0 %v6047_v63 }
 0x276   : > { %3887 = vmatmul.bf16.gmra.mxu2 %v7769_v41  ;;  %v6459_v41 = vld [vmem:[#allocation2 + $0xac] sm:$0xf] }
 0x277   : > { %3981 = vmatmul.bf16.gmra.mxu3 %v8316_v9  ;;  %v6059_v63 = vor.u32 %v6459_v41, %v6056_v15  ;;  %v8523_v9 = vpop.f32.mrf.mxu0  ;;  %v6068_v41 = vld [vmem:[#allocation2 + $0xcc] sm:$0xf0] }
 0x278   : > { %9134 = vst [vmem:[#allocation47_spill] sm:$0xff] %v8523_v9 }
 0x279   : > { %v3412_v56 = vpop.f32.mrf.mxu2 }
 0x27a   : > { %v8518_v1 = vadd.f32 %v3501_v10, %v3412_v56  ;;  %v3506_v19 = vpop.f32.mrf.mxu3  ;;  %v6018_v10 = vld [vmem:[#allocation2 + $0x60] sm:$0xf] }
 0x27b   : > { %v3565_v17 = vpop.f32.mrf.mxu1 }
 0x27c   : > { %v8521_v62 = vadd.f32 %v3565_v17, %v8435_v16  ;;  %v6451_v16 = vld [vmem:[#allocation2 + $0x68] sm:$0xf0] }
 0x27d   : > { %v6019_v56 = vor.u32 %v6451_v16, %v6018_v10  ;;  %v6454_v16 = vld [vmem:[#allocation2 + $0x80] sm:$0xf0] }
 0x27e   : > { %4553 = vmatmul.bf16.gmra.mxu1 %v6007_v53 }
 0x27f   : > { %v8537_v15 = vpop.f32.mrf.mxu0 }
 0x281   : > { %v3414_v42 = vpop.f32.mrf.mxu2 }
 0x282   : > { %v8525_v45 = vadd.f32 %v3503_v22, %v3414_v42  ;;  %v3508_v6 = vpop.f32.mrf.mxu3 }
 0x283   : > { %v3567_v8 = vpop.f32.mrf.mxu1 }
 0x284   : > { %v8528_v57 = vadd.f32 %v3567_v8, %v8441_v13  ;;  %v6523_v13 = vld [vmem:[#allocation11 + $0x38] sm:$0xff] }
 0x285   : > { %4662 = vmatmul.bf16.gmra.mxu0 %v6059_v63  ;;  %4991 = vmatpush.bf16.msra.mxu3 %v6523_v13 }
 0x286   : > { %3892 = vmatmul.bf16.gmra.mxu2 %v7855_v2  ;;  %v6462_v2 = vld [vmem:[#allocation2 + $0xc4] sm:$0xf] }
 0x287   : > { %3986 = vmatmul.bf16.gmra.mxu3 %v8340_v61  ;;  %v6071_v63 = vor.u32 %v6462_v2, %v6068_v41  ;;  %v8544_v10 = vpop.f32.mrf.mxu0 }
 0x288   : > { %9135 = vst [vmem:[#allocation48_spill] sm:$0xff] %v8544_v10 }
 0x289   : > { %v3417_v14 = vpop.f32.mrf.mxu2 }
 0x28a   : > { %v8532_v17 = vadd.f32 %v3506_v19, %v3417_v14  ;;  %v3947_v53 = vpop.f32.mrf.mxu3  ;;  %v6510_v14 = vld [vmem:[#allocation9 + $0x210] sm:$0xff] }
 0x28b   : > { %v3570_v44 = vpop.f32.mrf.mxu1  ;;  %4723 = vmatpush.bf16.msra.mxu2 %v6510_v14 }
 0x28c   : > { %v8535_v22 = vadd.f32 %v3570_v44, %v8452_v27  ;;  %v6030_v27 = vld [vmem:[#allocation2 + $0x78] sm:$0xf]  ;;  %v3770_v44 = vadd.f32 %v8238_v23, %v8364_v32 }
 0x28d   : > { %v6031_v13 = vor.u32 %v6454_v16, %v6030_v27 }
 0x28e   : > { %4558 = vmatmul.bf16.gmra.mxu1 %v6019_v56 }
 0x291   : > { %v3419_v42 = vpop.f32.mrf.mxu2 }
 0x292   : > { %v8539_v61 = vadd.f32 %v3508_v6, %v3419_v42  ;;  %v3949_v9 = vpop.f32.mrf.mxu3  ;;  %v6465_v42 = vld [vmem:[#allocation2 + $0xdc] sm:$0xf] }
 0x293   : > { %v3572_v8 = vpop.f32.mrf.mxu1 }
 0x294   : > { %v8542_v19 = vadd.f32 %v3572_v8, %v8460_v25  ;;  %v8555_v8 = vpop.f32.mrf.mxu0 }
 0x295   : > { %4667 = vmatmul.bf16.gmra.mxu0 %v6071_v63 }
 0x296   : > { %3897 = vmatmul.bf16.gmra.mxu2 %v7973_v21  ;;  %v6080_v21 = vld [vmem:[#allocation2 + $0xe4] sm:$0xf0] }
 0x297   : > { %3991 = vmatmul.bf16.gmra.mxu3 %v8361_v20  ;;  %v3772_v20 = vadd.f32 %v8279_v58, %v8370_v33  ;;  %v6083_v23 = vor.u32 %v6465_v42, %v6080_v21  ;;  %v3775_v58 = vadd.f32 %v8296_v28, %v8383_v59  ;;  %v6092_v21 = vld [vmem:[#allocation2 + $0xfc] sm:$0xf0]  ;;  %v3777_v28 = vadd.f32 %v8311_v37, %v8391_v55  ;;  %v6509_v37 = vld [vmem:[#allocation9 + $0x208] sm:$0xff] }
 0x298   : > { %v3780_v55 = vadd.f32 %v8321_v4, %v8399_v38  ;;  %4724 = vmatpush.bf16.msra.mxu2 %v6509_v37 }
 0x299   : > { %v3858_v56 = vpop.f32.mrf.mxu2 }
 0x29a   : > { %v3859_v41 = vadd.f32 %v3858_v56, %v3770_v44  ;;  %v3952_v25 = vpop.f32.mrf.mxu3  ;;  %v6457_v44 = vld [vmem:[#allocation2 + $0x98] sm:$0xf0] }
 0x29b   : > { %v3575_v6 = vpop.f32.mrf.mxu1 }
 0x29c   : > { %v8551_v2 = vadd.f32 %v3575_v6, %v8471_v51  ;;  %v8553_v63 = vadd.f32 %v3947_v53, %v3859_v41  ;;  %v6042_v53 = vld [vmem:[#allocation2 + $0x90] sm:$0xf] }
 0x29d   : > { %v6043_v6 = vor.u32 %v6457_v44, %v6042_v53  ;;  %v6054_v53 = vld [vmem:[#allocation2 + $0xa8] sm:$0xf]  ;;  %v6460_v44 = vld [vmem:[#allocation2 + $0xb0] sm:$0xf0] }
 0x29e   : > { %4563 = vmatmul.bf16.gmra.mxu1 %v6031_v13  ;;  %v8568_v13 = vpop.f32.mrf.mxu0 }
 0x2a1   : > { %v3860_v32 = vpop.f32.mrf.mxu2 }
 0x2a2   : > { %v3861_v27 = vadd.f32 %v3860_v32, %v3772_v20  ;;  %v3954_v16 = vpop.f32.mrf.mxu3 }
 0x2a3   : > { %v3577_v10 = vpop.f32.mrf.mxu1 }
 0x2a4   : > { %v8560_v14 = vadd.f32 %v3577_v10, %v8479_v48  ;;  %v8562_v51 = vadd.f32 %v3949_v9, %v3861_v27 }
 0x2a5   : > { %4672 = vmatmul.bf16.gmra.mxu0 %v6083_v23 }
 0x2a6   : > { %3902 = vmatmul.bf16.gmra.mxu2 %v8036_v40  ;;  %v6522_v40 = vld [vmem:[#allocation11 + $0x30] sm:$0xff] }
 0x2a7   : > { %3996 = vmatmul.bf16.gmra.mxu3 %v8378_v52  ;;  %v6468_v52 = vld [vmem:[#allocation2 + $0xf4] sm:$0xf] }
 0x2a8   : > { %4992 = vmatpush.bf16.msra.mxu3 %v6522_v40  ;;  %v6095_v59 = vor.u32 %v6468_v52, %v6092_v21  ;;  %v3782_v21 = vadd.f32 %v8335_v3, %v8407_v5  ;;  %v3785_v3 = vadd.f32 %v8343_v11, %v8418_v12 }
 0x2a9   : > { %v3863_v33 = vpop.f32.mrf.mxu2 }
 0x2aa   : > { %v3864_v41 = vadd.f32 %v3863_v33, %v3775_v58  ;;  %v3957_v48 = vpop.f32.mrf.mxu3 }
 0x2ab   : > { %v3580_v56 = vpop.f32.mrf.mxu1 }
 0x2ac   : > { %v8571_v10 = vadd.f32 %v3580_v56, %v8488_v43  ;;  %v8573_v9 = vadd.f32 %v3952_v25, %v3864_v41  ;;  %v8580_v43 = vpop.f32.mrf.mxu0  ;;  %v6055_v56 = vor.u32 %v6460_v44, %v6054_v53 }
 0x2ae   : > { %4568 = vmatmul.bf16.gmra.mxu1 %v6043_v6 }
 0x2b1   : > { %v3865_v42 = vpop.f32.mrf.mxu2 }
 0x2b2   : > { %v3866_v23 = vadd.f32 %v3865_v42, %v3777_v28  ;;  %v3959_v32 = vpop.f32.mrf.mxu3 }
 0x2b3   : > { %v3582_v20 = vpop.f32.mrf.mxu1 }
 0x2b4   : > { %v8578_v27 = vadd.f32 %v3582_v20, %v8493_v7  ;;  %v8582_v25 = vadd.f32 %v3954_v16, %v3866_v23  ;;  %v8593_v40 = vpop.f32.mrf.mxu0  ;;  %v6463_v20 = vld [vmem:[#allocation2 + $0xc8] sm:$0xf0] }
 0x2b5   : > { %4677 = vmatmul.bf16.gmra.mxu0 %v6095_v59 }
 0x2b6   : > { %3907 = vmatmul.bf16.gmra.mxu2 %v8090_v35  ;;  %v6104_v35 = vld [vmem:[#allocation2 + $0x114] sm:$0xf0] }
 0x2b7   : > { %4001 = vmatmul.bf16.gmra.mxu3 %v8394_v50  ;;  %v6471_v50 = vld [vmem:[#allocation2 + $0x10c] sm:$0xf] }
 0x2b8   : > { %v6107_v4 = vor.u32 %v6471_v50, %v6104_v35 }
 0x2b9   : > { %v3868_v58 = vpop.f32.mrf.mxu2 }
 0x2ba   : > { %v3869_v7 = vadd.f32 %v3868_v58, %v3780_v55  ;;  %v3962_v6 = vpop.f32.mrf.mxu3  ;;  %v6116_v58 = vld [vmem:[#allocation2 + $0x12c] sm:$0xf0] }
 0x2bb   : > { %v3585_v33 = vpop.f32.mrf.mxu1 }
 0x2bc   : > { %v8589_v41 = vadd.f32 %v3585_v33, %v8502_v31  ;;  %v8591_v16 = vadd.f32 %v3957_v48, %v3869_v7  ;;  %v6066_v48 = vld [vmem:[#allocation2 + $0xc0] sm:$0xf]  ;;  %v8604_v23 = vpop.f32.mrf.mxu0  ;;  %v3787_v33 = vadd.f32 %v8357_v36, %v8426_v46  ;;  %v6508_v36 = vld [vmem:[#allocation9 + $0x200] sm:$0xff] }
 0x2bd   : > { %v6067_v44 = vor.u32 %v6463_v20, %v6066_v48  ;;  %v9137_v46 = vld [vmem:[#allocation28_spill] sm:$0xff]  ;;  %4725 = vmatpush.bf16.msra.mxu2 %v6508_v36 }
 0x2be   : > { %4573 = vmatmul.bf16.gmra.mxu1 %v6055_v56 }
 0x2c1   : > { %v3870_v38 = vpop.f32.mrf.mxu2 }
 0x2c2   : > { %v3871_v28 = vadd.f32 %v3870_v38, %v3782_v21  ;;  %v3964_v59 = vpop.f32.mrf.mxu3  ;;  %v9136_v21 = vld [vmem:[#allocation24_spill] sm:$0xff]  ;;  %v6466_v38 = vld [vmem:[#allocation2 + $0xe0] sm:$0xf0] }
 0x2c3   : > { %v3587_v52 = vpop.f32.mrf.mxu1 }
 0x2c4   : > { %v8598_v42 = vadd.f32 %v3587_v52, %v8509_v24  ;;  %v8600_v31 = vadd.f32 %v3959_v32, %v3871_v28  ;;  %v8615_v7 = vpop.f32.mrf.mxu0  ;;  %v3790_v52 = vadd.f32 %v9137_v46, %v8438_v18 }
 0x2c5   : > { %4682 = vmatmul.bf16.gmra.mxu0 %v6107_v4  ;;  %v6078_v4 = vld [vmem:[#allocation2 + $0xd8] sm:$0xf] }
 0x2c6   : > { %3912 = vmatmul.bf16.gmra.mxu2 %v8175_v30  ;;  %v6521_v30 = vld [vmem:[#allocation11 + $0x28] sm:$0xff]  ;;  %v6079_v20 = vor.u32 %v6466_v38, %v6078_v4  ;;  %v9141_v4 = vld [vmem:[#allocation30_spill] sm:$0xff] }
 0x2c7   : > { %4006 = vmatmul.bf16.gmra.mxu3 %v8413_v34  ;;  %v6474_v34 = vld [vmem:[#allocation2 + $0x124] sm:$0xf]  ;;  %v3795_v38 = vadd.f32 %v9141_v4, %v8455_v49  ;;  %v9146_v4 = vld [vmem:[#allocation40_spill] sm:$0xff] }
 0x2c8   : > { %4993 = vmatpush.bf16.msra.mxu3 %v6521_v30  ;;  %v6119_v56 = vor.u32 %v6474_v34, %v6116_v58  ;;  %v9139_v30 = vld [vmem:[#allocation29_spill] sm:$0xff] }
 0x2c9   : > { %v3873_v5 = vpop.f32.mrf.mxu2 }
 0x2ca   : > { %v3874_v37 = vadd.f32 %v3873_v5, %v3785_v3  ;;  %v3967_v24 = vpop.f32.mrf.mxu3 }
 0x2cb   : > { %v3590_v53 = vpop.f32.mrf.mxu1 }
 0x2cc   : > { %v8609_v55 = vadd.f32 %v3590_v53, %v8518_v1  ;;  %v8611_v32 = vadd.f32 %v3962_v6, %v3874_v37  ;;  %v6477_v37 = vld [vmem:[#allocation2 + $0x13c] sm:$0xf] }
 0x2ce   : > { %4578 = vmatmul.bf16.gmra.mxu1 %v6067_v44  ;;  %v6128_v44 = vld [vmem:[#allocation2 + $0x144] sm:$0xf0] }
 0x2cf   : > { %v6131_v34 = vor.u32 %v6477_v37, %v6128_v44  ;;  %v6480_v44 = vld [vmem:[#allocation2 + $0x154] sm:$0xf]  ;;  %v6140_v37 = vld [vmem:[#allocation2 + $0x15c] sm:$0xf0] }
 0x2d1   : > { %v3875_v11 = vpop.f32.mrf.mxu2 }
 0x2d2   : > { %v3876_v35 = vadd.f32 %v3875_v11, %v3787_v33  ;;  %v8617_v50 = vpop.f32.mrf.mxu3 }
 0x2d3   : > { %v3592_v12 = vpop.f32.mrf.mxu1 }
 0x2d4   : > { %v8620_v1 = vadd.f32 %v3592_v12, %v8525_v45  ;;  %v8622_v6 = vadd.f32 %v3964_v59, %v3876_v35  ;;  %v4638_v59 = vpop.f32.mrf.mxu0  ;;  %v9140_v35 = vld [vmem:[#allocation25_spill] sm:$0xff] }
 0x2d5   : > { %4687 = vmatmul.bf16.gmra.mxu0 %v6119_v56 }
 0x2d6   : > { %3917 = vmatmul.bf16.gmra.mxu2 %v9136_v21  ;;  %v6469_v21 = vld [vmem:[#allocation2 + $0xf8] sm:$0xf0] }
 0x2d7   : > { %4011 = vmatmul.bf16.gmra.mxu3 %v8433_v29  ;;  %v9138_v29 = vld [vmem:[#allocation36_spill] sm:$0xff] }
 0x2d8   : > { %v3792_v58 = vadd.f32 %v9139_v30, %v9138_v29  ;;  %v9142_v30 = vld [vmem:[#allocation38_spill] sm:$0xff] }
 0x2d9   : > { %v3878_v28 = vpop.f32.mrf.mxu2 }
 0x2da   : > { %v3879_v3 = vadd.f32 %v3878_v28, %v3790_v52  ;;  %v3972_v45 = vpop.f32.mrf.mxu3 }
 0x2db   : > { %v3595_v48 = vpop.f32.mrf.mxu1 }
 0x2dc   : > { %v8629_v5 = vadd.f32 %v3595_v48, %v8532_v17  ;;  %v8631_v53 = vadd.f32 %v3967_v24, %v3879_v3  ;;  %v4640_v17 = vpop.f32.mrf.mxu0  ;;  %v6090_v24 = vld [vmem:[#allocation2 + $0xf0] sm:$0xf] }
 0x2dd   : > { %v6091_v52 = vor.u32 %v6469_v21, %v6090_v24  ;;  %v6520_v3 = vld [vmem:[#allocation11 + $0x20] sm:$0xff]  ;;  %v6102_v24 = vld [vmem:[#allocation2 + $0x108] sm:$0xf] }
 0x2de   : > { %4583 = vmatmul.bf16.gmra.mxu1 %v6079_v20  ;;  %4994 = vmatpush.bf16.msra.mxu3 %v6520_v3  ;;  %v6472_v21 = vld [vmem:[#allocation2 + $0x110] sm:$0xf0] }
 0x2e1   : > { %v3880_v18 = vpop.f32.mrf.mxu2 }
 0x2e2   : > { %v8635_v56 = vadd.f32 %v3880_v18, %v3792_v58  ;;  %v8637_v11 = vpop.f32.mrf.mxu3 }
 0x2e3   : > { %v3597_v33 = vpop.f32.mrf.mxu1 }
 0x2e4   : > { %v8640_v12 = vadd.f32 %v3597_v33, %v8539_v61  ;;  %v4643_v29 = vpop.f32.mrf.mxu0 }
 0x2e5   : > { %4692 = vmatmul.bf16.gmra.mxu0 %v6131_v34  ;;  %v6143_v34 = vor.u32 %v6480_v44, %v6140_v37 }
 0x2e6   : > { %3922 = vmatmul.bf16.gmra.mxu2 %v9140_v35 }
 0x2e7   : > { %4016 = vmatmul.bf16.gmra.mxu3 %v8450_v54  ;;  %v9143_v54 = vld [vmem:[#allocation31_spill] sm:$0xff] }
 0x2e8   : > { %v3797_v58 = vadd.f32 %v9143_v54, %v9142_v30  ;;  %v6483_v54 = vld [vmem:[#allocation2 + $0x16c] sm:$0xf] }
 0x2e9   : > { %v3883_v36 = vpop.f32.mrf.mxu2 }
 0x2ea   : > { %v3884_v28 = vadd.f32 %v3883_v36, %v3795_v38  ;;  %v3977_v48 = vpop.f32.mrf.mxu3  ;;  %v9147_v38 = vld [vmem:[#allocation32_spill] sm:$0xff] }
 0x2eb   : > { %v4549_v46 = vpop.f32.mrf.mxu1  ;;  %v3800_v36 = vadd.f32 %v9147_v38, %v9146_v4 }
 0x2ec   : > { %v8646_v20 = vadd.f32 %v4638_v59, %v4549_v46  ;;  %v8648_v61 = vadd.f32 %v3972_v45, %v3884_v28  ;;  %v9145_v45 = vld [vmem:[#allocation26_spill] sm:$0xff]  ;;  %v6103_v28 = vor.u32 %v6472_v21, %v6102_v24  ;;  %v4645_v3 = vpop.f32.mrf.mxu0  ;;  %v9153_v21 = vld [vmem:[#allocation27_spill] sm:$0xff] }
 0x2ee   : > { %4588 = vmatmul.bf16.gmra.mxu1 %v6091_v52 }
 0x2f1   : > { %v3885_v49 = vpop.f32.mrf.mxu2 }
 0x2f2   : > { %v8652_v33 = vadd.f32 %v3885_v49, %v3797_v58  ;;  %v8654_v35 = vpop.f32.mrf.mxu3  ;;  %v6152_v58 = vld [vmem:[#allocation2 + $0x174] sm:$0xf0] }
 0x2f3   : > { %v4551_v18 = vpop.f32.mrf.mxu1  ;;  %9144 = vst [vmem:[#allocation24_spill] sm:$0xff] %v8654_v35  ;;  %v9150_v49 = vld [vmem:[#allocation33_spill] sm:$0xff] }
 0x2f4   : > { %v8656_v59 = vadd.f32 %v4640_v17, %v4551_v18 }
 0x2f5   : > { %4697 = vmatmul.bf16.gmra.mxu0 %v6143_v34  ;;  %v9149_v34 = vld [vmem:[#allocation42_spill] sm:$0xff] }
 0x2f6   : > { %3927 = vmatmul.bf16.gmra.mxu2 %v9145_v45  ;;  %v3802_v18 = vadd.f32 %v9150_v49, %v9149_v34 }
 0x2f7   : > { %4021 = vmatmul.bf16.gmra.mxu3 %v8469_v26  ;;  %v6155_v26 = vor.u32 %v6483_v54, %v6152_v58 }
 0x2f9   : > { %v3888_v46 = vpop.f32.mrf.mxu2 }
 0x2fa   : > { %v3889_v44 = vadd.f32 %v3888_v46, %v3800_v36  ;;  %v3982_v37 = vpop.f32.mrf.mxu3  ;;  %v6475_v36 = vld [vmem:[#allocation2 + $0x128] sm:$0xf0]  ;;  %v9154_v46 = vld [vmem:[#allocation34_spill] sm:$0xff] }
 0x2fb   : > { %v4554_v52 = vpop.f32.mrf.mxu1 }
 0x2fc   : > { %v8662_v30 = vadd.f32 %v4643_v29, %v4554_v52  ;;  %v8664_v17 = vadd.f32 %v3977_v48, %v3889_v44  ;;  %v4648_v29 = vpop.f32.mrf.mxu0  ;;  %v6114_v48 = vld [vmem:[#allocation2 + $0x120] sm:$0xf]  ;;  %v3805_v52 = vadd.f32 %v9154_v46, %v8491_v60  ;;  %v6002_v46 = vld [vmem:[#allocation2 + $0x38] sm:$0xf] }
 0x2fd   : > { %v6115_v54 = vor.u32 %v6475_v36, %v6114_v48 }
 0x2fe   : > { %4593 = vmatmul.bf16.gmra.mxu1 %v6103_v28  ;;  %9148 = vst [vmem:[#allocation28_spill] sm:$0xff] %v8664_v17  ;;  %v6446_v17 = vld [vmem:[#allocation2 + $0x40] sm:$0xf0] }
 0x301   : > { %v3890_v45 = vpop.f32.mrf.mxu2 }
 0x302   : > { %v8668_v4 = vadd.f32 %v3890_v45, %v3802_v18  ;;  %v8670_v38 = vpop.f32.mrf.mxu3 }
 0x303   : > { %v4556_v35 = vpop.f32.mrf.mxu1  ;;  %9152 = vst [vmem:[#allocation29_spill] sm:$0xff] %v8670_v38 }
 0x304   : > { %9151 = vst [vmem:[#allocation36_spill] sm:$0xff] %v8668_v4  ;;  %v8672_v24 = vadd.f32 %v4645_v3, %v4556_v35  ;;  %v6519_v35 = vld [vmem:[#allocation11 + $0x18] sm:$0xff]  ;;  %v6486_v3 = vld [vmem:[#allocation2 + $0x184] sm:$0xf]  ;;  %v4650_v45 = vpop.f32.mrf.mxu0 }
 0x305   : > { %4702 = vmatmul.bf16.gmra.mxu0 %v6155_v26  ;;  %v6164_v26 = vld [vmem:[#allocation2 + $0x18c] sm:$0xf0]  ;;  %4995 = vmatpush.bf16.msra.mxu3 %v6519_v35 }
 0x306   : > { %3932 = vmatmul.bf16.gmra.mxu2 %v9153_v21  ;;  %v9156_v21 = vld [vmem:[#allocation35_spill] sm:$0xff]  ;;  %v6167_v4 = vor.u32 %v6486_v3, %v6164_v26 }
 0x307   : > { %v3807_v38 = vadd.f32 %v9156_v21, %v8496_v39 }
 0x309   : > { %v3893_v28 = vpop.f32.mrf.mxu2 }
 0x30a   : > { %v3894_v58 = vadd.f32 %v3893_v28, %v3805_v52  ;;  %v3987_v34 = vpop.f32.mrf.mxu3  ;;  %v6126_v28 = vld [vmem:[#allocation2 + $0x138] sm:$0xf] }
 0x30b   : > { %v4559_v44 = vpop.f32.mrf.mxu1 }
 0x30c   : > { %v8677_v49 = vadd.f32 %v4648_v29, %v4559_v44  ;;  %v8679_v18 = vadd.f32 %v3982_v37, %v3894_v58  ;;  %v6003_v37 = vor.u32 %v6446_v17, %v6002_v46  ;;  %v6478_v44 = vld [vmem:[#allocation2 + $0x140] sm:$0xf0]  ;;  %v9158_v58 = vld [vmem:[#allocation37_spill] sm:$0xff]  ;;  %v6014_v46 = vld [vmem:[#allocation2 + $0x50] sm:$0xf] }
 0x30d   : > { %v3810_v39 = vadd.f32 %v9158_v58, %v8505_v0  ;;  %v6127_v26 = vor.u32 %v6478_v44, %v6126_v28  ;;  %v6138_v28 = vld [vmem:[#allocation2 + $0x150] sm:$0xf]  ;;  %v6481_v44 = vld [vmem:[#allocation2 + $0x158] sm:$0xf0] }
 0x30e   : > { %4598 = vmatmul.bf16.gmra.mxu1 %v6115_v54  ;;  %9155 = vst [vmem:[#allocation25_spill] sm:$0xff] %v8679_v18  ;;  %v4653_v54 = vpop.f32.mrf.mxu0 }
 0x311   : > { %v3895_v60 = vpop.f32.mrf.mxu2 }
 0x312   : > { %v8683_v36 = vadd.f32 %v3895_v60, %v3807_v38  ;;  %v8685_v29 = vpop.f32.mrf.mxu3 }
 0x313   : > { %v4561_v48 = vpop.f32.mrf.mxu1  ;;  %9157 = vst [vmem:[#allocation30_spill] sm:$0xff] %v8685_v29 }
 0x314   : > { %v8687_v52 = vadd.f32 %v4650_v45, %v4561_v48  ;;  %v6449_v48 = vld [vmem:[#allocation2 + $0x58] sm:$0xf0] }
 0x315   : > { %4707 = vmatmul.bf16.gmra.mxu0 %v6167_v4  ;;  %v9159_v4 = vld [vmem:[#allocation39_spill] sm:$0xff]  ;;  %v6015_v0 = vor.u32 %v6449_v48, %v6014_v46  ;;  %v6452_v46 = vld [vmem:[#allocation2 + $0x70] sm:$0xf0] }
 0x316   : > { %4726 = vmatmul.bf16.vlgmr.msra.gmra.mxu2 %v6003_v37  ;;  %v3812_v17 = vadd.f32 %v9159_v4, %v8512_v47 }
 0x319   : > { %v3898_v35 = vpop.f32.mrf.mxu2 }
 0x31a   : > { %v3899_v21 = vadd.f32 %v3898_v35, %v3810_v39  ;;  %v3992_v18 = vpop.f32.mrf.mxu3 }
 0x31b   : > { %v4564_v3 = vpop.f32.mrf.mxu1 }
 0x31c   : > { %v8691_v38 = vadd.f32 %v4653_v54, %v4564_v3  ;;  %v8693_v60 = vadd.f32 %v3987_v34, %v3899_v21  ;;  %v9161_v54 = vld [vmem:[#allocation41_spill] sm:$0xff]  ;;  %v6139_v34 = vor.u32 %v6481_v44, %v6138_v28  ;;  %v9162_v21 = vld [vmem:[#allocation43_spill] sm:$0xff]  ;;  %v6484_v44 = vld [vmem:[#allocation2 + $0x170] sm:$0xf0] }
 0x31d   : > { %v3815_v58 = vadd.f32 %v9161_v54, %v8521_v62  ;;  %v3817_v4 = vadd.f32 %v9162_v21, %v8528_v57  ;;  %v6150_v28 = vld [vmem:[#allocation2 + $0x168] sm:$0xf]  ;;  %v9165_v54 = vld [vmem:[#allocation44_spill] sm:$0xff] }
 0x31e   : > { %4603 = vmatmul.bf16.gmra.mxu1 %v6127_v26  ;;  %v6518_v26 = vld [vmem:[#allocation11 + $0x10] sm:$0xff] }
 0x31f   : > { %4996 = vmatpush.bf16.msra.mxu3 %v6518_v26  ;;  %v9166_v26 = vld [vmem:[#allocation45_spill] sm:$0xff] }
 0x320   : > { %v3822_v21 = vadd.f32 %v9166_v26, %v8542_v19 }
 0x321   : > { %v3900_v45 = vpop.f32.mrf.mxu2 }
 0x322   : > { %v8697_v37 = vadd.f32 %v3900_v45, %v3812_v17  ;;  %v8699_v29 = vpop.f32.mrf.mxu3  ;;  %v6026_v45 = vld [vmem:[#allocation2 + $0x68] sm:$0xf] }
 0x323   : > { %9160 = vst [vmem:[#allocation38_spill] sm:$0xff] %v8699_v29  ;;  %v6027_v62 = vor.u32 %v6452_v46, %v6026_v45  ;;  %v6176_v29 = vld [vmem:[#allocation2 + $0x1a4] sm:$0xf0] }
 0x326   : > { %4731 = vmatmul.bf16.gmra.mxu2 %v6015_v0 }
 0x329   : > { %v3903_v39 = vpop.f32.mrf.mxu2 }
 0x32a   : > { %v3904_v35 = vadd.f32 %v3903_v39, %v3815_v58  ;;  %v3997_v3 = vpop.f32.mrf.mxu3  ;;  %v6151_v39 = vor.u32 %v6484_v44, %v6150_v28  ;;  %v6162_v28 = vld [vmem:[#allocation2 + $0x180] sm:$0xf]  ;;  %v6487_v44 = vld [vmem:[#allocation2 + $0x188] sm:$0xf0] }
 0x32c   : > { %v8703_v47 = vadd.f32 %v3992_v18, %v3904_v35  ;;  %v3820_v18 = vadd.f32 %v9165_v54, %v8535_v22  ;;  %v8721_v54 = vpop.f32.mrf.mxu0 }
 0x32e   : > { %4608 = vmatmul.bf16.gmra.mxu1 %v6139_v34 }
 0x331   : > { %v3905_v17 = vpop.f32.mrf.mxu2 }
 0x332   : > { %v8707_v48 = vadd.f32 %v3905_v17, %v3817_v4  ;;  %v8709_v0 = vpop.f32.mrf.mxu3  ;;  %v6038_v17 = vld [vmem:[#allocation2 + $0x80] sm:$0xf] }
 0x333   : > { %9164 = vst [vmem:[#allocation26_spill] sm:$0xff] %v8709_v0  ;;  %v6455_v0 = vld [vmem:[#allocation2 + $0x88] sm:$0xf0] }
 0x334   : > { %9163 = vst [vmem:[#allocation31_spill] sm:$0xff] %v8707_v48  ;;  %v6039_v46 = vor.u32 %v6455_v0, %v6038_v17  ;;  %v6517_v0 = vld [vmem:[#allocation11 + $0x8] sm:$0xff] }
 0x335   : > { %4997 = vmatpush.bf16.msra.mxu3 %v6517_v0  ;;  %v6050_v17 = vld [vmem:[#allocation2 + $0x98] sm:$0xf] }
 0x336   : > { %4736 = vmatmul.bf16.gmra.mxu2 %v6027_v62  ;;  %v6489_v62 = vld [vmem:[#allocation2 + $0x19c] sm:$0xf] }
 0x337   : > { %v6179_v22 = vor.u32 %v6489_v62, %v6176_v29  ;;  %v9168_v29 = vld [vmem:[#allocation47_spill] sm:$0xff] }
 0x339   : > { %v3908_v58 = vpop.f32.mrf.mxu2  ;;  %4712 = vmatmul.bf16.gmra.mxu0 %v6179_v22 }
 0x33a   : > { %v3909_v34 = vadd.f32 %v3908_v58, %v3820_v18  ;;  %v4002_v35 = vpop.f32.mrf.mxu3  ;;  %v6163_v58 = vor.u32 %v6487_v44, %v6162_v28  ;;  %v3830_v28 = vadd.f32 %v8537_v15, %v8571_v10  ;;  %v3835_v10 = vadd.f32 %v8555_v8, %v8589_v41 }
 0x33b   : > { %v3840_v8 = vadd.f32 %v8580_v43, %v8609_v55 }
 0x33c   : > { %v8713_v57 = vadd.f32 %v3997_v3, %v3909_v34  ;;  %v9167_v3 = vld [vmem:[#allocation46_spill] sm:$0xff] }
 0x33d   : > { %v3825_v19 = vadd.f32 %v9167_v3, %v8551_v2  ;;  %v6174_v2 = vld [vmem:[#allocation2 + $0x198] sm:$0xf]  ;;  %v6490_v3 = vld [vmem:[#allocation2 + $0x1a0] sm:$0xf0] }
 0x33e   : > { %4613 = vmatmul.bf16.gmra.mxu1 %v6151_v39 }
 0x341   : > { %v3910_v4 = vpop.f32.mrf.mxu2 }
 0x342   : > { %v8717_v45 = vadd.f32 %v3910_v4, %v3822_v21  ;;  %v8719_v48 = vpop.f32.mrf.mxu3  ;;  %v3827_v21 = vadd.f32 %v9168_v29, %v8560_v14 }
 0x346   : > { %4741 = vmatmul.bf16.gmra.mxu2 %v6039_v46  ;;  %v6458_v46 = vld [vmem:[#allocation2 + $0xa0] sm:$0xf0] }
 0x347   : > { %v6051_v22 = vor.u32 %v6458_v46, %v6050_v17 }
 0x349   : > { %v3913_v18 = vpop.f32.mrf.mxu2 }
 0x34a   : > { %v3914_v39 = vadd.f32 %v3913_v18, %v3825_v19  ;;  %v4007_v26 = vpop.f32.mrf.mxu3  ;;  %v6175_v19 = vor.u32 %v6490_v3, %v6174_v2 }
 0x34c   : > { %v8725_v34 = vadd.f32 %v4002_v35, %v3914_v39  ;;  %v9169_v39 = vld [vmem:[#allocation48_spill] sm:$0xff] }
 0x34d   : > { %v3832_v0 = vadd.f32 %v9169_v39, %v8578_v27  ;;  %v3837_v27 = vadd.f32 %v8568_v13, %v8598_v42  ;;  %v6086_v42 = vld [vmem:[#allocation2 + $0xe0] sm:$0xf] }
 0x34e   : > { %4618 = vmatmul.bf16.gmra.mxu1 %v6163_v58  ;;  %v8735_v58 = vpop.f32.mrf.mxu1 }
 0x351   : > { %v3915_v4 = vpop.f32.mrf.mxu2 }
 0x352   : > { %v8729_v62 = vadd.f32 %v3915_v4, %v3827_v21  ;;  %v8733_v35 = vpop.f32.mrf.mxu3  ;;  %v6062_v21 = vld [vmem:[#allocation2 + $0xb0] sm:$0xf]  ;;  %v6461_v4 = vld [vmem:[#allocation2 + $0xb8] sm:$0xf0] }
 0x353   : > { %v6063_v15 = vor.u32 %v6461_v4, %v6062_v21 }
 0x356   : > { %4746 = vmatmul.bf16.gmra.mxu2 %v6051_v22 }
 0x359   : > { %v3918_v44 = vpop.f32.mrf.mxu2 }
 0x35a   : > { %v3919_v18 = vadd.f32 %v3918_v44, %v3830_v28  ;;  %v4012_v46 = vpop.f32.mrf.mxu3 }
 0x35c   : > { %v8737_v14 = vadd.f32 %v4007_v26, %v3919_v18  ;;  %v6516_v26 = vld [vmem:[#allocation11] sm:$0xff] }
 0x35d   : > { %4998 = vmatpush.bf16.msra.mxu3 %v6516_v26  ;;  %v6464_v18 = vld [vmem:[#allocation2 + $0xd0] sm:$0xf0]  ;;  %v3845_v26 = vadd.f32 %v8604_v23, %v8629_v5  ;;  %v8776_v5 = vld [vmem:[%s8984_s6] ss:$0 sm:$0xff] }
 0x35e   : > { %4623 = vmatmul.bf16.gmra.mxu1 %v6175_v19  ;;  %v6074_v19 = vld [vmem:[#allocation2 + $0xc8] sm:$0xf] }
 0x361   : > { %v3920_v29 = vpop.f32.mrf.mxu2 }
 0x362   : > { %v8741_v17 = vadd.f32 %v3920_v29, %v3832_v0  ;;  %v8747_v28 = vpop.f32.mrf.mxu3  ;;  %v6075_v0 = vor.u32 %v6464_v18, %v6074_v19  ;;  %v6098_v19 = vld [vmem:[#allocation2 + $0xf8] sm:$0xf]  ;;  %v6470_v18 = vld [vmem:[#allocation2 + $0x100] sm:$0xf0] }
 0x366   : > { %4751 = vmatmul.bf16.gmra.mxu2 %v6063_v15 }
 0x369   : > { %v3923_v22 = vpop.f32.mrf.mxu2 }
 0x36a   : > { %v3924_v2 = vadd.f32 %v3923_v22, %v3835_v10  ;;  %v4017_v29 = vpop.f32.mrf.mxu3  ;;  %v6467_v10 = vld [vmem:[#allocation2 + $0xe8] sm:$0xf0] }
 0x36c   : > { %v8745_v3 = vadd.f32 %v4012_v46, %v3924_v2  ;;  %v3842_v46 = vadd.f32 %v8593_v40, %v8620_v1  ;;  %v6087_v2 = vor.u32 %v6467_v10, %v6086_v42  ;;  %v3847_v40 = vadd.f32 %v8615_v7, %v8640_v12  ;;  %v6473_v7 = vld [vmem:[#allocation2 + $0x118] sm:$0xf0] }
 0x371   : > { %v3925_v44 = vpop.f32.mrf.mxu2 }
 0x372   : > { %v8751_v39 = vadd.f32 %v3925_v44, %v3837_v27  ;;  %v8759_v15 = vpop.f32.mrf.mxu3 }
 0x376   : > { %4756 = vmatmul.bf16.gmra.mxu2 %v6075_v0 }
 0x379   : > { %v3928_v41 = vpop.f32.mrf.mxu2 }
 0x37a   : > { %v3929_v21 = vadd.f32 %v3928_v41, %v3840_v8  ;;  %v4022_v27 = vpop.f32.mrf.mxu3 }
 0x37c   : > { %v8755_v4 = vadd.f32 %v4017_v29, %v3929_v21  ;;  %v6099_v29 = vor.u32 %v6470_v18, %v6098_v19  ;;  %v6122_v18 = vld [vmem:[#allocation2 + $0x128] sm:$0xf] }
 0x381   : > { %v3930_v13 = vpop.f32.mrf.mxu2 }
 0x382   : > { %v8761_v22 = vadd.f32 %v3930_v13, %v3842_v46  ;;  %v6110_v46 = vld [vmem:[#allocation2 + $0x110] sm:$0xf] }
 0x383   : > { %v6111_v10 = vor.u32 %v6473_v7, %v6110_v46 }
 0x386   : > { %4761 = vmatmul.bf16.gmra.mxu2 %v6087_v2 }
 0x389   : > { %v3933_v43 = vpop.f32.mrf.mxu2 }
 0x38a   : > { %v3934_v55 = vadd.f32 %v3933_v43, %v3845_v26  ;;  %v4658_v43 = vpop.f32.mrf.mxu0 }
 0x38c   : > { %v8765_v44 = vadd.f32 %v4022_v27, %v3934_v55 }
 0x391   : > { %v3935_v1 = vpop.f32.mrf.mxu2 }
 0x392   : > { %v8769_v0 = vadd.f32 %v3935_v1, %v3847_v40 }
 0x396   : > { %4766 = vmatmul.bf16.gmra.mxu2 %v6099_v29 }
 0x399   : > { %v4727_v8 = vpop.f32.mrf.mxu2 }
 0x39a   : > { %v4728_v41 = vadd.f32 %v4727_v8, %v8646_v20  ;;  %v8782_v20 = vpop.f32.mrf.mxu1  ;;  %v4660_v8 = vpop.f32.mrf.mxu0 }
 0x39c   : > { %v4807_v23 = vadd.f32 %v4728_v41, %v8553_v63 }
 0x39e   : > { %v4843_v13 = vadd.f32 %v8776_v5, %v4807_v23 }
 0x3a0   : > { %v4875_v63 = vmax.f32 %v4843_v13, 0.0 }
 0x3a1   : > { %v4729_v21 = vpop.f32.mrf.mxu2 }
 0x3a2   : > { %v4730_v12 = vadd.f32 %v4729_v21, %v8656_v59  ;;  %v4571_v59 = vpop.f32.mrf.mxu1 }
 0x3a4   : > { %v4808_v42 = vadd.f32 %v4730_v12, %v8562_v51  ;;  %v6476_v51 = vld [vmem:[#allocation2 + $0x130] sm:$0xf0] }
 0x3a5   : > { %v6123_v21 = vor.u32 %v6476_v51, %v6122_v18 }
 0x3a6   : > { %v4844_v2 = vadd.f32 %v8776_v5, %v4808_v42  ;;  %4771 = vmatmul.bf16.gmra.mxu2 %v6111_v10 }
 0x3a8   : > { %v4876_v26 = vmax.f32 %v4844_v2, 0.0 }
 0x3a9   : > { %v4732_v55 = vpop.f32.mrf.mxu2 }
 0x3aa   : > { %v4907_v27 = vpack.c.bf16 %v4876_v26, %v4875_v63  ;;  %v4733_v40 = vadd.f32 %v4732_v55, %v8662_v30  ;;  %v4574_v42 = vpop.f32.mrf.mxu1  ;;  %v6134_v63 = vld [vmem:[#allocation2 + $0x140] sm:$0xf]  ;;  %v6479_v26 = vld [vmem:[#allocation2 + $0x148] sm:$0xf0] }
 0x3ac   : > { %v4809_v1 = vadd.f32 %v4733_v40, %v8573_v9  ;;  %4999 = vmatmul.bf16.vlgmr.msra.gmra.mxu3 %v4907_v27  ;;  %v6135_v40 = vor.u32 %v6479_v26, %v6134_v63 }
 0x3ae   : > { %v4845_v41 = vadd.f32 %v8776_v5, %v4809_v1 }
 0x3b0   : > { %v4877_v7 = vmax.f32 %v4845_v41, 0.0 }
 0x3b1   : > { %v4734_v19 = vpop.f32.mrf.mxu2 }
 0x3b2   : > { %v4735_v29 = vadd.f32 %v4734_v19, %v8672_v24  ;;  %v4663_v24 = vpop.f32.mrf.mxu0  ;;  %v4576_v1 = vpop.f32.mrf.mxu1 }
 0x3b4   : > { %v4810_v23 = vadd.f32 %v4735_v29, %v8582_v25 }
 0x3b6   : > { %v4846_v46 = vadd.f32 %v8776_v5, %v4810_v23  ;;  %4776 = vmatmul.bf16.gmra.mxu2 %v6123_v21  ;;  %v4656_v21 = vadd.f32 %v8721_v54, %v8735_v58 }
 0x3b8   : > { %v4878_v30 = vmax.f32 %v4846_v46, 0.0 }
 0x3b9   : > { %v4737_v12 = vpop.f32.mrf.mxu2 }
 0x3ba   : > { %v4738_v9 = vadd.f32 %v4737_v12, %v8677_v49  ;;  %v4908_v13 = vpack.c.bf16 %v4878_v30, %v4877_v7  ;;  %v4665_v49 = vpop.f32.mrf.mxu0  ;;  %v6146_v7 = vld [vmem:[#allocation2 + $0x158] sm:$0xf]  ;;  %v6482_v30 = vld [vmem:[#allocation2 + $0x160] sm:$0xf0] }
 0x3bc   : > { %v4811_v10 = vadd.f32 %v4738_v9, %v8591_v16  ;;  %5004 = vmatmul.bf16.gmra.mxu3 %v4908_v13 }
 0x3be   : > { %v4847_v55 = vadd.f32 %v8776_v5, %v4811_v10  ;;  %v6147_v10 = vor.u32 %v6482_v30, %v6146_v7 }
 0x3c0   : > { %v4879_v18 = vmax.f32 %v4847_v55, 0.0 }
 0x3c1   : > { %v4739_v2 = vpop.f32.mrf.mxu2 }
 0x3c2   : > { %v4740_v25 = vadd.f32 %v4739_v2, %v8687_v52  ;;  %v4579_v52 = vpop.f32.mrf.mxu1 }
 0x3c4   : > { %v4812_v27 = vadd.f32 %v4740_v25, %v8600_v31  ;;  %v4668_v31 = vpop.f32.mrf.mxu0  ;;  %v4659_v25 = vadd.f32 %v4658_v43, %v8782_v20 }
 0x3c6   : > { %v4848_v19 = vadd.f32 %v8776_v5, %v4812_v27  ;;  %4781 = vmatmul.bf16.gmra.mxu2 %v6135_v40  ;;  %v4661_v27 = vadd.f32 %v4660_v8, %v4571_v59 }
 0x3c8   : > { %v4880_v51 = vmax.f32 %v4848_v19, 0.0 }
 0x3c9   : > { %v4742_v16 = vpop.f32.mrf.mxu2 }
 0x3ca   : > { %v4743_v29 = vadd.f32 %v4742_v16, %v8691_v38  ;;  %v4909_v41 = vpack.c.bf16 %v4880_v51, %v4879_v18  ;;  %v4581_v63 = vpop.f32.mrf.mxu1  ;;  %v6158_v18 = vld [vmem:[#allocation2 + $0x170] sm:$0xf]  ;;  %v3970_v51 = vadd.f32 %v8617_v50, %v8635_v56  ;;  %v4666_v50 = vadd.f32 %v4665_v49, %v4576_v1 }
 0x3cc   : > { %v4813_v23 = vadd.f32 %v4743_v29, %v8611_v32  ;;  %5009 = vmatmul.bf16.gmra.mxu3 %v4909_v41  ;;  %v4670_v58 = vpop.f32.mrf.mxu0 }
 0x3ce   : > { %v4849_v9 = vadd.f32 %v8776_v5, %v4813_v23 }
 0x3d0   : > { %v4881_v2 = vmax.f32 %v4849_v9, 0.0 }
 0x3d1   : > { %v4744_v46 = vpop.f32.mrf.mxu2 }
 0x3d2   : > { %v4745_v12 = vadd.f32 %v4744_v46, %v4656_v21  ;;  %v4584_v29 = vpop.f32.mrf.mxu1 }
 0x3d4   : > { %v4814_v13 = vadd.f32 %v4745_v12, %v8622_v6  ;;  %v6485_v6 = vld [vmem:[#allocation2 + $0x178] sm:$0xf0]  ;;  %v4673_v20 = vpop.f32.mrf.mxu0 }
 0x3d5   : > { %v6159_v21 = vor.u32 %v6485_v6, %v6158_v18  ;;  %v6182_v18 = vld [vmem:[#allocation2 + $0x1a0] sm:$0xf]  ;;  %v6491_v6 = vld [vmem:[#allocation2 + $0x1a8] sm:$0xf0] }
 0x3d6   : > { %v4850_v38 = vadd.f32 %v8776_v5, %v4814_v13  ;;  %4786 = vmatmul.bf16.gmra.mxu2 %v6147_v10  ;;  %v6170_v10 = vld [vmem:[#allocation2 + $0x188] sm:$0xf] }
 0x3d8   : > { %v4882_v32 = vmax.f32 %v4850_v38, 0.0  ;;  %v6488_v38 = vld [vmem:[#allocation2 + $0x190] sm:$0xf0] }
 0x3d9   : > { %v4747_v26 = vpop.f32.mrf.mxu2 }
 0x3da   : > { %v4910_v54 = vpack.c.bf16 %v4882_v32, %v4881_v2  ;;  %v4748_v55 = vadd.f32 %v4747_v26, %v4659_v25  ;;  %v4586_v12 = vpop.f32.mrf.mxu1  ;;  %v3975_v2 = vadd.f32 %v8637_v11, %v8652_v33  ;;  %v4671_v11 = vadd.f32 %v4670_v58, %v4581_v63  ;;  %v9170_v33 = vld [vmem:[#allocation28_spill] sm:$0xff] }
 0x3db   : > { %v4674_v63 = vadd.f32 %v4673_v20, %v4584_v29 }
 0x3dc   : > { %5014 = vmatmul.bf16.gmra.mxu3 %v4910_v54  ;;  %v4815_v40 = vadd.f32 %v4748_v55, %v8631_v53  ;;  %v4664_v53 = vadd.f32 %v4663_v24, %v4574_v42  ;;  %v4675_v9 = vpop.f32.mrf.mxu0  ;;  %v6171_v54 = vor.u32 %v6488_v38, %v6170_v10 }
 0x3dd   : > { %v4676_v38 = vadd.f32 %v4675_v9, %v4586_v12 }
 0x3de   : > { %v4851_v41 = vadd.f32 %v8776_v5, %v4815_v40 }
 0x3e0   : > { %v4883_v46 = vmax.f32 %v4851_v41, 0.0 }
 0x3e1   : > { %v4749_v19 = vpop.f32.mrf.mxu2 }
 0x3e2   : > { %v4750_v16 = vadd.f32 %v4749_v19, %v4661_v27  ;;  %v4589_v24 = vpop.f32.mrf.mxu1 }
 0x3e4   : > { %v4816_v23 = vadd.f32 %v4750_v16, %v3970_v51  ;;  %v4678_v1 = vpop.f32.mrf.mxu0 }
 0x3e6   : > { %v4852_v43 = vadd.f32 %v8776_v5, %v4816_v23  ;;  %4791 = vmatmul.bf16.gmra.mxu2 %v6159_v21  ;;  %v9171_v23 = vld [vmem:[#allocation36_spill] sm:$0xff] }
 0x3e7   : > { %v9172_v21 = vld [vmem:[#allocation24_spill] sm:$0xff] }
 0x3e8   : > { %v4884_v59 = vmax.f32 %v4852_v43, 0.0  ;;  %v3980_v43 = vadd.f32 %v9172_v21, %v9171_v23 }
 0x3e9   : > { %v4752_v8 = vpop.f32.mrf.mxu2 }
 0x3ea   : > { %v4911_v7 = vpack.c.bf16 %v4884_v59, %v4883_v46  ;;  %v4753_v30 = vadd.f32 %v4752_v8, %v4664_v53  ;;  %v4591_v16 = vpop.f32.mrf.mxu1  ;;  %v6183_v59 = vor.u32 %v6491_v6, %v6182_v18  ;;  %v4679_v18 = vadd.f32 %v4678_v1, %v4589_v24  ;;  %v8829_v24 = vpop.f32.mrf.mxu3 }
 0x3ec   : > { %5019 = vmatmul.bf16.gmra.mxu3 %v4911_v7  ;;  %v4817_v56 = vadd.f32 %v4753_v30, %v8648_v61  ;;  %v4669_v61 = vadd.f32 %v4668_v31, %v4579_v52  ;;  %v4680_v8 = vpop.f32.mrf.mxu0 }
 0x3ee   : > { %v4853_v26 = vadd.f32 %v8776_v5, %v4817_v56 }
 0x3f0   : > { %v4885_v55 = vmax.f32 %v4853_v26, 0.0 }
 0x3f1   : > { %v4754_v13 = vpop.f32.mrf.mxu2 }
 0x3f2   : > { %v4755_v32 = vadd.f32 %v4754_v13, %v4666_v50  ;;  %v4594_v56 = vpop.f32.mrf.mxu1 }
 0x3f4   : > { %v4818_v25 = vadd.f32 %v4755_v32, %v3975_v2  ;;  %v4683_v10 = vpop.f32.mrf.mxu0  ;;  %v9173_v2 = vld [vmem:[#allocation25_spill] sm:$0xff] }
 0x3f6   : > { %v4854_v42 = vadd.f32 %v8776_v5, %v4818_v25  ;;  %4796 = vmatmul.bf16.gmra.mxu2 %v6171_v54  ;;  %v9174_v25 = vld [vmem:[#allocation29_spill] sm:$0xff] }
 0x3f7   : > { %v3985_v54 = vadd.f32 %v9174_v25, %v8683_v36 }
 0x3f8   : > { %v4886_v27 = vmax.f32 %v4854_v42, 0.0 }
 0x3f9   : > { %v4757_v49 = vpop.f32.mrf.mxu2 }
 0x3fa   : > { %v4912_v40 = vpack.c.bf16 %v4886_v27, %v4885_v55  ;;  %v4758_v19 = vadd.f32 %v4757_v49, %v4669_v61  ;;  %v4596_v49 = vpop.f32.mrf.mxu1 }
 0x3fc   : > { %5024 = vmatmul.bf16.gmra.mxu3 %v4912_v40  ;;  %v4819_v51 = vadd.f32 %v4758_v19, %v9170_v33  ;;  %v4685_v29 = vpop.f32.mrf.mxu0 }
 0x3fe   : > { %v4855_v53 = vadd.f32 %v8776_v5, %v4819_v51 }
 0x400   : > { %v4887_v31 = vmax.f32 %v4855_v53, 0.0 }
 0x401   : > { %v4759_v41 = vpop.f32.mrf.mxu2 }
 0x402   : > { %v4760_v46 = vadd.f32 %v4759_v41, %v4671_v11  ;;  %v4599_v9 = vpop.f32.mrf.mxu1  ;;  %v4681_v11 = vadd.f32 %v4680_v8, %v4591_v16  ;;  %v9175_v41 = vld [vmem:[#allocation30_spill] sm:$0xff]  ;;  %v4684_v8 = vadd.f32 %v4683_v10, %v4594_v56 }
 0x403   : > { %v3990_v23 = vadd.f32 %v9175_v41, %v8697_v37  ;;  %v4686_v37 = vadd.f32 %v4685_v29, %v4596_v49 }
 0x404   : > { %v4820_v7 = vadd.f32 %v4760_v46, %v3980_v43  ;;  %v4688_v36 = vpop.f32.mrf.mxu0 }
 0x406   : > { %v4856_v52 = vadd.f32 %v8776_v5, %v4820_v7  ;;  %4801 = vmatmul.bf16.gmra.mxu2 %v6183_v59 }
 0x408   : > { %v4888_v30 = vmax.f32 %v4856_v52, 0.0 }
 0x409   : > { %v4762_v50 = vpop.f32.mrf.mxu2 }
 0x40a   : > { %v4913_v58 = vpack.c.bf16 %v4888_v30, %v4887_v31  ;;  %v4763_v13 = vadd.f32 %v4762_v50, %v4674_v63  ;;  %v4601_v7 = vpop.f32.mrf.mxu1  ;;  %v8835_v63 = vld [vmem:[%s8985_s7] ss:$0 sm:$0xff] }
 0x40c   : > { %5029 = vmatmul.bf16.gmra.mxu3 %v4913_v58  ;;  %v4821_v32 = vadd.f32 %v4763_v13, %v9173_v2  ;;  %v4690_v52 = vpop.f32.mrf.mxu0  ;;  %v462_v58 = vld [vmem:[%s7192_s14] sm:$0xff]   ;;  %v9177_v2 = vld [vmem:[#allocation38_spill] sm:$0xff] }
 0x40e   : > { %v4857_v55 = vadd.f32 %v8776_v5, %v4821_v32 }
 0x410   : > { %v4889_v20 = vmax.f32 %v4857_v55, 0.0 }
 0x411   : > { %v4764_v26 = vpop.f32.mrf.mxu2 }
 0x412   : > { %v4765_v42 = vadd.f32 %v4764_v26, %v4676_v38  ;;  %v9176_v38 = vld [vmem:[#allocation31_spill] sm:$0xff]  ;;  %v4604_v56 = vpop.f32.mrf.mxu1 }
 0x413   : > { %v3995_v32 = vadd.f32 %v9177_v2, %v9176_v38 }
 0x414   : > { %v4822_v27 = vadd.f32 %v4765_v42, %v3985_v54  ;;  %v5080_v54 = vunpack.c.l.bf16 %v462_v58  ;;  %v4693_v55 = vpop.f32.mrf.mxu0 }
 0x416   : > { %v4858_v61 = vadd.f32 %v8776_v5, %v4822_v27  ;;  %v5081_v27 = vunpack.c.h.bf16 %v462_v58 }
 0x418   : > { %v4890_v40 = vmax.f32 %v4858_v61, 0.0 }
 0x419   : > { %v4767_v19 = vpop.f32.mrf.mxu2 }
 0x41a   : > { %v4914_v6 = vpack.c.bf16 %v4890_v40, %v4889_v20  ;;  %v4768_v12 = vadd.f32 %v4767_v19, %v4679_v18  ;;  %v4689_v18 = vadd.f32 %v4688_v36, %v4599_v9  ;;  %v4606_v41 = vpop.f32.mrf.mxu1  ;;  %v9178_v36 = vld [vmem:[#allocation26_spill] sm:$0xff] }
 0x41c   : > { %5034 = vmatmul.bf16.gmra.mxu3 %v4914_v6  ;;  %v4823_v33 = vadd.f32 %v4768_v12, %v8693_v60 }
 0x41e   : > { %v4859_v43 = vadd.f32 %v8776_v5, %v4823_v33 }
 0x420   : > { %v4891_v1 = vmax.f32 %v4859_v43, 0.0 }
 0x421   : > { %v4769_v51 = vpop.f32.mrf.mxu2 }
 0x422   : > { %v4770_v21 = vadd.f32 %v4769_v51, %v4681_v11 }
 0x424   : > { %v4824_v46 = vadd.f32 %v4770_v21, %v3990_v23  ;;  %v4695_v21 = vpop.f32.mrf.mxu0 }
 0x426   : > { %v4860_v59 = vadd.f32 %v8776_v5, %v4824_v46  ;;  %v4691_v46 = vadd.f32 %v4690_v52, %v4601_v7 }
 0x428   : > { %v4892_v53 = vmax.f32 %v4860_v59, 0.0 }
 0x429   : > { %v4772_v16 = vpop.f32.mrf.mxu2 }
 0x42a   : > { %v4915_v60 = vpack.c.bf16 %v4892_v53, %v4891_v1  ;;  %v4773_v31 = vadd.f32 %v4772_v16, %v4684_v8  ;;  %v464_v1 = vld [vmem:[%s7192_s14 + $0x8] sm:$0xff]   ;;  %v4000_v53 = vadd.f32 %v9178_v36, %v8717_v45 }
 0x42b   : > { %v5083_v52 = vunpack.c.h.bf16 %v464_v1 }
 0x42c   : > { %5039 = vmatmul.bf16.gmra.mxu3 %v4915_v60  ;;  %v4825_v50 = vadd.f32 %v4773_v31, %v8703_v47  ;;  %v5082_v31 = vunpack.c.l.bf16 %v464_v1  ;;  %v4698_v45 = vpop.f32.mrf.mxu0 }
 0x42e   : > { %v4861_v10 = vadd.f32 %v8776_v5, %v4825_v50 }
 0x42f   : > { %v5000_v30 = vpop.f32.mrf.mxu3 }
 0x430   : > { %v5001_v25 = vadd.f32 %v8835_v63, %v5000_v30  ;;  %v4893_v61 = vmax.f32 %v4861_v10, 0.0 }
 0x431   : > { %v4774_v13 = vpop.f32.mrf.mxu2 }
 0x432   : > { %v4775_v26 = vadd.f32 %v4774_v13, %v4686_v37  ;;  %v5112_v29 = vadd.f32 %v5080_v54, %v5001_v25  ;;  %v4609_v37 = vpop.f32.mrf.mxu1 }
 0x434   : > { %v4826_v42 = vadd.f32 %v4775_v26, %v3995_v32  ;;  %v5144_v11 = vmax.f32 %v5112_v29, 0.0  ;;  %v4694_v32 = vadd.f32 %v4693_v55, %v4604_v56  ;;  %v4700_v56 = vpop.f32.mrf.mxu0 }
 0x436   : > { %v4862_v47 = vadd.f32 %v8776_v5, %v4826_v42 }
 0x437   : > { %v5002_v49 = vpop.f32.mrf.mxu3 }
 0x438   : > { %v4894_v20 = vmax.f32 %v4862_v47, 0.0  ;;  %v5003_v40 = vadd.f32 %v8835_v63, %v5002_v49  ;;  %v4696_v49 = vadd.f32 %v4695_v21, %v4606_v41 }
 0x439   : > { %v4777_v19 = vpop.f32.mrf.mxu2 }
 0x43a   : > { %v5113_v6 = vadd.f32 %v5081_v27, %v5003_v40  ;;  %v4916_v12 = vpack.c.bf16 %v4894_v20, %v4893_v61  ;;  %v4778_v51 = vadd.f32 %v4777_v19, %v4689_v18  ;;  %v4611_v29 = vpop.f32.mrf.mxu1  ;;  %v466_v20 = vld [vmem:[%s7192_s14 + $0x10] sm:$0xff]   ;;  %v4005_v19 = vadd.f32 %v8719_v48, %v8729_v62 }
 0x43b   : > { %v4699_v62 = vadd.f32 %v4698_v45, %v4609_v37 }
 0x43c   : > { %v5145_v33 = vmax.f32 %v5113_v6, 0.0  ;;  %5044 = vmatmul.bf16.gmra.mxu3 %v4916_v12  ;;  %v4827_v59 = vadd.f32 %v4778_v51, %v8713_v57  ;;  %v5084_v12 = vunpack.c.l.bf16 %v466_v20  ;;  %v5085_v51 = vunpack.c.h.bf16 %v466_v20 }
 0x43e   : > { %v6528_v23 = vpack.c.bf16 %v5145_v33, %v5144_v11  ;;  %v4863_v8 = vadd.f32 %v8776_v5, %v4827_v59 }
 0x43f   : > { %v5005_v43 = vpop.f32.mrf.mxu3 }
 0x440   : > { %6529 = vst [vmem:[%s8846_s15] sm:$0xff] %v6528_v23   ;;  %v5006_v60 = vadd.f32 %v8835_v63, %v5005_v43  ;;  %v4895_v58 = vmax.f32 %v4863_v8, 0.0 }
 0x441   : > { %v4779_v9 = vpop.f32.mrf.mxu2 }
 0x442   : > { %v4780_v16 = vadd.f32 %v4779_v9, %v4691_v46  ;;  %v5114_v57 = vadd.f32 %v5082_v31, %v5006_v60  ;;  %v4614_v1 = vpop.f32.mrf.mxu1  ;;  %v4701_v31 = vadd.f32 %v4700_v56, %v4611_v29 }
 0x444   : > { %v4828_v30 = vadd.f32 %v4780_v16, %v4000_v53  ;;  %v5146_v25 = vmax.f32 %v5114_v57, 0.0  ;;  %v4703_v16 = vpop.f32.mrf.mxu0 }
 0x446   : > { %v4864_v7 = vadd.f32 %v8776_v5, %v4828_v30 }
 0x447   : > { %v5007_v50 = vpop.f32.mrf.mxu3 }
 0x448   : > { %v4896_v13 = vmax.f32 %v4864_v7, 0.0  ;;  %v5008_v38 = vadd.f32 %v8835_v63, %v5007_v50  ;;  %v468_v7 = vld [vmem:[%s7192_s14 + $0x18] sm:$0xff]   ;;  %v4010_v50 = vadd.f32 %v8733_v35, %v8741_v17  ;;  %v4704_v17 = vadd.f32 %v4703_v16, %v4614_v1 }
 0x449   : > { %v4782_v2 = vpop.f32.mrf.mxu2 }
 0x44a   : > { %v5115_v26 = vadd.f32 %v5083_v52, %v5008_v38  ;;  %v4917_v10 = vpack.c.bf16 %v4896_v13, %v4895_v58  ;;  %v4783_v42 = vadd.f32 %v4782_v2, %v4694_v32  ;;  %v5086_v13 = vunpack.c.l.bf16 %v468_v7  ;;  %v4616_v45 = vpop.f32.mrf.mxu1 }
 0x44b   : > { %v5087_v32 = vunpack.c.h.bf16 %v468_v7 }
 0x44c   : > { %v5147_v54 = vmax.f32 %v5115_v26, 0.0  ;;  %5049 = vmatmul.bf16.gmra.mxu3 %v4917_v10  ;;  %v4829_v61 = vadd.f32 %v4783_v42, %v8725_v34  ;;  %v4705_v26 = vpop.f32.mrf.mxu0 }
 0x44e   : > { %v6533_v47 = vpack.c.bf16 %v5147_v54, %v5146_v25  ;;  %v4865_v55 = vadd.f32 %v8776_v5, %v4829_v61 }
 0x44f   : > { %v5010_v27 = vpop.f32.mrf.mxu3 }
 0x450   : > { %6605 = vst [vmem:[%s8846_s15 + $0x8] sm:$0xff] %v6533_v47   ;;  %v5011_v6 = vadd.f32 %v8835_v63, %v5010_v27  ;;  %v4897_v23 = vmax.f32 %v4865_v55, 0.0 }
 0x451   : > { %v4784_v40 = vpop.f32.mrf.mxu2 }
 0x452   : > { %v4785_v18 = vadd.f32 %v4784_v40, %v4696_v49  ;;  %v5116_v34 = vadd.f32 %v5084_v12, %v5011_v6  ;;  %v4619_v40 = vpop.f32.mrf.mxu1  ;;  %v470_v6 = vld [vmem:[%s7192_s14 + $0x20] sm:$0xff]  }
 0x454   : > { %v4830_v11 = vadd.f32 %v4785_v18, %v4005_v19  ;;  %v5148_v9 = vmax.f32 %v5116_v34, 0.0  ;;  %v4706_v18 = vadd.f32 %v4705_v26, %v4616_v45  ;;  %v4708_v55 = vpop.f32.mrf.mxu0 }
 0x456   : > { %v4866_v33 = vadd.f32 %v8776_v5, %v4830_v11  ;;  %v4015_v11 = vadd.f32 %v8747_v28, %v8751_v39  ;;  %v4709_v39 = vadd.f32 %v4708_v55, %v4619_v40  ;;  %v474_v55 = vld [vmem:[%s7192_s14 + $0x30] sm:$0xff]  }
 0x457   : > { %v5012_v41 = vpop.f32.mrf.mxu3 }
 0x458   : > { %v4898_v21 = vmax.f32 %v4866_v33, 0.0  ;;  %v5013_v43 = vadd.f32 %v8835_v63, %v5012_v41 }
 0x459   : > { %v4787_v48 = vpop.f32.mrf.mxu2 }
 0x45a   : > { %v5117_v46 = vadd.f32 %v5085_v51, %v5013_v43  ;;  %v4918_v59 = vpack.c.bf16 %v4898_v21, %v4897_v23  ;;  %v4788_v53 = vadd.f32 %v4787_v48, %v4699_v62  ;;  %v5088_v23 = vunpack.c.l.bf16 %v470_v6  ;;  %v4621_v1 = vpop.f32.mrf.mxu1 }
 0x45b   : > { %v5089_v43 = vunpack.c.h.bf16 %v470_v6 }
 0x45c   : > { %v5149_v36 = vmax.f32 %v5117_v46, 0.0  ;;  %5054 = vmatmul.bf16.gmra.mxu3 %v4918_v59  ;;  %v4831_v30 = vadd.f32 %v4788_v53, %v8737_v14  ;;  %v4710_v53 = vpop.f32.mrf.mxu0 }
 0x45d   : > { %v4711_v7 = vadd.f32 %v4710_v53, %v4621_v1 }
 0x45e   : > { %v6538_v8 = vpack.c.bf16 %v5149_v36, %v5148_v9  ;;  %v4867_v58 = vadd.f32 %v8776_v5, %v4831_v30 }
 0x45f   : > { %v5015_v60 = vpop.f32.mrf.mxu3 }
 0x460   : > { %6606 = vst [vmem:[%s8846_s15 + $0x10] sm:$0xff] %v6538_v8   ;;  %v5016_v57 = vadd.f32 %v8835_v63, %v5015_v60  ;;  %v4899_v25 = vmax.f32 %v4867_v58, 0.0  ;;  %v4020_v58 = vadd.f32 %v8759_v15, %v8761_v22 }
 0x461   : > { %v4789_v52 = vpop.f32.mrf.mxu2 }
 0x462   : > { %v4790_v37 = vadd.f32 %v4789_v52, %v4701_v31  ;;  %v5118_v14 = vadd.f32 %v5086_v13, %v5016_v57  ;;  %v4624_v13 = vpop.f32.mrf.mxu1 }
 0x464   : > { %v4832_v38 = vadd.f32 %v4790_v37, %v4010_v50  ;;  %v5150_v49 = vmax.f32 %v5118_v14, 0.0  ;;  %v472_v50 = vld [vmem:[%s7192_s14 + $0x28] sm:$0xff]  }
 0x466   : > { %v4868_v2 = vadd.f32 %v8776_v5, %v4832_v38  ;;  %v4713_v38 = vpop.f32.mrf.mxu0 }
 0x467   : > { %v5017_v10 = vpop.f32.mrf.mxu3  ;;  %v4714_v22 = vadd.f32 %v4713_v38, %v4624_v13 }
 0x468   : > { %v4900_v54 = vmax.f32 %v4868_v2, 0.0  ;;  %v5018_v42 = vadd.f32 %v8835_v63, %v5017_v10 }
 0x469   : > { %v4792_v35 = vpop.f32.mrf.mxu2 }
 0x46a   : > { %v5119_v47 = vadd.f32 %v5087_v32, %v5018_v42  ;;  %v4919_v27 = vpack.c.bf16 %v4900_v54, %v4899_v25  ;;  %v4793_v29 = vadd.f32 %v4792_v35, %v4704_v17  ;;  %v5090_v32 = vunpack.c.l.bf16 %v472_v50 }
 0x46b   : > { %v5091_v25 = vunpack.c.h.bf16 %v472_v50  ;;  %v478_v50 = vld [vmem:[%s7192_s14 + $0x40] sm:$0xff]  }
 0x46c   : > { %v5151_v61 = vmax.f32 %v5119_v47, 0.0  ;;  %5059 = vmatmul.bf16.gmra.mxu3 %v4919_v27  ;;  %v4833_v56 = vadd.f32 %v4793_v29, %v8745_v3  ;;  %v4626_v29 = vpop.f32.mrf.mxu1 }
 0x46e   : > { %v6543_v20 = vpack.c.bf16 %v5151_v61, %v5150_v49  ;;  %v4869_v51 = vadd.f32 %v8776_v5, %v4833_v56 }
 0x46f   : > { %v5020_v19 = vpop.f32.mrf.mxu3 }
 0x470   : > { %6607 = vst [vmem:[%s8846_s15 + $0x18] sm:$0xff] %v6543_v20   ;;  %v5021_v41 = vadd.f32 %v8835_v63, %v5020_v19  ;;  %v4901_v62 = vmax.f32 %v4869_v51, 0.0  ;;  %v4715_v20 = vpop.f32.mrf.mxu0 }
 0x471   : > { %v4794_v12 = vpop.f32.mrf.mxu2 }
 0x472   : > { %v4795_v33 = vadd.f32 %v4794_v12, %v4706_v18  ;;  %v5120_v46 = vadd.f32 %v5088_v23, %v5021_v41  ;;  %v4716_v18 = vadd.f32 %v4715_v20, %v4626_v29  ;;  %v4025_v12 = vadd.f32 %v8829_v24, %v8769_v0  ;;  %v482_v29 = vld [vmem:[%s7192_s14 + $0x50] sm:$0xff]  }
 0x473   : > { %v5092_v41 = vunpack.c.l.bf16 %v474_v55 }
 0x474   : > { %v4834_v34 = vadd.f32 %v4795_v33, %v4015_v11  ;;  %v5152_v16 = vmax.f32 %v5120_v46, 0.0 }
 0x476   : > { %v4870_v21 = vadd.f32 %v8776_v5, %v4834_v34 }
 0x477   : > { %v5022_v48 = vpop.f32.mrf.mxu3 }
 0x478   : > { %v4902_v3 = vmax.f32 %v4870_v21, 0.0  ;;  %v5023_v59 = vadd.f32 %v8835_v63, %v5022_v48  ;;  %v5093_v21 = vunpack.c.h.bf16 %v474_v55 }
 0x479   : > { %v4797_v28 = vpop.f32.mrf.mxu2 }
 0x47a   : > { %v5121_v9 = vadd.f32 %v5089_v43, %v5023_v59  ;;  %v4920_v36 = vpack.c.bf16 %v4902_v3, %v4901_v62  ;;  %v4798_v60 = vadd.f32 %v4797_v28, %v4709_v39  ;;  %v476_v39 = vld [vmem:[%s7192_s14 + $0x38] sm:$0xff]  }
 0x47c   : > { %v5153_v8 = vmax.f32 %v5121_v9, 0.0  ;;  %5064 = vmatmul.bf16.gmra.mxu3 %v4920_v36  ;;  %v4835_v52 = vadd.f32 %v4798_v60, %v8755_v4  ;;  %v5094_v9 = vunpack.c.l.bf16 %v476_v39  ;;  %v5095_v36 = vunpack.c.h.bf16 %v476_v39 }
 0x47e   : > { %v6548_v31 = vpack.c.bf16 %v5153_v8, %v5152_v16  ;;  %v4871_v45 = vadd.f32 %v8776_v5, %v4835_v52 }
 0x47f   : > { %v5025_v30 = vpop.f32.mrf.mxu3 }
 0x480   : > { %6608 = vst [vmem:[%s8846_s15 + $0x20] sm:$0xff] %v6548_v31   ;;  %v5026_v2 = vadd.f32 %v8835_v63, %v5025_v30  ;;  %v4903_v54 = vmax.f32 %v4871_v45, 0.0 }
 0x481   : > { %v4799_v37 = vpop.f32.mrf.mxu2 }
 0x482   : > { %v4800_v57 = vadd.f32 %v4799_v37, %v4711_v7  ;;  %v5122_v4 = vadd.f32 %v5090_v32, %v5026_v2 }
 0x484   : > { %v4836_v26 = vadd.f32 %v4800_v57, %v4020_v58  ;;  %v5154_v27 = vmax.f32 %v5122_v4, 0.0  ;;  %v5096_v58 = vunpack.c.l.bf16 %v478_v50  ;;  %v5097_v57 = vunpack.c.h.bf16 %v478_v50 }
 0x486   : > { %v4872_v10 = vadd.f32 %v8776_v5, %v4836_v26 }
 0x487   : > { %v5027_v14 = vpop.f32.mrf.mxu3 }
 0x488   : > { %v4904_v42 = vmax.f32 %v4872_v10, 0.0  ;;  %v5028_v35 = vadd.f32 %v8835_v63, %v5027_v14  ;;  %v480_v14 = vld [vmem:[%s7192_s14 + $0x48] sm:$0xff]  }
 0x489   : > { %v4802_v15 = vpop.f32.mrf.mxu2  ;;  %v5098_v4 = vunpack.c.l.bf16 %v480_v14 }
 0x48a   : > { %v5123_v17 = vadd.f32 %v5091_v25, %v5028_v35  ;;  %v4921_v47 = vpack.c.bf16 %v4904_v42, %v4903_v54  ;;  %v4803_v61 = vadd.f32 %v4802_v15, %v4714_v22  ;;  %v5099_v42 = vunpack.c.h.bf16 %v480_v14 }
 0x48c   : > { %v5155_v49 = vmax.f32 %v5123_v17, 0.0  ;;  %5069 = vmatmul.bf16.gmra.mxu3 %v4921_v47  ;;  %v4837_v56 = vadd.f32 %v4803_v61, %v8765_v44 }
 0x48e   : > { %v6553_v40 = vpack.c.bf16 %v5155_v49, %v5154_v27  ;;  %v4873_v33 = vadd.f32 %v8776_v5, %v4837_v56 }
 0x48f   : > { %v5030_v19 = vpop.f32.mrf.mxu3 }
 0x490   : > { %6609 = vst [vmem:[%s8846_s15 + $0x28] sm:$0xff] %v6553_v40   ;;  %v5031_v51 = vadd.f32 %v8835_v63, %v5030_v19  ;;  %v4905_v48 = vmax.f32 %v4873_v33, 0.0  ;;  %v5100_v40 = vunpack.c.l.bf16 %v482_v29  ;;  %v5101_v19 = vunpack.c.h.bf16 %v482_v29 }
 0x491   : > { %v4804_v6 = vpop.f32.mrf.mxu2 }
 0x492   : > { %v4805_v11 = vadd.f32 %v4804_v6, %v4716_v18  ;;  %v5124_v44 = vadd.f32 %v5092_v41, %v5031_v51  ;;  %v484_v41 = vld [vmem:[%s7192_s14 + $0x58] sm:$0xff]  }
 0x494   : > { %v4838_v23 = vadd.f32 %v4805_v11, %v4025_v12  ;;  %v5156_v24 = vmax.f32 %v5124_v44, 0.0 }
 0x496   : > { %v4874_v34 = vadd.f32 %v8776_v5, %v4838_v23 }
 0x497   : > { %v5032_v43 = vpop.f32.mrf.mxu3 }
 0x498   : > { %v4906_v62 = vmax.f32 %v4874_v34, 0.0  ;;  %v5033_v46 = vadd.f32 %v8835_v63, %v5032_v43  ;;  %v5102_v34 = vunpack.c.l.bf16 %v484_v41 }
 0x49a   : > { %v5125_v3 = vadd.f32 %v5093_v21, %v5033_v46  ;;  %v4922_v0 = vpack.c.bf16 %v4906_v62, %v4905_v48  ;;  %v5103_v21 = vunpack.c.h.bf16 %v484_v41 }
 0x49c   : > { %v5157_v59 = vmax.f32 %v5125_v3, 0.0  ;;  %5074 = vmatmul.bf16.gmra.mxu3 %v4922_v0 }
 0x49e   : > { %v6558_v1 = vpack.c.bf16 %v5157_v59, %v5156_v24  ;;  %v486_v59 = vld [vmem:[%s7192_s14 + $0x60] sm:$0xff]  }
 0x49f   : > { %v5035_v28 = vpop.f32.mrf.mxu3  ;;  %v5105_v39 = vunpack.c.h.bf16 %v486_v59 }
 0x4a0   : > { %6610 = vst [vmem:[%s8846_s15 + $0x30] sm:$0xff] %v6558_v1   ;;  %v5036_v5 = vadd.f32 %v8835_v63, %v5035_v28  ;;  %v5104_v28 = vunpack.c.l.bf16 %v486_v59 }
 0x4a2   : > { %v5126_v16 = vadd.f32 %v5094_v9, %v5036_v5 }
 0x4a4   : > { %v5158_v31 = vmax.f32 %v5126_v16, 0.0 }
 0x4a7   : > { %v5037_v53 = vpop.f32.mrf.mxu3 }
 0x4a8   : > { %v5038_v8 = vadd.f32 %v8835_v63, %v5037_v53 }
 0x4aa   : > { %v5127_v60 = vadd.f32 %v5095_v36, %v5038_v8 }
 0x4ac   : > { %v5159_v30 = vmax.f32 %v5127_v60, 0.0 }
 0x4ae   : > { %v6563_v7 = vpack.c.bf16 %v5159_v30, %v5158_v31  ;;  %v488_v30 = vld [vmem:[%s7192_s14 + $0x68] sm:$0xff]  }
 0x4af   : > { %v5040_v52 = vpop.f32.mrf.mxu3  ;;  %v5107_v50 = vunpack.c.h.bf16 %v488_v30 }
 0x4b0   : > { %6611 = vst [vmem:[%s8846_s15 + $0x38] sm:$0xff] %v6563_v7   ;;  %v5041_v37 = vadd.f32 %v8835_v63, %v5040_v52  ;;  %v5106_v52 = vunpack.c.l.bf16 %v488_v30 }
 0x4b2   : > { %v5128_v38 = vadd.f32 %v5096_v58, %v5041_v37 }
 0x4b4   : > { %v5160_v32 = vmax.f32 %v5128_v38, 0.0 }
 0x4b7   : > { %v5042_v13 = vpop.f32.mrf.mxu3 }
 0x4b8   : > { %v5043_v45 = vadd.f32 %v8835_v63, %v5042_v13 }
 0x4ba   : > { %v5129_v2 = vadd.f32 %v5097_v57, %v5043_v45 }
 0x4bc   : > { %v5161_v26 = vmax.f32 %v5129_v2, 0.0 }
 0x4be   : > { %v6568_v10 = vpack.c.bf16 %v5161_v26, %v5160_v32  ;;  %v490_v26 = vld [vmem:[%s7192_s14 + $0x70] sm:$0xff]  }
 0x4bf   : > { %v5045_v25 = vpop.f32.mrf.mxu3  ;;  %v5109_v14 = vunpack.c.h.bf16 %v490_v26 }
 0x4c0   : > { %6612 = vst [vmem:[%s8846_s15 + $0x40] sm:$0xff] %v6568_v10   ;;  %v5046_v54 = vadd.f32 %v8835_v63, %v5045_v25  ;;  %v5108_v25 = vunpack.c.l.bf16 %v490_v26 }
 0x4c2   : > { %v5130_v15 = vadd.f32 %v5098_v4, %v5046_v54 }
 0x4c4   : > { %v5162_v47 = vmax.f32 %v5130_v15, 0.0 }
 0x4c7   : > { %v5047_v35 = vpop.f32.mrf.mxu3 }
 0x4c8   : > { %v5048_v22 = vadd.f32 %v8835_v63, %v5047_v35 }
 0x4ca   : > { %v5131_v17 = vadd.f32 %v5099_v42, %v5048_v22 }
 0x4cc   : > { %v5163_v27 = vmax.f32 %v5131_v17, 0.0 }
 0x4ce   : > { %v6573_v49 = vpack.c.bf16 %v5163_v27, %v5162_v47  ;;  %v492_v27 = vld [vmem:[%s7192_s14 + $0x78] sm:$0xff]   ;;  %s6918_s14 = sshra.s32 %s5259_s17, 4  ;;  %s6919_s14 = int_to_ptr.hbm [resolvable:$true] %s6918_s14 }
 0x4cf   : > { %v5050_v61 = vpop.f32.mrf.mxu3  ;;  %v5111_v29 = vunpack.c.h.bf16 %v492_v27  ;;  %s6920_s24 = scalar_lea.hbm %s6919_s14, 128  ;;  %p6925_p10 = scmp.lt.s32.totalorder %s6919_s14, %s8986_s8 }
 0x4d0   : > { %6613 = vst [vmem:[%s8846_s15 + $0x48] sm:$0xff] %v6573_v49   ;;  %v5051_v20 = vadd.f32 %v8835_v63, %v5050_v61  ;;  %v5110_v61 = vunpack.c.l.bf16 %v492_v27  ;;  %p6921_p1 = scmp.ne.s32.totalorder %s6919_s14, %s6920_s24  ;;  %p6926_p12 = scmp.lt.s32.totalorder %s6924_s21, %s6920_s24 }
 0x4d2   : > { %v5132_v56 = vadd.f32 %v5100_v40, %v5051_v20  ;;  %p6922_p4 = pnand %p6921_p1, %p7155_p5  ;;  %p6927_p13 = por %p6926_p12, %p6925_p10 }
 0x4d4   : > { %v5164_v12 = vmax.f32 %v5132_v56, 0.0  ;;  %p6923_p8 = pneg %p6922_p4 }
 0x4d6   : > { %p6928_p0 = pnand %p6927_p13, %p6923_p8 }
 0x4d7   : > { %v5052_v18 = vpop.f32.mrf.mxu3 }
 0x4d8   : > { %v5053_v55 = vadd.f32 %v8835_v63, %v5052_v18 }
 0x4da   : > { %v5133_v6 = vadd.f32 %v5101_v19, %v5053_v55 }
 0x4dc   : > { %v5165_v11 = vmax.f32 %v5133_v6, 0.0 }
 0x4de   : > { %v6578_v33 = vpack.c.bf16 %v5165_v11, %v5164_v12 }
 0x4df   : > { %v5055_v51 = vpop.f32.mrf.mxu3 }
 0x4e0   : > { %6614 = vst [vmem:[%s8846_s15 + $0x50] sm:$0xff] %v6578_v33   ;;  %v5056_v23 = vadd.f32 %v8835_v63, %v5055_v51 }
 0x4e2   : > { %v5134_v48 = vadd.f32 %v5102_v34, %v5056_v23 }
 0x4e4   : > { %v5166_v46 = vmax.f32 %v5134_v48, 0.0 }
 0x4e7   : > { %v5057_v43 = vpop.f32.mrf.mxu3 }
 0x4e8   : > { %v5058_v44 = vadd.f32 %v8835_v63, %v5057_v43 }
 0x4ea   : > { %v5135_v62 = vadd.f32 %v5103_v21, %v5058_v44 }
 0x4ec   : > { %v5167_v3 = vmax.f32 %v5135_v62, 0.0 }
 0x4ee   : > { %v6583_v0 = vpack.c.bf16 %v5167_v3, %v5166_v46 }
 0x4ef   : > { %v5060_v24 = vpop.f32.mrf.mxu3 }
 0x4f0   : > { %6615 = vst [vmem:[%s8846_s15 + $0x58] sm:$0xff] %v6583_v0   ;;  %v5061_v1 = vadd.f32 %v8835_v63, %v5060_v24 }
 0x4f2   : > { %v5136_v9 = vadd.f32 %v5104_v28, %v5061_v1 }
 0x4f4   : > { %v5168_v16 = vmax.f32 %v5136_v9, 0.0 }
 0x4f7   : > { %v5062_v5 = vpop.f32.mrf.mxu3 }
 0x4f8   : > { %v5063_v36 = vadd.f32 %v8835_v63, %v5062_v5 }
 0x4fa   : > { %v5137_v53 = vadd.f32 %v5105_v39, %v5063_v36 }
 0x4fc   : > { %v5169_v8 = vmax.f32 %v5137_v53, 0.0 }
 0x4fe   : > { %v6588_v60 = vpack.c.bf16 %v5169_v8, %v5168_v16 }
 0x4ff   : > { %v5065_v31 = vpop.f32.mrf.mxu3 }
 0x500   : > { %6616 = vst [vmem:[%s8846_s15 + $0x60] sm:$0xff] %v6588_v60   ;;  %v5066_v7 = vadd.f32 %v8835_v63, %v5065_v31 }
 0x502   : > { %v5138_v58 = vadd.f32 %v5106_v52, %v5066_v7 }
 0x504   : > { %v5170_v38 = vmax.f32 %v5138_v58, 0.0 }
 0x507   : > { %v5067_v37 = vpop.f32.mrf.mxu3 }
 0x508   : > { %v5068_v57 = vadd.f32 %v8835_v63, %v5067_v37 }
 0x50a   : > { %v5139_v13 = vadd.f32 %v5107_v50, %v5068_v57 }
 0x50c   : > { %v5171_v45 = vmax.f32 %v5139_v13, 0.0 }
 0x50e   : > { %v6593_v2 = vpack.c.bf16 %v5171_v45, %v5170_v38 }
 0x50f   : > { %v5070_v32 = vpop.f32.mrf.mxu3 }
 0x510   : > { %6617 = vst [vmem:[%s8846_s15 + $0x68] sm:$0xff] %v6593_v2   ;;  %v5071_v10 = vadd.f32 %v8835_v63, %v5070_v32 }
 0x512   : > { %v5140_v4 = vadd.f32 %v5108_v25, %v5071_v10 }
 0x514   : > { %v5172_v15 = vmax.f32 %v5140_v4, 0.0 }
 0x517   : > { %v5072_v54 = vpop.f32.mrf.mxu3 }
 0x518   : > { %v5073_v42 = vadd.f32 %v8835_v63, %v5072_v54 }
 0x51a   : > { %v5141_v35 = vadd.f32 %v5109_v14, %v5073_v42 }
 0x51c   : > { %v5173_v22 = vmax.f32 %v5141_v35, 0.0 }
 0x51e   : > { %v6598_v17 = vpack.c.bf16 %v5173_v22, %v5172_v15 }
 0x51f   : > { %v5075_v47 = vpop.f32.mrf.mxu3 }
 0x520   : > { %6618 = vst [vmem:[%s8846_s15 + $0x70] sm:$0xff] %v6598_v17   ;;  %v5076_v49 = vadd.f32 %v8835_v63, %v5075_v47 }
 0x522   : > { %v5142_v40 = vadd.f32 %v5110_v61, %v5076_v49 }
 0x524   : > { %v5174_v56 = vmax.f32 %v5142_v40, 0.0 }
 0x527   : > { %v5077_v20 = vpop.f32.mrf.mxu3 }
 0x528   : > { %v5078_v19 = vadd.f32 %v8835_v63, %v5077_v20 }
 0x52a   : > { %v5143_v18 = vadd.f32 %v5111_v29, %v5078_v19 }
 0x52c   : > { %v5175_v55 = vmax.f32 %v5143_v18, 0.0 }
 0x52e   : > { %v6603_v6 = vpack.c.bf16 %v5175_v55, %v5174_v56 }
 0x530   : > { %6619 = vst [vmem:[%s8846_s15 + $0x78] sm:$0xff] %v6603_v6  }
 0x531   : > { %6931 = shalt.err (!%p6928_p0)
}
 0x532   : > { %s7008_s3 = smov 64   ;;  %s7009_s23 = smov 4  }
 0x533   : > { %6660 = dma.vmem_to_hbm [thread:$0]  (%p7155_p5), %s5257_s18, 2048, %s5259_s17, %s5241_s30, %s7008_s3, %s7008_s3, %s7009_s23  }
 0x534 PF: > { %s9180_s2 = sld [smem:[#allocation18_spill]]  ;;  %p6680_p3 = pnand %p5406_p11, %p7100_p6 }
 0x536   : > { %p6681_p7 = pneg %p6680_p3 }
 0x53a   : > { %s5273_s22 = sand.u32 1, %s9180_s2  }
 0x53b   : > { %s5274_s19 = scalar_lea.sflag [#allocation5], %s5273_s22 }
 0x53c   : > { %6973 = dma.done.wait (%p6681_p7), %s5274_s19, 2048  }
 0x53d   : > { %6975 = vsyncadd (%p6681_p7), %s5274_s19, 4294965248  ;;  %s28_s10 = sadd.s32 1, %s6998_s10   ;;  %s9182_s15 = sld [smem:[#allocation19_spill]] }
 0x53e   : > { %p25_p9 = scmp.ge.s32.totalorder %s28_s10, 4   ;;  %s9183_s29 = sld [smem:[#allocation23_spill]] }
 0x53f   : > { %s9184_s26 = sld [smem:[#allocation21_spill]]  ;;  %s9185_s27 = smov %s6982_s28 }
 0x540   : > { %s9187_s30 = smov %s6994_s9 }
 0x541   :  { %27 = sbr.rel (!%p25_p9) target bundleno = 13 (0xd), region = 124 }
 0x543   : > { %s9186_s28 = smov %s9182_s15 }
 0x545   : > { %s9188_s9 = smov %s9184_s26 }
 0x546   :  { %5280 = vsyncpa [#allocation4], 1 }
 0x547   :  { %5282 = vsyncpa [#allocation4 + $0x1], 1 }
 0x548   :  { %5283 = vsyncpa [#allocation7], 1 }
 0x549   :  { %5285 = vsyncpa [#allocation7 + $0x1], 1 }
 0x54a   :  { %5286 = vsyncpa [#allocation10], 1 }
 0x54b   :  { %5287 = vsyncpa [#allocation5], 1 }
 0x54c   :  { %5289 = vsyncpa [#allocation5 + $0x1], 1 }

</bundles_post_ra>
